<compile_context>
chip_gen: v7x
topology: tpu7x:2x2x1
jax: 0.10.0
libtpu: 0.0.40
codegen_flags: <defaults>
</compile_context>

<pallas_src>
import functools

import jax
import jax.numpy as jnp
from jax.experimental import pallas as pl
from jax.experimental.pallas import tpu as pltpu


def _ceil_to(x, m):
    return ((x + m - 1) // m) * m


def _tn_max():
    # v5e's MXU output is 128 lanes wide -> TN=256 buys nothing there.
    try:
        kind = jax.devices()[0].device_kind.lower()
        if "v5 lite" in kind or "v5e" in kind or "v5litepod" in kind:
            return 128
    except Exception:
        pass
    return 256


_TM_MAX = 512
_TK_MAX = 1024
_TN_MAX = _tn_max()

# (chunk, kh, kw) taps feeding each of the 4 sub-pixel output phases of a
# ConvTranspose2d(k=3, s=2, p=1, output_padding=1).
#   chunk: 0 = x[a,b], 1 = x[a,b+1], 2 = x[a+1,b], 3 = x[a+1,b+1]
#   phase p = 2*(output row parity) + (output col parity)
_PHASE_TAPS = (
    ((0, 1, 1),),
    ((0, 1, 2), (1, 1, 0)),
    ((0, 2, 1), (2, 0, 1)),
    ((0, 2, 2), (1, 2, 0), (2, 0, 2), (3, 0, 0)),
)


# ----------------------------- Pallas kernel ------------------------------

def _mm_kernel(a_ref, w_ref, b_ref, *rest, apply_relu, has_residual,
               with_stats, m_real, tm):
    """out = act(A @ W + bias) [+ residual]; optional per-column sum/sum-sq.

    Grid = (M/TM, N/TN, K/TK).  A/W tiles are bf16, accumulation is f32,
    epilogue math is f32, output is bf16 (or f32 for the classifier).
    """
    idx = 0
    r_ref = None
    if has_residual:
        r_ref = rest[idx]; idx += 1
    o_ref = rest[idx]; idx += 1
    stats_ref = None
    if with_stats:
        stats_ref = rest[idx]; idx += 1
    acc_ref = rest[idx]

    # NOTE: program_id / num_programs must live OUTSIDE the pl.when bodies.
    i = pl.program_id(0)
    k = pl.program_id(2)
    nk = pl.num_programs(2)

    @pl.when(k == 0)
    def _():
        acc_ref[...] = jnp.zeros_like(acc_ref)

    acc_ref[...] += jnp.dot(a_ref[...], w_ref[...],
                            preferred_element_type=jnp.float32)

    @pl.when(k == nk - 1)
    def _():
        r = acc_ref[...] + b_ref[...]
        if apply_relu:
            r = jnp.maximum(r, 0.0)
        if has_residual:
            r = r + r_ref[...].astype(jnp.float32)
        o_ref[...] = r.astype(o_ref.dtype)
        if with_stats:
            row = jax.lax.broadcasted_iota(jnp.int32, r.shape, 0)
            rm = jnp.where((i * tm + row) < m_real, r, 0.0)   # mask padded rows
            col_sum = jnp.sum(rm, axis=0, keepdims=True)
            col_sq = jnp.sum(rm * rm, axis=0, keepdims=True)
            stats_ref[...] = jnp.concatenate([col_sum, col_sq], axis=0)[None]


# --------------------------- kernel wrapper --------------------------------

def matmul_fused(a, w, b, *, residual=None, apply_relu=True, with_stats=False,
                 out_dtype=jnp.bfloat16):
    """a: [M, K], w: [K, Nn], b: [Nn] ->
       out[M, Nn] (+ (col_sum[Nn], col_sumsq[Nn]) over the real M rows)."""
    M, K = a.shape
    Nn = w.shape[1]
    Np = _ceil_to(Nn, 128)

    TK = min(_TK_MAX, K)
    if K % TK:
        TK = 128 if K % 128 == 0 else K
    TN = min(_TN_MAX, Np)
    if Np % TN:
        TN = 128
    Mp = _ceil_to(M, 16)
    TM = min(_TM_MAX, Mp)
    Mp = _ceil_to(Mp, TM)
    gi, gj, gk = Mp // TM, Np // TN, K // TK
    # v7x megacore: keep >=2 parallel blocks whenever the problem allows it.
    if gi * gj < 2 and TM >= 32 and (TM // 2) % 16 == 0 and Mp % (TM // 2) == 0:
        TM //= 2
        gi = Mp // TM

    a_p = a.astype(jnp.bfloat16)
    if Mp != M:
        a_p = jnp.pad(a_p, ((0, Mp - M), (0, 0)))
    w_p = w.astype(jnp.bfloat16)
    b_p = b.reshape(1, -1).astype(jnp.float32)
    if Np != Nn:
        w_p = jnp.pad(w_p, ((0, 0), (0, Np - Nn)))
        b_p = jnp.pad(b_p, ((0, 0), (0, Np - Nn)))

    has_res = residual is not None
    inputs = [a_p, w_p, b_p]
    in_specs = [
        pl.BlockSpec((TM, TK), lambda i, j, k: (i, k)),
        pl.BlockSpec((TK, TN), lambda i, j, k: (k, j)),
        pl.BlockSpec((1, TN), lambda i, j, k: (0, j)),
    ]
    if has_res:
        r_p = residual.astype(jnp.bfloat16)
        if Mp != M or Np != Nn:
            r_p = jnp.pad(r_p, ((0, Mp - M), (0, Np - Nn)))
        inputs.append(r_p)
        in_specs.append(pl.BlockSpec((TM, TN), lambda i, j, k: (i, j)))

    out_shapes = [jax.ShapeDtypeStruct((Mp, Np), out_dtype)]
    out_specs = [pl.BlockSpec((TM, TN), lambda i, j, k: (i, j))]
    if with_stats:
        # per-row-block partial stats; i and j stay "parallel", tiny JAX sum
        # reduces the [gi, 2, Np] partials afterwards.
        out_shapes.append(jax.ShapeDtypeStruct((gi, 2, Np), jnp.float32))
        out_specs.append(pl.BlockSpec((1, 2, TN), lambda i, j, k: (i, 0, j)))

    kernel = functools.partial(_mm_kernel, apply_relu=apply_relu,
                               has_residual=has_res, with_stats=with_stats,
                               m_real=M, tm=TM)
    res = pl.pallas_call(
        kernel,
        out_shape=tuple(out_shapes) if with_stats else out_shapes[0],
        grid_spec=pltpu.PrefetchScalarGridSpec(
            num_scalar_prefetch=0,
            grid=(gi, gj, gk),
            in_specs=in_specs,
            out_specs=out_specs if with_stats else out_specs[0],
            scratch_shapes=[pltpu.VMEM((TM, TN), jnp.float32)],
        ),
        compiler_params=pltpu.CompilerParams(
            dimension_semantics=("parallel", "parallel", "arbitrary")),
    )(*inputs)

    if with_stats:
        out, stats = res
        stats = jnp.sum(stats, axis=0)                # [2, Np]
        return out[:M, :Nn], stats[0, :Nn], stats[1, :Nn]
    return res[:M, :Nn]


# ------------------ deconv layer = one phase-packed matmul -----------------

def _build_phase_weights(w_pt, bias, scale_prev, shift_prev):
    """Fold the previous layer's train-mode BN (y*scale + shift) into the 3x3
    transposed-conv taps, packed as one [4*Cin, 4*Cout] block matrix (column
    block p = output sub-pixel phase p, row chunk c = c-th shifted view)."""
    Cin, Cout = w_pt.shape[0], w_pt.shape[1]
    sw = w_pt * scale_prev[:, None, None, None]
    zero_blk = jnp.zeros((Cin, Cout), jnp.float32)
    w_cols, b_cols = [], []
    for taps in _PHASE_TAPS:
        blocks = [zero_blk, zero_blk, zero_blk, zero_blk]
        badd = jnp.zeros((Cout,), jnp.float32)
        for (c, kh, kw) in taps:
            blocks[c] = sw[:, :, kh, kw]
            badd = badd + shift_prev @ w_pt[:, :, kh, kw]
        w_cols.append(jnp.concatenate(blocks, axis=0))
        b_cols.append(bias + badd)
    return (jnp.concatenate(w_cols, axis=1).astype(jnp.bfloat16),
            jnp.concatenate(b_cols, axis=0))


def _shifted_views(y, pad_val):
    """A = [N*H*W, 4*C] concat of x[a,b], x[a,b+1], x[a+1,b], x[a+1,b+1];
    out-of-range taps take the per-channel pad value (maps to 0 after the
    folded BN of the previous layer)."""
    N, H, W, C = y.shape
    pv = jnp.broadcast_to(pad_val.astype(y.dtype), (C,))
    yp = jnp.concatenate([y, jnp.broadcast_to(pv, (N, 1, W, C))], axis=1)
    yp = jnp.concatenate([yp, jnp.broadcast_to(pv, (N, H + 1, 1, C))], axis=2)
    x00 = y
    x01 = yp[:, :H, 1:, :]
    x10 = yp[:, 1:, :W, :]
    x11 = yp[:, 1:, 1:, :]
    return jnp.concatenate([x00, x01, x10, x11],
                           axis=-1).reshape(N * H * W, 4 * C)


def _interleave_phases(y_ph, n, h, w, c):
    """[N*H*W, 4*C] phase-major -> [N, 2H, 2W, C] spatial (bf16)."""
    y = y_ph.reshape(n, h, w, 2, 2, c)
    y = jnp.transpose(y, (0, 1, 3, 2, 4, 5))
    return y.reshape(n, 2 * h, 2 * w, c)


def _bn_params(col_sum, col_sq, cout, count, gamma, beta, eps):
    s = col_sum.reshape(4, cout).sum(axis=0)
    q = col_sq.reshape(4, cout).sum(axis=0)
    mean = s / count
    # NOTE: single-pass variance (E[x^2] - mean^2); may lose a little precision
    # vs PyTorch's two-pass variance for large-mean activations.
    var = jnp.maximum(q / count - mean * mean, 0.0)
    inv = jax.lax.rsqrt(var + eps)
    scale = gamma * inv
    shift = beta - mean * scale
    return scale, shift


def deconv_layer(x, pad_val, w_pt, bias, scale_prev, shift_prev,
                 *, residual_ph=None):
    """relu(ConvTranspose2d(k3,s2,p1,op1)(BN_prev(x))) [+ residual] as ONE
    matmul; BN_prev folded into the weights.  Returns the phase-major bf16
    activation [N*H*W, 4*Cout] plus its per-(phase,channel) sum / sum-sq."""
    a = _shifted_views(x, pad_val)
    w_big, b_big = _build_phase_weights(w_pt, bias, scale_prev, shift_prev)
    return matmul_fused(a, w_big, b_big, residual=residual_ph,
                        apply_relu=True, with_stats=True,
                        out_dtype=jnp.bfloat16)


# ------------------------------- parameters -------------------------------

def init_params(key, n_class):
    chans = [(512, 512), (512, 256), (256, 128), (128, 64), (64, 32)]
    params = {}
    for idx, (cin, cout) in enumerate(chans, start=1):
        key, k1, k2, k3, k4 = jax.random.split(key, 5)
        fan = cin * 9
        params[f"w{idx}"] = jax.random.normal(k1, (cin, cout, 3, 3),
                                              jnp.float32) / jnp.sqrt(fan)
        params[f"b{idx}"] = 0.01 * jax.random.normal(k2, (cout,), jnp.float32)
        params[f"g{idx}"] = 1.0 + 0.1 * jax.random.normal(k3, (cout,), jnp.float32)
        params[f"be{idx}"] = 0.1 * jax.random.normal(k4, (cout,), jnp.float32)
    key, k1, k2 = jax.random.split(key, 3)
    params["w_cls"] = jax.random.normal(k1, (n_class, 32, 1, 1),
                                        jnp.float32) / jnp.sqrt(32.0)
    params["b_cls"] = 0.01 * jax.random.normal(k2, (n_class,), jnp.float32)
    return params


# -------------------------------- forward ---------------------------------

def fcn16s_forward(x5_nchw, x4_nchw, params, *, eps=1e-5):
    x5 = jnp.transpose(x5_nchw, (0, 2, 3, 1)).astype(jnp.bfloat16)   # NHWC
    x4 = jnp.transpose(x4_nchw, (0, 2, 3, 1))
    N, H, W, cin1 = x5.shape
    n_class = params["b_cls"].shape[0]

    # x4 skip rearranged to the phase-major layout of deconv1's output (bf16).
    r_ph = jnp.concatenate(
        [x4[:, 0::2, 0::2, :], x4[:, 0::2, 1::2, :],
         x4[:, 1::2, 0::2, :], x4[:, 1::2, 1::2, :]],
        axis=-1).reshape(N * H * W, -1).astype(jnp.bfloat16)

    scale = jnp.ones((cin1,), jnp.float32)       # no BN before layer 1
    shift = jnp.zeros((cin1,), jnp.float32)
    pad_val = jnp.zeros((cin1,), jnp.float32)

    y = x5
    h, w = H, W
    y_ph = None
    for idx in range(1, 6):
        w_pt, b_pt = params[f"w{idx}"], params[f"b{idx}"]
        cout = w_pt.shape[1]
        res = r_ph if idx == 1 else None
        y_ph, s, q = deconv_layer(y, pad_val, w_pt, b_pt, scale, shift,
                                  residual_ph=res)
        count = 4.0 * N * h * w                  # = N * (2h) * (2w)
        scale, shift = _bn_params(s, q, cout, count,
                                  params[f"g{idx}"], params[f"be{idx}"], eps)
        if idx < 5:
            y = _interleave_phases(y_ph, N, h, w, cout)      # bf16 activation
            # raw-activation pad value that maps to 0 under the folded BN
            pad_val = jnp.where(scale != 0, -shift / scale, 0.0)
            h, w = 2 * h, 2 * w

    # BN5 folded into the 1x1 classifier, applied in the phase-major layout so
    # the largest (64x64) activation is never re-interleaved.
    cout5 = params["w5"].shape[1]
    w_cls = params["w_cls"][:, :, 0, 0].T                    # [32, n_class]
    wc = scale[:, None] * w_cls
    bc = shift @ w_cls + params["b_cls"]
    a_cls = y_ph.reshape(-1, cout5)                          # [4*N*h*w, 32]
    logits = matmul_fused(a_cls, wc, bc, apply_relu=False, with_stats=False,
                          out_dtype=jnp.float32)             # [4*N*h*w, ncls]

    logits = logits.reshape(N, h, w, 2, 2, n_class)
    logits = jnp.transpose(logits, (0, 1, 3, 2, 4, 5)).reshape(
        N, 2 * h, 2 * w, n_class)
    return jnp.transpose(logits, (0, 3, 1, 2))               # NCHW, f32


# ---------------------------------- main -----------------------------------

if __name__ == "__main__":
    n_class = 8
    key = jax.random.PRNGKey(0)
    kp, k5, k4 = jax.random.split(key, 3)
    params = init_params(kp, n_class)

    # x5: deepest VGG feature (H/32), x4: one level up (H/16) -> 2x spatial
    x5 = jax.random.normal(k5, (2, 512, 2, 2), jnp.float32)
    x4 = jax.random.normal(k4, (2, 512, 4, 4), jnp.float32)

    out = jax.jit(fcn16s_forward)(x5, x4, params)
    out = jax.block_until_ready(out)
    assert out.shape == (2, n_class, 64, 64), out.shape
    print("KERNEL_OK")
</pallas_src>

<mosaic_0001>
module attributes {stable_mosaic.version = 11 : i64} {
  func.func @_mm_kernel(%arg0: i32, %arg1: i32, %arg2: i32, %arg3: memref<16x1024xbf16, #tpu.memory_space<vmem>>, %arg4: memref<1024x256xbf16, #tpu.memory_space<vmem>>, %arg5: memref<1x256xf32, #tpu.memory_space<vmem>>, %arg6: memref<16x256xbf16, #tpu.memory_space<vmem>>, %arg7: memref<16x256xbf16, #tpu.memory_space<vmem>>, %arg8: memref<1x2x256xf32, #tpu.memory_space<vmem>>, %arg9: memref<16x256xf32, #tpu.memory_space<vmem>>) attributes {dimension_semantics = [#tpu.dimension_semantics<parallel>, #tpu.dimension_semantics<parallel>, #tpu.dimension_semantics<arbitrary>], iteration_bounds = array<i64: 1, 8, 2>, scalar_prefetch = 0 : i64, scratch_operands = 1 : i64, tpu.core_type = #tpu.core_type<tc>, window_params = [{transform_indices = @transform_0, window_bounds = array<i64: 16, 1024>}, {transform_indices = @transform_1, window_bounds = array<i64: 1024, 256>}, {transform_indices = @transform_2, window_bounds = array<i64: 1, 256>}, {transform_indices = @transform_3, window_bounds = array<i64: 16, 256>}, {transform_indices = @transform_4, window_bounds = array<i64: 16, 256>}, {transform_indices = @transform_5, window_bounds = array<i64: 1, 2, 256>}]} {
    %c0_i32 = arith.constant 0 : i32
    %0 = arith.cmpi eq, %arg2, %c0_i32 : i32
    %1 = arith.extui %0 : i1 to i32
    %c0_i32_0 = arith.constant 0 : i32
    %2 = arith.cmpi ne, %1, %c0_i32_0 : i32
    scf.if %2 {
      %cst_9 = arith.constant 0.000000e+00 : f32
      %12 = vector.broadcast %cst_9 : f32 to vector<16x256xf32>
      %c0_10 = arith.constant 0 : index
      %c0_11 = arith.constant 0 : index
      %13 = vector.load %arg9[%c0_10, %c0_11] : memref<16x256xf32, #tpu.memory_space<vmem>>, vector<16x256xf32>
      tpu.vector_store %arg9[%c0_10, %c0_11], %12 {strides = array<i32>} : memref<16x256xf32, #tpu.memory_space<vmem>>, vector<16x256xf32>,
    } else {
    }
    %c0 = arith.constant 0 : index
    %c0_1 = arith.constant 0 : index
    %3 = vector.load %arg9[%c0, %c0_1] : memref<16x256xf32, #tpu.memory_space<vmem>>, vector<16x256xf32>
    %c0_2 = arith.constant 0 : index
    %c0_3 = arith.constant 0 : index
    %4 = vector.load %arg3[%c0_2, %c0_3] : memref<16x1024xbf16, #tpu.memory_space<vmem>>, vector<16x1024xbf16>
    %c0_4 = arith.constant 0 : index
    %c0_5 = arith.constant 0 : index
    %5 = vector.load %arg4[%c0_4, %c0_5] : memref<1024x256xbf16, #tpu.memory_space<vmem>>, vector<1024x256xbf16>
    %cst = arith.constant dense<0.000000e+00> : vector<16x256xf32>
    %6 = tpu.matmul %4, %5, %cst {dimension_numbers = #tpu.dot_dimension_numbers<[1], [0], [0], [1], [0, 0, 1, 1], [], []>} : vector<16x1024xbf16>, vector<1024x256xbf16>, vector<16x256xf32> -> vector<16x256xf32>
    %7 = arith.addf %3, %6 : vector<16x256xf32>
    %c0_6 = arith.constant 0 : index
    %c0_7 = arith.constant 0 : index
    %8 = vector.load %arg9[%c0_6, %c0_7] : memref<16x256xf32, #tpu.memory_space<vmem>>, vector<16x256xf32>
    tpu.vector_store %arg9[%c0_6, %c0_7], %7 {strides = array<i32>} : memref<16x256xf32, #tpu.memory_space<vmem>>, vector<16x256xf32>,
    %c1_i32 = arith.constant 1 : i32
    %9 = arith.cmpi eq, %arg2, %c1_i32 : i32
    %10 = arith.extui %9 : i1 to i32
    %c0_i32_8 = arith.constant 0 : i32
    %11 = arith.cmpi ne, %10, %c0_i32_8 : i32
    scf.if %11 {
      %c0_9 = arith.constant 0 : index
      %c0_10 = arith.constant 0 : index
      %12 = vector.load %arg9[%c0_9, %c0_10] : memref<16x256xf32, #tpu.memory_space<vmem>>, vector<16x256xf32>
      %c0_11 = arith.constant 0 : index
      %c0_12 = arith.constant 0 : index
      %13 = vector.load %arg5[%c0_11, %c0_12] : memref<1x256xf32, #tpu.memory_space<vmem>>, vector<1x256xf32>
      %14 = vector.broadcast %13 : vector<1x256xf32> to vector<16x256xf32>
      %15 = arith.addf %12, %14 : vector<16x256xf32>
      %cst_13 = arith.constant 0.000000e+00 : f32
      %16 = vector.broadcast %cst_13 : f32 to vector<16x256xf32>
      %17 = arith.maximumf %15, %16 : vector<16x256xf32>
      %c0_14 = arith.constant 0 : index
      %c0_15 = arith.constant 0 : index
      %18 = vector.load %arg6[%c0_14, %c0_15] : memref<16x256xbf16, #tpu.memory_space<vmem>>, vector<16x256xbf16>
      %19 = arith.extf %18 : vector<16x256xbf16> to vector<16x256xf32>
      %20 = arith.addf %17, %19 : vector<16x256xf32>
      %21 = arith.truncf %20 : vector<16x256xf32> to vector<16x256xbf16>
      %c0_16 = arith.constant 0 : index
      %c0_17 = arith.constant 0 : index
      %22 = vector.load %arg7[%c0_16, %c0_17] : memref<16x256xbf16, #tpu.memory_space<vmem>>, vector<16x256xbf16>
      tpu.vector_store %arg7[%c0_16, %c0_17], %21 {strides = array<i32>} : memref<16x256xbf16, #tpu.memory_space<vmem>>, vector<16x256xbf16>,
      %23 = tpu.iota {dimensions = array<i32: 0>} : vector<16x256xi32>
      %c16_i32 = arith.constant 16 : i32
      %24 = arith.muli %arg0, %c16_i32 : i32
      %25 = vector.broadcast %24 : i32 to vector<16x256xi32>
      %26 = arith.addi %25, %23 : vector<16x256xi32>
      %c8_i32 = arith.constant 8 : i32
      %27 = vector.broadcast %c8_i32 : i32 to vector<16x256xi32>
      %28 = arith.cmpi slt, %26, %27 : vector<16x256xi32>
      %cst_18 = arith.constant 0.000000e+00 : f32
      %29 = vector.broadcast %cst_18 : f32 to vector<16x256xf32>
      %30 = arith.select %28, %20, %29 : vector<16x256xi1>, vector<16x256xf32>
      %cst_19 = arith.constant dense<0.000000e+00> : vector<256xf32>
      %31 = vector.multi_reduction <add>, %30, %cst_19 [0] : vector<16x256xf32> to vector<256xf32>
      %32 = vector.shape_cast %31 : vector<256xf32> to vector<1x256xf32>
      %33 = arith.mulf %30, %30 : vector<16x256xf32>
      %cst_20 = arith.constant dense<0.000000e+00> : vector<256xf32>
      %34 = vector.multi_reduction <add>, %33, %cst_20 [0] : vector<16x256xf32> to vector<256xf32>
      %35 = vector.shape_cast %34 : vector<256xf32> to vector<1x256xf32>
      %36 = tpu.concatenate %32, %35 in 0 : vector<1x256xf32>, vector<1x256xf32> -> vector<2x256xf32>
      %37 = vector.shape_cast %36 : vector<2x256xf32> to vector<1x2x256xf32>
      %c0_21 = arith.constant 0 : index
      %c0_22 = arith.constant 0 : index
      %c0_23 = arith.constant 0 : index
      %38 = vector.load %arg8[%c0_21, %c0_22, %c0_23] : memref<1x2x256xf32, #tpu.memory_space<vmem>>, vector<1x2x256xf32>
      tpu.vector_store %arg8[%c0_21, %c0_22, %c0_23], %37 {strides = array<i32>} : memref<1x2x256xf32, #tpu.memory_space<vmem>>, vector<1x2x256xf32>,
    } else {
    }
    return
  }
  func.func @transform_0(%arg0: i32, %arg1: i32, %arg2: i32) -> (i32, i32) {
    %c0_i32 = arith.constant 0 : i32
    return %arg0, %arg2 : i32, i32
  }
  func.func @transform_1(%arg0: i32, %arg1: i32, %arg2: i32) -> (i32, i32) {
    %c0_i32 = arith.constant 0 : i32
    return %arg2, %arg1 : i32, i32
  }
  func.func @transform_2(%arg0: i32, %arg1: i32, %arg2: i32) -> (i32, i32) {
    %c0_i32 = arith.constant 0 : i32
    %c0_i32_0 = arith.constant 0 : i32
    return %c0_i32, %arg1 : i32, i32
  }
  func.func @transform_3(%arg0: i32, %arg1: i32, %arg2: i32) -> (i32, i32) {
    %c0_i32 = arith.constant 0 : i32
    return %arg0, %arg1 : i32, i32
  }
  func.func @transform_4(%arg0: i32, %arg1: i32, %arg2: i32) -> (i32, i32) {
    %c0_i32 = arith.constant 0 : i32
    return %arg0, %arg1 : i32, i32
  }
  func.func @transform_5(%arg0: i32, %arg1: i32, %arg2: i32) -> (i32, i32, i32) {
    %c0_i32 = arith.constant 0 : i32
    %c0_i32_0 = arith.constant 0 : i32
    return %arg0, %c0_i32, %arg1 : i32, i32, i32
  }
}

module attributes {stable_mosaic.version = 11 : i64} {
  func.func @_mm_kernel(%arg0: i32, %arg1: i32, %arg2: i32, %arg3: memref<32x1024xbf16, #tpu.memory_space<vmem>>, %arg4: memref<1024x256xbf16, #tpu.memory_space<vmem>>, %arg5: memref<1x256xf32, #tpu.memory_space<vmem>>, %arg6: memref<32x256xbf16, #tpu.memory_space<vmem>>, %arg7: memref<1x2x256xf32, #tpu.memory_space<vmem>>, %arg8: memref<32x256xf32, #tpu.memory_space<vmem>>) attributes {dimension_semantics = [#tpu.dimension_semantics<parallel>, #tpu.dimension_semantics<parallel>, #tpu.dimension_semantics<arbitrary>], iteration_bounds = array<i64: 1, 4, 2>, scalar_prefetch = 0 : i64, scratch_operands = 1 : i64, tpu.core_type = #tpu.core_type<tc>, window_params = [{transform_indices = @transform_0, window_bounds = array<i64: 32, 1024>}, {transform_indices = @transform_1, window_bounds = array<i64: 1024, 256>}, {transform_indices = @transform_2, window_bounds = array<i64: 1, 256>}, {transform_indices = @transform_3, window_bounds = array<i64: 32, 256>}, {transform_indices = @transform_4, window_bounds = array<i64: 1, 2, 256>}]} {
    %c0_i32 = arith.constant 0 : i32
    %0 = arith.cmpi eq, %arg2, %c0_i32 : i32
    %1 = arith.extui %0 : i1 to i32
    %c0_i32_0 = arith.constant 0 : i32
    %2 = arith.cmpi ne, %1, %c0_i32_0 : i32
    scf.if %2 {
      %cst_9 = arith.constant 0.000000e+00 : f32
      %12 = vector.broadcast %cst_9 : f32 to vector<32x256xf32>
      %c0_10 = arith.constant 0 : index
      %c0_11 = arith.constant 0 : index
      %13 = vector.load %arg8[%c0_10, %c0_11] : memref<32x256xf32, #tpu.memory_space<vmem>>, vector<32x256xf32>
      tpu.vector_store %arg8[%c0_10, %c0_11], %12 {strides = array<i32>} : memref<32x256xf32, #tpu.memory_space<vmem>>, vector<32x256xf32>,
    } else {
    }
    %c0 = arith.constant 0 : index
    %c0_1 = arith.constant 0 : index
    %3 = vector.load %arg8[%c0, %c0_1] : memref<32x256xf32, #tpu.memory_space<vmem>>, vector<32x256xf32>
    %c0_2 = arith.constant 0 : index
    %c0_3 = arith.constant 0 : index
    %4 = vector.load %arg3[%c0_2, %c0_3] : memref<32x1024xbf16, #tpu.memory_space<vmem>>, vector<32x1024xbf16>
    %c0_4 = arith.constant 0 : index
    %c0_5 = arith.constant 0 : index
    %5 = vector.load %arg4[%c0_4, %c0_5] : memref<1024x256xbf16, #tpu.memory_space<vmem>>, vector<1024x256xbf16>
    %cst = arith.constant dense<0.000000e+00> : vector<32x256xf32>
    %6 = tpu.matmul %4, %5, %cst {dimension_numbers = #tpu.dot_dimension_numbers<[1], [0], [0], [1], [0, 0, 1, 1], [], []>} : vector<32x1024xbf16>, vector<1024x256xbf16>, vector<32x256xf32> -> vector<32x256xf32>
    %7 = arith.addf %3, %6 : vector<32x256xf32>
    %c0_6 = arith.constant 0 : index
    %c0_7 = arith.constant 0 : index
    %8 = vector.load %arg8[%c0_6, %c0_7] : memref<32x256xf32, #tpu.memory_space<vmem>>, vector<32x256xf32>
    tpu.vector_store %arg8[%c0_6, %c0_7], %7 {strides = array<i32>} : memref<32x256xf32, #tpu.memory_space<vmem>>, vector<32x256xf32>,
    %c1_i32 = arith.constant 1 : i32
    %9 = arith.cmpi eq, %arg2, %c1_i32 : i32
    %10 = arith.extui %9 : i1 to i32
    %c0_i32_8 = arith.constant 0 : i32
    %11 = arith.cmpi ne, %10, %c0_i32_8 : i32
    scf.if %11 {
      %c0_9 = arith.constant 0 : index
      %c0_10 = arith.constant 0 : index
      %12 = vector.load %arg8[%c0_9, %c0_10] : memref<32x256xf32, #tpu.memory_space<vmem>>, vector<32x256xf32>
      %c0_11 = arith.constant 0 : index
      %c0_12 = arith.constant 0 : index
      %13 = vector.load %arg5[%c0_11, %c0_12] : memref<1x256xf32, #tpu.memory_space<vmem>>, vector<1x256xf32>
      %14 = vector.broadcast %13 : vector<1x256xf32> to vector<32x256xf32>
      %15 = arith.addf %12, %14 : vector<32x256xf32>
      %cst_13 = arith.constant 0.000000e+00 : f32
      %16 = vector.broadcast %cst_13 : f32 to vector<32x256xf32>
      %17 = arith.maximumf %15, %16 : vector<32x256xf32>
      %18 = arith.truncf %17 : vector<32x256xf32> to vector<32x256xbf16>
      %c0_14 = arith.constant 0 : index
      %c0_15 = arith.constant 0 : index
      %19 = vector.load %arg6[%c0_14, %c0_15] : memref<32x256xbf16, #tpu.memory_space<vmem>>, vector<32x256xbf16>
      tpu.vector_store %arg6[%c0_14, %c0_15], %18 {strides = array<i32>} : memref<32x256xbf16, #tpu.memory_space<vmem>>, vector<32x256xbf16>,
      %20 = tpu.iota {dimensions = array<i32: 0>} : vector<32x256xi32>
      %c32_i32 = arith.constant 32 : i32
      %21 = arith.muli %arg0, %c32_i32 : i32
      %22 = vector.broadcast %21 : i32 to vector<32x256xi32>
      %23 = arith.addi %22, %20 : vector<32x256xi32>
      %c32_i32_16 = arith.constant 32 : i32
      %24 = vector.broadcast %c32_i32_16 : i32 to vector<32x256xi32>
      %25 = arith.cmpi slt, %23, %24 : vector<32x256xi32>
      %cst_17 = arith.constant 0.000000e+00 : f32
      %26 = vector.broadcast %cst_17 : f32 to vector<32x256xf32>
      %27 = arith.select %25, %17, %26 : vector<32x256xi1>, vector<32x256xf32>
      %cst_18 = arith.constant dense<0.000000e+00> : vector<256xf32>
      %28 = vector.multi_reduction <add>, %27, %cst_18 [0] : vector<32x256xf32> to vector<256xf32>
      %29 = vector.shape_cast %28 : vector<256xf32> to vector<1x256xf32>
      %30 = arith.mulf %27, %27 : vector<32x256xf32>
      %cst_19 = arith.constant dense<0.000000e+00> : vector<256xf32>
      %31 = vector.multi_reduction <add>, %30, %cst_19 [0] : vector<32x256xf32> to vector<256xf32>
      %32 = vector.shape_cast %31 : vector<256xf32> to vector<1x256xf32>
      %33 = tpu.concatenate %29, %32 in 0 : vector<1x256xf32>, vector<1x256xf32> -> vector<2x256xf32>
      %34 = vector.shape_cast %33 : vector<2x256xf32> to vector<1x2x256xf32>
      %c0_20 = arith.constant 0 : index
      %c0_21 = arith.constant 0 : index
      %c0_22 = arith.constant 0 : index
      %35 = vector.load %arg7[%c0_20, %c0_21, %c0_22] : memref<1x2x256xf32, #tpu.memory_space<vmem>>, vector<1x2x256xf32>
      tpu.vector_store %arg7[%c0_20, %c0_21, %c0_22], %34 {strides = array<i32>} : memref<1x2x256xf32, #tpu.memory_space<vmem>>, vector<1x2x256xf32>,
    } else {
    }
    return
  }
  func.func @transform_0(%arg0: i32, %arg1: i32, %arg2: i32) -> (i32, i32) {
    %c0_i32 = arith.constant 0 : i32
    return %arg0, %arg2 : i32, i32
  }
  func.func @transform_1(%arg0: i32, %arg1: i32, %arg2: i32) -> (i32, i32) {
    %c0_i32 = arith.constant 0 : i32
    return %arg2, %arg1 : i32, i32
  }
  func.func @transform_2(%arg0: i32, %arg1: i32, %arg2: i32) -> (i32, i32) {
    %c0_i32 = arith.constant 0 : i32
    %c0_i32_0 = arith.constant 0 : i32
    return %c0_i32, %arg1 : i32, i32
  }
  func.func @transform_3(%arg0: i32, %arg1: i32, %arg2: i32) -> (i32, i32) {
    %c0_i32 = arith.constant 0 : i32
    return %arg0, %arg1 : i32, i32
  }
  func.func @transform_4(%arg0: i32, %arg1: i32, %arg2: i32) -> (i32, i32, i32) {
    %c0_i32 = arith.constant 0 : i32
    %c0_i32_0 = arith.constant 0 : i32
    return %arg0, %c0_i32, %arg1 : i32, i32, i32
  }
}

module attributes {stable_mosaic.version = 11 : i64} {
  func.func @_mm_kernel(%arg0: i32, %arg1: i32, %arg2: i32, %arg3: memref<128x1024xbf16, #tpu.memory_space<vmem>>, %arg4: memref<1024x256xbf16, #tpu.memory_space<vmem>>, %arg5: memref<1x256xf32, #tpu.memory_space<vmem>>, %arg6: memref<128x256xbf16, #tpu.memory_space<vmem>>, %arg7: memref<1x2x256xf32, #tpu.memory_space<vmem>>, %arg8: memref<128x256xf32, #tpu.memory_space<vmem>>) attributes {dimension_semantics = [#tpu.dimension_semantics<parallel>, #tpu.dimension_semantics<parallel>, #tpu.dimension_semantics<arbitrary>], iteration_bounds = array<i64: 1, 2, 1>, scalar_prefetch = 0 : i64, scratch_operands = 1 : i64, tpu.core_type = #tpu.core_type<tc>, window_params = [{transform_indices = @transform_0, window_bounds = array<i64: 128, 1024>}, {transform_indices = @transform_1, window_bounds = array<i64: 1024, 256>}, {transform_indices = @transform_2, window_bounds = array<i64: 1, 256>}, {transform_indices = @transform_3, window_bounds = array<i64: 128, 256>}, {transform_indices = @transform_4, window_bounds = array<i64: 1, 2, 256>}]} {
    %c0_i32 = arith.constant 0 : i32
    %0 = arith.cmpi eq, %arg2, %c0_i32 : i32
    %1 = arith.extui %0 : i1 to i32
    %c0_i32_0 = arith.constant 0 : i32
    %2 = arith.cmpi ne, %1, %c0_i32_0 : i32
    scf.if %2 {
      %cst_10 = arith.constant 0.000000e+00 : f32
      %12 = vector.broadcast %cst_10 : f32 to vector<128x256xf32>
      %c0_11 = arith.constant 0 : index
      %c0_12 = arith.constant 0 : index
      %13 = vector.load %arg8[%c0_11, %c0_12] : memref<128x256xf32, #tpu.memory_space<vmem>>, vector<128x256xf32>
      tpu.vector_store %arg8[%c0_11, %c0_12], %12 {strides = array<i32>} : memref<128x256xf32, #tpu.memory_space<vmem>>, vector<128x256xf32>,
    } else {
    }
    %c0 = arith.constant 0 : index
    %c0_1 = arith.constant 0 : index
    %3 = vector.load %arg8[%c0, %c0_1] : memref<128x256xf32, #tpu.memory_space<vmem>>, vector<128x256xf32>
    %c0_2 = arith.constant 0 : index
    %c0_3 = arith.constant 0 : index
    %4 = vector.load %arg3[%c0_2, %c0_3] : memref<128x1024xbf16, #tpu.memory_space<vmem>>, vector<128x1024xbf16>
    %c0_4 = arith.constant 0 : index
    %c0_5 = arith.constant 0 : index
    %5 = vector.load %arg4[%c0_4, %c0_5] : memref<1024x256xbf16, #tpu.memory_space<vmem>>, vector<1024x256xbf16>
    %cst = arith.constant dense<0.000000e+00> : vector<128x256xf32>
    %6 = tpu.matmul %4, %5, %cst {dimension_numbers = #tpu.dot_dimension_numbers<[1], [0], [0], [1], [0, 0, 1, 1], [], []>} : vector<128x1024xbf16>, vector<1024x256xbf16>, vector<128x256xf32> -> vector<128x256xf32>
    %7 = arith.addf %3, %6 : vector<128x256xf32>
    %c0_6 = arith.constant 0 : index
    %c0_7 = arith.constant 0 : index
    %8 = vector.load %arg8[%c0_6, %c0_7] : memref<128x256xf32, #tpu.memory_space<vmem>>, vector<128x256xf32>
    tpu.vector_store %arg8[%c0_6, %c0_7], %7 {strides = array<i32>} : memref<128x256xf32, #tpu.memory_space<vmem>>, vector<128x256xf32>,
    %c0_i32_8 = arith.constant 0 : i32
    %9 = arith.cmpi eq, %arg2, %c0_i32_8 : i32
    %10 = arith.extui %9 : i1 to i32
    %c0_i32_9 = arith.constant 0 : i32
    %11 = arith.cmpi ne, %10, %c0_i32_9 : i32
    scf.if %11 {
      %c0_10 = arith.constant 0 : index
      %c0_11 = arith.constant 0 : index
      %12 = vector.load %arg8[%c0_10, %c0_11] : memref<128x256xf32, #tpu.memory_space<vmem>>, vector<128x256xf32>
      %c0_12 = arith.constant 0 : index
      %c0_13 = arith.constant 0 : index
      %13 = vector.load %arg5[%c0_12, %c0_13] : memref<1x256xf32, #tpu.memory_space<vmem>>, vector<1x256xf32>
      %14 = vector.broadcast %13 : vector<1x256xf32> to vector<128x256xf32>
      %15 = arith.addf %12, %14 : vector<128x256xf32>
      %cst_14 = arith.constant 0.000000e+00 : f32
      %16 = vector.broadcast %cst_14 : f32 to vector<128x256xf32>
      %17 = arith.maximumf %15, %16 : vector<128x256xf32>
      %18 = arith.truncf %17 : vector<128x256xf32> to vector<128x256xbf16>
      %c0_15 = arith.constant 0 : index
      %c0_16 = arith.constant 0 : index
      %19 = vector.load %arg6[%c0_15, %c0_16] : memref<128x256xbf16, #tpu.memory_space<vmem>>, vector<128x256xbf16>
      tpu.vector_store %arg6[%c0_15, %c0_16], %18 {strides = array<i32>} : memref<128x256xbf16, #tpu.memory_space<vmem>>, vector<128x256xbf16>,
      %20 = tpu.iota {dimensions = array<i32: 0>} : vector<128x256xi32>
      %c128_i32 = arith.constant 128 : i32
      %21 = arith.muli %arg0, %c128_i32 : i32
      %22 = vector.broadcast %21 : i32 to vector<128x256xi32>
      %23 = arith.addi %22, %20 : vector<128x256xi32>
      %c128_i32_17 = arith.constant 128 : i32
      %24 = vector.broadcast %c128_i32_17 : i32 to vector<128x256xi32>
      %25 = arith.cmpi slt, %23, %24 : vector<128x256xi32>
      %cst_18 = arith.constant 0.000000e+00 : f32
      %26 = vector.broadcast %cst_18 : f32 to vector<128x256xf32>
      %27 = arith.select %25, %17, %26 : vector<128x256xi1>, vector<128x256xf32>
      %cst_19 = arith.constant dense<0.000000e+00> : vector<256xf32>
      %28 = vector.multi_reduction <add>, %27, %cst_19 [0] : vector<128x256xf32> to vector<256xf32>
      %29 = vector.shape_cast %28 : vector<256xf32> to vector<1x256xf32>
      %30 = arith.mulf %27, %27 : vector<128x256xf32>
      %cst_20 = arith.constant dense<0.000000e+00> : vector<256xf32>
      %31 = vector.multi_reduction <add>, %30, %cst_20 [0] : vector<128x256xf32> to vector<256xf32>
      %32 = vector.shape_cast %31 : vector<256xf32> to vector<1x256xf32>
      %33 = tpu.concatenate %29, %32 in 0 : vector<1x256xf32>, vector<1x256xf32> -> vector<2x256xf32>
      %34 = vector.shape_cast %33 : vector<2x256xf32> to vector<1x2x256xf32>
      %c0_21 = arith.constant 0 : index
      %c0_22 = arith.constant 0 : index
      %c0_23 = arith.constant 0 : index
      %35 = vector.load %arg7[%c0_21, %c0_22, %c0_23] : memref<1x2x256xf32, #tpu.memory_space<vmem>>, vector<1x2x256xf32>
      tpu.vector_store %arg7[%c0_21, %c0_22, %c0_23], %34 {strides = array<i32>} : memref<1x2x256xf32, #tpu.memory_space<vmem>>, vector<1x2x256xf32>,
    } else {
    }
    return
  }
  func.func @transform_0(%arg0: i32, %arg1: i32, %arg2: i32) -> (i32, i32) {
    %c0_i32 = arith.constant 0 : i32
    return %arg0, %arg2 : i32, i32
  }
  func.func @transform_1(%arg0: i32, %arg1: i32, %arg2: i32) -> (i32, i32) {
    %c0_i32 = arith.constant 0 : i32
    return %arg2, %arg1 : i32, i32
  }
  func.func @transform_2(%arg0: i32, %arg1: i32, %arg2: i32) -> (i32, i32) {
    %c0_i32 = arith.constant 0 : i32
    %c0_i32_0 = arith.constant 0 : i32
    return %c0_i32, %arg1 : i32, i32
  }
  func.func @transform_3(%arg0: i32, %arg1: i32, %arg2: i32) -> (i32, i32) {
    %c0_i32 = arith.constant 0 : i32
    return %arg0, %arg1 : i32, i32
  }
  func.func @transform_4(%arg0: i32, %arg1: i32, %arg2: i32) -> (i32, i32, i32) {
    %c0_i32 = arith.constant 0 : i32
    %c0_i32_0 = arith.constant 0 : i32
    return %arg0, %c0_i32, %arg1 : i32, i32, i32
  }
}

module attributes {stable_mosaic.version = 11 : i64} {
  func.func @_mm_kernel(%arg0: i32, %arg1: i32, %arg2: i32, %arg3: memref<256x512xbf16, #tpu.memory_space<vmem>>, %arg4: memref<512x256xbf16, #tpu.memory_space<vmem>>, %arg5: memref<1x256xf32, #tpu.memory_space<vmem>>, %arg6: memref<256x256xbf16, #tpu.memory_space<vmem>>, %arg7: memref<1x2x256xf32, #tpu.memory_space<vmem>>, %arg8: memref<256x256xf32, #tpu.memory_space<vmem>>) attributes {dimension_semantics = [#tpu.dimension_semantics<parallel>, #tpu.dimension_semantics<parallel>, #tpu.dimension_semantics<arbitrary>], iteration_bounds = array<i64: 2, 1, 1>, scalar_prefetch = 0 : i64, scratch_operands = 1 : i64, tpu.core_type = #tpu.core_type<tc>, window_params = [{transform_indices = @transform_0, window_bounds = array<i64: 256, 512>}, {transform_indices = @transform_1, window_bounds = array<i64: 512, 256>}, {transform_indices = @transform_2, window_bounds = array<i64: 1, 256>}, {transform_indices = @transform_3, window_bounds = array<i64: 256, 256>}, {transform_indices = @transform_4, window_bounds = array<i64: 1, 2, 256>}]} {
    %c0_i32 = arith.constant 0 : i32
    %0 = arith.cmpi eq, %arg2, %c0_i32 : i32
    %1 = arith.extui %0 : i1 to i32
    %c0_i32_0 = arith.constant 0 : i32
    %2 = arith.cmpi ne, %1, %c0_i32_0 : i32
    scf.if %2 {
      %cst_10 = arith.constant 0.000000e+00 : f32
      %12 = vector.broadcast %cst_10 : f32 to vector<256x256xf32>
      %c0_11 = arith.constant 0 : index
      %c0_12 = arith.constant 0 : index
      %13 = vector.load %arg8[%c0_11, %c0_12] : memref<256x256xf32, #tpu.memory_space<vmem>>, vector<256x256xf32>
      tpu.vector_store %arg8[%c0_11, %c0_12], %12 {strides = array<i32>} : memref<256x256xf32, #tpu.memory_space<vmem>>, vector<256x256xf32>,
    } else {
    }
    %c0 = arith.constant 0 : index
    %c0_1 = arith.constant 0 : index
    %3 = vector.load %arg8[%c0, %c0_1] : memref<256x256xf32, #tpu.memory_space<vmem>>, vector<256x256xf32>
    %c0_2 = arith.constant 0 : index
    %c0_3 = arith.constant 0 : index
    %4 = vector.load %arg3[%c0_2, %c0_3] : memref<256x512xbf16, #tpu.memory_space<vmem>>, vector<256x512xbf16>
    %c0_4 = arith.constant 0 : index
    %c0_5 = arith.constant 0 : index
    %5 = vector.load %arg4[%c0_4, %c0_5] : memref<512x256xbf16, #tpu.memory_space<vmem>>, vector<512x256xbf16>
    %cst = arith.constant dense<0.000000e+00> : vector<256x256xf32>
    %6 = tpu.matmul %4, %5, %cst {dimension_numbers = #tpu.dot_dimension_numbers<[1], [0], [0], [1], [0, 0, 1, 1], [], []>} : vector<256x512xbf16>, vector<512x256xbf16>, vector<256x256xf32> -> vector<256x256xf32>
    %7 = arith.addf %3, %6 : vector<256x256xf32>
    %c0_6 = arith.constant 0 : index
    %c0_7 = arith.constant 0 : index
    %8 = vector.load %arg8[%c0_6, %c0_7] : memref<256x256xf32, #tpu.memory_space<vmem>>, vector<256x256xf32>
    tpu.vector_store %arg8[%c0_6, %c0_7], %7 {strides = array<i32>} : memref<256x256xf32, #tpu.memory_space<vmem>>, vector<256x256xf32>,
    %c0_i32_8 = arith.constant 0 : i32
    %9 = arith.cmpi eq, %arg2, %c0_i32_8 : i32
    %10 = arith.extui %9 : i1 to i32
    %c0_i32_9 = arith.constant 0 : i32
    %11 = arith.cmpi ne, %10, %c0_i32_9 : i32
    scf.if %11 {
      %c0_10 = arith.constant 0 : index
      %c0_11 = arith.constant 0 : index
      %12 = vector.load %arg8[%c0_10, %c0_11] : memref<256x256xf32, #tpu.memory_space<vmem>>, vector<256x256xf32>
      %c0_12 = arith.constant 0 : index
      %c0_13 = arith.constant 0 : index
      %13 = vector.load %arg5[%c0_12, %c0_13] : memref<1x256xf32, #tpu.memory_space<vmem>>, vector<1x256xf32>
      %14 = vector.broadcast %13 : vector<1x256xf32> to vector<256x256xf32>
      %15 = arith.addf %12, %14 : vector<256x256xf32>
      %cst_14 = arith.constant 0.000000e+00 : f32
      %16 = vector.broadcast %cst_14 : f32 to vector<256x256xf32>
      %17 = arith.maximumf %15, %16 : vector<256x256xf32>
      %18 = arith.truncf %17 : vector<256x256xf32> to vector<256x256xbf16>
      %c0_15 = arith.constant 0 : index
      %c0_16 = arith.constant 0 : index
      %19 = vector.load %arg6[%c0_15, %c0_16] : memref<256x256xbf16, #tpu.memory_space<vmem>>, vector<256x256xbf16>
      tpu.vector_store %arg6[%c0_15, %c0_16], %18 {strides = array<i32>} : memref<256x256xbf16, #tpu.memory_space<vmem>>, vector<256x256xbf16>,
      %20 = tpu.iota {dimensions = array<i32: 0>} : vector<256x256xi32>
      %c256_i32 = arith.constant 256 : i32
      %21 = arith.muli %arg0, %c256_i32 : i32
      %22 = vector.broadcast %21 : i32 to vector<256x256xi32>
      %23 = arith.addi %22, %20 : vector<256x256xi32>
      %c512_i32 = arith.constant 512 : i32
      %24 = vector.broadcast %c512_i32 : i32 to vector<256x256xi32>
      %25 = arith.cmpi slt, %23, %24 : vector<256x256xi32>
      %cst_17 = arith.constant 0.000000e+00 : f32
      %26 = vector.broadcast %cst_17 : f32 to vector<256x256xf32>
      %27 = arith.select %25, %17, %26 : vector<256x256xi1>, vector<256x256xf32>
      %cst_18 = arith.constant dense<0.000000e+00> : vector<256xf32>
      %28 = vector.multi_reduction <add>, %27, %cst_18 [0] : vector<256x256xf32> to vector<256xf32>
      %29 = vector.shape_cast %28 : vector<256xf32> to vector<1x256xf32>
      %30 = arith.mulf %27, %27 : vector<256x256xf32>
      %cst_19 = arith.constant dense<0.000000e+00> : vector<256xf32>
      %31 = vector.multi_reduction <add>, %30, %cst_19 [0] : vector<256x256xf32> to vector<256xf32>
      %32 = vector.shape_cast %31 : vector<256xf32> to vector<1x256xf32>
      %33 = tpu.concatenate %29, %32 in 0 : vector<1x256xf32>, vector<1x256xf32> -> vector<2x256xf32>
      %34 = vector.shape_cast %33 : vector<2x256xf32> to vector<1x2x256xf32>
      %c0_20 = arith.constant 0 : index
      %c0_21 = arith.constant 0 : index
      %c0_22 = arith.constant 0 : index
      %35 = vector.load %arg7[%c0_20, %c0_21, %c0_22] : memref<1x2x256xf32, #tpu.memory_space<vmem>>, vector<1x2x256xf32>
      tpu.vector_store %arg7[%c0_20, %c0_21, %c0_22], %34 {strides = array<i32>} : memref<1x2x256xf32, #tpu.memory_space<vmem>>, vector<1x2x256xf32>,
    } else {
    }
    return
  }
  func.func @transform_0(%arg0: i32, %arg1: i32, %arg2: i32) -> (i32, i32) {
    %c0_i32 = arith.constant 0 : i32
    return %arg0, %arg2 : i32, i32
  }
  func.func @transform_1(%arg0: i32, %arg1: i32, %arg2: i32) -> (i32, i32) {
    %c0_i32 = arith.constant 0 : i32
    return %arg2, %arg1 : i32, i32
  }
  func.func @transform_2(%arg0: i32, %arg1: i32, %arg2: i32) -> (i32, i32) {
    %c0_i32 = arith.constant 0 : i32
    %c0_i32_0 = arith.constant 0 : i32
    return %c0_i32, %arg1 : i32, i32
  }
  func.func @transform_3(%arg0: i32, %arg1: i32, %arg2: i32) -> (i32, i32) {
    %c0_i32 = arith.constant 0 : i32
    return %arg0, %arg1 : i32, i32
  }
  func.func @transform_4(%arg0: i32, %arg1: i32, %arg2: i32) -> (i32, i32, i32) {
    %c0_i32 = arith.constant 0 : i32
    %c0_i32_0 = arith.constant 0 : i32
    return %arg0, %c0_i32, %arg1 : i32, i32, i32
  }
}

module attributes {stable_mosaic.version = 11 : i64} {
  func.func @_mm_kernel(%arg0: i32, %arg1: i32, %arg2: i32, %arg3: memref<512x256xbf16, #tpu.memory_space<vmem>>, %arg4: memref<256x128xbf16, #tpu.memory_space<vmem>>, %arg5: memref<1x128xf32, #tpu.memory_space<vmem>>, %arg6: memref<512x128xbf16, #tpu.memory_space<vmem>>, %arg7: memref<1x2x128xf32, #tpu.memory_space<vmem>>, %arg8: memref<512x128xf32, #tpu.memory_space<vmem>>) attributes {dimension_semantics = [#tpu.dimension_semantics<parallel>, #tpu.dimension_semantics<parallel>, #tpu.dimension_semantics<arbitrary>], iteration_bounds = array<i64: 4, 1, 1>, scalar_prefetch = 0 : i64, scratch_operands = 1 : i64, tpu.core_type = #tpu.core_type<tc>, window_params = [{transform_indices = @transform_0, window_bounds = array<i64: 512, 256>}, {transform_indices = @transform_1, window_bounds = array<i64: 256, 128>}, {transform_indices = @transform_2, window_bounds = array<i64: 1, 128>}, {transform_indices = @transform_3, window_bounds = array<i64: 512, 128>}, {transform_indices = @transform_4, window_bounds = array<i64: 1, 2, 128>}]} {
    %c0_i32 = arith.constant 0 : i32
    %0 = arith.cmpi eq, %arg2, %c0_i32 : i32
    %1 = arith.extui %0 : i1 to i32
    %c0_i32_0 = arith.constant 0 : i32
    %2 = arith.cmpi ne, %1, %c0_i32_0 : i32
    scf.if %2 {
      %cst_10 = arith.constant 0.000000e+00 : f32
      %12 = vector.broadcast %cst_10 : f32 to vector<512x128xf32>
      %c0_11 = arith.constant 0 : index
      %c0_12 = arith.constant 0 : index
      %13 = vector.load %arg8[%c0_11, %c0_12] : memref<512x128xf32, #tpu.memory_space<vmem>>, vector<512x128xf32>
      tpu.vector_store %arg8[%c0_11, %c0_12], %12 {strides = array<i32>} : memref<512x128xf32, #tpu.memory_space<vmem>>, vector<512x128xf32>,
    } else {
    }
    %c0 = arith.constant 0 : index
    %c0_1 = arith.constant 0 : index
    %3 = vector.load %arg8[%c0, %c0_1] : memref<512x128xf32, #tpu.memory_space<vmem>>, vector<512x128xf32>
    %c0_2 = arith.constant 0 : index
    %c0_3 = arith.constant 0 : index
    %4 = vector.load %arg3[%c0_2, %c0_3] : memref<512x256xbf16, #tpu.memory_space<vmem>>, vector<512x256xbf16>
    %c0_4 = arith.constant 0 : index
    %c0_5 = arith.constant 0 : index
    %5 = vector.load %arg4[%c0_4, %c0_5] : memref<256x128xbf16, #tpu.memory_space<vmem>>, vector<256x128xbf16>
    %cst = arith.constant dense<0.000000e+00> : vector<512x128xf32>
    %6 = tpu.matmul %4, %5, %cst {dimension_numbers = #tpu.dot_dimension_numbers<[1], [0], [0], [1], [0, 0, 1, 1], [], []>} : vector<512x256xbf16>, vector<256x128xbf16>, vector<512x128xf32> -> vector<512x128xf32>
    %7 = arith.addf %3, %6 : vector<512x128xf32>
    %c0_6 = arith.constant 0 : index
    %c0_7 = arith.constant 0 : index
    %8 = vector.load %arg8[%c0_6, %c0_7] : memref<512x128xf32, #tpu.memory_space<vmem>>, vector<512x128xf32>
    tpu.vector_store %arg8[%c0_6, %c0_7], %7 {strides = array<i32>} : memref<512x128xf32, #tpu.memory_space<vmem>>, vector<512x128xf32>,
    %c0_i32_8 = arith.constant 0 : i32
    %9 = arith.cmpi eq, %arg2, %c0_i32_8 : i32
    %10 = arith.extui %9 : i1 to i32
    %c0_i32_9 = arith.constant 0 : i32
    %11 = arith.cmpi ne, %10, %c0_i32_9 : i32
    scf.if %11 {
      %c0_10 = arith.constant 0 : index
      %c0_11 = arith.constant 0 : index
      %12 = vector.load %arg8[%c0_10, %c0_11] : memref<512x128xf32, #tpu.memory_space<vmem>>, vector<512x128xf32>
      %c0_12 = arith.constant 0 : index
      %c0_13 = arith.constant 0 : index
      %13 = vector.load %arg5[%c0_12, %c0_13] : memref<1x128xf32, #tpu.memory_space<vmem>>, vector<1x128xf32>
      %14 = vector.broadcast %13 : vector<1x128xf32> to vector<512x128xf32>
      %15 = arith.addf %12, %14 : vector<512x128xf32>
      %cst_14 = arith.constant 0.000000e+00 : f32
      %16 = vector.broadcast %cst_14 : f32 to vector<512x128xf32>
      %17 = arith.maximumf %15, %16 : vector<512x128xf32>
      %18 = arith.truncf %17 : vector<512x128xf32> to vector<512x128xbf16>
      %c0_15 = arith.constant 0 : index
      %c0_16 = arith.constant 0 : index
      %19 = vector.load %arg6[%c0_15, %c0_16] : memref<512x128xbf16, #tpu.memory_space<vmem>>, vector<512x128xbf16>
      tpu.vector_store %arg6[%c0_15, %c0_16], %18 {strides = array<i32>} : memref<512x128xbf16, #tpu.memory_space<vmem>>, vector<512x128xbf16>,
      %20 = tpu.iota {dimensions = array<i32: 0>} : vector<512x128xi32>
      %c512_i32 = arith.constant 512 : i32
      %21 = arith.muli %arg0, %c512_i32 : i32
      %22 = vector.broadcast %21 : i32 to vector<512x128xi32>
      %23 = arith.addi %22, %20 : vector<512x128xi32>
      %c2048_i32 = arith.constant 2048 : i32
      %24 = vector.broadcast %c2048_i32 : i32 to vector<512x128xi32>
      %25 = arith.cmpi slt, %23, %24 : vector<512x128xi32>
      %cst_17 = arith.constant 0.000000e+00 : f32
      %26 = vector.broadcast %cst_17 : f32 to vector<512x128xf32>
      %27 = arith.select %25, %17, %26 : vector<512x128xi1>, vector<512x128xf32>
      %cst_18 = arith.constant dense<0.000000e+00> : vector<128xf32>
      %28 = vector.multi_reduction <add>, %27, %cst_18 [0] : vector<512x128xf32> to vector<128xf32>
      %29 = vector.shape_cast %28 : vector<128xf32> to vector<1x128xf32>
      %30 = arith.mulf %27, %27 : vector<512x128xf32>
      %cst_19 = arith.constant dense<0.000000e+00> : vector<128xf32>
      %31 = vector.multi_reduction <add>, %30, %cst_19 [0] : vector<512x128xf32> to vector<128xf32>
      %32 = vector.shape_cast %31 : vector<128xf32> to vector<1x128xf32>
      %33 = tpu.concatenate %29, %32 in 0 : vector<1x128xf32>, vector<1x128xf32> -> vector<2x128xf32>
      %34 = vector.shape_cast %33 : vector<2x128xf32> to vector<1x2x128xf32>
      %c0_20 = arith.constant 0 : index
      %c0_21 = arith.constant 0 : index
      %c0_22 = arith.constant 0 : index
      %35 = vector.load %arg7[%c0_20, %c0_21, %c0_22] : memref<1x2x128xf32, #tpu.memory_space<vmem>>, vector<1x2x128xf32>
      tpu.vector_store %arg7[%c0_20, %c0_21, %c0_22], %34 {strides = array<i32>} : memref<1x2x128xf32, #tpu.memory_space<vmem>>, vector<1x2x128xf32>,
    } else {
    }
    return
  }
  func.func @transform_0(%arg0: i32, %arg1: i32, %arg2: i32) -> (i32, i32) {
    %c0_i32 = arith.constant 0 : i32
    return %arg0, %arg2 : i32, i32
  }
  func.func @transform_1(%arg0: i32, %arg1: i32, %arg2: i32) -> (i32, i32) {
    %c0_i32 = arith.constant 0 : i32
    return %arg2, %arg1 : i32, i32
  }
  func.func @transform_2(%arg0: i32, %arg1: i32, %arg2: i32) -> (i32, i32) {
    %c0_i32 = arith.constant 0 : i32
    %c0_i32_0 = arith.constant 0 : i32
    return %c0_i32, %arg1 : i32, i32
  }
  func.func @transform_3(%arg0: i32, %arg1: i32, %arg2: i32) -> (i32, i32) {
    %c0_i32 = arith.constant 0 : i32
    return %arg0, %arg1 : i32, i32
  }
  func.func @transform_4(%arg0: i32, %arg1: i32, %arg2: i32) -> (i32, i32, i32) {
    %c0_i32 = arith.constant 0 : i32
    %c0_i32_0 = arith.constant 0 : i32
    return %arg0, %c0_i32, %arg1 : i32, i32, i32
  }
}

module attributes {stable_mosaic.version = 11 : i64} {
  func.func @_mm_kernel(%arg0: i32, %arg1: i32, %arg2: i32, %arg3: memref<512x32xbf16, #tpu.memory_space<vmem>>, %arg4: memref<32x128xbf16, #tpu.memory_space<vmem>>, %arg5: memref<1x128xf32, #tpu.memory_space<vmem>>, %arg6: memref<512x128xf32, #tpu.memory_space<vmem>>, %arg7: memref<512x128xf32, #tpu.memory_space<vmem>>) attributes {dimension_semantics = [#tpu.dimension_semantics<parallel>, #tpu.dimension_semantics<parallel>, #tpu.dimension_semantics<arbitrary>], iteration_bounds = array<i64: 16, 1, 1>, scalar_prefetch = 0 : i64, scratch_operands = 1 : i64, tpu.core_type = #tpu.core_type<tc>, window_params = [{transform_indices = @transform_0, window_bounds = array<i64: 512, 32>}, {transform_indices = @transform_1, window_bounds = array<i64: 32, 128>}, {transform_indices = @transform_2, window_bounds = array<i64: 1, 128>}, {transform_indices = @transform_3, window_bounds = array<i64: 512, 128>}]} {
    %c0_i32 = arith.constant 0 : i32
    %0 = arith.cmpi eq, %arg2, %c0_i32 : i32
    %1 = arith.extui %0 : i1 to i32
    %c0_i32_0 = arith.constant 0 : i32
    %2 = arith.cmpi ne, %1, %c0_i32_0 : i32
    scf.if %2 {
      %cst_10 = arith.constant 0.000000e+00 : f32
      %12 = vector.broadcast %cst_10 : f32 to vector<512x128xf32>
      %c0_11 = arith.constant 0 : index
      %c0_12 = arith.constant 0 : index
      %13 = vector.load %arg7[%c0_11, %c0_12] : memref<512x128xf32, #tpu.memory_space<vmem>>, vector<512x128xf32>
      tpu.vector_store %arg7[%c0_11, %c0_12], %12 {strides = array<i32>} : memref<512x128xf32, #tpu.memory_space<vmem>>, vector<512x128xf32>,
    } else {
    }
    %c0 = arith.constant 0 : index
    %c0_1 = arith.constant 0 : index
    %3 = vector.load %arg7[%c0, %c0_1] : memref<512x128xf32, #tpu.memory_space<vmem>>, vector<512x128xf32>
    %c0_2 = arith.constant 0 : index
    %c0_3 = arith.constant 0 : index
    %4 = vector.load %arg3[%c0_2, %c0_3] : memref<512x32xbf16, #tpu.memory_space<vmem>>, vector<512x32xbf16>
    %c0_4 = arith.constant 0 : index
    %c0_5 = arith.constant 0 : index
    %5 = vector.load %arg4[%c0_4, %c0_5] : memref<32x128xbf16, #tpu.memory_space<vmem>>, vector<32x128xbf16>
    %cst = arith.constant dense<0.000000e+00> : vector<512x128xf32>
    %6 = tpu.matmul %4, %5, %cst {dimension_numbers = #tpu.dot_dimension_numbers<[1], [0], [0], [1], [0, 0, 1, 1], [], []>} : vector<512x32xbf16>, vector<32x128xbf16>, vector<512x128xf32> -> vector<512x128xf32>
    %7 = arith.addf %3, %6 : vector<512x128xf32>
    %c0_6 = arith.constant 0 : index
    %c0_7 = arith.constant 0 : index
    %8 = vector.load %arg7[%c0_6, %c0_7] : memref<512x128xf32, #tpu.memory_space<vmem>>, vector<512x128xf32>
    tpu.vector_store %arg7[%c0_6, %c0_7], %7 {strides = array<i32>} : memref<512x128xf32, #tpu.memory_space<vmem>>, vector<512x128xf32>,
    %c0_i32_8 = arith.constant 0 : i32
    %9 = arith.cmpi eq, %arg2, %c0_i32_8 : i32
    %10 = arith.extui %9 : i1 to i32
    %c0_i32_9 = arith.constant 0 : i32
    %11 = arith.cmpi ne, %10, %c0_i32_9 : i32
    scf.if %11 {
      %c0_10 = arith.constant 0 : index
      %c0_11 = arith.constant 0 : index
      %12 = vector.load %arg7[%c0_10, %c0_11] : memref<512x128xf32, #tpu.memory_space<vmem>>, vector<512x128xf32>
      %c0_12 = arith.constant 0 : index
      %c0_13 = arith.constant 0 : index
      %13 = vector.load %arg5[%c0_12, %c0_13] : memref<1x128xf32, #tpu.memory_space<vmem>>, vector<1x128xf32>
      %14 = vector.broadcast %13 : vector<1x128xf32> to vector<512x128xf32>
      %15 = arith.addf %12, %14 : vector<512x128xf32>
      %c0_14 = arith.constant 0 : index
      %c0_15 = arith.constant 0 : index
      %16 = vector.load %arg6[%c0_14, %c0_15] : memref<512x128xf32, #tpu.memory_space<vmem>>, vector<512x128xf32>
      tpu.vector_store %arg6[%c0_14, %c0_15], %15 {strides = array<i32>} : memref<512x128xf32, #tpu.memory_space<vmem>>, vector<512x128xf32>,
    } else {
    }
    return
  }
  func.func @transform_0(%arg0: i32, %arg1: i32, %arg2: i32) -> (i32, i32) {
    %c0_i32 = arith.constant 0 : i32
    return %arg0, %arg2 : i32, i32
  }
  func.func @transform_1(%arg0: i32, %arg1: i32, %arg2: i32) -> (i32, i32) {
    %c0_i32 = arith.constant 0 : i32
    return %arg2, %arg1 : i32, i32
  }
  func.func @transform_2(%arg0: i32, %arg1: i32, %arg2: i32) -> (i32, i32) {
    %c0_i32 = arith.constant 0 : i32
    %c0_i32_0 = arith.constant 0 : i32
    return %c0_i32, %arg1 : i32, i32
  }
  func.func @transform_3(%arg0: i32, %arg1: i32, %arg2: i32) -> (i32, i32) {
    %c0_i32 = arith.constant 0 : i32
    return %arg0, %arg1 : i32, i32
  }
}

</mosaic_0001>

<bundles_post_ra>
// kernel: fcn16s_forward.6
= control target key start
LH: loop header
LB: loop body
LE: loop exit
PB: predicated region body
PF: predicated region fallthrough
CT: control target
= control target key end

     0   :  { %s3522_s0 = inlined_call_operand.vmem [shape: bf16[16,2048], index: 0, kind: input, shape index: {}]   ;;  %s3523_s1 = inlined_call_operand.vmem [shape: bf16[2048,2048], index: 1, kind: input, shape index: {}]   ;;  %s3524_s2 = inlined_call_operand.vmem [shape: f32[1,2048], index: 2, kind: input, shape index: {}]   ;;  %s3525_s3 = inlined_call_operand.vmem [shape: bf16[16,2048], index: 3, kind: input, shape index: {}]   ;;  %s3526_s4 = inlined_call_operand.vmem [shape: bf16[16,2048], index: 4, kind: output, shape index: {0}]   ;;  %s3527_s5 = inlined_call_operand.vmem [shape: f32[1,2,2048], index: 5, kind: output, shape index: {1}]  }
   0x1   :  { %3531 = sst [smem:[#allocation11_spill]] %s3522_s0 }
   0x2   :  { %s2896_s18 = smov 0   ;;  %s2898_s19 = smov 0  }
   0x3   :  { %s2900_s20 = smov 0   ;;  %s2902_s21 = smov 0  }
   0x4   :  { %s2904_s22 = smov 0   ;;  %s2906_s23 = smov 0  }
   0x5   :  { %s2908_s24 = smov 0   ;;  %s2910_s25 = smov 0  }
   0x6   :  { %s2912_s26 = smov 0   ;;  %s2914_s27 = smov 0  }
   0x7   :  { %s2916_s28 = smov 0  }
   0x8 LB: > { %3532 = sst [smem:[#allocation7_spill]] %s2843_s23  ;;  %s2309_s29 = sadd.s32 4294967295, %s2863_s28   ;;  %s2863_s28 = sphi %s2916_s28, %s16_s28   ;;  %s2859_s27 = sphi %s2914_s27, %s3552_s27   ;;  %s2855_s26 = sphi %s2912_s26, %s3551_s26   ;;  %s2851_s25 = sphi %s2910_s25, %s3550_s25   ;;  %s2847_s24 = sphi %s2908_s24, %s3549_s24   ;;  %s2843_s23 = sphi %s2906_s23, %s3542_s23   ;;  %s2839_s22 = sphi %s2904_s22, %s3541_s22   ;;  %s2835_s21 = sphi %s2902_s21, %s3548_s21   ;;  %s2831_s20 = sphi %s2900_s20, %s3547_s20   ;;  %s2827_s19 = sphi %s2898_s19, %s3546_s19   ;;  %s2823_s18 = sphi %s2896_s18, %s3545_s18  }
   0x9   : > { %s28_s30 = sadd.s32 1, %s2855_s26  ;;  %s31_s6 = sadd.s32 1, %s2859_s27 }
   0xa   : > { %p29_p0 = scmp.ge.s32.totalorder %s28_s30, 2  ;;  %s44_s7 = sadd.s32 1, %s2843_s23 }
   0xb   : > { %p51_p1 = scmp.ne.s32.totalorder %s2843_s23, %s2839_s22  ;;  %p52_p2 = scmp.eq.s32.totalorder %s2863_s28, 0 }
   0xc   : > { %s3554_s30 = smov (%p29_p0, %s28_s30), 0  ;;  %s3556_s6 = smov (!%p29_p0, %s31_s6), %s2859_s27 }
   0xd   : > { %3533 = sst [smem:[#allocation8_spill]] %s3554_s30  ;;  %s40_s8 = ssub.s32 %s2855_s26, %s3554_s30 }
   0xe   : > { %p33_p3 = scmp.ge.s32.totalorder %s3556_s6, 8  ;;  %p42_p4 = scmp.eq.s32.totalorder %s40_s8, 0 }
   0xf   : > { %p2965_p5 = por %p52_p2, %p51_p1  ;;  %s72_s10 = sadd.s32 1, %s2835_s21 }
  0x10   : > { %s3558_s6 = smov (%p33_p3, %s3556_s6), 0  ;;  %p79_p6 = scmp.ne.s32.totalorder %s2835_s21, %s2831_s20 }
  0x11   : > { %3535 = sst [smem:[#allocation9_spill]] %s3558_s6  ;;  %s68_s12 = ssub.s32 %s2859_s27, %s3558_s6 }
  0x12   : > { %s2973_s11 = scalar_select %p42_p4, %s2843_s23, %s44_s7  }
  0x13   : > { %s69_s13 = sor.u32 %s68_s12, %s40_s8  ;;  %p124_p7 = scmp.eq.s32.totalorder %s68_s12, 0 }
  0x14   : > { %3536 = sst [smem:[#allocation10_spill]] %s2973_s11  ;;  %p70_p8 = scmp.eq.s32.totalorder %s69_s13, 0 }
  0x15   : > { %p2981_p9 = por %p79_p6, %p52_p2  ;;  %s126_s15 = sadd.s32 1, %s2827_s19 }
  0x16   : > { %p133_p10 = scmp.ne.s32.totalorder %s2827_s19, %s2823_s18  ;;  %p165_p12 = scmp.eq.s32.totalorder %s2309_s29, 15 }
  0x17   : > { %s2989_s16 = scalar_select %p70_p8, %s2835_s21, %s72_s10  }
  0x18   : > { %s2992_s17 = scalar_select %p124_p7, %s2827_s19, %s126_s15  }
  0x19   : > { %p2996_p11 = por %p133_p10, %p52_p2  ;;  %p3000_p13 = por %p165_p12, %p133_p10 }
  0x1a   : > { %p2312_p0 = scmp.ge.s32.totalorder %s2863_s28, 16 }
  0x1c   : > { %215 = sbr.rel (%p2312_p0) target bundleno = 191 (0xbf), region = 16 }
  0x23   : > { %218 = sbr.rel (!%p2965_p5) target bundleno = 49 (0x31), region = 20  ;;  %s220_s10 = sand.u32 (%p2965_p5), 1, %s2843_s23  }
  0x24   : > { %s2478_s12 = sshll.u32 (%p2965_p5), %s2855_s26, 5  ;;  %s2313_s13 = sshll.u32 (%p2965_p5), %s220_s10, 6 }
  0x25   : > { %s3540_s0 = sld [smem:[#allocation11_spill]] (%p2965_p5)  ;;  %s222_s29 = scalar_lea.vmem (%p2965_p5), [#allocation3], %s2313_s13 }
  0x2b   : > { %s228_s30 = scalar_lea.vmem %s3540_s0, %s2478_s12 }
  0x2c   : > { %v241_v0 = vld [vmem:[%s228_s30] sm:$0xff]  ;;  %v243_v1 = vld [vmem:[%s228_s30 + $0x8] sm:$0xff]  ;;  %v245_v2 = vld [vmem:[%s228_s30 + $0x10] sm:$0xff] }
  0x2d   : > { %242 = vst [vmem:[%s222_s29] sm:$0xff] %v241_v0  ;;  %244 = vst [vmem:[%s222_s29 + $0x8] sm:$0xff] %v243_v1  ;;  %v247_v3 = vld [vmem:[%s228_s30 + $0x18] sm:$0xff]  ;;  %v249_v4 = vld [vmem:[%s228_s30 + $0x40] sm:$0xff] }
  0x2e   : > { %246 = vst [vmem:[%s222_s29 + $0x10] sm:$0xff] %v245_v2  ;;  %v251_v5 = vld [vmem:[%s228_s30 + $0x48] sm:$0xff]  ;;  %248 = vst [vmem:[%s222_s29 + $0x18] sm:$0xff] %v247_v3  ;;  %v253_v6 = vld [vmem:[%s228_s30 + $0x50] sm:$0xff] }
  0x2f   : > { %250 = vst [vmem:[%s222_s29 + $0x20] sm:$0xff] %v249_v4  ;;  %252 = vst [vmem:[%s222_s29 + $0x28] sm:$0xff] %v251_v5  ;;  %v255_v7 = vld [vmem:[%s228_s30 + $0x58] sm:$0xff] }
  0x30   : > { %254 = vst [vmem:[%s222_s29 + $0x30] sm:$0xff] %v253_v6  ;;  %256 = vst [vmem:[%s222_s29 + $0x38] sm:$0xff] %v255_v7 }
  0x31 PF: > { %262 = sbr.rel (!%p2981_p9) target bundleno = 184 (0xb8), region = 43  ;;  %s264_s6 = sand.u32 (%p2981_p9), 1, %s2835_s21  }
  0x32   : > { %s2318_s9 = sshll.u32 (%p2981_p9), %s2859_s27, 1  ;;  %s2316_s10 = sshll.u32 (%p2981_p9), %s264_s6, 10 }
  0x33   : > { %s2479_s12 = sshll.u32 (%p2981_p9), %s2855_s26, 11  ;;  %s3025_s30 = scalar_lea.vmem (%p2981_p9), [#allocation4], %s2316_s10 }
  0x34   : > { %s270_s13 = sadd.s32 (%p2981_p9), %s2479_s12, %s2318_s9 }
  0x35   : > { %s2320_s15 = sshll.u32 (%p2981_p9), %s270_s13, 2 }
  0x36   : > { %s3020_s23 = scalar_lea.vmem (%p2981_p9), %s3523_s1, %s2320_s15 }
  0x37   : > { %v554_v8 = vld [vmem:[%s3020_s23] sm:$0xff] (%p2981_p9) }
  0x38   : > { %v556_v9 = vld [vmem:[%s3020_s23 + $0x40] sm:$0xff]  ;;  %555 = vst [vmem:[%s3025_s30] sm:$0xff] %v554_v8 }
  0x39   : > { %v558_v10 = vld [vmem:[%s3020_s23 + $0x80] sm:$0xff]  ;;  %557 = vst [vmem:[%s3025_s30 + $0x8] sm:$0xff] %v556_v9 }
  0x3a   : > { %559 = vst [vmem:[%s3025_s30 + $0x10] sm:$0xff] %v558_v10  ;;  %v560_v11 = vld [vmem:[%s3020_s23 + $0xc0] sm:$0xff] }
  0x3b   : > { %v562_v12 = vld [vmem:[%s3020_s23 + $0x100] sm:$0xff]  ;;  %561 = vst [vmem:[%s3025_s30 + $0x18] sm:$0xff] %v560_v11 }
  0x3c   : > { %v564_v13 = vld [vmem:[%s3020_s23 + $0x140] sm:$0xff]  ;;  %563 = vst [vmem:[%s3025_s30 + $0x20] sm:$0xff] %v562_v12 }
  0x3d   : > { %565 = vst [vmem:[%s3025_s30 + $0x28] sm:$0xff] %v564_v13  ;;  %v566_v14 = vld [vmem:[%s3020_s23 + $0x180] sm:$0xff] }
  0x3e   : > { %v568_v15 = vld [vmem:[%s3020_s23 + $0x1c0] sm:$0xff]  ;;  %567 = vst [vmem:[%s3025_s30 + $0x30] sm:$0xff] %v566_v14 }
  0x3f   : > { %v570_v16 = vld [vmem:[%s3020_s23 + $0x200] sm:$0xff]  ;;  %569 = vst [vmem:[%s3025_s30 + $0x38] sm:$0xff] %v568_v15 }
  0x40   : > { %571 = vst [vmem:[%s3025_s30 + $0x40] sm:$0xff] %v570_v16  ;;  %v572_v17 = vld [vmem:[%s3020_s23 + $0x240] sm:$0xff] }
  0x41   : > { %v574_v18 = vld [vmem:[%s3020_s23 + $0x280] sm:$0xff]  ;;  %573 = vst [vmem:[%s3025_s30 + $0x48] sm:$0xff] %v572_v17 }
  0x42   : > { %v576_v19 = vld [vmem:[%s3020_s23 + $0x2c0] sm:$0xff]  ;;  %575 = vst [vmem:[%s3025_s30 + $0x50] sm:$0xff] %v574_v18 }
  0x43   : > { %577 = vst [vmem:[%s3025_s30 + $0x58] sm:$0xff] %v576_v19  ;;  %v578_v20 = vld [vmem:[%s3020_s23 + $0x300] sm:$0xff] }
  0x44   : > { %v580_v21 = vld [vmem:[%s3020_s23 + $0x340] sm:$0xff]  ;;  %579 = vst [vmem:[%s3025_s30 + $0x60] sm:$0xff] %v578_v20 }
  0x45   : > { %v582_v22 = vld [vmem:[%s3020_s23 + $0x380] sm:$0xff]  ;;  %581 = vst [vmem:[%s3025_s30 + $0x68] sm:$0xff] %v580_v21 }
  0x46   : > { %583 = vst [vmem:[%s3025_s30 + $0x70] sm:$0xff] %v582_v22  ;;  %v584_v23 = vld [vmem:[%s3020_s23 + $0x3c0] sm:$0xff] }
  0x47   : > { %v586_v24 = vld [vmem:[%s3020_s23 + $0x400] sm:$0xff]  ;;  %585 = vst [vmem:[%s3025_s30 + $0x78] sm:$0xff] %v584_v23 }
  0x48   : > { %v588_v25 = vld [vmem:[%s3020_s23 + $0x440] sm:$0xff]  ;;  %587 = vst [vmem:[%s3025_s30 + $0x80] sm:$0xff] %v586_v24 }
  0x49   : > { %589 = vst [vmem:[%s3025_s30 + $0x88] sm:$0xff] %v588_v25  ;;  %v590_v26 = vld [vmem:[%s3020_s23 + $0x480] sm:$0xff] }
  0x4a   : > { %v592_v27 = vld [vmem:[%s3020_s23 + $0x4c0] sm:$0xff]  ;;  %591 = vst [vmem:[%s3025_s30 + $0x90] sm:$0xff] %v590_v26 }
  0x4b   : > { %v594_v28 = vld [vmem:[%s3020_s23 + $0x500] sm:$0xff]  ;;  %593 = vst [vmem:[%s3025_s30 + $0x98] sm:$0xff] %v592_v27 }
  0x4c   : > { %595 = vst [vmem:[%s3025_s30 + $0xa0] sm:$0xff] %v594_v28  ;;  %v596_v29 = vld [vmem:[%s3020_s23 + $0x540] sm:$0xff] }
  0x4d   : > { %v598_v30 = vld [vmem:[%s3020_s23 + $0x580] sm:$0xff]  ;;  %597 = vst [vmem:[%s3025_s30 + $0xa8] sm:$0xff] %v596_v29 }
  0x4e   : > { %v600_v31 = vld [vmem:[%s3020_s23 + $0x5c0] sm:$0xff]  ;;  %599 = vst [vmem:[%s3025_s30 + $0xb0] sm:$0xff] %v598_v30 }
  0x4f   : > { %601 = vst [vmem:[%s3025_s30 + $0xb8] sm:$0xff] %v600_v31  ;;  %v602_v32 = vld [vmem:[%s3020_s23 + $0x600] sm:$0xff] }
  0x50   : > { %v604_v33 = vld [vmem:[%s3020_s23 + $0x640] sm:$0xff]  ;;  %603 = vst [vmem:[%s3025_s30 + $0xc0] sm:$0xff] %v602_v32 }
  0x51   : > { %v606_v34 = vld [vmem:[%s3020_s23 + $0x680] sm:$0xff]  ;;  %605 = vst [vmem:[%s3025_s30 + $0xc8] sm:$0xff] %v604_v33 }
  0x52   : > { %607 = vst [vmem:[%s3025_s30 + $0xd0] sm:$0xff] %v606_v34  ;;  %v608_v35 = vld [vmem:[%s3020_s23 + $0x6c0] sm:$0xff] }
  0x53   : > { %v610_v36 = vld [vmem:[%s3020_s23 + $0x700] sm:$0xff]  ;;  %609 = vst [vmem:[%s3025_s30 + $0xd8] sm:$0xff] %v608_v35 }
  0x54   : > { %v612_v37 = vld [vmem:[%s3020_s23 + $0x740] sm:$0xff]  ;;  %611 = vst [vmem:[%s3025_s30 + $0xe0] sm:$0xff] %v610_v36 }
  0x55   : > { %613 = vst [vmem:[%s3025_s30 + $0xe8] sm:$0xff] %v612_v37  ;;  %v614_v38 = vld [vmem:[%s3020_s23 + $0x780] sm:$0xff] }
  0x56   : > { %v616_v39 = vld [vmem:[%s3020_s23 + $0x7c0] sm:$0xff]  ;;  %615 = vst [vmem:[%s3025_s30 + $0xf0] sm:$0xff] %v614_v38 }
  0x57   : > { %v618_v40 = vld [vmem:[%s3020_s23 + $0x800] sm:$0xff]  ;;  %617 = vst [vmem:[%s3025_s30 + $0xf8] sm:$0xff] %v616_v39 }
  0x58   : > { %619 = vst [vmem:[%s3025_s30 + $0x100] sm:$0xff] %v618_v40  ;;  %v620_v41 = vld [vmem:[%s3020_s23 + $0x840] sm:$0xff] }
  0x59   : > { %v622_v42 = vld [vmem:[%s3020_s23 + $0x880] sm:$0xff]  ;;  %621 = vst [vmem:[%s3025_s30 + $0x108] sm:$0xff] %v620_v41 }
  0x5a   : > { %v624_v43 = vld [vmem:[%s3020_s23 + $0x8c0] sm:$0xff]  ;;  %623 = vst [vmem:[%s3025_s30 + $0x110] sm:$0xff] %v622_v42 }
  0x5b   : > { %625 = vst [vmem:[%s3025_s30 + $0x118] sm:$0xff] %v624_v43  ;;  %v626_v44 = vld [vmem:[%s3020_s23 + $0x900] sm:$0xff] }
  0x5c   : > { %v628_v45 = vld [vmem:[%s3020_s23 + $0x940] sm:$0xff]  ;;  %627 = vst [vmem:[%s3025_s30 + $0x120] sm:$0xff] %v626_v44 }
  0x5d   : > { %v630_v46 = vld [vmem:[%s3020_s23 + $0x980] sm:$0xff]  ;;  %629 = vst [vmem:[%s3025_s30 + $0x128] sm:$0xff] %v628_v45 }
  0x5e   : > { %631 = vst [vmem:[%s3025_s30 + $0x130] sm:$0xff] %v630_v46  ;;  %v632_v47 = vld [vmem:[%s3020_s23 + $0x9c0] sm:$0xff] }
  0x5f   : > { %v634_v48 = vld [vmem:[%s3020_s23 + $0xa00] sm:$0xff]  ;;  %633 = vst [vmem:[%s3025_s30 + $0x138] sm:$0xff] %v632_v47 }
  0x60   : > { %v636_v49 = vld [vmem:[%s3020_s23 + $0xa40] sm:$0xff]  ;;  %635 = vst [vmem:[%s3025_s30 + $0x140] sm:$0xff] %v634_v48 }
  0x61   : > { %637 = vst [vmem:[%s3025_s30 + $0x148] sm:$0xff] %v636_v49  ;;  %v638_v50 = vld [vmem:[%s3020_s23 + $0xa80] sm:$0xff] }
  0x62   : > { %v640_v51 = vld [vmem:[%s3020_s23 + $0xac0] sm:$0xff]  ;;  %639 = vst [vmem:[%s3025_s30 + $0x150] sm:$0xff] %v638_v50 }
  0x63   : > { %v642_v52 = vld [vmem:[%s3020_s23 + $0xb00] sm:$0xff]  ;;  %641 = vst [vmem:[%s3025_s30 + $0x158] sm:$0xff] %v640_v51 }
  0x64   : > { %643 = vst [vmem:[%s3025_s30 + $0x160] sm:$0xff] %v642_v52  ;;  %v644_v53 = vld [vmem:[%s3020_s23 + $0xb40] sm:$0xff] }
  0x65   : > { %v646_v54 = vld [vmem:[%s3020_s23 + $0xb80] sm:$0xff]  ;;  %645 = vst [vmem:[%s3025_s30 + $0x168] sm:$0xff] %v644_v53 }
  0x66   : > { %v648_v55 = vld [vmem:[%s3020_s23 + $0xbc0] sm:$0xff]  ;;  %647 = vst [vmem:[%s3025_s30 + $0x170] sm:$0xff] %v646_v54 }
  0x67   : > { %649 = vst [vmem:[%s3025_s30 + $0x178] sm:$0xff] %v648_v55  ;;  %v650_v56 = vld [vmem:[%s3020_s23 + $0xc00] sm:$0xff] }
  0x68   : > { %v652_v57 = vld [vmem:[%s3020_s23 + $0xc40] sm:$0xff]  ;;  %651 = vst [vmem:[%s3025_s30 + $0x180] sm:$0xff] %v650_v56 }
  0x69   : > { %v654_v58 = vld [vmem:[%s3020_s23 + $0xc80] sm:$0xff]  ;;  %653 = vst [vmem:[%s3025_s30 + $0x188] sm:$0xff] %v652_v57 }
  0x6a   : > { %655 = vst [vmem:[%s3025_s30 + $0x190] sm:$0xff] %v654_v58  ;;  %v656_v59 = vld [vmem:[%s3020_s23 + $0xcc0] sm:$0xff] }
  0x6b   : > { %v658_v60 = vld [vmem:[%s3020_s23 + $0xd00] sm:$0xff]  ;;  %657 = vst [vmem:[%s3025_s30 + $0x198] sm:$0xff] %v656_v59 }
  0x6c   : > { %v660_v61 = vld [vmem:[%s3020_s23 + $0xd40] sm:$0xff]  ;;  %659 = vst [vmem:[%s3025_s30 + $0x1a0] sm:$0xff] %v658_v60 }
  0x6d   : > { %661 = vst [vmem:[%s3025_s30 + $0x1a8] sm:$0xff] %v660_v61  ;;  %v662_v62 = vld [vmem:[%s3020_s23 + $0xd80] sm:$0xff] }
  0x6e   : > { %v664_v63 = vld [vmem:[%s3020_s23 + $0xdc0] sm:$0xff]  ;;  %663 = vst [vmem:[%s3025_s30 + $0x1b0] sm:$0xff] %v662_v62 }
  0x6f   : > { %v666_v0 = vld [vmem:[%s3020_s23 + $0xe00] sm:$0xff]  ;;  %665 = vst [vmem:[%s3025_s30 + $0x1b8] sm:$0xff] %v664_v63 }
  0x70   : > { %667 = vst [vmem:[%s3025_s30 + $0x1c0] sm:$0xff] %v666_v0  ;;  %v668_v1 = vld [vmem:[%s3020_s23 + $0xe40] sm:$0xff] }
  0x71   : > { %v670_v2 = vld [vmem:[%s3020_s23 + $0xe80] sm:$0xff]  ;;  %669 = vst [vmem:[%s3025_s30 + $0x1c8] sm:$0xff] %v668_v1 }
  0x72   : > { %v672_v3 = vld [vmem:[%s3020_s23 + $0xec0] sm:$0xff]  ;;  %671 = vst [vmem:[%s3025_s30 + $0x1d0] sm:$0xff] %v670_v2 }
  0x73   : > { %673 = vst [vmem:[%s3025_s30 + $0x1d8] sm:$0xff] %v672_v3  ;;  %v674_v4 = vld [vmem:[%s3020_s23 + $0xf00] sm:$0xff] }
  0x74   : > { %v676_v5 = vld [vmem:[%s3020_s23 + $0xf40] sm:$0xff]  ;;  %675 = vst [vmem:[%s3025_s30 + $0x1e0] sm:$0xff] %v674_v4 }
  0x75   : > { %v678_v6 = vld [vmem:[%s3020_s23 + $0xf80] sm:$0xff]  ;;  %677 = vst [vmem:[%s3025_s30 + $0x1e8] sm:$0xff] %v676_v5 }
  0x76   : > { %679 = vst [vmem:[%s3025_s30 + $0x1f0] sm:$0xff] %v678_v6  ;;  %v680_v7 = vld [vmem:[%s3020_s23 + $0xfc0] sm:$0xff] }
  0x77   : > { %v682_v8 = vld [vmem:[%s3020_s23 + $0x1000] sm:$0xff]  ;;  %681 = vst [vmem:[%s3025_s30 + $0x1f8] sm:$0xff] %v680_v7 }
  0x78   : > { %v684_v9 = vld [vmem:[%s3020_s23 + $0x1040] sm:$0xff]  ;;  %683 = vst [vmem:[%s3025_s30 + $0x200] sm:$0xff] %v682_v8 }
  0x79   : > { %685 = vst [vmem:[%s3025_s30 + $0x208] sm:$0xff] %v684_v9  ;;  %v686_v10 = vld [vmem:[%s3020_s23 + $0x1080] sm:$0xff] }
  0x7a   : > { %v688_v11 = vld [vmem:[%s3020_s23 + $0x10c0] sm:$0xff]  ;;  %687 = vst [vmem:[%s3025_s30 + $0x210] sm:$0xff] %v686_v10 }
  0x7b   : > { %v690_v12 = vld [vmem:[%s3020_s23 + $0x1100] sm:$0xff]  ;;  %689 = vst [vmem:[%s3025_s30 + $0x218] sm:$0xff] %v688_v11 }
  0x7c   : > { %691 = vst [vmem:[%s3025_s30 + $0x220] sm:$0xff] %v690_v12  ;;  %v692_v13 = vld [vmem:[%s3020_s23 + $0x1140] sm:$0xff] }
  0x7d   : > { %v694_v14 = vld [vmem:[%s3020_s23 + $0x1180] sm:$0xff]  ;;  %693 = vst [vmem:[%s3025_s30 + $0x228] sm:$0xff] %v692_v13 }
  0x7e   : > { %v696_v15 = vld [vmem:[%s3020_s23 + $0x11c0] sm:$0xff]  ;;  %695 = vst [vmem:[%s3025_s30 + $0x230] sm:$0xff] %v694_v14 }
  0x7f   : > { %697 = vst [vmem:[%s3025_s30 + $0x238] sm:$0xff] %v696_v15  ;;  %v698_v16 = vld [vmem:[%s3020_s23 + $0x1200] sm:$0xff] }
  0x80   : > { %v700_v17 = vld [vmem:[%s3020_s23 + $0x1240] sm:$0xff]  ;;  %699 = vst [vmem:[%s3025_s30 + $0x240] sm:$0xff] %v698_v16 }
  0x81   : > { %v702_v18 = vld [vmem:[%s3020_s23 + $0x1280] sm:$0xff]  ;;  %701 = vst [vmem:[%s3025_s30 + $0x248] sm:$0xff] %v700_v17 }
  0x82   : > { %703 = vst [vmem:[%s3025_s30 + $0x250] sm:$0xff] %v702_v18  ;;  %v704_v19 = vld [vmem:[%s3020_s23 + $0x12c0] sm:$0xff] }
  0x83   : > { %v706_v20 = vld [vmem:[%s3020_s23 + $0x1300] sm:$0xff]  ;;  %705 = vst [vmem:[%s3025_s30 + $0x258] sm:$0xff] %v704_v19 }
  0x84   : > { %v708_v21 = vld [vmem:[%s3020_s23 + $0x1340] sm:$0xff]  ;;  %707 = vst [vmem:[%s3025_s30 + $0x260] sm:$0xff] %v706_v20 }
  0x85   : > { %709 = vst [vmem:[%s3025_s30 + $0x268] sm:$0xff] %v708_v21  ;;  %v710_v22 = vld [vmem:[%s3020_s23 + $0x1380] sm:$0xff] }
  0x86   : > { %v712_v23 = vld [vmem:[%s3020_s23 + $0x13c0] sm:$0xff]  ;;  %711 = vst [vmem:[%s3025_s30 + $0x270] sm:$0xff] %v710_v22 }
  0x87   : > { %v714_v24 = vld [vmem:[%s3020_s23 + $0x1400] sm:$0xff]  ;;  %713 = vst [vmem:[%s3025_s30 + $0x278] sm:$0xff] %v712_v23 }
  0x88   : > { %715 = vst [vmem:[%s3025_s30 + $0x280] sm:$0xff] %v714_v24  ;;  %v716_v25 = vld [vmem:[%s3020_s23 + $0x1440] sm:$0xff] }
  0x89   : > { %v718_v26 = vld [vmem:[%s3020_s23 + $0x1480] sm:$0xff]  ;;  %717 = vst [vmem:[%s3025_s30 + $0x288] sm:$0xff] %v716_v25 }
  0x8a   : > { %v720_v27 = vld [vmem:[%s3020_s23 + $0x14c0] sm:$0xff]  ;;  %719 = vst [vmem:[%s3025_s30 + $0x290] sm:$0xff] %v718_v26 }
  0x8b   : > { %721 = vst [vmem:[%s3025_s30 + $0x298] sm:$0xff] %v720_v27  ;;  %v722_v28 = vld [vmem:[%s3020_s23 + $0x1500] sm:$0xff] }
  0x8c   : > { %v724_v29 = vld [vmem:[%s3020_s23 + $0x1540] sm:$0xff]  ;;  %723 = vst [vmem:[%s3025_s30 + $0x2a0] sm:$0xff] %v722_v28 }
  0x8d   : > { %v726_v30 = vld [vmem:[%s3020_s23 + $0x1580] sm:$0xff]  ;;  %725 = vst [vmem:[%s3025_s30 + $0x2a8] sm:$0xff] %v724_v29 }
  0x8e   : > { %727 = vst [vmem:[%s3025_s30 + $0x2b0] sm:$0xff] %v726_v30  ;;  %v728_v31 = vld [vmem:[%s3020_s23 + $0x15c0] sm:$0xff] }
  0x8f   : > { %v730_v32 = vld [vmem:[%s3020_s23 + $0x1600] sm:$0xff]  ;;  %729 = vst [vmem:[%s3025_s30 + $0x2b8] sm:$0xff] %v728_v31 }
  0x90   : > { %v732_v33 = vld [vmem:[%s3020_s23 + $0x1640] sm:$0xff]  ;;  %731 = vst [vmem:[%s3025_s30 + $0x2c0] sm:$0xff] %v730_v32 }
  0x91   : > { %733 = vst [vmem:[%s3025_s30 + $0x2c8] sm:$0xff] %v732_v33  ;;  %v734_v34 = vld [vmem:[%s3020_s23 + $0x1680] sm:$0xff] }
  0x92   : > { %v736_v35 = vld [vmem:[%s3020_s23 + $0x16c0] sm:$0xff]  ;;  %735 = vst [vmem:[%s3025_s30 + $0x2d0] sm:$0xff] %v734_v34 }
  0x93   : > { %v738_v36 = vld [vmem:[%s3020_s23 + $0x1700] sm:$0xff]  ;;  %737 = vst [vmem:[%s3025_s30 + $0x2d8] sm:$0xff] %v736_v35 }
  0x94   : > { %739 = vst [vmem:[%s3025_s30 + $0x2e0] sm:$0xff] %v738_v36  ;;  %v740_v37 = vld [vmem:[%s3020_s23 + $0x1740] sm:$0xff] }
  0x95   : > { %v742_v38 = vld [vmem:[%s3020_s23 + $0x1780] sm:$0xff]  ;;  %741 = vst [vmem:[%s3025_s30 + $0x2e8] sm:$0xff] %v740_v37 }
  0x96   : > { %v744_v39 = vld [vmem:[%s3020_s23 + $0x17c0] sm:$0xff]  ;;  %743 = vst [vmem:[%s3025_s30 + $0x2f0] sm:$0xff] %v742_v38 }
  0x97   : > { %745 = vst [vmem:[%s3025_s30 + $0x2f8] sm:$0xff] %v744_v39  ;;  %v746_v40 = vld [vmem:[%s3020_s23 + $0x1800] sm:$0xff] }
  0x98   : > { %v748_v41 = vld [vmem:[%s3020_s23 + $0x1840] sm:$0xff]  ;;  %747 = vst [vmem:[%s3025_s30 + $0x300] sm:$0xff] %v746_v40 }
  0x99   : > { %v750_v42 = vld [vmem:[%s3020_s23 + $0x1880] sm:$0xff]  ;;  %749 = vst [vmem:[%s3025_s30 + $0x308] sm:$0xff] %v748_v41 }
  0x9a   : > { %751 = vst [vmem:[%s3025_s30 + $0x310] sm:$0xff] %v750_v42  ;;  %v752_v43 = vld [vmem:[%s3020_s23 + $0x18c0] sm:$0xff] }
  0x9b   : > { %v754_v44 = vld [vmem:[%s3020_s23 + $0x1900] sm:$0xff]  ;;  %753 = vst [vmem:[%s3025_s30 + $0x318] sm:$0xff] %v752_v43 }
  0x9c   : > { %v756_v45 = vld [vmem:[%s3020_s23 + $0x1940] sm:$0xff]  ;;  %755 = vst [vmem:[%s3025_s30 + $0x320] sm:$0xff] %v754_v44 }
  0x9d   : > { %757 = vst [vmem:[%s3025_s30 + $0x328] sm:$0xff] %v756_v45  ;;  %v758_v46 = vld [vmem:[%s3020_s23 + $0x1980] sm:$0xff] }
  0x9e   : > { %v760_v47 = vld [vmem:[%s3020_s23 + $0x19c0] sm:$0xff]  ;;  %759 = vst [vmem:[%s3025_s30 + $0x330] sm:$0xff] %v758_v46 }
  0x9f   : > { %v762_v48 = vld [vmem:[%s3020_s23 + $0x1a00] sm:$0xff]  ;;  %761 = vst [vmem:[%s3025_s30 + $0x338] sm:$0xff] %v760_v47 }
  0xa0   : > { %763 = vst [vmem:[%s3025_s30 + $0x340] sm:$0xff] %v762_v48  ;;  %v764_v49 = vld [vmem:[%s3020_s23 + $0x1a40] sm:$0xff] }
  0xa1   : > { %v766_v50 = vld [vmem:[%s3020_s23 + $0x1a80] sm:$0xff]  ;;  %765 = vst [vmem:[%s3025_s30 + $0x348] sm:$0xff] %v764_v49 }
  0xa2   : > { %v768_v51 = vld [vmem:[%s3020_s23 + $0x1ac0] sm:$0xff]  ;;  %767 = vst [vmem:[%s3025_s30 + $0x350] sm:$0xff] %v766_v50 }
  0xa3   : > { %769 = vst [vmem:[%s3025_s30 + $0x358] sm:$0xff] %v768_v51  ;;  %v770_v52 = vld [vmem:[%s3020_s23 + $0x1b00] sm:$0xff] }
  0xa4   : > { %v772_v53 = vld [vmem:[%s3020_s23 + $0x1b40] sm:$0xff]  ;;  %771 = vst [vmem:[%s3025_s30 + $0x360] sm:$0xff] %v770_v52 }
  0xa5   : > { %v774_v54 = vld [vmem:[%s3020_s23 + $0x1b80] sm:$0xff]  ;;  %773 = vst [vmem:[%s3025_s30 + $0x368] sm:$0xff] %v772_v53 }
  0xa6   : > { %775 = vst [vmem:[%s3025_s30 + $0x370] sm:$0xff] %v774_v54  ;;  %v776_v55 = vld [vmem:[%s3020_s23 + $0x1bc0] sm:$0xff] }
  0xa7   : > { %v778_v56 = vld [vmem:[%s3020_s23 + $0x1c00] sm:$0xff]  ;;  %777 = vst [vmem:[%s3025_s30 + $0x378] sm:$0xff] %v776_v55 }
  0xa8   : > { %v780_v57 = vld [vmem:[%s3020_s23 + $0x1c40] sm:$0xff]  ;;  %779 = vst [vmem:[%s3025_s30 + $0x380] sm:$0xff] %v778_v56 }
  0xa9   : > { %781 = vst [vmem:[%s3025_s30 + $0x388] sm:$0xff] %v780_v57  ;;  %v782_v58 = vld [vmem:[%s3020_s23 + $0x1c80] sm:$0xff] }
  0xaa   : > { %v784_v59 = vld [vmem:[%s3020_s23 + $0x1cc0] sm:$0xff]  ;;  %783 = vst [vmem:[%s3025_s30 + $0x390] sm:$0xff] %v782_v58 }
  0xab   : > { %v786_v60 = vld [vmem:[%s3020_s23 + $0x1d00] sm:$0xff]  ;;  %785 = vst [vmem:[%s3025_s30 + $0x398] sm:$0xff] %v784_v59 }
  0xac   : > { %787 = vst [vmem:[%s3025_s30 + $0x3a0] sm:$0xff] %v786_v60  ;;  %v788_v61 = vld [vmem:[%s3020_s23 + $0x1d40] sm:$0xff] }
  0xad   : > { %v790_v62 = vld [vmem:[%s3020_s23 + $0x1d80] sm:$0xff]  ;;  %789 = vst [vmem:[%s3025_s30 + $0x3a8] sm:$0xff] %v788_v61 }
  0xae   : > { %v792_v63 = vld [vmem:[%s3020_s23 + $0x1dc0] sm:$0xff]  ;;  %791 = vst [vmem:[%s3025_s30 + $0x3b0] sm:$0xff] %v790_v62 }
  0xaf   : > { %793 = vst [vmem:[%s3025_s30 + $0x3b8] sm:$0xff] %v792_v63  ;;  %v794_v0 = vld [vmem:[%s3020_s23 + $0x1e00] sm:$0xff] }
  0xb0   : > { %v796_v1 = vld [vmem:[%s3020_s23 + $0x1e40] sm:$0xff]  ;;  %795 = vst [vmem:[%s3025_s30 + $0x3c0] sm:$0xff] %v794_v0 }
  0xb1   : > { %v798_v2 = vld [vmem:[%s3020_s23 + $0x1e80] sm:$0xff]  ;;  %797 = vst [vmem:[%s3025_s30 + $0x3c8] sm:$0xff] %v796_v1 }
  0xb2   : > { %799 = vst [vmem:[%s3025_s30 + $0x3d0] sm:$0xff] %v798_v2  ;;  %v800_v3 = vld [vmem:[%s3020_s23 + $0x1ec0] sm:$0xff] }
  0xb3   : > { %v802_v4 = vld [vmem:[%s3020_s23 + $0x1f00] sm:$0xff]  ;;  %801 = vst [vmem:[%s3025_s30 + $0x3d8] sm:$0xff] %v800_v3 }
  0xb4   : > { %v804_v5 = vld [vmem:[%s3020_s23 + $0x1f40] sm:$0xff]  ;;  %803 = vst [vmem:[%s3025_s30 + $0x3e0] sm:$0xff] %v802_v4 }
  0xb5   : > { %805 = vst [vmem:[%s3025_s30 + $0x3e8] sm:$0xff] %v804_v5  ;;  %v806_v6 = vld [vmem:[%s3020_s23 + $0x1f80] sm:$0xff] }
  0xb6   : > { %v808_v7 = vld [vmem:[%s3020_s23 + $0x1fc0] sm:$0xff]  ;;  %807 = vst [vmem:[%s3025_s30 + $0x3f0] sm:$0xff] %v806_v6 }
  0xb7   : > { %809 = vst [vmem:[%s3025_s30 + $0x3f8] sm:$0xff] %v808_v7 }
  0xb8 PF: > { %823 = sbr.rel (!%p2996_p11) target bundleno = 191 (0xbf), region = 85  ;;  %s825_s0 = sand.u32 (%p2996_p11), 1, %s2827_s19  }
  0xb9   : > { %s2480_s11 = sshll.u32 (%p2996_p11), %s2859_s27, 3  ;;  %s2321_s14 = sshll.u32 (%p2996_p11), %s825_s0, 4 }
  0xba   : > { %s833_s9 = scalar_lea.vmem (%p2996_p11), %s3525_s3, %s2480_s11  ;;  %s827_s10 = scalar_lea.vmem (%p2996_p11), [#allocation5], %s2321_s14 }
  0xbb   : > { %v863_v8 = vld [vmem:[%s833_s9] sm:$0xff] (%p2996_p11) }
  0xbc   : > { %v865_v9 = vld [vmem:[%s833_s9 + $0x40] sm:$0xff] (%p2996_p11)  ;;  %864 = vst [vmem:[%s827_s10] sm:$0xff] (%p2996_p11), %v863_v8 }
  0xbd   : > { %866 = vst [vmem:[%s827_s10 + $0x8] sm:$0xff] (%p2996_p11), %v865_v9 }
  0xbf PF: > { %p2324_p1 = scmp.ge.s32.totalorder %s2863_s28, 1  ;;  %p871_p2 = scmp.lt.s32.totalorder %s2863_s28, 17 }
  0xc1   : > { %p872_p3 = pnand %p2324_p1, %p871_p2 }
  0xc2   : > { %s878_s23 = sand.u32 (!%p872_p3), 1, %s2839_s22   ;;  %s885_s7 = sand.u32 (!%p872_p3), 1, %s2831_s20  }
  0xc3   : > { %875 = sbr.rel (%p872_p3) target bundleno = 595 (0x253), region = 123  ;;  %s2325_s12 = sshll.u32 (!%p872_p3), %s878_s23, 6 }
  0xc4   : > { %s2326_s13 = sshll.u32 (!%p872_p3), %s885_s7, 10  ;;  %s892_s15 = sand.u32 (!%p872_p3), 1, %s2823_s18  }
  0xc5   : > { %s2329_s30 = sshll.u32 (!%p872_p3), %s2851_s25, 1  ;;  %s3293_s0 = sshll.u32 (!%p872_p3), %s892_s15, 4 }
  0xc6   : > { %p944_p4 = scmp.lt.s32.totalorder (!%p872_p3), %s2329_s30, 15  ;;  %s3307_s18 = scalar_lea.vmem (!%p872_p3), [#allocation3], %s2325_s12 }
  0xc7   : > { %s3309_s10 = scalar_lea.vmem (!%p872_p3), [#allocation4], %s2326_s13  ;;  %s894_s23 = scalar_lea.vmem (!%p872_p3), [#allocation5], %s3293_s0 }
  0xc8   : > { %s3313_s7 = scalar_lea.vmem (!%p872_p3), [#allocation6], %s3293_s0  ;;  %p2332_p5 = scmp.ne.s32.totalorder (!%p872_p3), %s2847_s24, 0 }
  0xca   : > { %s3560_s30 = smov (!%p944_p4, %s2329_s30), 15  ;;  %965 = sbr.rel (%p2332_p5) target bundleno = 209 (0xd1), region = 139 }
  0xcb   : > { %s946_s29 = scalar_lea.vmem %s3524_s2, %s3560_s30  ;;  %s2331_s6 = sshll.u32 %s3560_s30, 1  ;;  %v2865_v10 = vmov (!%p2332_p5), 0.0  }
  0xcc   : > { %s3305_s9 = scalar_lea.vmem %s3527_s5, %s2331_s6  ;;  %966 = vst [vmem:[#allocation2] sm:$0xff] (!%p2332_p5), %v2865_v10  ;;  %967 = vst [vmem:[#allocation2 + $0x8] sm:$0xff] (!%p2332_p5), %v2865_v10 }
  0xcd   : > { %968 = vst [vmem:[#allocation2 + $0x10] sm:$0xff] (!%p2332_p5), %v2865_v10  ;;  %969 = vst [vmem:[#allocation2 + $0x18] sm:$0xff] (!%p2332_p5), %v2865_v10 }
  0xd1 PF: > { %v2585_v11 = vld [vmem:[%s3309_s10 + $0x4] ss:$8 sps:$4 sm:$0xff]   ;;  %v2589_v13 = vld [vmem:[%s3309_s10] ss:$8 sps:$4 sm:$0xff]   ;;  %v2591_v15 = vld [vmem:[%s3309_s10 + $0x14] ss:$8 sps:$4 sm:$0xff]  }
  0xd2   : > { %v2587_v12 = vld [vmem:[%s3309_s10 + $0x204] ss:$8 sps:$4 sm:$0xff]   ;;  %1790 = vmatprep.subr.bf16.mxu1 %v2585_v11  ;;  %v2590_v14 = vld [vmem:[%s3309_s10 + $0x200] ss:$8 sps:$4 sm:$0xff]   ;;  %v2593_v16 = vld [vmem:[%s3309_s10 + $0x214] ss:$8 sps:$4 sm:$0xff]  }
  0xd3   : > { %1876 = vmatprep.subr.bf16.mxu0 %v2587_v12  ;;  %1791 = vmatpush1.bf16.msra.mxu1 %v2589_v13  ;;  %v2595_v17 = vld [vmem:[%s3309_s10 + $0x10] ss:$8 sps:$4 sm:$0xff]   ;;  %v2597_v19 = vld [vmem:[%s3309_s10 + $0x24] ss:$8 sps:$4 sm:$0xff]   ;;  %v2601_v21 = vld [vmem:[%s3309_s10 + $0x20] ss:$8 sps:$4 sm:$0xff]  }
  0xd4   : > { %1877 = vmatpush1.bf16.msra.mxu0 %v2590_v14  ;;  %1792 = vmatprep.subr.bf16.mxu1 %v2591_v15  ;;  %v2596_v18 = vld [vmem:[%s3309_s10 + $0x210] ss:$8 sps:$4 sm:$0xff]   ;;  %v2599_v20 = vld [vmem:[%s3309_s10 + $0x224] ss:$8 sps:$4 sm:$0xff]   ;;  %v2602_v22 = vld [vmem:[%s3309_s10 + $0x220] ss:$8 sps:$4 sm:$0xff]  }
  0xd5   : > { %1878 = vmatprep.subr.bf16.mxu0 %v2593_v16  ;;  %v2603_v23 = vld [vmem:[%s3309_s10 + $0x34] ss:$8 sps:$4 sm:$0xff]   ;;  %v2607_v25 = vld [vmem:[%s3309_s10 + $0x30] ss:$8 sps:$4 sm:$0xff]   ;;  %v2609_v27 = vld [vmem:[%s3309_s10 + $0x44] ss:$8 sps:$4 sm:$0xff]  }
  0xd6   : > { %v2605_v24 = vld [vmem:[%s3309_s10 + $0x234] ss:$8 sps:$4 sm:$0xff]   ;;  %v2608_v26 = vld [vmem:[%s3309_s10 + $0x230] ss:$8 sps:$4 sm:$0xff]   ;;  %v2611_v28 = vld [vmem:[%s3309_s10 + $0x244] ss:$8 sps:$4 sm:$0xff]  }
  0xd7   : > { %1793 = vmatpush1.bf16.msra.mxu1 %v2595_v17  ;;  %v2613_v29 = vld [vmem:[%s3309_s10 + $0x40] ss:$8 sps:$4 sm:$0xff]   ;;  %v2615_v31 = vld [vmem:[%s3309_s10 + $0x54] ss:$8 sps:$4 sm:$0xff]   ;;  %v2619_v33 = vld [vmem:[%s3309_s10 + $0x50] ss:$8 sps:$4 sm:$0xff]  }
  0xd8   : > { %1879 = vmatpush1.bf16.msra.mxu0 %v2596_v18  ;;  %1794 = vmatprep.subr.bf16.mxu1 %v2597_v19  ;;  %v2614_v30 = vld [vmem:[%s3309_s10 + $0x240] ss:$8 sps:$4 sm:$0xff]   ;;  %v2617_v32 = vld [vmem:[%s3309_s10 + $0x254] ss:$8 sps:$4 sm:$0xff]   ;;  %v2620_v34 = vld [vmem:[%s3309_s10 + $0x250] ss:$8 sps:$4 sm:$0xff]  }
  0xd9   : > { %1880 = vmatprep.subr.bf16.mxu0 %v2599_v20  ;;  %v2621_v35 = vld [vmem:[%s3309_s10 + $0x64] ss:$8 sps:$4 sm:$0xff]   ;;  %v2625_v37 = vld [vmem:[%s3309_s10 + $0x60] ss:$8 sps:$4 sm:$0xff]   ;;  %v2627_v39 = vld [vmem:[%s3309_s10 + $0x74] ss:$8 sps:$4 sm:$0xff]  }
  0xda   : > { %v2623_v36 = vld [vmem:[%s3309_s10 + $0x264] ss:$8 sps:$4 sm:$0xff]   ;;  %v2626_v38 = vld [vmem:[%s3309_s10 + $0x260] ss:$8 sps:$4 sm:$0xff]   ;;  %v2629_v40 = vld [vmem:[%s3309_s10 + $0x274] ss:$8 sps:$4 sm:$0xff]  }
  0xdb   : > { %1795 = vmatpush1.bf16.msra.mxu1 %v2601_v21  ;;  %v2631_v41 = vld [vmem:[%s3309_s10 + $0x70] ss:$8 sps:$4 sm:$0xff]   ;;  %v2633_v43 = vld [vmem:[%s3309_s10 + $0x84] ss:$8 sps:$4 sm:$0xff]   ;;  %v2637_v45 = vld [vmem:[%s3309_s10 + $0x80] ss:$8 sps:$4 sm:$0xff]  }
  0xdc   : > { %1881 = vmatpush1.bf16.msra.mxu0 %v2602_v22  ;;  %1796 = vmatprep.subr.bf16.mxu1 %v2603_v23  ;;  %v2632_v42 = vld [vmem:[%s3309_s10 + $0x270] ss:$8 sps:$4 sm:$0xff]   ;;  %v2635_v44 = vld [vmem:[%s3309_s10 + $0x284] ss:$8 sps:$4 sm:$0xff]   ;;  %v2638_v46 = vld [vmem:[%s3309_s10 + $0x280] ss:$8 sps:$4 sm:$0xff]  }
  0xdd   : > { %1882 = vmatprep.subr.bf16.mxu0 %v2605_v24  ;;  %v2639_v47 = vld [vmem:[%s3309_s10 + $0x94] ss:$8 sps:$4 sm:$0xff]   ;;  %v2643_v49 = vld [vmem:[%s3309_s10 + $0x90] ss:$8 sps:$4 sm:$0xff]   ;;  %v2645_v51 = vld [vmem:[%s3309_s10 + $0xa4] ss:$8 sps:$4 sm:$0xff]  }
  0xde   : > { %v2641_v48 = vld [vmem:[%s3309_s10 + $0x294] ss:$8 sps:$4 sm:$0xff]   ;;  %v2644_v50 = vld [vmem:[%s3309_s10 + $0x290] ss:$8 sps:$4 sm:$0xff]   ;;  %v2647_v52 = vld [vmem:[%s3309_s10 + $0x2a4] ss:$8 sps:$4 sm:$0xff]  }
  0xdf   : > { %1797 = vmatpush1.bf16.msra.mxu1 %v2607_v25  ;;  %v2649_v53 = vld [vmem:[%s3309_s10 + $0xa0] ss:$8 sps:$4 sm:$0xff]   ;;  %v2651_v55 = vld [vmem:[%s3309_s10 + $0xb4] ss:$8 sps:$4 sm:$0xff]   ;;  %v2655_v57 = vld [vmem:[%s3309_s10 + $0xb0] ss:$8 sps:$4 sm:$0xff]  }
  0xe0   : > { %1883 = vmatpush1.bf16.msra.mxu0 %v2608_v26  ;;  %1798 = vmatprep.subr.bf16.mxu1 %v2609_v27  ;;  %v2650_v54 = vld [vmem:[%s3309_s10 + $0x2a0] ss:$8 sps:$4 sm:$0xff]   ;;  %v2653_v56 = vld [vmem:[%s3309_s10 + $0x2b4] ss:$8 sps:$4 sm:$0xff]   ;;  %v2656_v58 = vld [vmem:[%s3309_s10 + $0x2b0] ss:$8 sps:$4 sm:$0xff]  }
  0xe1   : > { %1884 = vmatprep.subr.bf16.mxu0 %v2611_v28  ;;  %v974_v59 = vld [vmem:[%s3307_s18] sm:$0xff]  ;;  %v976_v0 = vld [vmem:[%s3307_s18 + $0x10] sm:$0xff]  ;;  %p2469_p6 = scmp.ne.s32.totalorder %s2847_s24, 1 }
  0xe2   : > { %v978_v60 = vld [vmem:[%s3307_s18 + $0x20] sm:$0xff]  ;;  %v980_v1 = vld [vmem:[%s3307_s18 + $0x30] sm:$0xff]  ;;  %vm2067_vm0 = vcmask (!%p2469_p6), 1040384  }
  0xe3   : > { %1799 = vmatpush1.bf16.msra.mxu1 %v2613_v29  ;;  %v2657_v61 = vld [vmem:[%s3309_s10 + $0xc4] ss:$8 sps:$4 sm:$0xff]   ;;  %v2334_v63 = vcombine.high %v974_v59, %v978_v60  ;;  %v2338_v2 = vcombine.high %v976_v0, %v980_v1  ;;  %v2661_v3 = vld [vmem:[%s3309_s10 + $0xc0] ss:$8 sps:$4 sm:$0xff]   ;;  %v2663_v5 = vld [vmem:[%s3309_s10 + $0xd4] ss:$8 sps:$4 sm:$0xff]   ;;  %v2333_v19 = vcombine.low %v974_v59, %v978_v60  ;;  %v2337_v21 = vcombine.low %v976_v0, %v980_v1 }
  0xe4   : > { %1885 = vmatpush1.bf16.msra.mxu0 %v2614_v30  ;;  %1800 = vmatprep.subr.bf16.mxu1 %v2615_v31  ;;  %v2659_v62 = vld [vmem:[%s3309_s10 + $0x2c4] ss:$8 sps:$4 sm:$0xff]   ;;  %v2662_v4 = vld [vmem:[%s3309_s10 + $0x2c0] ss:$8 sps:$4 sm:$0xff]   ;;  %v2665_v6 = vld [vmem:[%s3309_s10 + $0x2d4] ss:$8 sps:$4 sm:$0xff]  }
  0xe5   : > { %1886 = vmatprep.subr.bf16.mxu0 %v2617_v32  ;;  %1822 = vmatprep.mubr.bf16.mxu1 %v2334_v63  ;;  %v2667_v7 = vld [vmem:[%s3309_s10 + $0xd0] ss:$8 sps:$4 sm:$0xff]   ;;  %v2669_v9 = vld [vmem:[%s3309_s10 + $0xe4] ss:$8 sps:$4 sm:$0xff]   ;;  %v2673_v11 = vld [vmem:[%s3309_s10 + $0xe0] ss:$8 sps:$4 sm:$0xff]  }
  0xe6   : > { %1908 = vmatprep.mubr.bf16.mxu0 %v2338_v2  ;;  %v2668_v8 = vld [vmem:[%s3309_s10 + $0x2d0] ss:$8 sps:$4 sm:$0xff]   ;;  %v2671_v10 = vld [vmem:[%s3309_s10 + $0x2e4] ss:$8 sps:$4 sm:$0xff]   ;;  %v2674_v12 = vld [vmem:[%s3309_s10 + $0x2e0] ss:$8 sps:$4 sm:$0xff]  }
  0xe7   : > { %1801 = vmatpush1.bf16.msra.mxu1 %v2619_v33  ;;  %v2675_v13 = vld [vmem:[%s3309_s10 + $0xf4] ss:$8 sps:$4 sm:$0xff]   ;;  %v2679_v15 = vld [vmem:[%s3309_s10 + $0xf0] ss:$8 sps:$4 sm:$0xff]   ;;  %v2683_v17 = vld [vmem:[%s3309_s10 + $0x104] ss:$8 sps:$4 sm:$0xff]  }
  0xe8   : > { %1887 = vmatpush1.bf16.msra.mxu0 %v2620_v34  ;;  %1802 = vmatprep.subr.bf16.mxu1 %v2621_v35  ;;  %v2677_v14 = vld [vmem:[%s3309_s10 + $0x2f4] ss:$8 sps:$4 sm:$0xff]   ;;  %v2680_v16 = vld [vmem:[%s3309_s10 + $0x2f0] ss:$8 sps:$4 sm:$0xff]   ;;  %v2686_v18 = vld [vmem:[%s3309_s10 + $0x304] ss:$8 sps:$4 sm:$0xff]  }
  0xe9   : > { %1888 = vmatprep.subr.bf16.mxu0 %v2623_v36  ;;  %v2681_v20 = vld [vmem:[%s3309_s10 + $0x100] ss:$8 sps:$4 sm:$0xff]   ;;  %v2689_v23 = vld [vmem:[%s3309_s10 + $0x114] ss:$8 sps:$4 sm:$0xff]   ;;  %v2687_v25 = vld [vmem:[%s3309_s10 + $0x110] ss:$8 sps:$4 sm:$0xff]  }
  0xea   : > { %v2684_v22 = vld [vmem:[%s3309_s10 + $0x300] ss:$8 sps:$4 sm:$0xff]   ;;  %v2692_v24 = vld [vmem:[%s3309_s10 + $0x314] ss:$8 sps:$4 sm:$0xff]   ;;  %v2690_v26 = vld [vmem:[%s3309_s10 + $0x310] ss:$8 sps:$4 sm:$0xff]  }
  0xeb   : > { %1803 = vmatpush1.bf16.msra.mxu1 %v2625_v37  ;;  %v2695_v27 = vld [vmem:[%s3309_s10 + $0x124] ss:$8 sps:$4 sm:$0xff]   ;;  %v2693_v29 = vld [vmem:[%s3309_s10 + $0x120] ss:$8 sps:$4 sm:$0xff]   ;;  %v2701_v31 = vld [vmem:[%s3309_s10 + $0x134] ss:$8 sps:$4 sm:$0xff]  }
  0xec   : > { %1889 = vmatpush1.bf16.msra.mxu0 %v2626_v38  ;;  %1804 = vmatprep.subr.bf16.mxu1 %v2627_v39  ;;  %v2698_v28 = vld [vmem:[%s3309_s10 + $0x324] ss:$8 sps:$4 sm:$0xff]   ;;  %v2696_v30 = vld [vmem:[%s3309_s10 + $0x320] ss:$8 sps:$4 sm:$0xff]   ;;  %v2704_v32 = vld [vmem:[%s3309_s10 + $0x334] ss:$8 sps:$4 sm:$0xff]  }
  0xed   : > { %1890 = vmatprep.subr.bf16.mxu0 %v2629_v40  ;;  %v2699_v33 = vld [vmem:[%s3309_s10 + $0x130] ss:$8 sps:$4 sm:$0xff]   ;;  %v2707_v35 = vld [vmem:[%s3309_s10 + $0x144] ss:$8 sps:$4 sm:$0xff]   ;;  %v2705_v37 = vld [vmem:[%s3309_s10 + $0x140] ss:$8 sps:$4 sm:$0xff]  }
  0xee   : > { %v2702_v34 = vld [vmem:[%s3309_s10 + $0x330] ss:$8 sps:$4 sm:$0xff]   ;;  %v2710_v36 = vld [vmem:[%s3309_s10 + $0x344] ss:$8 sps:$4 sm:$0xff]   ;;  %v2708_v38 = vld [vmem:[%s3309_s10 + $0x340] ss:$8 sps:$4 sm:$0xff]  }
  0xef   : > { %1805 = vmatpush1.bf16.msra.mxu1 %v2631_v41  ;;  %v2713_v39 = vld [vmem:[%s3309_s10 + $0x154] ss:$8 sps:$4 sm:$0xff]   ;;  %v2711_v41 = vld [vmem:[%s3309_s10 + $0x150] ss:$8 sps:$4 sm:$0xff]   ;;  %v2729_v59 = vld [vmem:[%s3309_s10 + $0x180] ss:$8 sps:$4 sm:$0xff]  }
  0xf0   : > { %1891 = vmatpush1.bf16.msra.mxu0 %v2632_v42  ;;  %1806 = vmatprep.subr.bf16.mxu1 %v2633_v43  ;;  %v2716_v40 = vld [vmem:[%s3309_s10 + $0x354] ss:$8 sps:$4 sm:$0xff]   ;;  %v2714_v42 = vld [vmem:[%s3309_s10 + $0x350] ss:$8 sps:$4 sm:$0xff]   ;;  %v2719_v43 = vld [vmem:[%s3309_s10 + $0x164] ss:$8 sps:$4 sm:$0xff]  }
  0xf1   : > { %1892 = vmatprep.subr.bf16.mxu0 %v2635_v44  ;;  %v2722_v44 = vld [vmem:[%s3309_s10 + $0x364] ss:$8 sps:$4 sm:$0xff]   ;;  %v2732_v60 = vld [vmem:[%s3309_s10 + $0x380] ss:$8 sps:$4 sm:$0xff]   ;;  %v2735_v63 = vld [vmem:[%s3309_s10 + $0x190] ss:$8 sps:$4 sm:$0xff]  }
  0xf2   : > { %v2738_v0 = vld [vmem:[%s3309_s10 + $0x390] ss:$8 sps:$4 sm:$0xff]   ;;  %v2743_v1 = vld [vmem:[%s3309_s10 + $0x1a4] ss:$8 sps:$4 sm:$0xff]  }
  0xf3   : > { %1807 = vmatpush1.bf16.msra.mxu1 %v2637_v45  ;;  %v3411_v45 = vld [vmem:[%s3307_s18 + $0x8] sm:$0xff] }
  0xf4   : > { %1893 = vmatpush1.bf16.msra.mxu0 %v2638_v46  ;;  %1808 = vmatprep.subr.bf16.mxu1 %v2639_v47  ;;  %v3414_v46 = vld [vmem:[%s3307_s18 + $0x28] sm:$0xff]  ;;  %v3417_v47 = vld [vmem:[%s3307_s18 + $0x18] sm:$0xff] }
  0xf5   : > { %1894 = vmatprep.subr.bf16.mxu0 %v2641_v48  ;;  %v3420_v48 = vld [vmem:[%s3307_s18 + $0x38] sm:$0xff]  ;;  %v2746_v2 = vld [vmem:[%s3309_s10 + $0x3a4] ss:$8 sps:$4 sm:$0xff]  }
  0xf7   : > { %1809 = vmatpush1.bf16.msra.mxu1 %v2643_v49  ;;  %v2717_v49 = vld [vmem:[%s3309_s10 + $0x160] ss:$8 sps:$4 sm:$0xff]  }
  0xf8   : > { %1895 = vmatpush1.bf16.msra.mxu0 %v2644_v50  ;;  %1810 = vmatprep.subr.bf16.mxu1 %v2645_v51  ;;  %v2720_v50 = vld [vmem:[%s3309_s10 + $0x360] ss:$8 sps:$4 sm:$0xff]   ;;  %v2336_v51 = vcombine.high %v3411_v45, %v3414_v46 }
  0xf9   : > { %1896 = vmatprep.subr.bf16.mxu0 %v2647_v52  ;;  %v2725_v52 = vld [vmem:[%s3309_s10 + $0x174] ss:$8 sps:$4 sm:$0xff]  }
  0xfb   : > { %1811 = vmatpush1.bf16.msra.mxu1 %v2649_v53  ;;  %v2728_v53 = vld [vmem:[%s3309_s10 + $0x374] ss:$8 sps:$4 sm:$0xff]  }
  0xfc   : > { %1897 = vmatpush1.bf16.msra.mxu0 %v2650_v54  ;;  %1812 = vmatprep.subr.bf16.mxu1 %v2651_v55  ;;  %v2340_v54 = vcombine.high %v3417_v47, %v3420_v48  ;;  %v2723_v55 = vld [vmem:[%s3309_s10 + $0x170] ss:$8 sps:$4 sm:$0xff]  }
  0xfd   : > { %1898 = vmatprep.subr.bf16.mxu0 %v2653_v56  ;;  %v2726_v56 = vld [vmem:[%s3309_s10 + $0x370] ss:$8 sps:$4 sm:$0xff]  }
  0xff   : > { %1813 = vmatpush1.bf16.msra.mxu1 %v2655_v57  ;;  %v2731_v57 = vld [vmem:[%s3309_s10 + $0x184] ss:$8 sps:$4 sm:$0xff]  }
 0x100   : > { %1899 = vmatpush1.bf16.msra.mxu0 %v2656_v58  ;;  %1814 = vmatprep.subr.bf16.mxu1 %v2657_v61  ;;  %v2734_v58 = vld [vmem:[%s3309_s10 + $0x384] ss:$8 sps:$4 sm:$0xff]   ;;  %v2737_v61 = vld [vmem:[%s3309_s10 + $0x194] ss:$8 sps:$4 sm:$0xff]  }
 0x101   : > { %1900 = vmatprep.subr.bf16.mxu0 %v2659_v62  ;;  %v2740_v62 = vld [vmem:[%s3309_s10 + $0x394] ss:$8 sps:$4 sm:$0xff]  }
 0x103   : > { %1815 = vmatpush1.bf16.msra.mxu1 %v2661_v3  ;;  %v2741_v3 = vld [vmem:[%s3309_s10 + $0x1a0] ss:$8 sps:$4 sm:$0xff]  }
 0x104   : > { %1901 = vmatpush1.bf16.msra.mxu0 %v2662_v4  ;;  %1816 = vmatprep.subr.bf16.mxu1 %v2663_v5  ;;  %v2744_v4 = vld [vmem:[%s3309_s10 + $0x3a0] ss:$8 sps:$4 sm:$0xff]   ;;  %v2749_v5 = vld [vmem:[%s3309_s10 + $0x1b4] ss:$8 sps:$4 sm:$0xff]  }
 0x105   : > { %1902 = vmatprep.subr.bf16.mxu0 %v2665_v6  ;;  %v2752_v6 = vld [vmem:[%s3309_s10 + $0x3b4] ss:$8 sps:$4 sm:$0xff]  }
 0x107   : > { %1817 = vmatpush1.bf16.msra.mxu1 %v2667_v7  ;;  %v2747_v7 = vld [vmem:[%s3309_s10 + $0x1b0] ss:$8 sps:$4 sm:$0xff]  }
 0x108   : > { %1903 = vmatpush1.bf16.msra.mxu0 %v2668_v8  ;;  %1818 = vmatprep.subr.bf16.mxu1 %v2669_v9  ;;  %v2750_v8 = vld [vmem:[%s3309_s10 + $0x3b0] ss:$8 sps:$4 sm:$0xff]   ;;  %v2755_v9 = vld [vmem:[%s3309_s10 + $0x1c4] ss:$8 sps:$4 sm:$0xff]  }
 0x109   : > { %1904 = vmatprep.subr.bf16.mxu0 %v2671_v10  ;;  %v2758_v10 = vld [vmem:[%s3309_s10 + $0x3c4] ss:$8 sps:$4 sm:$0xff]  }
 0x10b   : > { %1819 = vmatpush1.bf16.msra.mxu1 %v2673_v11  ;;  %v2753_v11 = vld [vmem:[%s3309_s10 + $0x1c0] ss:$8 sps:$4 sm:$0xff]  }
 0x10c   : > { %1905 = vmatpush1.bf16.msra.mxu0 %v2674_v12  ;;  %1820 = vmatprep.subr.bf16.mxu1 %v2675_v13  ;;  %v2756_v12 = vld [vmem:[%s3309_s10 + $0x3c0] ss:$8 sps:$4 sm:$0xff]   ;;  %v2761_v13 = vld [vmem:[%s3309_s10 + $0x1d4] ss:$8 sps:$4 sm:$0xff]  }
 0x10d   : > { %1906 = vmatprep.subr.bf16.mxu0 %v2677_v14  ;;  %v2764_v14 = vld [vmem:[%s3309_s10 + $0x3d4] ss:$8 sps:$4 sm:$0xff]  }
 0x10f   : > { %1821 = vmatpush1.bf16.msra.mxu1 %v2679_v15  ;;  %v2759_v15 = vld [vmem:[%s3309_s10 + $0x1d0] ss:$8 sps:$4 sm:$0xff]  }
 0x110   : > { %1907 = vmatpush1.bf16.msra.mxu0 %v2680_v16  ;;  %1833 = vmatprep.subr.bf16.mxu1 %v2683_v17  ;;  %v2762_v16 = vld [vmem:[%s3309_s10 + $0x3d0] ss:$8 sps:$4 sm:$0xff]   ;;  %v2767_v17 = vld [vmem:[%s3309_s10 + $0x1e4] ss:$8 sps:$4 sm:$0xff]  }
 0x111   : > { %1919 = vmatprep.subr.bf16.mxu0 %v2686_v18  ;;  %v2770_v18 = vld [vmem:[%s3309_s10 + $0x3e4] ss:$8 sps:$4 sm:$0xff]  }
 0x112   : > { %1823 = vmatmul.mubr.bf16.vlgmr.msra.gmra.mrb[0].mxu1 %v2333_v19  ;;  %v2765_v19 = vld [vmem:[%s3309_s10 + $0x1e0] ss:$8 sps:$4 sm:$0xff]  }
 0x113   : > { %1909 = vmatmul.mubr.bf16.vlgmr.msra.gmra.mrb[0].mxu0 %v2337_v21  ;;  %1834 = vmatpush1.bf16.msra.mxu1 %v2681_v20  ;;  %v2768_v20 = vld [vmem:[%s3309_s10 + $0x3e0] ss:$8 sps:$4 sm:$0xff]   ;;  %v2773_v21 = vld [vmem:[%s3309_s10 + $0x1f4] ss:$8 sps:$4 sm:$0xff]  }
 0x114   : > { %1920 = vmatpush1.bf16.msra.mxu0 %v2684_v22  ;;  %1835 = vmatprep.subr.bf16.mxu1 %v2689_v23  ;;  %v2776_v22 = vld [vmem:[%s3309_s10 + $0x3f4] ss:$8 sps:$4 sm:$0xff]   ;;  %v2771_v23 = vld [vmem:[%s3309_s10 + $0x1f0] ss:$8 sps:$4 sm:$0xff]  }
 0x115   : > { %1921 = vmatprep.subr.bf16.mxu0 %v2692_v24  ;;  %1865 = vmatprep.mubr.bf16.mxu1 %v2336_v51  ;;  %v2774_v24 = vld [vmem:[%s3309_s10 + $0x3f0] ss:$8 sps:$4 sm:$0xff]  }
 0x116   : > { %1951 = vmatprep.mubr.bf16.mxu0 %v2340_v54  ;;  %v1999_v54 = vld [vmem:[%s894_s23 + $0x8] sm:$0xff] (!%p2469_p6) }
 0x117   : > { %1836 = vmatpush1.bf16.msra.mxu1 %v2687_v25  ;;  %v2335_v25 = vcombine.low %v3411_v45, %v3414_v46 }
 0x118   : > { %1922 = vmatpush1.bf16.msra.mxu0 %v2690_v26  ;;  %1837 = vmatprep.subr.bf16.mxu1 %v2695_v27  ;;  %v2339_v26 = vcombine.low %v3417_v47, %v3420_v48  ;;  %v1980_v47 = vlaneseq (!%p2469_p6) }
 0x119   : > { %1923 = vmatprep.subr.bf16.mxu0 %v2698_v28  ;;  %v970_v28 = vld [vmem:[#allocation2] sm:$0xff] }
 0x11a   : > { %v1981_v48 = vshrl.u32 (!%p2469_p6), %v1980_v47, 7 }
 0x11b   : > { %1838 = vmatpush1.bf16.msra.mxu1 %v2693_v29 }
 0x11c   : > { %1924 = vmatpush1.bf16.msra.mxu0 %v2696_v30  ;;  %1839 = vmatprep.subr.bf16.mxu1 %v2701_v31  ;;  %v1982_v51 = vsub.s32 (!%p2469_p6), 0, %v1981_v48 }
 0x11d   : > { %1925 = vmatprep.subr.bf16.mxu0 %v2704_v32  ;;  %v971_v32 = vld [vmem:[#allocation2 + $0x8] sm:$0xff] }
 0x11f   : > { %1840 = vmatpush1.bf16.msra.mxu1 %v2699_v33 }
 0x120   : > { %1926 = vmatpush1.bf16.msra.mxu0 %v2702_v34  ;;  %1841 = vmatprep.subr.bf16.mxu1 %v2707_v35 }
 0x121   : > { %1927 = vmatprep.subr.bf16.mxu0 %v2710_v36  ;;  %v972_v36 = vld [vmem:[#allocation2 + $0x10] sm:$0xff] }
 0x123   : > { %1842 = vmatpush1.bf16.msra.mxu1 %v2705_v37 }
 0x124   : > { %1928 = vmatpush1.bf16.msra.mxu0 %v2708_v38  ;;  %1843 = vmatprep.subr.bf16.mxu1 %v2713_v39 }
 0x125   : > { %1929 = vmatprep.subr.bf16.mxu0 %v2716_v40 }
 0x127   : > { %1844 = vmatpush1.bf16.msra.mxu1 %v2711_v41  ;;  %v973_v41 = vld [vmem:[#allocation2 + $0x18] sm:$0xff] }
 0x128   : > { %1930 = vmatpush1.bf16.msra.mxu0 %v2714_v42  ;;  %1845 = vmatprep.subr.bf16.mxu1 %v2719_v43 }
 0x129   : > { %1931 = vmatprep.subr.bf16.mxu0 %v2722_v44 }
 0x12b   : > { %1846 = vmatpush1.bf16.msra.mxu1 %v2717_v49  ;;  %v1978_v49 = vld [vmem:[%s946_s29] sm:$0x3] (!%p2469_p6) }
 0x12c   : > { %1932 = vmatpush1.bf16.msra.mxu0 %v2720_v50  ;;  %1847 = vmatprep.subr.bf16.mxu1 %v2725_v52  ;;  %v1986_v52 = vsub.s32 (!%p2469_p6), 1, %v1981_v48 }
 0x12d   : > { %1933 = vmatprep.subr.bf16.mxu0 %v2728_v53  ;;  %v1998_v53 = vld [vmem:[%s894_s23] sm:$0xff] (!%p2469_p6) }
 0x12f   : > { %1848 = vmatpush1.bf16.msra.mxu1 %v2723_v55 }
 0x130   : > { %1934 = vmatpush1.bf16.msra.mxu0 %v2726_v56  ;;  %1849 = vmatprep.subr.bf16.mxu1 %v2731_v57 }
 0x131   : > { %1935 = vmatprep.subr.bf16.mxu0 %v2734_v58  ;;  %v1983_v58 = vrot.slane (!%p2469_p6), %v1978_v49, %v1982_v51 }
 0x133   : > { %1850 = vmatpush1.bf16.msra.mxu1 %v2729_v59  ;;  %v1987_v59 = vrot.slane (!%p2469_p6), %v1978_v49, %v1986_v52 }
 0x134   : > { %1936 = vmatpush1.bf16.msra.mxu0 %v2732_v60  ;;  %1851 = vmatprep.subr.bf16.mxu1 %v2737_v61  ;;  %v2000_v60 = vunpack.c.l.bf16 (!%p2469_p6), %v1998_v53  ;;  %v2001_v61 = vunpack.c.h.bf16 (!%p2469_p6), %v1998_v53 }
 0x135   : > { %1937 = vmatprep.subr.bf16.mxu0 %v2740_v62  ;;  %v2002_v62 = vunpack.c.l.bf16 (!%p2469_p6), %v1999_v54 }
 0x137   : > { %1852 = vmatpush1.bf16.msra.mxu1 %v2735_v63  ;;  %v2003_v63 = vunpack.c.h.bf16 (!%p2469_p6), %v1999_v54 }
 0x138   : > { %1938 = vmatpush1.bf16.msra.mxu0 %v2738_v0  ;;  %1853 = vmatprep.subr.bf16.mxu1 %v2743_v1 }
 0x139   : > { %1939 = vmatprep.subr.bf16.mxu0 %v2746_v2 }
 0x13b   : > { %1854 = vmatpush1.bf16.msra.mxu1 %v2741_v3 }
 0x13c   : > { %1940 = vmatpush1.bf16.msra.mxu0 %v2744_v4  ;;  %1855 = vmatprep.subr.bf16.mxu1 %v2749_v5 }
 0x13d   : > { %1941 = vmatprep.subr.bf16.mxu0 %v2752_v6 }
 0x13f   : > { %1856 = vmatpush1.bf16.msra.mxu1 %v2747_v7 }
 0x140   : > { %1942 = vmatpush1.bf16.msra.mxu0 %v2750_v8  ;;  %1857 = vmatprep.subr.bf16.mxu1 %v2755_v9 }
 0x141   : > { %1943 = vmatprep.subr.bf16.mxu0 %v2758_v10 }
 0x143   : > { %1858 = vmatpush1.bf16.msra.mxu1 %v2753_v11 }
 0x144   : > { %1944 = vmatpush1.bf16.msra.mxu0 %v2756_v12  ;;  %1859 = vmatprep.subr.bf16.mxu1 %v2761_v13 }
 0x145   : > { %1945 = vmatprep.subr.bf16.mxu0 %v2764_v14 }
 0x147   : > { %1860 = vmatpush1.bf16.msra.mxu1 %v2759_v15 }
 0x148   : > { %1946 = vmatpush1.bf16.msra.mxu0 %v2762_v16  ;;  %1861 = vmatprep.subr.bf16.mxu1 %v2767_v17 }
 0x149   : > { %1947 = vmatprep.subr.bf16.mxu0 %v2770_v18 }
 0x14b   : > { %1862 = vmatpush1.bf16.msra.mxu1 %v2765_v19 }
 0x14c   : > { %1948 = vmatpush1.bf16.msra.mxu0 %v2768_v20  ;;  %1863 = vmatprep.subr.bf16.mxu1 %v2773_v21 }
 0x14d   : > { %1949 = vmatprep.subr.bf16.mxu0 %v2776_v22 }
 0x14f   : > { %1864 = vmatpush1.bf16.msra.mxu1 %v2771_v23 }
 0x150   : > { %1950 = vmatpush1.bf16.msra.mxu0 %v2774_v24 }
 0x152   : > { %1866 = vmatmul.mubr.bf16.vlgmr.msra.gmra.mrb[0].mxu1 %v2335_v25 }
 0x153   : > { %1952 = vmatmul.mubr.bf16.vlgmr.msra.gmra.mrb[0].mxu0 %v2339_v26 }
 0x225   : > { %v1867_v27 = vpop.f32.mrb[0].mxu1 }
 0x226   : > { %v1953_v29 = vpop.f32.mrb[0].mxu0  ;;  %v1869_v31 = vpop.f32.mrb[1].mxu1 }
 0x227   : > { %v2484_v30 = vadd.f32 %v1953_v29, %v1867_v27  ;;  %v1955_v33 = vpop.f32.mrb[1].mxu0  ;;  %v1871_v35 = vpop.f32.mrb[2].mxu1 }
 0x228   : > { %v2485_v34 = vadd.f32 %v1955_v33, %v1869_v31  ;;  %v1957_v37 = vpop.f32.mrb[2].mxu0  ;;  %v1873_v40 = vpop.f32.mrb[3].mxu1  ;;  %1973 = sbr.rel (%p2469_p6) target bundleno = 588 (0x24c), region = 143 }
 0x229   : > { %v1962_v38 = vadd.f32 %v2484_v30, %v970_v28  ;;  %v2486_v39 = vadd.f32 %v1957_v37, %v1871_v35  ;;  %v1959_v42 = vpop.f32.mrb[3].mxu0 }
 0x22a   : > { %v1963_v43 = vadd.f32 %v2485_v34, %v971_v32  ;;  %v2487_v44 = vadd.f32 %v1959_v42, %v1873_v40 }
 0x22b   : > { %1966 = vst [vmem:[#allocation2] sm:$0xff] %v1962_v38  ;;  %v1964_v45 = vadd.f32 %v2486_v39, %v972_v36 }
 0x22c   : > { %1967 = vst [vmem:[#allocation2 + $0x8] sm:$0xff] %v1963_v43  ;;  %v1965_v46 = vadd.f32 %v2487_v44, %v973_v41 }
 0x22d   : > { %1968 = vst [vmem:[#allocation2 + $0x10] sm:$0xff] %v1964_v45 }
 0x22e   : > { %1969 = vst [vmem:[#allocation2 + $0x18] sm:$0xff] %v1965_v46 }
 0x232   : > { %v1974_v50 = vld [vmem:[#allocation2] sm:$0xff] }
 0x233   : > { %v1975_v55 = vld [vmem:[#allocation2 + $0x8] sm:$0xff]  ;;  %v1990_v0 = vadd.f32 %v1983_v58, %v1974_v50 }
 0x234   : > { %v1976_v56 = vld [vmem:[#allocation2 + $0x10] sm:$0xff]  ;;  %v1991_v1 = vadd.f32 %v1987_v59, %v1975_v55 }
 0x235   : > { %v1977_v57 = vld [vmem:[#allocation2 + $0x18] sm:$0xff]  ;;  %v1992_v2 = vadd.f32 %v1983_v58, %v1976_v56  ;;  %v1994_v4 = vmax.f32 %v1990_v0, 0.0 }
 0x236   : > { %v1993_v3 = vadd.f32 %v1987_v59, %v1977_v57  ;;  %v1995_v5 = vmax.f32 %v1991_v1, 0.0 }
 0x237   : > { %v1996_v6 = vmax.f32 %v1992_v2, 0.0  ;;  %v2004_v8 = vadd.f32 %v2000_v60, %v1994_v4 }
 0x238   : > { %v1997_v7 = vmax.f32 %v1993_v3, 0.0  ;;  %v2005_v9 = vadd.f32 %v2001_v61, %v1995_v5 }
 0x239   : > { %v2006_v10 = vadd.f32 %v2002_v62, %v1996_v6  ;;  %v2036_v14 = vrot.slane %v2004_v8, 4  ;;  %v2049_v16 = vmul.f32 %v2004_v8, %v2004_v8 }
 0x23a   : > { %v2007_v11 = vadd.f32 %v2003_v63, %v1997_v7  ;;  %v2481_v12 = vpack.c.bf16 %v2005_v9, %v2004_v8  ;;  %v2043_v15 = vrot.slane %v2005_v9, 4  ;;  %v2050_v17 = vmul.f32 %v2005_v9, %v2005_v9 }
 0x23b   : > { %v2037_v18 = vadd.f32 %v2036_v14, %v2004_v8  ;;  %v2054_v20 = vrot.slane %v2049_v16, 4 }
 0x23c   : > { %v2482_v13 = vpack.c.bf16 %v2007_v11, %v2006_v10  ;;  %2020 = vst [vmem:[%s3313_s7] sm:$0xff] %v2481_v12  ;;  %v2044_v19 = vadd.f32 %v2043_v15, %v2005_v9  ;;  %v2061_v21 = vrot.slane %v2050_v17, 4 }
 0x23d   : > { %v2038_v22 = vrot.slane %v2037_v18, 2  ;;  %v2055_v24 = vadd.f32 %v2054_v20, %v2049_v16 }
 0x23e   : > { %2021 = vst [vmem:[%s3313_s7 + $0x8] sm:$0xff] %v2482_v13  ;;  %v2045_v23 = vrot.slane %v2044_v19, 2  ;;  %v2062_v25 = vadd.f32 %v2061_v21, %v2050_v17 }
 0x23f   : > { %v2039_v26 = vadd.f32 %v2038_v22, %v2037_v18  ;;  %v2056_v28 = vrot.slane %v2055_v24, 2 }
 0x240   : > { %v2046_v27 = vadd.f32 %v2045_v23, %v2044_v19  ;;  %v2063_v29 = vrot.slane %v2062_v25, 2 }
 0x241   : > { %v2040_v30 = vrot.slane %v2039_v26, 1  ;;  %v2057_v32 = vadd.f32 %v2056_v28, %v2055_v24 }
 0x242   : > { %v2047_v31 = vrot.slane %v2046_v27, 1  ;;  %v2064_v33 = vadd.f32 %v2063_v29, %v2062_v25 }
 0x243   : > { %v2041_v34 = vadd.f32 %v2040_v30, %v2039_v26  ;;  %v2058_v36 = vrot.slane %v2057_v32, 1 }
 0x244   : > { %v2048_v35 = vadd.f32 %v2047_v31, %v2046_v27  ;;  %v2065_v37 = vrot.slane %v2064_v33, 1 }
 0x245   : > { %v2059_v38 = vadd.f32 %v2058_v36, %v2057_v32 }
 0x246   : > { %v2066_v39 = vadd.f32 %v2065_v37, %v2064_v33 }
 0x247   : > { %v2068_v40 = vsel %vm2067_vm0, %v2041_v34, %v2059_v38 }
 0x248   : > { %v2069_v41 = vsel %vm2067_vm0, %v2048_v35, %v2066_v39 }
 0x249   : > { %v2072_v42 = vcombine.low %v2068_v40, %v2069_v41 }
 0x24b   : > { %2472 = vst.sshfl [vmem:[%s3305_s9] sm:$0x33 pattern:$0x76325410] %v2072_v42 }
 0x24c PF: > { %2097 = sbr.rel (!%p3000_p13) target bundleno = 595 (0x253), region = 147  ;;  %s2483_s24 = sshll.u32 (%p3000_p13), %s2851_s25, 3  ;;  %v2133_v43 = vld [vmem:[%s3313_s7] sm:$0xff] (%p3000_p13)  ;;  %v2135_v44 = vld [vmem:[%s3313_s7 + $0x8] sm:$0xff] (%p3000_p13) }
 0x24d   : > { %s2103_s0 = scalar_lea.vmem (%p3000_p13), %s3526_s4, %s2483_s24 }
 0x24e   : > { %2134 = vst [vmem:[%s2103_s0] sm:$0xff] (%p3000_p13), %v2133_v43  ;;  %2136 = vst [vmem:[%s2103_s0 + $0x40] sm:$0xff] (%p3000_p13), %v2135_v44 }
 0x253 PF: > { %s16_s28 = sadd.s32 1, %s2863_s28   ;;  %s3541_s22 = sld [smem:[#allocation7_spill]] }
 0x254   : > { %p13_p7 = scmp.ge.s32.totalorder %s16_s28, 18   ;;  %s3542_s23 = sld [smem:[#allocation10_spill]] }
 0x255   : > { %s3543_s8 = sld [smem:[#allocation8_spill]]  ;;  %s3544_s11 = sld [smem:[#allocation9_spill]] }
 0x256   : > { %s3545_s18 = smov %s2827_s19  ;;  %s3546_s19 = smov %s2992_s17 }
 0x257   : > { %s3547_s20 = smov %s2835_s21  ;;  %s3548_s21 = smov %s2989_s16 }
 0x258   : > { %s3549_s24 = smov %s2855_s26  ;;  %s3550_s25 = smov %s2859_s27 }
 0x259   :  { %15 = sbr.rel (!%p13_p7) target bundleno = 8 (0x8), region = 247 }
 0x25b   : > { %s3551_s26 = smov %s3543_s8  ;;  %s3552_s27 = smov %s3544_s11 }

// kernel: squeeze.119
= control target key start
LH: loop header
LB: loop body
LE: loop exit
PB: predicated region body
PF: predicated region fallthrough
CT: control target
= control target key end

     0   :  { %s69_s0 = inlined_call_operand.vmem [shape: f32[2048], index: 0, kind: input, shape index: {}]   ;;  %s70_s1 = inlined_call_operand.vmem [shape: f32[4,512], index: 1, kind: output, shape index: {}]  }
   0x1   :  { %v2_v0 = vld [vmem:[%s69_s0] sm:$0xff]   ;;  %v37_v1 = vld [vmem:[%s69_s0 + $0x8] sm:$0xff]  }
   0x2   :  { %3 = vst [vmem:[#allocation0] ss:$8 sm:$0xf] %v2_v0   ;;  %5 = vst [vmem:[#allocation0 - $0x1f] ss:$8 sm:$0xf0] %v2_v0  }
   0x3   :  { %9 = vst [vmem:[#allocation0 + $0x2] ss:$8 sm:$0xf] %v37_v1   ;;  %11 = vst [vmem:[#allocation0 - $0x1d] ss:$8 sm:$0xf0] %v37_v1  }
   0xa   :  { %v15_v2 = vld [vmem:[#allocation0] sm:$0xf]  ;;  %v19_v3 = vld [vmem:[#allocation0 + $0x8] sm:$0xf]  ;;  %v24_v4 = vld [vmem:[#allocation0 + $0x10] sm:$0xf] }
   0xb   :  { %17 = vst [vmem:[%s70_s1] sm:$0xf] %v15_v2  ;;  %38 = vst [vmem:[%s70_s1 + $0x4] sm:$0xf] %v19_v3  ;;  %v30_v5 = vld [vmem:[#allocation0 + $0x18] sm:$0xf] }
   0xc   :  { %39 = vst [vmem:[%s70_s1 + $0x8] sm:$0xf] %v24_v4  ;;  %40 = vst [vmem:[%s70_s1 + $0xc] sm:$0xf] %v30_v5 }

// kernel: fcn16s_forward.7
= control target key start
LH: loop header
LB: loop body
LE: loop exit
PB: predicated region body
PF: predicated region fallthrough
CT: control target
= control target key end

     0   :  { %s3593_s0 = inlined_call_operand.vmem [shape: bf16[32,2048], index: 0, kind: input, shape index: {}]   ;;  %s3594_s1 = inlined_call_operand.vmem [shape: bf16[2048,1024], index: 1, kind: input, shape index: {}]   ;;  %s3595_s2 = inlined_call_operand.vmem [shape: f32[1,1024], index: 2, kind: input, shape index: {}]   ;;  %s3596_s3 = inlined_call_operand.vmem [shape: bf16[32,1024], index: 3, kind: output, shape index: {0}]   ;;  %s3597_s4 = inlined_call_operand.vmem [shape: f32[1,2,1024], index: 4, kind: output, shape index: {1}]  }
   0x1   :  { %3600 = sst [smem:[#allocation8_spill]] %s3593_s0 }
   0x2   :  { %3601 = sst [smem:[#allocation9_spill]] %s3594_s1 }
   0x3   :  { %s2962_s15 = smov 0   ;;  %s2964_s16 = smov 0  }
   0x4   :  { %s2966_s17 = smov 0   ;;  %s2968_s18 = smov 0  }
   0x5   :  { %s2970_s19 = smov 0   ;;  %s2972_s20 = smov 0  }
   0x6   :  { %s2974_s21 = smov 0   ;;  %s2976_s22 = smov 0  }
   0x7   :  { %s2978_s23 = smov 0   ;;  %s2980_s24 = smov 0  }
   0x8   :  { %s2982_s25 = smov 0  }
   0x9 LB: > { %s2361_s26 = sadd.s32 4294967295, %s2934_s25   ;;  %s27_s27 = sadd.s32 1, %s2926_s23  ;;  %s2934_s25 = sphi %s2982_s25, %s15_s25   ;;  %s2930_s24 = sphi %s2980_s24, %s3620_s24   ;;  %s2926_s23 = sphi %s2978_s23, %s3619_s23   ;;  %s2922_s22 = sphi %s2976_s22, %s3618_s22   ;;  %s2918_s21 = sphi %s2974_s21, %s3617_s21   ;;  %s2914_s20 = sphi %s2972_s20, %s3616_s20   ;;  %s2910_s19 = sphi %s2970_s19, %s3615_s19   ;;  %s2906_s18 = sphi %s2968_s18, %s3614_s18   ;;  %s2902_s17 = sphi %s2966_s17, %s3613_s17   ;;  %s2898_s16 = sphi %s2964_s16, %s3612_s16   ;;  %s2894_s15 = sphi %s2962_s15, %s3611_s15  }
   0xa   : > { %p28_p0 = scmp.ge.s32.totalorder %s27_s27, 2  ;;  %s30_s28 = sadd.s32 1, %s2930_s24 }
   0xb   : > { %s43_s29 = sadd.s32 1, %s2914_s20  ;;  %p50_p1 = scmp.ne.s32.totalorder %s2914_s20, %s2910_s19 }
   0xc   : > { %s3622_s27 = smov (%p28_p0, %s27_s27), 0  ;;  %s3624_s28 = smov (!%p28_p0, %s30_s28), %s2930_s24 }
   0xd   : > { %3602 = sst [smem:[#allocation6_spill]] %s3622_s27  ;;  %s39_s30 = ssub.s32 %s2926_s23, %s3622_s27 }
   0xe   : > { %p51_p2 = scmp.eq.s32.totalorder %s2934_s25, 0  ;;  %p32_p3 = scmp.ge.s32.totalorder %s3624_s28, 4 }
   0xf   : > { %p41_p4 = scmp.eq.s32.totalorder %s39_s30, 0  ;;  %s71_s6 = sadd.s32 1, %s2906_s18 }
  0x10   : > { %p3029_p5 = por %p51_p2, %p50_p1  ;;  %s3626_s28 = smov (%p32_p3, %s3624_s28), 0 }
  0x11   : > { %3604 = sst [smem:[#allocation7_spill]] %s3626_s28  ;;  %s67_s8 = ssub.s32 %s2930_s24, %s3626_s28 }
  0x12   : > { %s3037_s7 = scalar_select %p41_p4, %s2914_s20, %s43_s29  }
  0x13   : > { %p78_p6 = scmp.ne.s32.totalorder %s2906_s18, %s2902_s17  ;;  %s68_s9 = sor.u32 %s67_s8, %s39_s30 }
  0x14   : > { %p123_p7 = scmp.eq.s32.totalorder %s67_s8, 0  ;;  %p69_p8 = scmp.eq.s32.totalorder %s68_s9, 0 }
  0x15   : > { %p3043_p9 = por %p78_p6, %p51_p2  ;;  %s125_s11 = sadd.s32 1, %s2898_s16 }
  0x16   : > { %p135_p10 = scmp.ne.s32.totalorder %s2898_s16, %s2894_s15  ;;  %p136_p11 = scmp.eq.s32.totalorder %s2361_s26, 7 }
  0x17   : > { %s3051_s12 = scalar_select %p69_p8, %s2906_s18, %s71_s6  }
  0x18   : > { %s3054_s13 = scalar_select %p123_p7, %s2898_s16, %s125_s11  }
  0x19   : > { %p3056_p12 = por %p136_p11, %p135_p10  ;;  %p2364_p13 = scmp.ge.s32.totalorder %s2934_s25, 8 }
  0x1b   : > { %186 = sbr.rel (%p2364_p13) target bundleno = 190 (0xbe), region = 16 }
  0x22   : > { %189 = sbr.rel (!%p3029_p5) target bundleno = 52 (0x34), region = 20  ;;  %s191_s29 = sand.u32 (%p3029_p5), 1, %s2914_s20  }
  0x23   : > { %s2536_s30 = sshll.u32 (%p3029_p5), %s2926_s23, 5  ;;  %s2365_s8 = sshll.u32 (%p3029_p5), %s191_s29, 7 }
  0x24   : > { %s3607_s0 = sld [smem:[#allocation8_spill]] (%p3029_p5)  ;;  %s193_s26 = scalar_lea.vmem (%p3029_p5), [#allocation3], %s2365_s8 }
  0x2a   : > { %s3068_s11 = scalar_lea.vmem %s3607_s0, %s2536_s30 }
  0x2b   : > { %v212_v0 = vld [vmem:[%s3068_s11] sm:$0xff]  ;;  %v214_v1 = vld [vmem:[%s3068_s11 + $0x8] sm:$0xff]  ;;  %v216_v2 = vld [vmem:[%s3068_s11 + $0x10] sm:$0xff] }
  0x2c   : > { %213 = vst [vmem:[%s193_s26] sm:$0xff] %v212_v0  ;;  %215 = vst [vmem:[%s193_s26 + $0x8] sm:$0xff] %v214_v1  ;;  %v218_v3 = vld [vmem:[%s3068_s11 + $0x18] sm:$0xff]  ;;  %v220_v4 = vld [vmem:[%s3068_s11 + $0x40] sm:$0xff] }
  0x2d   : > { %217 = vst [vmem:[%s193_s26 + $0x10] sm:$0xff] %v216_v2  ;;  %v222_v5 = vld [vmem:[%s3068_s11 + $0x48] sm:$0xff]  ;;  %219 = vst [vmem:[%s193_s26 + $0x18] sm:$0xff] %v218_v3  ;;  %v224_v6 = vld [vmem:[%s3068_s11 + $0x50] sm:$0xff] }
  0x2e   : > { %221 = vst [vmem:[%s193_s26 + $0x20] sm:$0xff] %v220_v4  ;;  %223 = vst [vmem:[%s193_s26 + $0x28] sm:$0xff] %v222_v5  ;;  %v226_v7 = vld [vmem:[%s3068_s11 + $0x58] sm:$0xff]  ;;  %v228_v8 = vld [vmem:[%s3068_s11 + $0x80] sm:$0xff] }
  0x2f   : > { %225 = vst [vmem:[%s193_s26 + $0x30] sm:$0xff] %v224_v6  ;;  %227 = vst [vmem:[%s193_s26 + $0x38] sm:$0xff] %v226_v7  ;;  %v230_v9 = vld [vmem:[%s3068_s11 + $0x88] sm:$0xff]  ;;  %v232_v10 = vld [vmem:[%s3068_s11 + $0x90] sm:$0xff] }
  0x30   : > { %229 = vst [vmem:[%s193_s26 + $0x40] sm:$0xff] %v228_v8  ;;  %v234_v11 = vld [vmem:[%s3068_s11 + $0x98] sm:$0xff]  ;;  %231 = vst [vmem:[%s193_s26 + $0x48] sm:$0xff] %v230_v9  ;;  %v236_v12 = vld [vmem:[%s3068_s11 + $0xc0] sm:$0xff] }
  0x31   : > { %233 = vst [vmem:[%s193_s26 + $0x50] sm:$0xff] %v232_v10  ;;  %235 = vst [vmem:[%s193_s26 + $0x58] sm:$0xff] %v234_v11  ;;  %v238_v13 = vld [vmem:[%s3068_s11 + $0xc8] sm:$0xff]  ;;  %v240_v14 = vld [vmem:[%s3068_s11 + $0xd0] sm:$0xff] }
  0x32   : > { %237 = vst [vmem:[%s193_s26 + $0x60] sm:$0xff] %v236_v12  ;;  %239 = vst [vmem:[%s193_s26 + $0x68] sm:$0xff] %v238_v13  ;;  %v242_v15 = vld [vmem:[%s3068_s11 + $0xd8] sm:$0xff] }
  0x33   : > { %241 = vst [vmem:[%s193_s26 + $0x70] sm:$0xff] %v240_v14  ;;  %243 = vst [vmem:[%s193_s26 + $0x78] sm:$0xff] %v242_v15 }
  0x34 PF: > { %249 = sbr.rel (!%p3043_p9) target bundleno = 190 (0xbe), region = 43  ;;  %s251_s5 = sand.u32 (%p3043_p9), 1, %s2906_s18  }
  0x35   : > { %s2370_s29 = sshll.u32 (%p3043_p9), %s2930_s24, 1  ;;  %s2368_s30 = sshll.u32 (%p3043_p9), %s251_s5, 10 }
  0x36   : > { %s2537_s8 = sshll.u32 (%p3043_p9), %s2926_s23, 10  ;;  %s3608_s1 = sld [smem:[#allocation9_spill]] (%p3043_p9) }
  0x37   : > { %s257_s6 = sadd.s32 (%p3043_p9), %s2537_s8, %s2370_s29  ;;  %s3099_s10 = scalar_lea.vmem (%p3043_p9), [#allocation4], %s2368_s30 }
  0x38   : > { %s2372_s9 = sshll.u32 (%p3043_p9), %s257_s6, 2 }
  0x3c   : > { %s3094_s27 = scalar_lea.vmem %s3608_s1, %s2372_s9 }
  0x3d   : > { %v541_v16 = vld [vmem:[%s3094_s27] sm:$0xff] }
  0x3e   : > { %v543_v17 = vld [vmem:[%s3094_s27 + $0x20] sm:$0xff]  ;;  %542 = vst [vmem:[%s3099_s10] sm:$0xff] %v541_v16 }
  0x3f   : > { %v545_v18 = vld [vmem:[%s3094_s27 + $0x40] sm:$0xff]  ;;  %544 = vst [vmem:[%s3099_s10 + $0x8] sm:$0xff] %v543_v17 }
  0x40   : > { %546 = vst [vmem:[%s3099_s10 + $0x10] sm:$0xff] %v545_v18  ;;  %v547_v19 = vld [vmem:[%s3094_s27 + $0x60] sm:$0xff] }
  0x41   : > { %v549_v20 = vld [vmem:[%s3094_s27 + $0x80] sm:$0xff]  ;;  %548 = vst [vmem:[%s3099_s10 + $0x18] sm:$0xff] %v547_v19 }
  0x42   : > { %v551_v21 = vld [vmem:[%s3094_s27 + $0xa0] sm:$0xff]  ;;  %550 = vst [vmem:[%s3099_s10 + $0x20] sm:$0xff] %v549_v20 }
  0x43   : > { %552 = vst [vmem:[%s3099_s10 + $0x28] sm:$0xff] %v551_v21  ;;  %v553_v22 = vld [vmem:[%s3094_s27 + $0xc0] sm:$0xff] }
  0x44   : > { %v555_v23 = vld [vmem:[%s3094_s27 + $0xe0] sm:$0xff]  ;;  %554 = vst [vmem:[%s3099_s10 + $0x30] sm:$0xff] %v553_v22 }
  0x45   : > { %v557_v24 = vld [vmem:[%s3094_s27 + $0x100] sm:$0xff]  ;;  %556 = vst [vmem:[%s3099_s10 + $0x38] sm:$0xff] %v555_v23 }
  0x46   : > { %558 = vst [vmem:[%s3099_s10 + $0x40] sm:$0xff] %v557_v24  ;;  %v559_v25 = vld [vmem:[%s3094_s27 + $0x120] sm:$0xff] }
  0x47   : > { %v561_v26 = vld [vmem:[%s3094_s27 + $0x140] sm:$0xff]  ;;  %560 = vst [vmem:[%s3099_s10 + $0x48] sm:$0xff] %v559_v25 }
  0x48   : > { %v563_v27 = vld [vmem:[%s3094_s27 + $0x160] sm:$0xff]  ;;  %562 = vst [vmem:[%s3099_s10 + $0x50] sm:$0xff] %v561_v26 }
  0x49   : > { %564 = vst [vmem:[%s3099_s10 + $0x58] sm:$0xff] %v563_v27  ;;  %v565_v28 = vld [vmem:[%s3094_s27 + $0x180] sm:$0xff] }
  0x4a   : > { %v567_v29 = vld [vmem:[%s3094_s27 + $0x1a0] sm:$0xff]  ;;  %566 = vst [vmem:[%s3099_s10 + $0x60] sm:$0xff] %v565_v28 }
  0x4b   : > { %v569_v30 = vld [vmem:[%s3094_s27 + $0x1c0] sm:$0xff]  ;;  %568 = vst [vmem:[%s3099_s10 + $0x68] sm:$0xff] %v567_v29 }
  0x4c   : > { %570 = vst [vmem:[%s3099_s10 + $0x70] sm:$0xff] %v569_v30  ;;  %v571_v31 = vld [vmem:[%s3094_s27 + $0x1e0] sm:$0xff] }
  0x4d   : > { %v573_v32 = vld [vmem:[%s3094_s27 + $0x200] sm:$0xff]  ;;  %572 = vst [vmem:[%s3099_s10 + $0x78] sm:$0xff] %v571_v31 }
  0x4e   : > { %v575_v33 = vld [vmem:[%s3094_s27 + $0x220] sm:$0xff]  ;;  %574 = vst [vmem:[%s3099_s10 + $0x80] sm:$0xff] %v573_v32 }
  0x4f   : > { %576 = vst [vmem:[%s3099_s10 + $0x88] sm:$0xff] %v575_v33  ;;  %v577_v34 = vld [vmem:[%s3094_s27 + $0x240] sm:$0xff] }
  0x50   : > { %v579_v35 = vld [vmem:[%s3094_s27 + $0x260] sm:$0xff]  ;;  %578 = vst [vmem:[%s3099_s10 + $0x90] sm:$0xff] %v577_v34 }
  0x51   : > { %v581_v36 = vld [vmem:[%s3094_s27 + $0x280] sm:$0xff]  ;;  %580 = vst [vmem:[%s3099_s10 + $0x98] sm:$0xff] %v579_v35 }
  0x52   : > { %582 = vst [vmem:[%s3099_s10 + $0xa0] sm:$0xff] %v581_v36  ;;  %v583_v37 = vld [vmem:[%s3094_s27 + $0x2a0] sm:$0xff] }
  0x53   : > { %v585_v38 = vld [vmem:[%s3094_s27 + $0x2c0] sm:$0xff]  ;;  %584 = vst [vmem:[%s3099_s10 + $0xa8] sm:$0xff] %v583_v37 }
  0x54   : > { %v587_v39 = vld [vmem:[%s3094_s27 + $0x2e0] sm:$0xff]  ;;  %586 = vst [vmem:[%s3099_s10 + $0xb0] sm:$0xff] %v585_v38 }
  0x55   : > { %588 = vst [vmem:[%s3099_s10 + $0xb8] sm:$0xff] %v587_v39  ;;  %v589_v40 = vld [vmem:[%s3094_s27 + $0x300] sm:$0xff] }
  0x56   : > { %v591_v41 = vld [vmem:[%s3094_s27 + $0x320] sm:$0xff]  ;;  %590 = vst [vmem:[%s3099_s10 + $0xc0] sm:$0xff] %v589_v40 }
  0x57   : > { %v593_v42 = vld [vmem:[%s3094_s27 + $0x340] sm:$0xff]  ;;  %592 = vst [vmem:[%s3099_s10 + $0xc8] sm:$0xff] %v591_v41 }
  0x58   : > { %594 = vst [vmem:[%s3099_s10 + $0xd0] sm:$0xff] %v593_v42  ;;  %v595_v43 = vld [vmem:[%s3094_s27 + $0x360] sm:$0xff] }
  0x59   : > { %v597_v44 = vld [vmem:[%s3094_s27 + $0x380] sm:$0xff]  ;;  %596 = vst [vmem:[%s3099_s10 + $0xd8] sm:$0xff] %v595_v43 }
  0x5a   : > { %v599_v45 = vld [vmem:[%s3094_s27 + $0x3a0] sm:$0xff]  ;;  %598 = vst [vmem:[%s3099_s10 + $0xe0] sm:$0xff] %v597_v44 }
  0x5b   : > { %600 = vst [vmem:[%s3099_s10 + $0xe8] sm:$0xff] %v599_v45  ;;  %v601_v46 = vld [vmem:[%s3094_s27 + $0x3c0] sm:$0xff] }
  0x5c   : > { %v603_v47 = vld [vmem:[%s3094_s27 + $0x3e0] sm:$0xff]  ;;  %602 = vst [vmem:[%s3099_s10 + $0xf0] sm:$0xff] %v601_v46 }
  0x5d   : > { %v605_v48 = vld [vmem:[%s3094_s27 + $0x400] sm:$0xff]  ;;  %604 = vst [vmem:[%s3099_s10 + $0xf8] sm:$0xff] %v603_v47 }
  0x5e   : > { %606 = vst [vmem:[%s3099_s10 + $0x100] sm:$0xff] %v605_v48  ;;  %v607_v49 = vld [vmem:[%s3094_s27 + $0x420] sm:$0xff] }
  0x5f   : > { %v609_v50 = vld [vmem:[%s3094_s27 + $0x440] sm:$0xff]  ;;  %608 = vst [vmem:[%s3099_s10 + $0x108] sm:$0xff] %v607_v49 }
  0x60   : > { %v611_v51 = vld [vmem:[%s3094_s27 + $0x460] sm:$0xff]  ;;  %610 = vst [vmem:[%s3099_s10 + $0x110] sm:$0xff] %v609_v50 }
  0x61   : > { %612 = vst [vmem:[%s3099_s10 + $0x118] sm:$0xff] %v611_v51  ;;  %v613_v52 = vld [vmem:[%s3094_s27 + $0x480] sm:$0xff] }
  0x62   : > { %v615_v53 = vld [vmem:[%s3094_s27 + $0x4a0] sm:$0xff]  ;;  %614 = vst [vmem:[%s3099_s10 + $0x120] sm:$0xff] %v613_v52 }
  0x63   : > { %v617_v54 = vld [vmem:[%s3094_s27 + $0x4c0] sm:$0xff]  ;;  %616 = vst [vmem:[%s3099_s10 + $0x128] sm:$0xff] %v615_v53 }
  0x64   : > { %618 = vst [vmem:[%s3099_s10 + $0x130] sm:$0xff] %v617_v54  ;;  %v619_v55 = vld [vmem:[%s3094_s27 + $0x4e0] sm:$0xff] }
  0x65   : > { %v621_v56 = vld [vmem:[%s3094_s27 + $0x500] sm:$0xff]  ;;  %620 = vst [vmem:[%s3099_s10 + $0x138] sm:$0xff] %v619_v55 }
  0x66   : > { %v623_v57 = vld [vmem:[%s3094_s27 + $0x520] sm:$0xff]  ;;  %622 = vst [vmem:[%s3099_s10 + $0x140] sm:$0xff] %v621_v56 }
  0x67   : > { %624 = vst [vmem:[%s3099_s10 + $0x148] sm:$0xff] %v623_v57  ;;  %v625_v58 = vld [vmem:[%s3094_s27 + $0x540] sm:$0xff] }
  0x68   : > { %v627_v59 = vld [vmem:[%s3094_s27 + $0x560] sm:$0xff]  ;;  %626 = vst [vmem:[%s3099_s10 + $0x150] sm:$0xff] %v625_v58 }
  0x69   : > { %v629_v60 = vld [vmem:[%s3094_s27 + $0x580] sm:$0xff]  ;;  %628 = vst [vmem:[%s3099_s10 + $0x158] sm:$0xff] %v627_v59 }
  0x6a   : > { %630 = vst [vmem:[%s3099_s10 + $0x160] sm:$0xff] %v629_v60  ;;  %v631_v61 = vld [vmem:[%s3094_s27 + $0x5a0] sm:$0xff] }
  0x6b   : > { %v633_v62 = vld [vmem:[%s3094_s27 + $0x5c0] sm:$0xff]  ;;  %632 = vst [vmem:[%s3099_s10 + $0x168] sm:$0xff] %v631_v61 }
  0x6c   : > { %v635_v63 = vld [vmem:[%s3094_s27 + $0x5e0] sm:$0xff]  ;;  %634 = vst [vmem:[%s3099_s10 + $0x170] sm:$0xff] %v633_v62 }
  0x6d   : > { %636 = vst [vmem:[%s3099_s10 + $0x178] sm:$0xff] %v635_v63  ;;  %v637_v0 = vld [vmem:[%s3094_s27 + $0x600] sm:$0xff] }
  0x6e   : > { %v639_v1 = vld [vmem:[%s3094_s27 + $0x620] sm:$0xff]  ;;  %638 = vst [vmem:[%s3099_s10 + $0x180] sm:$0xff] %v637_v0 }
  0x6f   : > { %v641_v2 = vld [vmem:[%s3094_s27 + $0x640] sm:$0xff]  ;;  %640 = vst [vmem:[%s3099_s10 + $0x188] sm:$0xff] %v639_v1 }
  0x70   : > { %642 = vst [vmem:[%s3099_s10 + $0x190] sm:$0xff] %v641_v2  ;;  %v643_v3 = vld [vmem:[%s3094_s27 + $0x660] sm:$0xff] }
  0x71   : > { %v645_v4 = vld [vmem:[%s3094_s27 + $0x680] sm:$0xff]  ;;  %644 = vst [vmem:[%s3099_s10 + $0x198] sm:$0xff] %v643_v3 }
  0x72   : > { %v647_v5 = vld [vmem:[%s3094_s27 + $0x6a0] sm:$0xff]  ;;  %646 = vst [vmem:[%s3099_s10 + $0x1a0] sm:$0xff] %v645_v4 }
  0x73   : > { %648 = vst [vmem:[%s3099_s10 + $0x1a8] sm:$0xff] %v647_v5  ;;  %v649_v6 = vld [vmem:[%s3094_s27 + $0x6c0] sm:$0xff] }
  0x74   : > { %v651_v7 = vld [vmem:[%s3094_s27 + $0x6e0] sm:$0xff]  ;;  %650 = vst [vmem:[%s3099_s10 + $0x1b0] sm:$0xff] %v649_v6 }
  0x75   : > { %v653_v8 = vld [vmem:[%s3094_s27 + $0x700] sm:$0xff]  ;;  %652 = vst [vmem:[%s3099_s10 + $0x1b8] sm:$0xff] %v651_v7 }
  0x76   : > { %654 = vst [vmem:[%s3099_s10 + $0x1c0] sm:$0xff] %v653_v8  ;;  %v655_v9 = vld [vmem:[%s3094_s27 + $0x720] sm:$0xff] }
  0x77   : > { %v657_v10 = vld [vmem:[%s3094_s27 + $0x740] sm:$0xff]  ;;  %656 = vst [vmem:[%s3099_s10 + $0x1c8] sm:$0xff] %v655_v9 }
  0x78   : > { %v659_v11 = vld [vmem:[%s3094_s27 + $0x760] sm:$0xff]  ;;  %658 = vst [vmem:[%s3099_s10 + $0x1d0] sm:$0xff] %v657_v10 }
  0x79   : > { %660 = vst [vmem:[%s3099_s10 + $0x1d8] sm:$0xff] %v659_v11  ;;  %v661_v12 = vld [vmem:[%s3094_s27 + $0x780] sm:$0xff] }
  0x7a   : > { %v663_v13 = vld [vmem:[%s3094_s27 + $0x7a0] sm:$0xff]  ;;  %662 = vst [vmem:[%s3099_s10 + $0x1e0] sm:$0xff] %v661_v12 }
  0x7b   : > { %v665_v14 = vld [vmem:[%s3094_s27 + $0x7c0] sm:$0xff]  ;;  %664 = vst [vmem:[%s3099_s10 + $0x1e8] sm:$0xff] %v663_v13 }
  0x7c   : > { %666 = vst [vmem:[%s3099_s10 + $0x1f0] sm:$0xff] %v665_v14  ;;  %v667_v15 = vld [vmem:[%s3094_s27 + $0x7e0] sm:$0xff] }
  0x7d   : > { %v669_v16 = vld [vmem:[%s3094_s27 + $0x800] sm:$0xff]  ;;  %668 = vst [vmem:[%s3099_s10 + $0x1f8] sm:$0xff] %v667_v15 }
  0x7e   : > { %v671_v17 = vld [vmem:[%s3094_s27 + $0x820] sm:$0xff]  ;;  %670 = vst [vmem:[%s3099_s10 + $0x200] sm:$0xff] %v669_v16 }
  0x7f   : > { %672 = vst [vmem:[%s3099_s10 + $0x208] sm:$0xff] %v671_v17  ;;  %v673_v18 = vld [vmem:[%s3094_s27 + $0x840] sm:$0xff] }
  0x80   : > { %v675_v19 = vld [vmem:[%s3094_s27 + $0x860] sm:$0xff]  ;;  %674 = vst [vmem:[%s3099_s10 + $0x210] sm:$0xff] %v673_v18 }
  0x81   : > { %v677_v20 = vld [vmem:[%s3094_s27 + $0x880] sm:$0xff]  ;;  %676 = vst [vmem:[%s3099_s10 + $0x218] sm:$0xff] %v675_v19 }
  0x82   : > { %678 = vst [vmem:[%s3099_s10 + $0x220] sm:$0xff] %v677_v20  ;;  %v679_v21 = vld [vmem:[%s3094_s27 + $0x8a0] sm:$0xff] }
  0x83   : > { %v681_v22 = vld [vmem:[%s3094_s27 + $0x8c0] sm:$0xff]  ;;  %680 = vst [vmem:[%s3099_s10 + $0x228] sm:$0xff] %v679_v21 }
  0x84   : > { %v683_v23 = vld [vmem:[%s3094_s27 + $0x8e0] sm:$0xff]  ;;  %682 = vst [vmem:[%s3099_s10 + $0x230] sm:$0xff] %v681_v22 }
  0x85   : > { %684 = vst [vmem:[%s3099_s10 + $0x238] sm:$0xff] %v683_v23  ;;  %v685_v24 = vld [vmem:[%s3094_s27 + $0x900] sm:$0xff] }
  0x86   : > { %v687_v25 = vld [vmem:[%s3094_s27 + $0x920] sm:$0xff]  ;;  %686 = vst [vmem:[%s3099_s10 + $0x240] sm:$0xff] %v685_v24 }
  0x87   : > { %v689_v26 = vld [vmem:[%s3094_s27 + $0x940] sm:$0xff]  ;;  %688 = vst [vmem:[%s3099_s10 + $0x248] sm:$0xff] %v687_v25 }
  0x88   : > { %690 = vst [vmem:[%s3099_s10 + $0x250] sm:$0xff] %v689_v26  ;;  %v691_v27 = vld [vmem:[%s3094_s27 + $0x960] sm:$0xff] }
  0x89   : > { %v693_v28 = vld [vmem:[%s3094_s27 + $0x980] sm:$0xff]  ;;  %692 = vst [vmem:[%s3099_s10 + $0x258] sm:$0xff] %v691_v27 }
  0x8a   : > { %v695_v29 = vld [vmem:[%s3094_s27 + $0x9a0] sm:$0xff]  ;;  %694 = vst [vmem:[%s3099_s10 + $0x260] sm:$0xff] %v693_v28 }
  0x8b   : > { %696 = vst [vmem:[%s3099_s10 + $0x268] sm:$0xff] %v695_v29  ;;  %v697_v30 = vld [vmem:[%s3094_s27 + $0x9c0] sm:$0xff] }
  0x8c   : > { %v699_v31 = vld [vmem:[%s3094_s27 + $0x9e0] sm:$0xff]  ;;  %698 = vst [vmem:[%s3099_s10 + $0x270] sm:$0xff] %v697_v30 }
  0x8d   : > { %v701_v32 = vld [vmem:[%s3094_s27 + $0xa00] sm:$0xff]  ;;  %700 = vst [vmem:[%s3099_s10 + $0x278] sm:$0xff] %v699_v31 }
  0x8e   : > { %702 = vst [vmem:[%s3099_s10 + $0x280] sm:$0xff] %v701_v32  ;;  %v703_v33 = vld [vmem:[%s3094_s27 + $0xa20] sm:$0xff] }
  0x8f   : > { %v705_v34 = vld [vmem:[%s3094_s27 + $0xa40] sm:$0xff]  ;;  %704 = vst [vmem:[%s3099_s10 + $0x288] sm:$0xff] %v703_v33 }
  0x90   : > { %v707_v35 = vld [vmem:[%s3094_s27 + $0xa60] sm:$0xff]  ;;  %706 = vst [vmem:[%s3099_s10 + $0x290] sm:$0xff] %v705_v34 }
  0x91   : > { %708 = vst [vmem:[%s3099_s10 + $0x298] sm:$0xff] %v707_v35  ;;  %v709_v36 = vld [vmem:[%s3094_s27 + $0xa80] sm:$0xff] }
  0x92   : > { %v711_v37 = vld [vmem:[%s3094_s27 + $0xaa0] sm:$0xff]  ;;  %710 = vst [vmem:[%s3099_s10 + $0x2a0] sm:$0xff] %v709_v36 }
  0x93   : > { %v713_v38 = vld [vmem:[%s3094_s27 + $0xac0] sm:$0xff]  ;;  %712 = vst [vmem:[%s3099_s10 + $0x2a8] sm:$0xff] %v711_v37 }
  0x94   : > { %714 = vst [vmem:[%s3099_s10 + $0x2b0] sm:$0xff] %v713_v38  ;;  %v715_v39 = vld [vmem:[%s3094_s27 + $0xae0] sm:$0xff] }
  0x95   : > { %v717_v40 = vld [vmem:[%s3094_s27 + $0xb00] sm:$0xff]  ;;  %716 = vst [vmem:[%s3099_s10 + $0x2b8] sm:$0xff] %v715_v39 }
  0x96   : > { %v719_v41 = vld [vmem:[%s3094_s27 + $0xb20] sm:$0xff]  ;;  %718 = vst [vmem:[%s3099_s10 + $0x2c0] sm:$0xff] %v717_v40 }
  0x97   : > { %720 = vst [vmem:[%s3099_s10 + $0x2c8] sm:$0xff] %v719_v41  ;;  %v721_v42 = vld [vmem:[%s3094_s27 + $0xb40] sm:$0xff] }
  0x98   : > { %v723_v43 = vld [vmem:[%s3094_s27 + $0xb60] sm:$0xff]  ;;  %722 = vst [vmem:[%s3099_s10 + $0x2d0] sm:$0xff] %v721_v42 }
  0x99   : > { %v725_v44 = vld [vmem:[%s3094_s27 + $0xb80] sm:$0xff]  ;;  %724 = vst [vmem:[%s3099_s10 + $0x2d8] sm:$0xff] %v723_v43 }
  0x9a   : > { %726 = vst [vmem:[%s3099_s10 + $0x2e0] sm:$0xff] %v725_v44  ;;  %v727_v45 = vld [vmem:[%s3094_s27 + $0xba0] sm:$0xff] }
  0x9b   : > { %v729_v46 = vld [vmem:[%s3094_s27 + $0xbc0] sm:$0xff]  ;;  %728 = vst [vmem:[%s3099_s10 + $0x2e8] sm:$0xff] %v727_v45 }
  0x9c   : > { %v731_v47 = vld [vmem:[%s3094_s27 + $0xbe0] sm:$0xff]  ;;  %730 = vst [vmem:[%s3099_s10 + $0x2f0] sm:$0xff] %v729_v46 }
  0x9d   : > { %732 = vst [vmem:[%s3099_s10 + $0x2f8] sm:$0xff] %v731_v47  ;;  %v733_v48 = vld [vmem:[%s3094_s27 + $0xc00] sm:$0xff] }
  0x9e   : > { %v735_v49 = vld [vmem:[%s3094_s27 + $0xc20] sm:$0xff]  ;;  %734 = vst [vmem:[%s3099_s10 + $0x300] sm:$0xff] %v733_v48 }
  0x9f   : > { %v737_v50 = vld [vmem:[%s3094_s27 + $0xc40] sm:$0xff]  ;;  %736 = vst [vmem:[%s3099_s10 + $0x308] sm:$0xff] %v735_v49 }
  0xa0   : > { %738 = vst [vmem:[%s3099_s10 + $0x310] sm:$0xff] %v737_v50  ;;  %v739_v51 = vld [vmem:[%s3094_s27 + $0xc60] sm:$0xff] }
  0xa1   : > { %v741_v52 = vld [vmem:[%s3094_s27 + $0xc80] sm:$0xff]  ;;  %740 = vst [vmem:[%s3099_s10 + $0x318] sm:$0xff] %v739_v51 }
  0xa2   : > { %v743_v53 = vld [vmem:[%s3094_s27 + $0xca0] sm:$0xff]  ;;  %742 = vst [vmem:[%s3099_s10 + $0x320] sm:$0xff] %v741_v52 }
  0xa3   : > { %744 = vst [vmem:[%s3099_s10 + $0x328] sm:$0xff] %v743_v53  ;;  %v745_v54 = vld [vmem:[%s3094_s27 + $0xcc0] sm:$0xff] }
  0xa4   : > { %v747_v55 = vld [vmem:[%s3094_s27 + $0xce0] sm:$0xff]  ;;  %746 = vst [vmem:[%s3099_s10 + $0x330] sm:$0xff] %v745_v54 }
  0xa5   : > { %v749_v56 = vld [vmem:[%s3094_s27 + $0xd00] sm:$0xff]  ;;  %748 = vst [vmem:[%s3099_s10 + $0x338] sm:$0xff] %v747_v55 }
  0xa6   : > { %750 = vst [vmem:[%s3099_s10 + $0x340] sm:$0xff] %v749_v56  ;;  %v751_v57 = vld [vmem:[%s3094_s27 + $0xd20] sm:$0xff] }
  0xa7   : > { %v753_v58 = vld [vmem:[%s3094_s27 + $0xd40] sm:$0xff]  ;;  %752 = vst [vmem:[%s3099_s10 + $0x348] sm:$0xff] %v751_v57 }
  0xa8   : > { %v755_v59 = vld [vmem:[%s3094_s27 + $0xd60] sm:$0xff]  ;;  %754 = vst [vmem:[%s3099_s10 + $0x350] sm:$0xff] %v753_v58 }
  0xa9   : > { %756 = vst [vmem:[%s3099_s10 + $0x358] sm:$0xff] %v755_v59  ;;  %v757_v60 = vld [vmem:[%s3094_s27 + $0xd80] sm:$0xff] }
  0xaa   : > { %v759_v61 = vld [vmem:[%s3094_s27 + $0xda0] sm:$0xff]  ;;  %758 = vst [vmem:[%s3099_s10 + $0x360] sm:$0xff] %v757_v60 }
  0xab   : > { %v761_v62 = vld [vmem:[%s3094_s27 + $0xdc0] sm:$0xff]  ;;  %760 = vst [vmem:[%s3099_s10 + $0x368] sm:$0xff] %v759_v61 }
  0xac   : > { %762 = vst [vmem:[%s3099_s10 + $0x370] sm:$0xff] %v761_v62  ;;  %v763_v63 = vld [vmem:[%s3094_s27 + $0xde0] sm:$0xff] }
  0xad   : > { %v765_v0 = vld [vmem:[%s3094_s27 + $0xe00] sm:$0xff]  ;;  %764 = vst [vmem:[%s3099_s10 + $0x378] sm:$0xff] %v763_v63 }
  0xae   : > { %v767_v1 = vld [vmem:[%s3094_s27 + $0xe20] sm:$0xff]  ;;  %766 = vst [vmem:[%s3099_s10 + $0x380] sm:$0xff] %v765_v0 }
  0xaf   : > { %768 = vst [vmem:[%s3099_s10 + $0x388] sm:$0xff] %v767_v1  ;;  %v769_v2 = vld [vmem:[%s3094_s27 + $0xe40] sm:$0xff] }
  0xb0   : > { %v771_v3 = vld [vmem:[%s3094_s27 + $0xe60] sm:$0xff]  ;;  %770 = vst [vmem:[%s3099_s10 + $0x390] sm:$0xff] %v769_v2 }
  0xb1   : > { %v773_v4 = vld [vmem:[%s3094_s27 + $0xe80] sm:$0xff]  ;;  %772 = vst [vmem:[%s3099_s10 + $0x398] sm:$0xff] %v771_v3 }
  0xb2   : > { %774 = vst [vmem:[%s3099_s10 + $0x3a0] sm:$0xff] %v773_v4  ;;  %v775_v5 = vld [vmem:[%s3094_s27 + $0xea0] sm:$0xff] }
  0xb3   : > { %v777_v6 = vld [vmem:[%s3094_s27 + $0xec0] sm:$0xff]  ;;  %776 = vst [vmem:[%s3099_s10 + $0x3a8] sm:$0xff] %v775_v5 }
  0xb4   : > { %v779_v7 = vld [vmem:[%s3094_s27 + $0xee0] sm:$0xff]  ;;  %778 = vst [vmem:[%s3099_s10 + $0x3b0] sm:$0xff] %v777_v6 }
  0xb5   : > { %780 = vst [vmem:[%s3099_s10 + $0x3b8] sm:$0xff] %v779_v7  ;;  %v781_v8 = vld [vmem:[%s3094_s27 + $0xf00] sm:$0xff] }
  0xb6   : > { %v783_v9 = vld [vmem:[%s3094_s27 + $0xf20] sm:$0xff]  ;;  %782 = vst [vmem:[%s3099_s10 + $0x3c0] sm:$0xff] %v781_v8 }
  0xb7   : > { %v785_v10 = vld [vmem:[%s3094_s27 + $0xf40] sm:$0xff]  ;;  %784 = vst [vmem:[%s3099_s10 + $0x3c8] sm:$0xff] %v783_v9 }
  0xb8   : > { %786 = vst [vmem:[%s3099_s10 + $0x3d0] sm:$0xff] %v785_v10  ;;  %v787_v11 = vld [vmem:[%s3094_s27 + $0xf60] sm:$0xff] }
  0xb9   : > { %v789_v12 = vld [vmem:[%s3094_s27 + $0xf80] sm:$0xff]  ;;  %788 = vst [vmem:[%s3099_s10 + $0x3d8] sm:$0xff] %v787_v11 }
  0xba   : > { %v791_v13 = vld [vmem:[%s3094_s27 + $0xfa0] sm:$0xff]  ;;  %790 = vst [vmem:[%s3099_s10 + $0x3e0] sm:$0xff] %v789_v12 }
  0xbb   : > { %792 = vst [vmem:[%s3099_s10 + $0x3e8] sm:$0xff] %v791_v13  ;;  %v793_v14 = vld [vmem:[%s3094_s27 + $0xfc0] sm:$0xff] }
  0xbc   : > { %v795_v15 = vld [vmem:[%s3094_s27 + $0xfe0] sm:$0xff]  ;;  %794 = vst [vmem:[%s3099_s10 + $0x3f0] sm:$0xff] %v793_v14 }
  0xbd   : > { %796 = vst [vmem:[%s3099_s10 + $0x3f8] sm:$0xff] %v795_v15 }
  0xbe PF: > { %p2373_p0 = scmp.ge.s32.totalorder %s2934_s25, 1  ;;  %p809_p1 = scmp.lt.s32.totalorder %s2934_s25, 9 }
  0xc0   : > { %p810_p2 = pnand %p2373_p0, %p809_p1 }
  0xc1   : > { %s816_s0 = sand.u32 (!%p810_p2), 1, %s2910_s19   ;;  %s823_s28 = sand.u32 (!%p810_p2), 1, %s2902_s17  }
  0xc2   : > { %813 = sbr.rel (%p810_p2) target bundleno = 604 (0x25c), region = 85  ;;  %s2374_s11 = sshll.u32 (!%p810_p2), %s816_s0, 7 }
  0xc3   : > { %s2375_s26 = sshll.u32 (!%p810_p2), %s823_s28, 10  ;;  %s850_s5 = sand.u32 (!%p810_p2), 1, %s2894_s15  }
  0xc4   : > { %s2377_s27 = sshll.u32 (!%p810_p2), %s2922_s22, 1  ;;  %s2376_s29 = sshll.u32 (!%p810_p2), %s850_s5, 5 }
  0xc5   : > { %p869_p3 = scmp.lt.s32.totalorder (!%p810_p2), %s2377_s27, 7  ;;  %s3372_s17 = scalar_lea.vmem (!%p810_p2), [#allocation3], %s2374_s11 }
  0xc6   : > { %s3374_s15 = scalar_lea.vmem (!%p810_p2), [#allocation4], %s2375_s26  ;;  %s3376_s0 = scalar_lea.vmem (!%p810_p2), [#allocation5], %s2376_s29 }
  0xc7   : > { %p2380_p4 = scmp.ne.s32.totalorder (!%p810_p2), %s2918_s21, 0 }
  0xc9   : > { %s3628_s27 = smov (!%p869_p3, %s2377_s27), 7  ;;  %888 = sbr.rel (%p2380_p4) target bundleno = 208 (0xd0), region = 97 }
  0xca   : > { %s871_s6 = scalar_lea.vmem %s3595_s2, %s3628_s27  ;;  %s2379_s9 = sshll.u32 %s3628_s27, 1  ;;  %v2936_v16 = vmov (!%p2380_p4), 0.0  }
  0xcb   : > { %s3370_s19 = scalar_lea.vmem %s3597_s4, %s2379_s9  ;;  %889 = vst [vmem:[#allocation2] sm:$0xff] (!%p2380_p4), %v2936_v16  ;;  %890 = vst [vmem:[#allocation2 + $0x8] sm:$0xff] (!%p2380_p4), %v2936_v16 }
  0xcc   : > { %891 = vst [vmem:[#allocation2 + $0x10] sm:$0xff] (!%p2380_p4), %v2936_v16  ;;  %892 = vst [vmem:[#allocation2 + $0x18] sm:$0xff] (!%p2380_p4), %v2936_v16 }
  0xcd   : > { %893 = vst [vmem:[#allocation2 + $0x20] sm:$0xff] (!%p2380_p4), %v2936_v16  ;;  %894 = vst [vmem:[#allocation2 + $0x28] sm:$0xff] (!%p2380_p4), %v2936_v16 }
  0xce   : > { %895 = vst [vmem:[#allocation2 + $0x30] sm:$0xff] (!%p2380_p4), %v2936_v16  ;;  %896 = vst [vmem:[#allocation2 + $0x38] sm:$0xff] (!%p2380_p4), %v2936_v16 }
  0xd0 PF: > { %v2656_v17 = vld [vmem:[%s3374_s15 + $0x4] ss:$8 sps:$4 sm:$0xff]   ;;  %v2660_v19 = vld [vmem:[%s3374_s15] ss:$8 sps:$4 sm:$0xff]   ;;  %v2662_v21 = vld [vmem:[%s3374_s15 + $0x14] ss:$8 sps:$4 sm:$0xff]  }
  0xd1   : > { %v2658_v18 = vld [vmem:[%s3374_s15 + $0x204] ss:$8 sps:$4 sm:$0xff]   ;;  %1769 = vmatprep.subr.bf16.mxu1 %v2656_v17  ;;  %v2661_v20 = vld [vmem:[%s3374_s15 + $0x200] ss:$8 sps:$4 sm:$0xff]   ;;  %v2664_v22 = vld [vmem:[%s3374_s15 + $0x214] ss:$8 sps:$4 sm:$0xff]  }
  0xd2   : > { %1875 = vmatprep.subr.bf16.mxu0 %v2658_v18  ;;  %1770 = vmatpush1.bf16.msra.mxu1 %v2660_v19  ;;  %v2666_v23 = vld [vmem:[%s3374_s15 + $0x10] ss:$8 sps:$4 sm:$0xff]   ;;  %v2668_v25 = vld [vmem:[%s3374_s15 + $0x24] ss:$8 sps:$4 sm:$0xff]   ;;  %v2672_v27 = vld [vmem:[%s3374_s15 + $0x20] ss:$8 sps:$4 sm:$0xff]  }
  0xd3   : > { %1876 = vmatpush1.bf16.msra.mxu0 %v2661_v20  ;;  %1771 = vmatprep.subr.bf16.mxu1 %v2662_v21  ;;  %v2667_v24 = vld [vmem:[%s3374_s15 + $0x210] ss:$8 sps:$4 sm:$0xff]   ;;  %v2670_v26 = vld [vmem:[%s3374_s15 + $0x224] ss:$8 sps:$4 sm:$0xff]   ;;  %v2673_v28 = vld [vmem:[%s3374_s15 + $0x220] ss:$8 sps:$4 sm:$0xff]  }
  0xd4   : > { %1877 = vmatprep.subr.bf16.mxu0 %v2664_v22  ;;  %v2674_v29 = vld [vmem:[%s3374_s15 + $0x34] ss:$8 sps:$4 sm:$0xff]   ;;  %v2678_v31 = vld [vmem:[%s3374_s15 + $0x30] ss:$8 sps:$4 sm:$0xff]   ;;  %v2680_v33 = vld [vmem:[%s3374_s15 + $0x44] ss:$8 sps:$4 sm:$0xff]  }
  0xd5   : > { %v2676_v30 = vld [vmem:[%s3374_s15 + $0x234] ss:$8 sps:$4 sm:$0xff]   ;;  %v2679_v32 = vld [vmem:[%s3374_s15 + $0x230] ss:$8 sps:$4 sm:$0xff]   ;;  %v2682_v34 = vld [vmem:[%s3374_s15 + $0x244] ss:$8 sps:$4 sm:$0xff]  }
  0xd6   : > { %1772 = vmatpush1.bf16.msra.mxu1 %v2666_v23  ;;  %v2684_v35 = vld [vmem:[%s3374_s15 + $0x40] ss:$8 sps:$4 sm:$0xff]   ;;  %v2686_v37 = vld [vmem:[%s3374_s15 + $0x54] ss:$8 sps:$4 sm:$0xff]   ;;  %v2690_v39 = vld [vmem:[%s3374_s15 + $0x50] ss:$8 sps:$4 sm:$0xff]  }
  0xd7   : > { %1878 = vmatpush1.bf16.msra.mxu0 %v2667_v24  ;;  %1773 = vmatprep.subr.bf16.mxu1 %v2668_v25  ;;  %v2685_v36 = vld [vmem:[%s3374_s15 + $0x240] ss:$8 sps:$4 sm:$0xff]   ;;  %v2688_v38 = vld [vmem:[%s3374_s15 + $0x254] ss:$8 sps:$4 sm:$0xff]   ;;  %v2691_v40 = vld [vmem:[%s3374_s15 + $0x250] ss:$8 sps:$4 sm:$0xff]  }
  0xd8   : > { %1879 = vmatprep.subr.bf16.mxu0 %v2670_v26  ;;  %v2692_v41 = vld [vmem:[%s3374_s15 + $0x64] ss:$8 sps:$4 sm:$0xff]   ;;  %v2696_v43 = vld [vmem:[%s3374_s15 + $0x60] ss:$8 sps:$4 sm:$0xff]   ;;  %v2698_v45 = vld [vmem:[%s3374_s15 + $0x74] ss:$8 sps:$4 sm:$0xff]  }
  0xd9   : > { %v2694_v42 = vld [vmem:[%s3374_s15 + $0x264] ss:$8 sps:$4 sm:$0xff]   ;;  %v2697_v44 = vld [vmem:[%s3374_s15 + $0x260] ss:$8 sps:$4 sm:$0xff]   ;;  %v2700_v46 = vld [vmem:[%s3374_s15 + $0x274] ss:$8 sps:$4 sm:$0xff]  }
  0xda   : > { %1774 = vmatpush1.bf16.msra.mxu1 %v2672_v27  ;;  %v2702_v47 = vld [vmem:[%s3374_s15 + $0x70] ss:$8 sps:$4 sm:$0xff]   ;;  %v2704_v49 = vld [vmem:[%s3374_s15 + $0x84] ss:$8 sps:$4 sm:$0xff]   ;;  %v2708_v51 = vld [vmem:[%s3374_s15 + $0x80] ss:$8 sps:$4 sm:$0xff]  }
  0xdb   : > { %1880 = vmatpush1.bf16.msra.mxu0 %v2673_v28  ;;  %1775 = vmatprep.subr.bf16.mxu1 %v2674_v29  ;;  %v2703_v48 = vld [vmem:[%s3374_s15 + $0x270] ss:$8 sps:$4 sm:$0xff]   ;;  %v2706_v50 = vld [vmem:[%s3374_s15 + $0x284] ss:$8 sps:$4 sm:$0xff]   ;;  %v2709_v52 = vld [vmem:[%s3374_s15 + $0x280] ss:$8 sps:$4 sm:$0xff]  }
  0xdc   : > { %1881 = vmatprep.subr.bf16.mxu0 %v2676_v30  ;;  %v2710_v53 = vld [vmem:[%s3374_s15 + $0x94] ss:$8 sps:$4 sm:$0xff]   ;;  %v2714_v55 = vld [vmem:[%s3374_s15 + $0x90] ss:$8 sps:$4 sm:$0xff]   ;;  %v2716_v57 = vld [vmem:[%s3374_s15 + $0xa4] ss:$8 sps:$4 sm:$0xff]  }
  0xdd   : > { %v2712_v54 = vld [vmem:[%s3374_s15 + $0x294] ss:$8 sps:$4 sm:$0xff]   ;;  %v2715_v56 = vld [vmem:[%s3374_s15 + $0x290] ss:$8 sps:$4 sm:$0xff]   ;;  %v2718_v58 = vld [vmem:[%s3374_s15 + $0x2a4] ss:$8 sps:$4 sm:$0xff]  }
  0xde   : > { %1776 = vmatpush1.bf16.msra.mxu1 %v2678_v31  ;;  %v2720_v59 = vld [vmem:[%s3374_s15 + $0xa0] ss:$8 sps:$4 sm:$0xff]   ;;  %v2722_v61 = vld [vmem:[%s3374_s15 + $0xb4] ss:$8 sps:$4 sm:$0xff]   ;;  %v2726_v63 = vld [vmem:[%s3374_s15 + $0xb0] ss:$8 sps:$4 sm:$0xff]  }
  0xdf   : > { %1882 = vmatpush1.bf16.msra.mxu0 %v2679_v32  ;;  %1777 = vmatprep.subr.bf16.mxu1 %v2680_v33  ;;  %v2721_v60 = vld [vmem:[%s3374_s15 + $0x2a0] ss:$8 sps:$4 sm:$0xff]   ;;  %v2724_v62 = vld [vmem:[%s3374_s15 + $0x2b4] ss:$8 sps:$4 sm:$0xff]   ;;  %v2727_v0 = vld [vmem:[%s3374_s15 + $0x2b0] ss:$8 sps:$4 sm:$0xff]  }
  0xe0   : > { %1883 = vmatprep.subr.bf16.mxu0 %v2682_v34  ;;  %v905_v1 = vld [vmem:[%s3372_s17] sm:$0xff]  ;;  %v907_v6 = vld [vmem:[%s3372_s17 + $0x10] sm:$0xff]  ;;  %p2525_p5 = scmp.ne.s32.totalorder %s2918_s21, 1 }
  0xe1   : > { %v909_v2 = vld [vmem:[%s3372_s17 + $0x20] sm:$0xff]  ;;  %v911_v7 = vld [vmem:[%s3372_s17 + $0x30] sm:$0xff]  ;;  %vm2132_vm0 = vcmask (!%p2525_p5), 1040384  }
  0xe2   : > { %1778 = vmatpush1.bf16.msra.mxu1 %v2684_v35  ;;  %v2728_v3 = vld [vmem:[%s3374_s15 + $0xc4] ss:$8 sps:$4 sm:$0xff]   ;;  %v2382_v5 = vcombine.high %v905_v1, %v909_v2  ;;  %v2386_v8 = vcombine.high %v907_v6, %v911_v7  ;;  %v2732_v9 = vld [vmem:[%s3374_s15 + $0xc0] ss:$8 sps:$4 sm:$0xff]   ;;  %v2734_v11 = vld [vmem:[%s3374_s15 + $0xd4] ss:$8 sps:$4 sm:$0xff]   ;;  %v2381_v25 = vcombine.low %v905_v1, %v909_v2  ;;  %v2385_v27 = vcombine.low %v907_v6, %v911_v7 }
  0xe3   : > { %1884 = vmatpush1.bf16.msra.mxu0 %v2685_v36  ;;  %1779 = vmatprep.subr.bf16.mxu1 %v2686_v37  ;;  %v2730_v4 = vld [vmem:[%s3374_s15 + $0x2c4] ss:$8 sps:$4 sm:$0xff]   ;;  %v2733_v10 = vld [vmem:[%s3374_s15 + $0x2c0] ss:$8 sps:$4 sm:$0xff]   ;;  %v2736_v12 = vld [vmem:[%s3374_s15 + $0x2d4] ss:$8 sps:$4 sm:$0xff]  }
  0xe4   : > { %1885 = vmatprep.subr.bf16.mxu0 %v2688_v38  ;;  %1801 = vmatprep.mubr.bf16.mxu1 %v2382_v5  ;;  %v2738_v13 = vld [vmem:[%s3374_s15 + $0xd0] ss:$8 sps:$4 sm:$0xff]   ;;  %v2740_v15 = vld [vmem:[%s3374_s15 + $0xe4] ss:$8 sps:$4 sm:$0xff]   ;;  %v2744_v17 = vld [vmem:[%s3374_s15 + $0xe0] ss:$8 sps:$4 sm:$0xff]  }
  0xe5   : > { %1907 = vmatprep.mubr.bf16.mxu0 %v2386_v8  ;;  %v2739_v14 = vld [vmem:[%s3374_s15 + $0x2d0] ss:$8 sps:$4 sm:$0xff]   ;;  %v2742_v16 = vld [vmem:[%s3374_s15 + $0x2e4] ss:$8 sps:$4 sm:$0xff]   ;;  %v2745_v18 = vld [vmem:[%s3374_s15 + $0x2e0] ss:$8 sps:$4 sm:$0xff]  }
  0xe6   : > { %1780 = vmatpush1.bf16.msra.mxu1 %v2690_v39  ;;  %v2746_v19 = vld [vmem:[%s3374_s15 + $0xf4] ss:$8 sps:$4 sm:$0xff]   ;;  %v2750_v21 = vld [vmem:[%s3374_s15 + $0xf0] ss:$8 sps:$4 sm:$0xff]   ;;  %v2754_v23 = vld [vmem:[%s3374_s15 + $0x104] ss:$8 sps:$4 sm:$0xff]  }
  0xe7   : > { %1886 = vmatpush1.bf16.msra.mxu0 %v2691_v40  ;;  %1781 = vmatprep.subr.bf16.mxu1 %v2692_v41  ;;  %v2748_v20 = vld [vmem:[%s3374_s15 + $0x2f4] ss:$8 sps:$4 sm:$0xff]   ;;  %v2751_v22 = vld [vmem:[%s3374_s15 + $0x2f0] ss:$8 sps:$4 sm:$0xff]   ;;  %v2757_v24 = vld [vmem:[%s3374_s15 + $0x304] ss:$8 sps:$4 sm:$0xff]  }
  0xe8   : > { %1887 = vmatprep.subr.bf16.mxu0 %v2694_v42  ;;  %v2752_v26 = vld [vmem:[%s3374_s15 + $0x100] ss:$8 sps:$4 sm:$0xff]   ;;  %v2760_v29 = vld [vmem:[%s3374_s15 + $0x114] ss:$8 sps:$4 sm:$0xff]   ;;  %v2758_v31 = vld [vmem:[%s3374_s15 + $0x110] ss:$8 sps:$4 sm:$0xff]  }
  0xe9   : > { %v2755_v28 = vld [vmem:[%s3374_s15 + $0x300] ss:$8 sps:$4 sm:$0xff]   ;;  %v2763_v30 = vld [vmem:[%s3374_s15 + $0x314] ss:$8 sps:$4 sm:$0xff]   ;;  %v2761_v32 = vld [vmem:[%s3374_s15 + $0x310] ss:$8 sps:$4 sm:$0xff]  }
  0xea   : > { %1782 = vmatpush1.bf16.msra.mxu1 %v2696_v43  ;;  %v2766_v33 = vld [vmem:[%s3374_s15 + $0x124] ss:$8 sps:$4 sm:$0xff]   ;;  %v2764_v35 = vld [vmem:[%s3374_s15 + $0x120] ss:$8 sps:$4 sm:$0xff]   ;;  %v2772_v37 = vld [vmem:[%s3374_s15 + $0x134] ss:$8 sps:$4 sm:$0xff]  }
  0xeb   : > { %1888 = vmatpush1.bf16.msra.mxu0 %v2697_v44  ;;  %1783 = vmatprep.subr.bf16.mxu1 %v2698_v45  ;;  %v2769_v34 = vld [vmem:[%s3374_s15 + $0x324] ss:$8 sps:$4 sm:$0xff]   ;;  %v2767_v36 = vld [vmem:[%s3374_s15 + $0x320] ss:$8 sps:$4 sm:$0xff]   ;;  %v2775_v38 = vld [vmem:[%s3374_s15 + $0x334] ss:$8 sps:$4 sm:$0xff]  }
  0xec   : > { %1889 = vmatprep.subr.bf16.mxu0 %v2700_v46  ;;  %v2770_v39 = vld [vmem:[%s3374_s15 + $0x130] ss:$8 sps:$4 sm:$0xff]   ;;  %v2778_v41 = vld [vmem:[%s3374_s15 + $0x144] ss:$8 sps:$4 sm:$0xff]   ;;  %v2776_v43 = vld [vmem:[%s3374_s15 + $0x140] ss:$8 sps:$4 sm:$0xff]  }
  0xed   : > { %v2773_v40 = vld [vmem:[%s3374_s15 + $0x330] ss:$8 sps:$4 sm:$0xff]   ;;  %v2781_v42 = vld [vmem:[%s3374_s15 + $0x344] ss:$8 sps:$4 sm:$0xff]   ;;  %v2779_v44 = vld [vmem:[%s3374_s15 + $0x340] ss:$8 sps:$4 sm:$0xff]  }
  0xee   : > { %1784 = vmatpush1.bf16.msra.mxu1 %v2702_v47  ;;  %v2784_v45 = vld [vmem:[%s3374_s15 + $0x154] ss:$8 sps:$4 sm:$0xff]   ;;  %v913_v47 = vld [vmem:[%s3372_s17 + $0x40] sm:$0xff]  ;;  %v2794_v5 = vld [vmem:[%s3374_s15 + $0x170] ss:$8 sps:$4 sm:$0xff]  }
  0xef   : > { %1890 = vmatpush1.bf16.msra.mxu0 %v2703_v48  ;;  %1785 = vmatprep.subr.bf16.mxu1 %v2704_v49  ;;  %v2787_v46 = vld [vmem:[%s3374_s15 + $0x354] ss:$8 sps:$4 sm:$0xff]   ;;  %v917_v48 = vld [vmem:[%s3372_s17 + $0x60] sm:$0xff]  ;;  %v2797_v6 = vld [vmem:[%s3374_s15 + $0x370] ss:$8 sps:$4 sm:$0xff]  }
  0xf0   : > { %1891 = vmatprep.subr.bf16.mxu0 %v2706_v50  ;;  %v2390_v49 = vcombine.high %v913_v47, %v917_v48  ;;  %v915_v50 = vld [vmem:[%s3372_s17 + $0x50] sm:$0xff]  ;;  %v2802_v7 = vld [vmem:[%s3374_s15 + $0x184] ss:$8 sps:$4 sm:$0xff]  }
  0xf1   : > { %v2799_v1 = vld [vmem:[%s3374_s15 + $0x374] ss:$8 sps:$4 sm:$0xff]   ;;  %v2805_v8 = vld [vmem:[%s3374_s15 + $0x384] ss:$8 sps:$4 sm:$0xff]  }
  0xf2   : > { %1786 = vmatpush1.bf16.msra.mxu1 %v2708_v51  ;;  %v919_v51 = vld [vmem:[%s3372_s17 + $0x70] sm:$0xff] }
  0xf3   : > { %1892 = vmatpush1.bf16.msra.mxu0 %v2709_v52  ;;  %1787 = vmatprep.subr.bf16.mxu1 %v2710_v53  ;;  %v2782_v52 = vld [vmem:[%s3374_s15 + $0x150] ss:$8 sps:$4 sm:$0xff]  }
  0xf4   : > { %1893 = vmatprep.subr.bf16.mxu0 %v2712_v54  ;;  %v2785_v53 = vld [vmem:[%s3374_s15 + $0x350] ss:$8 sps:$4 sm:$0xff]   ;;  %v2394_v54 = vcombine.high %v915_v50, %v919_v51 }
  0xf6   : > { %1788 = vmatpush1.bf16.msra.mxu1 %v2714_v55  ;;  %v2389_v55 = vcombine.low %v913_v47, %v917_v48 }
  0xf7   : > { %1894 = vmatpush1.bf16.msra.mxu0 %v2715_v56  ;;  %1789 = vmatprep.subr.bf16.mxu1 %v2716_v57  ;;  %v2393_v56 = vcombine.low %v915_v50, %v919_v51  ;;  %v2790_v57 = vld [vmem:[%s3374_s15 + $0x164] ss:$8 sps:$4 sm:$0xff]  }
  0xf8   : > { %1895 = vmatprep.subr.bf16.mxu0 %v2718_v58  ;;  %v2793_v58 = vld [vmem:[%s3374_s15 + $0x364] ss:$8 sps:$4 sm:$0xff]  }
  0xf9   : > { %v897_v50 = vld [vmem:[#allocation2] sm:$0xff] }
  0xfa   : > { %1790 = vmatpush1.bf16.msra.mxu1 %v2720_v59  ;;  %v2788_v59 = vld [vmem:[%s3374_s15 + $0x160] ss:$8 sps:$4 sm:$0xff]  }
  0xfb   : > { %1896 = vmatpush1.bf16.msra.mxu0 %v2721_v60  ;;  %1791 = vmatprep.subr.bf16.mxu1 %v2722_v61  ;;  %v2791_v60 = vld [vmem:[%s3374_s15 + $0x360] ss:$8 sps:$4 sm:$0xff]  }
  0xfc   : > { %1897 = vmatprep.subr.bf16.mxu0 %v2724_v62  ;;  %v3480_v61 = vld [vmem:[%s3372_s17 + $0x8] sm:$0xff] }
  0xfd   : > { %v3483_v62 = vld [vmem:[%s3372_s17 + $0x28] sm:$0xff] }
  0xfe   : > { %1792 = vmatpush1.bf16.msra.mxu1 %v2726_v63  ;;  %v3486_v63 = vld [vmem:[%s3372_s17 + $0x18] sm:$0xff]  ;;  %v2384_v2 = vcombine.high %v3480_v61, %v3483_v62 }
  0xff   : > { %1898 = vmatpush1.bf16.msra.mxu0 %v2727_v0  ;;  %1793 = vmatprep.subr.bf16.mxu1 %v2728_v3  ;;  %v2796_v0 = vld [vmem:[%s3374_s15 + $0x174] ss:$8 sps:$4 sm:$0xff]  }
 0x100   : > { %1899 = vmatprep.subr.bf16.mxu0 %v2730_v4  ;;  %v3493_v3 = vld [vmem:[%s3372_s17 + $0x38] sm:$0xff] }
 0x101   : > { %v2388_v4 = vcombine.high %v3486_v63, %v3493_v3 }
 0x102   : > { %1794 = vmatpush1.bf16.msra.mxu1 %v2732_v9  ;;  %v2800_v9 = vld [vmem:[%s3374_s15 + $0x180] ss:$8 sps:$4 sm:$0xff]  }
 0x103   : > { %1900 = vmatpush1.bf16.msra.mxu0 %v2733_v10  ;;  %1795 = vmatprep.subr.bf16.mxu1 %v2734_v11  ;;  %v2803_v10 = vld [vmem:[%s3374_s15 + $0x380] ss:$8 sps:$4 sm:$0xff]   ;;  %v2808_v11 = vld [vmem:[%s3374_s15 + $0x194] ss:$8 sps:$4 sm:$0xff]  }
 0x104   : > { %1901 = vmatprep.subr.bf16.mxu0 %v2736_v12  ;;  %v2811_v12 = vld [vmem:[%s3374_s15 + $0x394] ss:$8 sps:$4 sm:$0xff]  }
 0x106   : > { %1796 = vmatpush1.bf16.msra.mxu1 %v2738_v13  ;;  %v2806_v13 = vld [vmem:[%s3374_s15 + $0x190] ss:$8 sps:$4 sm:$0xff]  }
 0x107   : > { %1902 = vmatpush1.bf16.msra.mxu0 %v2739_v14  ;;  %1797 = vmatprep.subr.bf16.mxu1 %v2740_v15  ;;  %v2809_v14 = vld [vmem:[%s3374_s15 + $0x390] ss:$8 sps:$4 sm:$0xff]   ;;  %v2814_v15 = vld [vmem:[%s3374_s15 + $0x1a4] ss:$8 sps:$4 sm:$0xff]  }
 0x108   : > { %1903 = vmatprep.subr.bf16.mxu0 %v2742_v16  ;;  %v2817_v16 = vld [vmem:[%s3374_s15 + $0x3a4] ss:$8 sps:$4 sm:$0xff]  }
 0x10a   : > { %1798 = vmatpush1.bf16.msra.mxu1 %v2744_v17  ;;  %v2812_v17 = vld [vmem:[%s3374_s15 + $0x1a0] ss:$8 sps:$4 sm:$0xff]  }
 0x10b   : > { %1904 = vmatpush1.bf16.msra.mxu0 %v2745_v18  ;;  %1799 = vmatprep.subr.bf16.mxu1 %v2746_v19  ;;  %v2815_v18 = vld [vmem:[%s3374_s15 + $0x3a0] ss:$8 sps:$4 sm:$0xff]   ;;  %v2820_v19 = vld [vmem:[%s3374_s15 + $0x1b4] ss:$8 sps:$4 sm:$0xff]  }
 0x10c   : > { %1905 = vmatprep.subr.bf16.mxu0 %v2748_v20  ;;  %v2823_v20 = vld [vmem:[%s3374_s15 + $0x3b4] ss:$8 sps:$4 sm:$0xff]  }
 0x10e   : > { %1800 = vmatpush1.bf16.msra.mxu1 %v2750_v21  ;;  %v2818_v21 = vld [vmem:[%s3374_s15 + $0x1b0] ss:$8 sps:$4 sm:$0xff]  }
 0x10f   : > { %1906 = vmatpush1.bf16.msra.mxu0 %v2751_v22  ;;  %1822 = vmatprep.subr.bf16.mxu1 %v2754_v23  ;;  %v2821_v22 = vld [vmem:[%s3374_s15 + $0x3b0] ss:$8 sps:$4 sm:$0xff]   ;;  %v2826_v23 = vld [vmem:[%s3374_s15 + $0x1c4] ss:$8 sps:$4 sm:$0xff]  }
 0x110   : > { %1928 = vmatprep.subr.bf16.mxu0 %v2757_v24  ;;  %v2829_v24 = vld [vmem:[%s3374_s15 + $0x3c4] ss:$8 sps:$4 sm:$0xff]  }
 0x111   : > { %1802 = vmatmul.mubr.bf16.vlgmr.msra.gmra.mrb[0].mxu1 %v2381_v25  ;;  %v2824_v25 = vld [vmem:[%s3374_s15 + $0x1c0] ss:$8 sps:$4 sm:$0xff]  }
 0x112   : > { %1908 = vmatmul.mubr.bf16.vlgmr.msra.gmra.mrb[0].mxu0 %v2385_v27  ;;  %1823 = vmatpush1.bf16.msra.mxu1 %v2752_v26  ;;  %v2827_v26 = vld [vmem:[%s3374_s15 + $0x3c0] ss:$8 sps:$4 sm:$0xff]   ;;  %v2832_v27 = vld [vmem:[%s3374_s15 + $0x1d4] ss:$8 sps:$4 sm:$0xff]  }
 0x113   : > { %1929 = vmatpush1.bf16.msra.mxu0 %v2755_v28  ;;  %1824 = vmatprep.subr.bf16.mxu1 %v2760_v29  ;;  %v2835_v28 = vld [vmem:[%s3374_s15 + $0x3d4] ss:$8 sps:$4 sm:$0xff]   ;;  %v2830_v29 = vld [vmem:[%s3374_s15 + $0x1d0] ss:$8 sps:$4 sm:$0xff]  }
 0x114   : > { %1930 = vmatprep.subr.bf16.mxu0 %v2763_v30  ;;  %1811 = vmatprep.mubr.bf16.mxu1 %v2390_v49  ;;  %v2833_v30 = vld [vmem:[%s3374_s15 + $0x3d0] ss:$8 sps:$4 sm:$0xff]  }
 0x115   : > { %1917 = vmatprep.mubr.bf16.mxu0 %v2394_v54  ;;  %v898_v54 = vld [vmem:[#allocation2 + $0x8] sm:$0xff] }
 0x116   : > { %1825 = vmatpush1.bf16.msra.mxu1 %v2758_v31  ;;  %v2838_v31 = vld [vmem:[%s3374_s15 + $0x1e4] ss:$8 sps:$4 sm:$0xff]  }
 0x117   : > { %1931 = vmatpush1.bf16.msra.mxu0 %v2761_v32  ;;  %1826 = vmatprep.subr.bf16.mxu1 %v2766_v33  ;;  %v2841_v32 = vld [vmem:[%s3374_s15 + $0x3e4] ss:$8 sps:$4 sm:$0xff]   ;;  %v2836_v33 = vld [vmem:[%s3374_s15 + $0x1e0] ss:$8 sps:$4 sm:$0xff]  }
 0x118   : > { %1932 = vmatprep.subr.bf16.mxu0 %v2769_v34  ;;  %v2839_v34 = vld [vmem:[%s3374_s15 + $0x3e0] ss:$8 sps:$4 sm:$0xff]  }
 0x119   : > { %1812 = vmatmul.mubr.bf16.gmra.mrb[4].mxu1 %v2389_v55 }
 0x11a   : > { %1827 = vmatpush1.bf16.msra.mxu1 %v2764_v35  ;;  %1918 = vmatmul.mubr.bf16.gmra.mrb[4].mxu0 %v2393_v56  ;;  %v2844_v35 = vld [vmem:[%s3374_s15 + $0x1f4] ss:$8 sps:$4 sm:$0xff]  }
 0x11b   : > { %1933 = vmatpush1.bf16.msra.mxu0 %v2767_v36  ;;  %1828 = vmatprep.subr.bf16.mxu1 %v2772_v37  ;;  %v2847_v36 = vld [vmem:[%s3374_s15 + $0x3f4] ss:$8 sps:$4 sm:$0xff]   ;;  %v2842_v37 = vld [vmem:[%s3374_s15 + $0x1f0] ss:$8 sps:$4 sm:$0xff]  }
 0x11c   : > { %1934 = vmatprep.subr.bf16.mxu0 %v2775_v38  ;;  %1854 = vmatprep.mubr.bf16.mxu1 %v2384_v2  ;;  %v2845_v38 = vld [vmem:[%s3374_s15 + $0x3f0] ss:$8 sps:$4 sm:$0xff]  }
 0x11d   : > { %1960 = vmatprep.mubr.bf16.mxu0 %v2388_v4 }
 0x11e   : > { %1829 = vmatpush1.bf16.msra.mxu1 %v2770_v39  ;;  %v914_v39 = vld [vmem:[%s3372_s17 + $0x48] sm:$0xff] }
 0x11f   : > { %1935 = vmatpush1.bf16.msra.mxu0 %v2773_v40  ;;  %1830 = vmatprep.subr.bf16.mxu1 %v2778_v41  ;;  %v918_v40 = vld [vmem:[%s3372_s17 + $0x68] sm:$0xff]  ;;  %v916_v41 = vld [vmem:[%s3372_s17 + $0x58] sm:$0xff] }
 0x120   : > { %1936 = vmatprep.subr.bf16.mxu0 %v2781_v42  ;;  %v920_v42 = vld [vmem:[%s3372_s17 + $0x78] sm:$0xff]  ;;  %v2391_v47 = vcombine.low %v914_v39, %v918_v40 }
 0x121   : > { %v2395_v48 = vcombine.low %v916_v41, %v920_v42 }
 0x122   : > { %1831 = vmatpush1.bf16.msra.mxu1 %v2776_v43  ;;  %v2383_v43 = vcombine.low %v3480_v61, %v3483_v62 }
 0x123   : > { %1937 = vmatpush1.bf16.msra.mxu0 %v2779_v44  ;;  %1832 = vmatprep.subr.bf16.mxu1 %v2784_v45  ;;  %v2387_v44 = vcombine.low %v3486_v63, %v3493_v3  ;;  %v2392_v45 = vcombine.high %v914_v39, %v918_v40  ;;  %v900_v63 = vld [vmem:[#allocation2 + $0x18] sm:$0xff] }
 0x124   : > { %1938 = vmatprep.subr.bf16.mxu0 %v2787_v46  ;;  %v2396_v46 = vcombine.high %v916_v41, %v920_v42 }
 0x126   : > { %1833 = vmatpush1.bf16.msra.mxu1 %v2782_v52 }
 0x127   : > { %1939 = vmatpush1.bf16.msra.mxu0 %v2785_v53  ;;  %1834 = vmatprep.subr.bf16.mxu1 %v2790_v57 }
 0x128   : > { %1940 = vmatprep.subr.bf16.mxu0 %v2793_v58  ;;  %v899_v58 = vld [vmem:[#allocation2 + $0x10] sm:$0xff] }
 0x12a   : > { %1835 = vmatpush1.bf16.msra.mxu1 %v2788_v59 }
 0x12b   : > { %1941 = vmatpush1.bf16.msra.mxu0 %v2791_v60  ;;  %1836 = vmatprep.subr.bf16.mxu1 %v2796_v0 }
 0x12c   : > { %1942 = vmatprep.subr.bf16.mxu0 %v2799_v1 }
 0x12e   : > { %1837 = vmatpush1.bf16.msra.mxu1 %v2794_v5 }
 0x12f   : > { %1943 = vmatpush1.bf16.msra.mxu0 %v2797_v6  ;;  %1838 = vmatprep.subr.bf16.mxu1 %v2802_v7  ;;  %v901_v6 = vld [vmem:[#allocation2 + $0x20] sm:$0xff] }
 0x130   : > { %1944 = vmatprep.subr.bf16.mxu0 %v2805_v8 }
 0x132   : > { %1839 = vmatpush1.bf16.msra.mxu1 %v2800_v9 }
 0x133   : > { %1945 = vmatpush1.bf16.msra.mxu0 %v2803_v10  ;;  %1840 = vmatprep.subr.bf16.mxu1 %v2808_v11  ;;  %v902_v10 = vld [vmem:[#allocation2 + $0x28] sm:$0xff] }
 0x134   : > { %1946 = vmatprep.subr.bf16.mxu0 %v2811_v12 }
 0x136   : > { %1841 = vmatpush1.bf16.msra.mxu1 %v2806_v13 }
 0x137   : > { %1947 = vmatpush1.bf16.msra.mxu0 %v2809_v14  ;;  %1842 = vmatprep.subr.bf16.mxu1 %v2814_v15  ;;  %v903_v14 = vld [vmem:[#allocation2 + $0x30] sm:$0xff] }
 0x138   : > { %1948 = vmatprep.subr.bf16.mxu0 %v2817_v16 }
 0x13a   : > { %1843 = vmatpush1.bf16.msra.mxu1 %v2812_v17 }
 0x13b   : > { %1949 = vmatpush1.bf16.msra.mxu0 %v2815_v18  ;;  %1844 = vmatprep.subr.bf16.mxu1 %v2820_v19  ;;  %v904_v19 = vld [vmem:[#allocation2 + $0x38] sm:$0xff] }
 0x13c   : > { %1950 = vmatprep.subr.bf16.mxu0 %v2823_v20 }
 0x13e   : > { %1845 = vmatpush1.bf16.msra.mxu1 %v2818_v21 }
 0x13f   : > { %1951 = vmatpush1.bf16.msra.mxu0 %v2821_v22  ;;  %1846 = vmatprep.subr.bf16.mxu1 %v2826_v23 }
 0x140   : > { %1952 = vmatprep.subr.bf16.mxu0 %v2829_v24 }
 0x142   : > { %1847 = vmatpush1.bf16.msra.mxu1 %v2824_v25  ;;  %v2011_v25 = vlaneseq (!%p2525_p5) }
 0x143   : > { %1953 = vmatpush1.bf16.msra.mxu0 %v2827_v26  ;;  %1848 = vmatprep.subr.bf16.mxu1 %v2832_v27  ;;  %v2009_v27 = vld [vmem:[%s871_s6] sm:$0x3] (!%p2525_p5) }
 0x144   : > { %1954 = vmatprep.subr.bf16.mxu0 %v2835_v28  ;;  %v2012_v26 = vshrl.u32 (!%p2525_p5), %v2011_v25, 7 }
 0x146   : > { %1849 = vmatpush1.bf16.msra.mxu1 %v2830_v29 }
 0x147   : > { %1955 = vmatpush1.bf16.msra.mxu0 %v2833_v30  ;;  %1850 = vmatprep.subr.bf16.mxu1 %v2838_v31  ;;  %v2013_v30 = vsub.s32 (!%p2525_p5), 0, %v2012_v26  ;;  %v2017_v31 = vsub.s32 (!%p2525_p5), 1, %v2012_v26 }
 0x148   : > { %1956 = vmatprep.subr.bf16.mxu0 %v2841_v32 }
 0x14a   : > { %1851 = vmatpush1.bf16.msra.mxu1 %v2836_v33 }
 0x14b   : > { %1957 = vmatpush1.bf16.msra.mxu0 %v2839_v34  ;;  %1852 = vmatprep.subr.bf16.mxu1 %v2844_v35  ;;  %v2014_v35 = vrot.slane (!%p2525_p5), %v2009_v27, %v2013_v30 }
 0x14c   : > { %1958 = vmatprep.subr.bf16.mxu0 %v2847_v36  ;;  %v2018_v36 = vrot.slane (!%p2525_p5), %v2009_v27, %v2017_v31 }
 0x14e   : > { %1853 = vmatpush1.bf16.msra.mxu1 %v2842_v37 }
 0x14f   : > { %1959 = vmatpush1.bf16.msra.mxu0 %v2845_v38 }
 0x151   : > { %1855 = vmatmul.mubr.bf16.vlgmr.msra.gmra.mrb[0].mxu1 %v2383_v43 }
 0x152   : > { %1961 = vmatmul.mubr.bf16.vlgmr.msra.gmra.mrb[0].mxu0 %v2387_v44  ;;  %1864 = vmatprep.mubr.bf16.mxu1 %v2392_v45 }
 0x153   : > { %1970 = vmatprep.mubr.bf16.mxu0 %v2396_v46 }
 0x159   : > { %1865 = vmatmul.mubr.bf16.gmra.mrb[4].mxu1 %v2391_v47 }
 0x15a   : > { %1971 = vmatmul.mubr.bf16.gmra.mrb[4].mxu0 %v2395_v48 }
 0x224   : > { %v1856_v49 = vpop.f32.mrb[0].mxu1 }
 0x225   : > { %v1962_v51 = vpop.f32.mrb[0].mxu0  ;;  %v1858_v53 = vpop.f32.mrb[1].mxu1 }
 0x226   : > { %v2543_v52 = vadd.f32 %v1962_v51, %v1856_v49  ;;  %v1964_v55 = vpop.f32.mrb[1].mxu0  ;;  %v1860_v57 = vpop.f32.mrb[2].mxu1 }
 0x227   : > { %v2544_v56 = vadd.f32 %v1964_v55, %v1858_v53  ;;  %v1966_v59 = vpop.f32.mrb[2].mxu0  ;;  %v1862_v62 = vpop.f32.mrb[3].mxu1 }
 0x228   : > { %v1981_v60 = vadd.f32 %v2543_v52, %v897_v50  ;;  %v2545_v61 = vadd.f32 %v1966_v59, %v1860_v57  ;;  %v1968_v0 = vpop.f32.mrb[3].mxu0 }
 0x229   : > { %v1982_v1 = vadd.f32 %v2544_v56, %v898_v54  ;;  %v2546_v2 = vadd.f32 %v1968_v0, %v1862_v62 }
 0x22a   : > { %1989 = vst [vmem:[#allocation2] sm:$0xff] %v1981_v60  ;;  %v1983_v3 = vadd.f32 %v2545_v61, %v899_v58 }
 0x22b   : > { %1990 = vst [vmem:[#allocation2 + $0x8] sm:$0xff] %v1982_v1  ;;  %v1984_v4 = vadd.f32 %v2546_v2, %v900_v63 }
 0x22c   : > { %1991 = vst [vmem:[#allocation2 + $0x10] sm:$0xff] %v1983_v3  ;;  %v1866_v5 = vpop.f32.mrb[4].mxu1 }
 0x22d   : > { %1992 = vst [vmem:[#allocation2 + $0x18] sm:$0xff] %v1984_v4  ;;  %v1972_v7 = vpop.f32.mrb[4].mxu0  ;;  %v1868_v9 = vpop.f32.mrb[5].mxu1 }
 0x22e   : > { %v2547_v8 = vadd.f32 %v1972_v7, %v1866_v5  ;;  %v1974_v11 = vpop.f32.mrb[5].mxu0  ;;  %v1870_v13 = vpop.f32.mrb[6].mxu1 }
 0x22f   : > { %v2548_v12 = vadd.f32 %v1974_v11, %v1868_v9  ;;  %v1976_v15 = vpop.f32.mrb[6].mxu0  ;;  %v1872_v18 = vpop.f32.mrb[7].mxu1  ;;  %2000 = sbr.rel (%p2525_p5) target bundleno = 597 (0x255), region = 101 }
 0x230   : > { %v1985_v16 = vadd.f32 %v2547_v8, %v901_v6  ;;  %v2549_v17 = vadd.f32 %v1976_v15, %v1870_v13  ;;  %v1978_v20 = vpop.f32.mrb[7].mxu0 }
 0x231   : > { %v1986_v21 = vadd.f32 %v2548_v12, %v902_v10  ;;  %v2550_v22 = vadd.f32 %v1978_v20, %v1872_v18  ;;  %v2001_v28 = vld [vmem:[#allocation2] sm:$0xff] (!%p2525_p5) }
 0x232   : > { %1993 = vst [vmem:[#allocation2 + $0x20] sm:$0xff] %v1985_v16  ;;  %v1987_v23 = vadd.f32 %v2549_v17, %v903_v14  ;;  %v2002_v29 = vld [vmem:[#allocation2 + $0x8] sm:$0xff] (!%p2525_p5)  ;;  %v2021_v40 = vadd.f32 (!%p2525_p5), %v2014_v35, %v2001_v28 }
 0x233   : > { %1994 = vst [vmem:[#allocation2 + $0x28] sm:$0xff] %v1986_v21  ;;  %v1988_v24 = vadd.f32 %v2550_v22, %v904_v19  ;;  %v2003_v32 = vld [vmem:[#allocation2 + $0x10] sm:$0xff] (!%p2525_p5)  ;;  %v2022_v41 = vadd.f32 (!%p2525_p5), %v2018_v36, %v2002_v29 }
 0x234   : > { %1995 = vst [vmem:[#allocation2 + $0x30] sm:$0xff] %v1987_v23  ;;  %v2004_v33 = vld [vmem:[#allocation2 + $0x18] sm:$0xff] (!%p2525_p5)  ;;  %v2023_v42 = vadd.f32 (!%p2525_p5), %v2014_v35, %v2003_v32  ;;  %v2029_v48 = vmax.f32 (!%p2525_p5), %v2021_v40, 0.0 }
 0x235   : > { %1996 = vst [vmem:[#allocation2 + $0x38] sm:$0xff] %v1988_v24  ;;  %v2024_v43 = vadd.f32 (!%p2525_p5), %v2018_v36, %v2004_v33  ;;  %v2030_v49 = vmax.f32 (!%p2525_p5), %v2022_v41, 0.0 }
 0x236   : > { %v2031_v50 = vmax.f32 %v2023_v42, 0.0  ;;  %v2106_v57 = vmul.f32 %v2029_v48, %v2029_v48 }
 0x237   : > { %v2032_v51 = vmax.f32 %v2024_v43, 0.0  ;;  %v2538_v56 = vpack.c.bf16 %v2030_v49, %v2029_v48  ;;  %v2107_v58 = vmul.f32 %v2030_v49, %v2030_v49 }
 0x238   : > { %v2088_v60 = vadd.f32 %v2031_v50, %v2029_v48  ;;  %v2108_v62 = vmul.f32 %v2031_v50, %v2031_v50 }
 0x239   : > { %v2005_v34 = vld [vmem:[#allocation2 + $0x20] sm:$0xff]  ;;  %v2539_v59 = vpack.c.bf16 %v2032_v51, %v2031_v50  ;;  %v2097_v61 = vadd.f32 %v2032_v51, %v2030_v49  ;;  %v2109_v63 = vmul.f32 %v2032_v51, %v2032_v51  ;;  %2061 = vst [vmem:[%s3376_s0] sm:$0xff] %v2538_v56 }
 0x23a   : > { %v2006_v37 = vld [vmem:[#allocation2 + $0x28] sm:$0xff]  ;;  %v2025_v44 = vadd.f32 %v2014_v35, %v2005_v34  ;;  %v2114_v4 = vadd.f32 %v2108_v62, %v2106_v57 }
 0x23b   : > { %v2007_v38 = vld [vmem:[#allocation2 + $0x30] sm:$0xff]  ;;  %v2026_v45 = vadd.f32 %v2018_v36, %v2006_v37  ;;  %2062 = vst [vmem:[%s3376_s0 + $0x8] sm:$0xff] %v2539_v59  ;;  %v2123_v5 = vadd.f32 %v2109_v63, %v2107_v58 }
 0x23c   : > { %v2008_v39 = vld [vmem:[#allocation2 + $0x38] sm:$0xff]  ;;  %v2027_v46 = vadd.f32 %v2014_v35, %v2007_v38  ;;  %v2033_v52 = vmax.f32 %v2025_v44, 0.0 }
 0x23d   : > { %v2028_v47 = vadd.f32 %v2018_v36, %v2008_v39  ;;  %v2034_v53 = vmax.f32 %v2026_v45, 0.0 }
 0x23e   : > { %v2035_v54 = vmax.f32 %v2027_v46, 0.0  ;;  %v2110_v1 = vmul.f32 %v2033_v52, %v2033_v52  ;;  %v2089_v6 = vadd.f32 %v2088_v60, %v2033_v52 }
 0x23f   : > { %v2036_v55 = vmax.f32 %v2028_v47, 0.0  ;;  %v2540_v0 = vpack.c.bf16 %v2034_v53, %v2033_v52  ;;  %v2111_v2 = vmul.f32 %v2034_v53, %v2034_v53  ;;  %v2098_v7 = vadd.f32 %v2097_v61, %v2034_v53 }
 0x240   : > { %v2112_v8 = vmul.f32 %v2035_v54, %v2035_v54  ;;  %v2115_v10 = vadd.f32 %v2114_v4, %v2110_v1  ;;  %v2090_v12 = vadd.f32 %v2089_v6, %v2035_v54 }
 0x241   : > { %v2541_v3 = vpack.c.bf16 %v2036_v55, %v2035_v54  ;;  %2063 = vst [vmem:[%s3376_s0 + $0x10] sm:$0xff] %v2540_v0  ;;  %v2113_v9 = vmul.f32 %v2036_v55, %v2036_v55  ;;  %v2124_v11 = vadd.f32 %v2123_v5, %v2111_v2  ;;  %v2099_v13 = vadd.f32 %v2098_v7, %v2036_v55 }
 0x242   : > { %v2091_v14 = vrot.slane %v2090_v12, 4  ;;  %v2116_v16 = vadd.f32 %v2115_v10, %v2112_v8 }
 0x243   : > { %2064 = vst [vmem:[%s3376_s0 + $0x18] sm:$0xff] %v2541_v3  ;;  %v2100_v15 = vrot.slane %v2099_v13, 4  ;;  %v2125_v17 = vadd.f32 %v2124_v11, %v2113_v9 }
 0x244   : > { %v2092_v18 = vadd.f32 %v2091_v14, %v2090_v12  ;;  %v2117_v20 = vrot.slane %v2116_v16, 4 }
 0x245   : > { %v2101_v19 = vadd.f32 %v2100_v15, %v2099_v13  ;;  %v2126_v21 = vrot.slane %v2125_v17, 4 }
 0x246   : > { %v2093_v22 = vrot.slane %v2092_v18, 2  ;;  %v2118_v24 = vadd.f32 %v2117_v20, %v2116_v16 }
 0x247   : > { %v2102_v23 = vrot.slane %v2101_v19, 2  ;;  %v2127_v25 = vadd.f32 %v2126_v21, %v2125_v17 }
 0x248   : > { %v2094_v26 = vadd.f32 %v2093_v22, %v2092_v18  ;;  %v2119_v28 = vrot.slane %v2118_v24, 2 }
 0x249   : > { %v2103_v27 = vadd.f32 %v2102_v23, %v2101_v19  ;;  %v2128_v29 = vrot.slane %v2127_v25, 2 }
 0x24a   : > { %v2095_v30 = vrot.slane %v2094_v26, 1  ;;  %v2120_v32 = vadd.f32 %v2119_v28, %v2118_v24 }
 0x24b   : > { %v2104_v31 = vrot.slane %v2103_v27, 1  ;;  %v2129_v33 = vadd.f32 %v2128_v29, %v2127_v25 }
 0x24c   : > { %v2096_v34 = vadd.f32 %v2095_v30, %v2094_v26  ;;  %v2121_v36 = vrot.slane %v2120_v32, 1 }
 0x24d   : > { %v2105_v35 = vadd.f32 %v2104_v31, %v2103_v27  ;;  %v2130_v37 = vrot.slane %v2129_v33, 1 }
 0x24e   : > { %v2122_v38 = vadd.f32 %v2121_v36, %v2120_v32 }
 0x24f   : > { %v2131_v39 = vadd.f32 %v2130_v37, %v2129_v33 }
 0x250   : > { %v2133_v40 = vsel %vm2132_vm0, %v2096_v34, %v2122_v38 }
 0x251   : > { %v2134_v41 = vsel %vm2132_vm0, %v2105_v35, %v2131_v39 }
 0x252   : > { %v2137_v42 = vcombine.low %v2133_v40, %v2134_v41 }
 0x254   : > { %2530 = vst.sshfl [vmem:[%s3370_s19] sm:$0x33 pattern:$0x76325410] %v2137_v42 }
 0x255 PF: > { %2162 = sbr.rel (!%p3056_p12) target bundleno = 604 (0x25c), region = 105  ;;  %s2542_s21 = sshll.u32 (%p3056_p12), %s2922_s22, 3  ;;  %v2202_v43 = vld [vmem:[%s3376_s0] sm:$0xff] (%p3056_p12)  ;;  %v2204_v44 = vld [vmem:[%s3376_s0 + $0x8] sm:$0xff] (%p3056_p12)  ;;  %v2206_v45 = vld [vmem:[%s3376_s0 + $0x10] sm:$0xff] (%p3056_p12) }
 0x256   : > { %s2168_s5 = scalar_lea.vmem (%p3056_p12), %s3596_s3, %s2542_s21  ;;  %v2208_v46 = vld [vmem:[%s3376_s0 + $0x18] sm:$0xff] (%p3056_p12) }
 0x257   : > { %2203 = vst [vmem:[%s2168_s5] sm:$0xff] (%p3056_p12), %v2202_v43  ;;  %2205 = vst [vmem:[%s2168_s5 + $0x20] sm:$0xff] (%p3056_p12), %v2204_v44 }
 0x258   : > { %2207 = vst [vmem:[%s2168_s5 + $0x40] sm:$0xff] (%p3056_p12), %v2206_v45  ;;  %2209 = vst [vmem:[%s2168_s5 + $0x60] sm:$0xff] (%p3056_p12), %v2208_v46 }
 0x25c PF: > { %s15_s25 = sadd.s32 1, %s2934_s25   ;;  %s3609_s14 = sld [smem:[#allocation6_spill]] }
 0x25d   : > { %p12_p6 = scmp.ge.s32.totalorder %s15_s25, 10   ;;  %s3610_s27 = sld [smem:[#allocation7_spill]] }
 0x25e   : > { %s3611_s15 = smov %s2898_s16  ;;  %s3612_s16 = smov %s3054_s13 }
 0x25f   : > { %s3613_s17 = smov %s2906_s18  ;;  %s3614_s18 = smov %s3051_s12 }
 0x260   : > { %s3615_s19 = smov %s2914_s20  ;;  %s3616_s20 = smov %s3037_s7 }
 0x261   : > { %s3617_s21 = smov %s2926_s23  ;;  %s3618_s22 = smov %s2930_s24 }
 0x262   : > { %s3619_s23 = smov %s3609_s14  ;;  %14 = sbr.rel (!%p12_p6) target bundleno = 9 (0x9), region = 197 }
 0x263   : > { %s3620_s24 = smov %s3610_s27 }

// kernel: squeeze.139
= control target key start
LH: loop header
LB: loop body
LE: loop exit
PB: predicated region body
PF: predicated region fallthrough
CT: control target
= control target key end

     0   :  { %s41_s0 = inlined_call_operand.vmem [shape: f32[1024], index: 0, kind: input, shape index: {}]   ;;  %s42_s1 = inlined_call_operand.vmem [shape: f32[4,256], index: 1, kind: output, shape index: {}]  }
   0x1   :  { %v2_v0 = vld [vmem:[%s41_s0] sm:$0xff]  }
   0x2   :  { %3 = vst [vmem:[#allocation0] ss:$8 sm:$0x3] %v2_v0   ;;  %5 = vst [vmem:[#allocation0 - $0xf] ss:$8 sm:$0xc] %v2_v0  }
   0x3   :  { %7 = vst [vmem:[#allocation0 - $0x1e] ss:$8 sm:$0x30] %v2_v0   ;;  %9 = vst [vmem:[#allocation0 - $0x2d] ss:$8 sm:$0xc0] %v2_v0  }
   0xa   :  { %v13_v1 = vld [vmem:[#allocation0] sm:$0xf]  ;;  %v17_v2 = vld [vmem:[#allocation0 + $0x8] sm:$0xf] }
   0xb   :  { %15 = vst [vmem:[%s42_s1] sm:$0xf] %v13_v1  ;;  %21 = vst [vmem:[%s42_s1 + $0x4] sm:$0xf] %v17_v2 }

// kernel: fcn16s_forward.8
= control target key start
LH: loop header
LB: loop body
LE: loop exit
PB: predicated region body
PF: predicated region fallthrough
CT: control target
= control target key end

     0   :  { %s3920_s15 = smov 0   ;;  %s3922_s16 = smov 0   ;;  %s4681_s0 = inlined_call_operand.vmem [shape: bf16[128,1024], index: 0, kind: input, shape index: {}]   ;;  %s4682_s1 = inlined_call_operand.vmem [shape: bf16[1024,512], index: 1, kind: input, shape index: {}]   ;;  %s4683_s2 = inlined_call_operand.vmem [shape: f32[1,512], index: 2, kind: input, shape index: {}]   ;;  %s4684_s3 = inlined_call_operand.vmem [shape: bf16[128,512], index: 3, kind: output, shape index: {0}]   ;;  %s4685_s4 = inlined_call_operand.vmem [shape: f32[1,2,512], index: 4, kind: output, shape index: {1}]  }
   0x1   :  { %s3924_s17 = smov 0   ;;  %s3926_s18 = smov 0  }
   0x2   :  { %s3928_s19 = smov 0  }
   0x3 LB: > { %s30_s20 = sadd.s32 1, %s3889_s18  ;;  %s3281_s21 = sadd.s32 4294967295, %s3893_s19   ;;  %s3893_s19 = sphi %s3928_s19, %s15_s19   ;;  %s3889_s18 = sphi %s3926_s18, %s4690_s18   ;;  %s3885_s17 = sphi %s3924_s17, %s4689_s17   ;;  %s3881_s16 = sphi %s3922_s16, %s4688_s16   ;;  %s3877_s15 = sphi %s3920_s15, %s4687_s15  }
   0x4   : > { %p32_p0 = scmp.ge.s32.totalorder %s30_s20, 2  ;;  %p78_p1 = scmp.ne.s32.totalorder %s3881_s16, %s3877_s15 }
   0x5   : > { %p79_p2 = scmp.eq.s32.totalorder %s3893_s19, 0  ;;  %p136_p4 = scmp.eq.s32.totalorder %s3281_s21, 1 }
   0x6   : > { %s4692_s20 = smov (%p32_p0, %s30_s20), 0  ;;  %s71_s23 = sadd.s32 1, %s3881_s16 }
   0x7   : > { %p80_p3 = por %p79_p2, %p78_p1  ;;  %s67_s22 = ssub.s32 %s3889_s18, %s4692_s20 }
   0x8   : > { %p69_p5 = scmp.eq.s32.totalorder %s67_s22, 0  ;;  %p3955_p6 = por %p136_p4, %p78_p1 }
   0x9   : > { %p3285_p7 = scmp.ge.s32.totalorder %s3893_s19, 2 }
   0xa   : > { %s3960_s25 = scalar_select %p69_p5, %s3881_s16, %s71_s23  }
   0xb   : > { %201 = sbr.rel (%p3285_p7) target bundleno = 86 (0x56), region = 20 }
  0x12   : > { %204 = sbr.rel (!%p80_p3) target bundleno = 86 (0x56), region = 24  ;;  %s206_s26 = sand.u32 (%p80_p3), 1, %s3881_s16  }
  0x13   : > { %s3509_s27 = sshll.u32 (%p80_p3), %s3889_s18, 3  ;;  %s3286_s28 = sshll.u32 (%p80_p3), %s206_s26, 10 }
  0x14   : > { %s3968_s5 = scalar_lea.vmem (%p80_p3), %s4682_s1, %s3509_s27  ;;  %s3973_s6 = scalar_lea.vmem (%p80_p3), [#allocation3], %s3286_s28 }
  0x15   : > { %v496_v0 = vld [vmem:[%s3968_s5] sm:$0xff] (%p80_p3)  ;;  %v498_v1 = vld [vmem:[%s3968_s5 + $0x10] sm:$0xff] (%p80_p3) }
  0x16   : > { %v500_v2 = vld [vmem:[%s3968_s5 + $0x20] sm:$0xff] (%p80_p3)  ;;  %497 = vst [vmem:[%s3973_s6] sm:$0xff] (%p80_p3), %v496_v0  ;;  %499 = vst [vmem:[%s3973_s6 + $0x8] sm:$0xff] (%p80_p3), %v498_v1  ;;  %v502_v3 = vld [vmem:[%s3968_s5 + $0x30] sm:$0xff] (%p80_p3) }
  0x17   : > { %501 = vst [vmem:[%s3973_s6 + $0x10] sm:$0xff] (%p80_p3), %v500_v2  ;;  %v504_v4 = vld [vmem:[%s3968_s5 + $0x40] sm:$0xff] (%p80_p3)  ;;  %v506_v5 = vld [vmem:[%s3968_s5 + $0x50] sm:$0xff] (%p80_p3)  ;;  %503 = vst [vmem:[%s3973_s6 + $0x18] sm:$0xff] (%p80_p3), %v502_v3 }
  0x18   : > { %505 = vst [vmem:[%s3973_s6 + $0x20] sm:$0xff] (%p80_p3), %v504_v4  ;;  %507 = vst [vmem:[%s3973_s6 + $0x28] sm:$0xff] (%p80_p3), %v506_v5  ;;  %v508_v6 = vld [vmem:[%s3968_s5 + $0x60] sm:$0xff] (%p80_p3)  ;;  %v510_v7 = vld [vmem:[%s3968_s5 + $0x70] sm:$0xff] (%p80_p3) }
  0x19   : > { %v512_v8 = vld [vmem:[%s3968_s5 + $0x80] sm:$0xff]  ;;  %509 = vst [vmem:[%s3973_s6 + $0x30] sm:$0xff] %v508_v6  ;;  %511 = vst [vmem:[%s3973_s6 + $0x38] sm:$0xff] %v510_v7  ;;  %v514_v9 = vld [vmem:[%s3968_s5 + $0x90] sm:$0xff] }
  0x1a   : > { %513 = vst [vmem:[%s3973_s6 + $0x40] sm:$0xff] %v512_v8  ;;  %v516_v10 = vld [vmem:[%s3968_s5 + $0xa0] sm:$0xff]  ;;  %v518_v11 = vld [vmem:[%s3968_s5 + $0xb0] sm:$0xff]  ;;  %515 = vst [vmem:[%s3973_s6 + $0x48] sm:$0xff] %v514_v9 }
  0x1b   : > { %517 = vst [vmem:[%s3973_s6 + $0x50] sm:$0xff] %v516_v10  ;;  %519 = vst [vmem:[%s3973_s6 + $0x58] sm:$0xff] %v518_v11  ;;  %v520_v12 = vld [vmem:[%s3968_s5 + $0xc0] sm:$0xff]  ;;  %v522_v13 = vld [vmem:[%s3968_s5 + $0xd0] sm:$0xff] }
  0x1c   : > { %v524_v14 = vld [vmem:[%s3968_s5 + $0xe0] sm:$0xff]  ;;  %521 = vst [vmem:[%s3973_s6 + $0x60] sm:$0xff] %v520_v12  ;;  %523 = vst [vmem:[%s3973_s6 + $0x68] sm:$0xff] %v522_v13  ;;  %v526_v15 = vld [vmem:[%s3968_s5 + $0xf0] sm:$0xff] }
  0x1d   : > { %525 = vst [vmem:[%s3973_s6 + $0x70] sm:$0xff] %v524_v14  ;;  %v528_v16 = vld [vmem:[%s3968_s5 + $0x100] sm:$0xff]  ;;  %v530_v17 = vld [vmem:[%s3968_s5 + $0x110] sm:$0xff]  ;;  %527 = vst [vmem:[%s3973_s6 + $0x78] sm:$0xff] %v526_v15 }
  0x1e   : > { %529 = vst [vmem:[%s3973_s6 + $0x80] sm:$0xff] %v528_v16  ;;  %531 = vst [vmem:[%s3973_s6 + $0x88] sm:$0xff] %v530_v17  ;;  %v532_v18 = vld [vmem:[%s3968_s5 + $0x120] sm:$0xff]  ;;  %v534_v19 = vld [vmem:[%s3968_s5 + $0x130] sm:$0xff] }
  0x1f   : > { %v536_v20 = vld [vmem:[%s3968_s5 + $0x140] sm:$0xff]  ;;  %533 = vst [vmem:[%s3973_s6 + $0x90] sm:$0xff] %v532_v18  ;;  %535 = vst [vmem:[%s3973_s6 + $0x98] sm:$0xff] %v534_v19  ;;  %v538_v21 = vld [vmem:[%s3968_s5 + $0x150] sm:$0xff] }
  0x20   : > { %537 = vst [vmem:[%s3973_s6 + $0xa0] sm:$0xff] %v536_v20  ;;  %v540_v22 = vld [vmem:[%s3968_s5 + $0x160] sm:$0xff]  ;;  %v542_v23 = vld [vmem:[%s3968_s5 + $0x170] sm:$0xff]  ;;  %539 = vst [vmem:[%s3973_s6 + $0xa8] sm:$0xff] %v538_v21 }
  0x21   : > { %541 = vst [vmem:[%s3973_s6 + $0xb0] sm:$0xff] %v540_v22  ;;  %543 = vst [vmem:[%s3973_s6 + $0xb8] sm:$0xff] %v542_v23  ;;  %v544_v24 = vld [vmem:[%s3968_s5 + $0x180] sm:$0xff]  ;;  %v546_v25 = vld [vmem:[%s3968_s5 + $0x190] sm:$0xff] }
  0x22   : > { %v548_v26 = vld [vmem:[%s3968_s5 + $0x1a0] sm:$0xff]  ;;  %545 = vst [vmem:[%s3973_s6 + $0xc0] sm:$0xff] %v544_v24  ;;  %547 = vst [vmem:[%s3973_s6 + $0xc8] sm:$0xff] %v546_v25  ;;  %v550_v27 = vld [vmem:[%s3968_s5 + $0x1b0] sm:$0xff] }
  0x23   : > { %549 = vst [vmem:[%s3973_s6 + $0xd0] sm:$0xff] %v548_v26  ;;  %v552_v28 = vld [vmem:[%s3968_s5 + $0x1c0] sm:$0xff]  ;;  %v554_v29 = vld [vmem:[%s3968_s5 + $0x1d0] sm:$0xff]  ;;  %551 = vst [vmem:[%s3973_s6 + $0xd8] sm:$0xff] %v550_v27 }
  0x24   : > { %553 = vst [vmem:[%s3973_s6 + $0xe0] sm:$0xff] %v552_v28  ;;  %555 = vst [vmem:[%s3973_s6 + $0xe8] sm:$0xff] %v554_v29  ;;  %v556_v30 = vld [vmem:[%s3968_s5 + $0x1e0] sm:$0xff]  ;;  %v558_v31 = vld [vmem:[%s3968_s5 + $0x1f0] sm:$0xff] }
  0x25   : > { %v560_v32 = vld [vmem:[%s3968_s5 + $0x200] sm:$0xff]  ;;  %557 = vst [vmem:[%s3973_s6 + $0xf0] sm:$0xff] %v556_v30  ;;  %559 = vst [vmem:[%s3973_s6 + $0xf8] sm:$0xff] %v558_v31  ;;  %v562_v33 = vld [vmem:[%s3968_s5 + $0x210] sm:$0xff] }
  0x26   : > { %561 = vst [vmem:[%s3973_s6 + $0x100] sm:$0xff] %v560_v32  ;;  %v564_v34 = vld [vmem:[%s3968_s5 + $0x220] sm:$0xff]  ;;  %v566_v35 = vld [vmem:[%s3968_s5 + $0x230] sm:$0xff]  ;;  %563 = vst [vmem:[%s3973_s6 + $0x108] sm:$0xff] %v562_v33 }
  0x27   : > { %565 = vst [vmem:[%s3973_s6 + $0x110] sm:$0xff] %v564_v34  ;;  %567 = vst [vmem:[%s3973_s6 + $0x118] sm:$0xff] %v566_v35  ;;  %v568_v36 = vld [vmem:[%s3968_s5 + $0x240] sm:$0xff]  ;;  %v570_v37 = vld [vmem:[%s3968_s5 + $0x250] sm:$0xff] }
  0x28   : > { %v572_v38 = vld [vmem:[%s3968_s5 + $0x260] sm:$0xff]  ;;  %569 = vst [vmem:[%s3973_s6 + $0x120] sm:$0xff] %v568_v36  ;;  %571 = vst [vmem:[%s3973_s6 + $0x128] sm:$0xff] %v570_v37  ;;  %v574_v39 = vld [vmem:[%s3968_s5 + $0x270] sm:$0xff] }
  0x29   : > { %573 = vst [vmem:[%s3973_s6 + $0x130] sm:$0xff] %v572_v38  ;;  %v576_v40 = vld [vmem:[%s3968_s5 + $0x280] sm:$0xff]  ;;  %v578_v41 = vld [vmem:[%s3968_s5 + $0x290] sm:$0xff]  ;;  %575 = vst [vmem:[%s3973_s6 + $0x138] sm:$0xff] %v574_v39 }
  0x2a   : > { %577 = vst [vmem:[%s3973_s6 + $0x140] sm:$0xff] %v576_v40  ;;  %579 = vst [vmem:[%s3973_s6 + $0x148] sm:$0xff] %v578_v41  ;;  %v580_v42 = vld [vmem:[%s3968_s5 + $0x2a0] sm:$0xff]  ;;  %v582_v43 = vld [vmem:[%s3968_s5 + $0x2b0] sm:$0xff] }
  0x2b   : > { %v584_v44 = vld [vmem:[%s3968_s5 + $0x2c0] sm:$0xff]  ;;  %581 = vst [vmem:[%s3973_s6 + $0x150] sm:$0xff] %v580_v42  ;;  %583 = vst [vmem:[%s3973_s6 + $0x158] sm:$0xff] %v582_v43  ;;  %v586_v45 = vld [vmem:[%s3968_s5 + $0x2d0] sm:$0xff] }
  0x2c   : > { %585 = vst [vmem:[%s3973_s6 + $0x160] sm:$0xff] %v584_v44  ;;  %v588_v46 = vld [vmem:[%s3968_s5 + $0x2e0] sm:$0xff]  ;;  %v590_v47 = vld [vmem:[%s3968_s5 + $0x2f0] sm:$0xff]  ;;  %587 = vst [vmem:[%s3973_s6 + $0x168] sm:$0xff] %v586_v45 }
  0x2d   : > { %589 = vst [vmem:[%s3973_s6 + $0x170] sm:$0xff] %v588_v46  ;;  %591 = vst [vmem:[%s3973_s6 + $0x178] sm:$0xff] %v590_v47  ;;  %v592_v48 = vld [vmem:[%s3968_s5 + $0x300] sm:$0xff]  ;;  %v594_v49 = vld [vmem:[%s3968_s5 + $0x310] sm:$0xff] }
  0x2e   : > { %v596_v50 = vld [vmem:[%s3968_s5 + $0x320] sm:$0xff]  ;;  %593 = vst [vmem:[%s3973_s6 + $0x180] sm:$0xff] %v592_v48  ;;  %595 = vst [vmem:[%s3973_s6 + $0x188] sm:$0xff] %v594_v49  ;;  %v598_v51 = vld [vmem:[%s3968_s5 + $0x330] sm:$0xff] }
  0x2f   : > { %597 = vst [vmem:[%s3973_s6 + $0x190] sm:$0xff] %v596_v50  ;;  %v600_v52 = vld [vmem:[%s3968_s5 + $0x340] sm:$0xff]  ;;  %v602_v53 = vld [vmem:[%s3968_s5 + $0x350] sm:$0xff]  ;;  %599 = vst [vmem:[%s3973_s6 + $0x198] sm:$0xff] %v598_v51 }
  0x30   : > { %601 = vst [vmem:[%s3973_s6 + $0x1a0] sm:$0xff] %v600_v52  ;;  %603 = vst [vmem:[%s3973_s6 + $0x1a8] sm:$0xff] %v602_v53  ;;  %v604_v54 = vld [vmem:[%s3968_s5 + $0x360] sm:$0xff]  ;;  %v606_v55 = vld [vmem:[%s3968_s5 + $0x370] sm:$0xff] }
  0x31   : > { %v608_v56 = vld [vmem:[%s3968_s5 + $0x380] sm:$0xff]  ;;  %605 = vst [vmem:[%s3973_s6 + $0x1b0] sm:$0xff] %v604_v54  ;;  %607 = vst [vmem:[%s3973_s6 + $0x1b8] sm:$0xff] %v606_v55  ;;  %v610_v57 = vld [vmem:[%s3968_s5 + $0x390] sm:$0xff] }
  0x32   : > { %609 = vst [vmem:[%s3973_s6 + $0x1c0] sm:$0xff] %v608_v56  ;;  %v612_v58 = vld [vmem:[%s3968_s5 + $0x3a0] sm:$0xff]  ;;  %v614_v59 = vld [vmem:[%s3968_s5 + $0x3b0] sm:$0xff]  ;;  %611 = vst [vmem:[%s3973_s6 + $0x1c8] sm:$0xff] %v610_v57 }
  0x33   : > { %613 = vst [vmem:[%s3973_s6 + $0x1d0] sm:$0xff] %v612_v58  ;;  %615 = vst [vmem:[%s3973_s6 + $0x1d8] sm:$0xff] %v614_v59  ;;  %v616_v60 = vld [vmem:[%s3968_s5 + $0x3c0] sm:$0xff]  ;;  %v618_v61 = vld [vmem:[%s3968_s5 + $0x3d0] sm:$0xff] }
  0x34   : > { %v620_v62 = vld [vmem:[%s3968_s5 + $0x3e0] sm:$0xff]  ;;  %617 = vst [vmem:[%s3973_s6 + $0x1e0] sm:$0xff] %v616_v60  ;;  %619 = vst [vmem:[%s3973_s6 + $0x1e8] sm:$0xff] %v618_v61  ;;  %v622_v63 = vld [vmem:[%s3968_s5 + $0x3f0] sm:$0xff] }
  0x35   : > { %621 = vst [vmem:[%s3973_s6 + $0x1f0] sm:$0xff] %v620_v62  ;;  %v624_v0 = vld [vmem:[%s3968_s5 + $0x400] sm:$0xff]  ;;  %v626_v1 = vld [vmem:[%s3968_s5 + $0x410] sm:$0xff]  ;;  %623 = vst [vmem:[%s3973_s6 + $0x1f8] sm:$0xff] %v622_v63 }
  0x36   : > { %625 = vst [vmem:[%s3973_s6 + $0x200] sm:$0xff] %v624_v0  ;;  %627 = vst [vmem:[%s3973_s6 + $0x208] sm:$0xff] %v626_v1  ;;  %v628_v2 = vld [vmem:[%s3968_s5 + $0x420] sm:$0xff]  ;;  %v630_v3 = vld [vmem:[%s3968_s5 + $0x430] sm:$0xff] }
  0x37   : > { %v632_v4 = vld [vmem:[%s3968_s5 + $0x440] sm:$0xff]  ;;  %629 = vst [vmem:[%s3973_s6 + $0x210] sm:$0xff] %v628_v2  ;;  %631 = vst [vmem:[%s3973_s6 + $0x218] sm:$0xff] %v630_v3  ;;  %v634_v5 = vld [vmem:[%s3968_s5 + $0x450] sm:$0xff] }
  0x38   : > { %633 = vst [vmem:[%s3973_s6 + $0x220] sm:$0xff] %v632_v4  ;;  %v636_v6 = vld [vmem:[%s3968_s5 + $0x460] sm:$0xff]  ;;  %v638_v7 = vld [vmem:[%s3968_s5 + $0x470] sm:$0xff]  ;;  %635 = vst [vmem:[%s3973_s6 + $0x228] sm:$0xff] %v634_v5 }
  0x39   : > { %637 = vst [vmem:[%s3973_s6 + $0x230] sm:$0xff] %v636_v6  ;;  %639 = vst [vmem:[%s3973_s6 + $0x238] sm:$0xff] %v638_v7  ;;  %v640_v8 = vld [vmem:[%s3968_s5 + $0x480] sm:$0xff]  ;;  %v642_v9 = vld [vmem:[%s3968_s5 + $0x490] sm:$0xff] }
  0x3a   : > { %v644_v10 = vld [vmem:[%s3968_s5 + $0x4a0] sm:$0xff]  ;;  %641 = vst [vmem:[%s3973_s6 + $0x240] sm:$0xff] %v640_v8  ;;  %643 = vst [vmem:[%s3973_s6 + $0x248] sm:$0xff] %v642_v9  ;;  %v646_v11 = vld [vmem:[%s3968_s5 + $0x4b0] sm:$0xff] }
  0x3b   : > { %645 = vst [vmem:[%s3973_s6 + $0x250] sm:$0xff] %v644_v10  ;;  %v648_v12 = vld [vmem:[%s3968_s5 + $0x4c0] sm:$0xff]  ;;  %v650_v13 = vld [vmem:[%s3968_s5 + $0x4d0] sm:$0xff]  ;;  %647 = vst [vmem:[%s3973_s6 + $0x258] sm:$0xff] %v646_v11 }
  0x3c   : > { %649 = vst [vmem:[%s3973_s6 + $0x260] sm:$0xff] %v648_v12  ;;  %651 = vst [vmem:[%s3973_s6 + $0x268] sm:$0xff] %v650_v13  ;;  %v652_v14 = vld [vmem:[%s3968_s5 + $0x4e0] sm:$0xff]  ;;  %v654_v15 = vld [vmem:[%s3968_s5 + $0x4f0] sm:$0xff] }
  0x3d   : > { %v656_v16 = vld [vmem:[%s3968_s5 + $0x500] sm:$0xff]  ;;  %653 = vst [vmem:[%s3973_s6 + $0x270] sm:$0xff] %v652_v14  ;;  %655 = vst [vmem:[%s3973_s6 + $0x278] sm:$0xff] %v654_v15  ;;  %v658_v17 = vld [vmem:[%s3968_s5 + $0x510] sm:$0xff] }
  0x3e   : > { %657 = vst [vmem:[%s3973_s6 + $0x280] sm:$0xff] %v656_v16  ;;  %v660_v18 = vld [vmem:[%s3968_s5 + $0x520] sm:$0xff]  ;;  %v662_v19 = vld [vmem:[%s3968_s5 + $0x530] sm:$0xff]  ;;  %659 = vst [vmem:[%s3973_s6 + $0x288] sm:$0xff] %v658_v17 }
  0x3f   : > { %661 = vst [vmem:[%s3973_s6 + $0x290] sm:$0xff] %v660_v18  ;;  %663 = vst [vmem:[%s3973_s6 + $0x298] sm:$0xff] %v662_v19  ;;  %v664_v20 = vld [vmem:[%s3968_s5 + $0x540] sm:$0xff]  ;;  %v666_v21 = vld [vmem:[%s3968_s5 + $0x550] sm:$0xff] }
  0x40   : > { %v668_v22 = vld [vmem:[%s3968_s5 + $0x560] sm:$0xff]  ;;  %665 = vst [vmem:[%s3973_s6 + $0x2a0] sm:$0xff] %v664_v20  ;;  %667 = vst [vmem:[%s3973_s6 + $0x2a8] sm:$0xff] %v666_v21  ;;  %v670_v23 = vld [vmem:[%s3968_s5 + $0x570] sm:$0xff] }
  0x41   : > { %669 = vst [vmem:[%s3973_s6 + $0x2b0] sm:$0xff] %v668_v22  ;;  %v672_v24 = vld [vmem:[%s3968_s5 + $0x580] sm:$0xff]  ;;  %v674_v25 = vld [vmem:[%s3968_s5 + $0x590] sm:$0xff]  ;;  %671 = vst [vmem:[%s3973_s6 + $0x2b8] sm:$0xff] %v670_v23 }
  0x42   : > { %673 = vst [vmem:[%s3973_s6 + $0x2c0] sm:$0xff] %v672_v24  ;;  %675 = vst [vmem:[%s3973_s6 + $0x2c8] sm:$0xff] %v674_v25  ;;  %v676_v26 = vld [vmem:[%s3968_s5 + $0x5a0] sm:$0xff]  ;;  %v678_v27 = vld [vmem:[%s3968_s5 + $0x5b0] sm:$0xff] }
  0x43   : > { %v680_v28 = vld [vmem:[%s3968_s5 + $0x5c0] sm:$0xff]  ;;  %677 = vst [vmem:[%s3973_s6 + $0x2d0] sm:$0xff] %v676_v26  ;;  %679 = vst [vmem:[%s3973_s6 + $0x2d8] sm:$0xff] %v678_v27  ;;  %v682_v29 = vld [vmem:[%s3968_s5 + $0x5d0] sm:$0xff] }
  0x44   : > { %681 = vst [vmem:[%s3973_s6 + $0x2e0] sm:$0xff] %v680_v28  ;;  %v684_v30 = vld [vmem:[%s3968_s5 + $0x5e0] sm:$0xff]  ;;  %v686_v31 = vld [vmem:[%s3968_s5 + $0x5f0] sm:$0xff]  ;;  %683 = vst [vmem:[%s3973_s6 + $0x2e8] sm:$0xff] %v682_v29 }
  0x45   : > { %685 = vst [vmem:[%s3973_s6 + $0x2f0] sm:$0xff] %v684_v30  ;;  %687 = vst [vmem:[%s3973_s6 + $0x2f8] sm:$0xff] %v686_v31  ;;  %v688_v32 = vld [vmem:[%s3968_s5 + $0x600] sm:$0xff]  ;;  %v690_v33 = vld [vmem:[%s3968_s5 + $0x610] sm:$0xff] }
  0x46   : > { %v692_v34 = vld [vmem:[%s3968_s5 + $0x620] sm:$0xff]  ;;  %689 = vst [vmem:[%s3973_s6 + $0x300] sm:$0xff] %v688_v32  ;;  %691 = vst [vmem:[%s3973_s6 + $0x308] sm:$0xff] %v690_v33  ;;  %v694_v35 = vld [vmem:[%s3968_s5 + $0x630] sm:$0xff] }
  0x47   : > { %693 = vst [vmem:[%s3973_s6 + $0x310] sm:$0xff] %v692_v34  ;;  %v696_v36 = vld [vmem:[%s3968_s5 + $0x640] sm:$0xff]  ;;  %v698_v37 = vld [vmem:[%s3968_s5 + $0x650] sm:$0xff]  ;;  %695 = vst [vmem:[%s3973_s6 + $0x318] sm:$0xff] %v694_v35 }
  0x48   : > { %697 = vst [vmem:[%s3973_s6 + $0x320] sm:$0xff] %v696_v36  ;;  %699 = vst [vmem:[%s3973_s6 + $0x328] sm:$0xff] %v698_v37  ;;  %v700_v38 = vld [vmem:[%s3968_s5 + $0x660] sm:$0xff]  ;;  %v702_v39 = vld [vmem:[%s3968_s5 + $0x670] sm:$0xff] }
  0x49   : > { %v704_v40 = vld [vmem:[%s3968_s5 + $0x680] sm:$0xff]  ;;  %701 = vst [vmem:[%s3973_s6 + $0x330] sm:$0xff] %v700_v38  ;;  %703 = vst [vmem:[%s3973_s6 + $0x338] sm:$0xff] %v702_v39  ;;  %v706_v41 = vld [vmem:[%s3968_s5 + $0x690] sm:$0xff] }
  0x4a   : > { %705 = vst [vmem:[%s3973_s6 + $0x340] sm:$0xff] %v704_v40  ;;  %v708_v42 = vld [vmem:[%s3968_s5 + $0x6a0] sm:$0xff]  ;;  %v710_v43 = vld [vmem:[%s3968_s5 + $0x6b0] sm:$0xff]  ;;  %707 = vst [vmem:[%s3973_s6 + $0x348] sm:$0xff] %v706_v41 }
  0x4b   : > { %709 = vst [vmem:[%s3973_s6 + $0x350] sm:$0xff] %v708_v42  ;;  %711 = vst [vmem:[%s3973_s6 + $0x358] sm:$0xff] %v710_v43  ;;  %v712_v44 = vld [vmem:[%s3968_s5 + $0x6c0] sm:$0xff]  ;;  %v714_v45 = vld [vmem:[%s3968_s5 + $0x6d0] sm:$0xff] }
  0x4c   : > { %v716_v46 = vld [vmem:[%s3968_s5 + $0x6e0] sm:$0xff]  ;;  %713 = vst [vmem:[%s3973_s6 + $0x360] sm:$0xff] %v712_v44  ;;  %715 = vst [vmem:[%s3973_s6 + $0x368] sm:$0xff] %v714_v45  ;;  %v718_v47 = vld [vmem:[%s3968_s5 + $0x6f0] sm:$0xff] }
  0x4d   : > { %717 = vst [vmem:[%s3973_s6 + $0x370] sm:$0xff] %v716_v46  ;;  %v720_v48 = vld [vmem:[%s3968_s5 + $0x700] sm:$0xff]  ;;  %v722_v49 = vld [vmem:[%s3968_s5 + $0x710] sm:$0xff]  ;;  %719 = vst [vmem:[%s3973_s6 + $0x378] sm:$0xff] %v718_v47 }
  0x4e   : > { %721 = vst [vmem:[%s3973_s6 + $0x380] sm:$0xff] %v720_v48  ;;  %723 = vst [vmem:[%s3973_s6 + $0x388] sm:$0xff] %v722_v49  ;;  %v724_v50 = vld [vmem:[%s3968_s5 + $0x720] sm:$0xff]  ;;  %v726_v51 = vld [vmem:[%s3968_s5 + $0x730] sm:$0xff] }
  0x4f   : > { %v728_v52 = vld [vmem:[%s3968_s5 + $0x740] sm:$0xff]  ;;  %725 = vst [vmem:[%s3973_s6 + $0x390] sm:$0xff] %v724_v50  ;;  %727 = vst [vmem:[%s3973_s6 + $0x398] sm:$0xff] %v726_v51  ;;  %v730_v53 = vld [vmem:[%s3968_s5 + $0x750] sm:$0xff] }
  0x50   : > { %729 = vst [vmem:[%s3973_s6 + $0x3a0] sm:$0xff] %v728_v52  ;;  %v732_v54 = vld [vmem:[%s3968_s5 + $0x760] sm:$0xff]  ;;  %v734_v55 = vld [vmem:[%s3968_s5 + $0x770] sm:$0xff]  ;;  %731 = vst [vmem:[%s3973_s6 + $0x3a8] sm:$0xff] %v730_v53 }
  0x51   : > { %733 = vst [vmem:[%s3973_s6 + $0x3b0] sm:$0xff] %v732_v54  ;;  %735 = vst [vmem:[%s3973_s6 + $0x3b8] sm:$0xff] %v734_v55  ;;  %v736_v56 = vld [vmem:[%s3968_s5 + $0x780] sm:$0xff]  ;;  %v738_v57 = vld [vmem:[%s3968_s5 + $0x790] sm:$0xff] }
  0x52   : > { %v740_v58 = vld [vmem:[%s3968_s5 + $0x7a0] sm:$0xff]  ;;  %737 = vst [vmem:[%s3973_s6 + $0x3c0] sm:$0xff] %v736_v56  ;;  %739 = vst [vmem:[%s3973_s6 + $0x3c8] sm:$0xff] %v738_v57  ;;  %v742_v59 = vld [vmem:[%s3968_s5 + $0x7b0] sm:$0xff] }
  0x53   : > { %741 = vst [vmem:[%s3973_s6 + $0x3d0] sm:$0xff] %v740_v58  ;;  %v744_v60 = vld [vmem:[%s3968_s5 + $0x7c0] sm:$0xff]  ;;  %v746_v61 = vld [vmem:[%s3968_s5 + $0x7d0] sm:$0xff]  ;;  %743 = vst [vmem:[%s3973_s6 + $0x3d8] sm:$0xff] %v742_v59 }
  0x54   : > { %745 = vst [vmem:[%s3973_s6 + $0x3e0] sm:$0xff] %v744_v60  ;;  %747 = vst [vmem:[%s3973_s6 + $0x3e8] sm:$0xff] %v746_v61  ;;  %v748_v62 = vld [vmem:[%s3968_s5 + $0x7e0] sm:$0xff]  ;;  %v750_v63 = vld [vmem:[%s3968_s5 + $0x7f0] sm:$0xff] }
  0x55   : > { %749 = vst [vmem:[%s3973_s6 + $0x3f0] sm:$0xff] %v748_v62  ;;  %751 = vst [vmem:[%s3973_s6 + $0x3f8] sm:$0xff] %v750_v63 }
  0x56 PF: > { %p3289_p8 = scmp.ge.s32.totalorder %s3893_s19, 1  ;;  %p764_p9 = scmp.lt.s32.totalorder %s3893_s19, 3 }
  0x58   : > { %p765_p10 = pnand %p3289_p8, %p764_p9 }
  0x59   : > { %s771_s7 = sand.u32 (!%p765_p10), 1, %s3877_s15   ;;  %v4234_v0 = vld [vmem:[%s4681_s0] sm:$0xff] (!%p765_p10)  ;;  %v4244_v2 = vld [vmem:[%s4681_s0 + $0x10] sm:$0xff] (!%p765_p10)  ;;  %s3292_s5 = sshll.u32 (!%p765_p10), %s3885_s17, 1  ;;  %vm3007_vm0 = vcmask (!%p765_p10), 1040384  }
  0x5a   : > { %768 = sbr.rel (%p765_p10) target bundleno = 521 (0x209), region = 66  ;;  %v4239_v1 = vld [vmem:[%s4681_s0 + $0x20] sm:$0xff] (!%p765_p10)  ;;  %s3290_s14 = sshll.u32 (!%p765_p10), %s771_s7, 10  ;;  %v4255_v5 = vld [vmem:[%s4681_s0 + $0x30] sm:$0xff] (!%p765_p10) }
  0x5b   : > { %v3295_v3 = vcombine.low (!%p765_p10), %v4234_v0, %v4239_v1  ;;  %v3296_v4 = vcombine.high (!%p765_p10), %v4234_v0, %v4239_v1  ;;  %v3299_v6 = vcombine.low (!%p765_p10), %v4244_v2, %v4255_v5  ;;  %v3300_v7 = vcombine.high (!%p765_p10), %v4244_v2, %v4255_v5  ;;  %s4261_s23 = scalar_lea.vmem (!%p765_p10), [#allocation3], %s3290_s14  ;;  %v933_v0 = vld [vmem:[%s4681_s0 + $0x80] sm:$0xff] (!%p765_p10)  ;;  %v935_v5 = vld [vmem:[%s4681_s0 + $0x90] sm:$0xff] (!%p765_p10)  ;;  %p833_p11 = scmp.lt.s32.totalorder (!%p765_p10), %s3292_s5, 3 }
  0x5c   : > { %v3663_v8 = vld [vmem:[%s4261_s23 + $0x4] ss:$8 sps:$4 sm:$0xff] (!%p765_p10)   ;;  %v3667_v10 = vld [vmem:[%s4261_s23] ss:$8 sps:$4 sm:$0xff] (!%p765_p10)   ;;  %v3669_v12 = vld [vmem:[%s4261_s23 + $0x14] ss:$8 sps:$4 sm:$0xff] (!%p765_p10)  }
  0x5d   : > { %2101 = vmatprep.mubr.bf16.mxu1 (!%p765_p10), %v3296_v4  ;;  %v3665_v9 = vld [vmem:[%s4261_s23 + $0x204] ss:$8 sps:$4 sm:$0xff] (!%p765_p10)   ;;  %2327 = vmatprep.mubr.bf16.mxu0 (!%p765_p10), %v3300_v7  ;;  %v3668_v11 = vld [vmem:[%s4261_s23 + $0x200] ss:$8 sps:$4 sm:$0xff] (!%p765_p10)   ;;  %v3671_v13 = vld [vmem:[%s4261_s23 + $0x214] ss:$8 sps:$4 sm:$0xff] (!%p765_p10)  }
  0x5e   : > { %2069 = vmatprep.subr.bf16.mxu1 (!%p765_p10), %v3663_v8  ;;  %2295 = vmatprep.subr.bf16.mxu0 (!%p765_p10), %v3665_v9  ;;  %v3673_v14 = vld [vmem:[%s4261_s23 + $0x10] ss:$8 sps:$4 sm:$0xff] (!%p765_p10)   ;;  %v3675_v16 = vld [vmem:[%s4261_s23 + $0x24] ss:$8 sps:$4 sm:$0xff] (!%p765_p10)   ;;  %v3679_v18 = vld [vmem:[%s4261_s23 + $0x20] ss:$8 sps:$4 sm:$0xff] (!%p765_p10)  }
  0x5f   : > { %2070 = vmatpush1.bf16.msra.mxu1 (!%p765_p10), %v3667_v10  ;;  %2296 = vmatpush1.bf16.msra.mxu0 (!%p765_p10), %v3668_v11  ;;  %v3674_v15 = vld [vmem:[%s4261_s23 + $0x210] ss:$8 sps:$4 sm:$0xff] (!%p765_p10)   ;;  %v3677_v17 = vld [vmem:[%s4261_s23 + $0x224] ss:$8 sps:$4 sm:$0xff] (!%p765_p10)   ;;  %v3680_v19 = vld [vmem:[%s4261_s23 + $0x220] ss:$8 sps:$4 sm:$0xff] (!%p765_p10)  }
  0x60   : > { %2071 = vmatprep.subr.bf16.mxu1 (!%p765_p10), %v3669_v12  ;;  %2297 = vmatprep.subr.bf16.mxu0 (!%p765_p10), %v3671_v13  ;;  %v3681_v20 = vld [vmem:[%s4261_s23 + $0x34] ss:$8 sps:$4 sm:$0xff] (!%p765_p10)   ;;  %v3685_v22 = vld [vmem:[%s4261_s23 + $0x30] ss:$8 sps:$4 sm:$0xff] (!%p765_p10)   ;;  %v3687_v24 = vld [vmem:[%s4261_s23 + $0x44] ss:$8 sps:$4 sm:$0xff] (!%p765_p10)  }
  0x61   : > { %v3683_v21 = vld [vmem:[%s4261_s23 + $0x234] ss:$8 sps:$4 sm:$0xff]   ;;  %v3686_v23 = vld [vmem:[%s4261_s23 + $0x230] ss:$8 sps:$4 sm:$0xff]   ;;  %v3689_v25 = vld [vmem:[%s4261_s23 + $0x244] ss:$8 sps:$4 sm:$0xff]  }
  0x62   : > { %v3691_v26 = vld [vmem:[%s4261_s23 + $0x40] ss:$8 sps:$4 sm:$0xff]   ;;  %v3693_v28 = vld [vmem:[%s4261_s23 + $0x54] ss:$8 sps:$4 sm:$0xff]   ;;  %v3697_v30 = vld [vmem:[%s4261_s23 + $0x50] ss:$8 sps:$4 sm:$0xff]  }
  0x63   : > { %2072 = vmatpush1.bf16.msra.mxu1 %v3673_v14  ;;  %2298 = vmatpush1.bf16.msra.mxu0 %v3674_v15  ;;  %v3692_v27 = vld [vmem:[%s4261_s23 + $0x240] ss:$8 sps:$4 sm:$0xff]   ;;  %v3695_v29 = vld [vmem:[%s4261_s23 + $0x254] ss:$8 sps:$4 sm:$0xff]   ;;  %v3698_v31 = vld [vmem:[%s4261_s23 + $0x250] ss:$8 sps:$4 sm:$0xff]  }
  0x64   : > { %2073 = vmatprep.subr.bf16.mxu1 %v3675_v16  ;;  %2299 = vmatprep.subr.bf16.mxu0 %v3677_v17  ;;  %v3699_v32 = vld [vmem:[%s4261_s23 + $0x64] ss:$8 sps:$4 sm:$0xff]   ;;  %v3703_v34 = vld [vmem:[%s4261_s23 + $0x60] ss:$8 sps:$4 sm:$0xff]   ;;  %v3705_v36 = vld [vmem:[%s4261_s23 + $0x74] ss:$8 sps:$4 sm:$0xff]  }
  0x65   : > { %v3701_v33 = vld [vmem:[%s4261_s23 + $0x264] ss:$8 sps:$4 sm:$0xff]   ;;  %v3704_v35 = vld [vmem:[%s4261_s23 + $0x260] ss:$8 sps:$4 sm:$0xff]   ;;  %v3707_v37 = vld [vmem:[%s4261_s23 + $0x274] ss:$8 sps:$4 sm:$0xff]  }
  0x66   : > { %v3709_v38 = vld [vmem:[%s4261_s23 + $0x70] ss:$8 sps:$4 sm:$0xff]   ;;  %v3711_v40 = vld [vmem:[%s4261_s23 + $0x84] ss:$8 sps:$4 sm:$0xff]   ;;  %v3715_v42 = vld [vmem:[%s4261_s23 + $0x80] ss:$8 sps:$4 sm:$0xff]  }
  0x67   : > { %2074 = vmatpush1.bf16.msra.mxu1 %v3679_v18  ;;  %2300 = vmatpush1.bf16.msra.mxu0 %v3680_v19  ;;  %v3710_v39 = vld [vmem:[%s4261_s23 + $0x270] ss:$8 sps:$4 sm:$0xff]   ;;  %v3713_v41 = vld [vmem:[%s4261_s23 + $0x284] ss:$8 sps:$4 sm:$0xff]   ;;  %v3716_v43 = vld [vmem:[%s4261_s23 + $0x280] ss:$8 sps:$4 sm:$0xff]  }
  0x68   : > { %2075 = vmatprep.subr.bf16.mxu1 %v3681_v20  ;;  %2301 = vmatprep.subr.bf16.mxu0 %v3683_v21  ;;  %v3717_v44 = vld [vmem:[%s4261_s23 + $0x94] ss:$8 sps:$4 sm:$0xff]   ;;  %v3721_v46 = vld [vmem:[%s4261_s23 + $0x90] ss:$8 sps:$4 sm:$0xff]   ;;  %v3723_v48 = vld [vmem:[%s4261_s23 + $0xa4] ss:$8 sps:$4 sm:$0xff]  }
  0x69   : > { %v3719_v45 = vld [vmem:[%s4261_s23 + $0x294] ss:$8 sps:$4 sm:$0xff]   ;;  %v3722_v47 = vld [vmem:[%s4261_s23 + $0x290] ss:$8 sps:$4 sm:$0xff]   ;;  %v3725_v49 = vld [vmem:[%s4261_s23 + $0x2a4] ss:$8 sps:$4 sm:$0xff]  }
  0x6a   : > { %v3727_v50 = vld [vmem:[%s4261_s23 + $0xa0] ss:$8 sps:$4 sm:$0xff]   ;;  %v3729_v52 = vld [vmem:[%s4261_s23 + $0xb4] ss:$8 sps:$4 sm:$0xff]   ;;  %v3733_v54 = vld [vmem:[%s4261_s23 + $0xb0] ss:$8 sps:$4 sm:$0xff]  }
  0x6b   : > { %2076 = vmatpush1.bf16.msra.mxu1 %v3685_v22  ;;  %2302 = vmatpush1.bf16.msra.mxu0 %v3686_v23  ;;  %v3728_v51 = vld [vmem:[%s4261_s23 + $0x2a0] ss:$8 sps:$4 sm:$0xff]   ;;  %v3731_v53 = vld [vmem:[%s4261_s23 + $0x2b4] ss:$8 sps:$4 sm:$0xff]   ;;  %v3734_v55 = vld [vmem:[%s4261_s23 + $0x2b0] ss:$8 sps:$4 sm:$0xff]  }
  0x6c   : > { %2077 = vmatprep.subr.bf16.mxu1 %v3687_v24  ;;  %2303 = vmatprep.subr.bf16.mxu0 %v3689_v25  ;;  %v3735_v56 = vld [vmem:[%s4261_s23 + $0xc4] ss:$8 sps:$4 sm:$0xff]   ;;  %v3739_v58 = vld [vmem:[%s4261_s23 + $0xc0] ss:$8 sps:$4 sm:$0xff]   ;;  %v3741_v60 = vld [vmem:[%s4261_s23 + $0xd4] ss:$8 sps:$4 sm:$0xff]  }
  0x6d   : > { %v3737_v57 = vld [vmem:[%s4261_s23 + $0x2c4] ss:$8 sps:$4 sm:$0xff]   ;;  %v3740_v59 = vld [vmem:[%s4261_s23 + $0x2c0] ss:$8 sps:$4 sm:$0xff]   ;;  %v3743_v61 = vld [vmem:[%s4261_s23 + $0x2d4] ss:$8 sps:$4 sm:$0xff]  }
  0x6e   : > { %v3745_v62 = vld [vmem:[%s4261_s23 + $0xd0] ss:$8 sps:$4 sm:$0xff]   ;;  %v3747_v4 = vld [vmem:[%s4261_s23 + $0xe4] ss:$8 sps:$4 sm:$0xff]   ;;  %v3751_v8 = vld [vmem:[%s4261_s23 + $0xe0] ss:$8 sps:$4 sm:$0xff]  }
  0x6f   : > { %2078 = vmatpush1.bf16.msra.mxu1 %v3691_v26  ;;  %2304 = vmatpush1.bf16.msra.mxu0 %v3692_v27  ;;  %v3746_v63 = vld [vmem:[%s4261_s23 + $0x2d0] ss:$8 sps:$4 sm:$0xff]   ;;  %v3749_v7 = vld [vmem:[%s4261_s23 + $0x2e4] ss:$8 sps:$4 sm:$0xff]   ;;  %v3752_v9 = vld [vmem:[%s4261_s23 + $0x2e0] ss:$8 sps:$4 sm:$0xff]  }
  0x70   : > { %2079 = vmatprep.subr.bf16.mxu1 %v3693_v28  ;;  %2305 = vmatprep.subr.bf16.mxu0 %v3695_v29  ;;  %v3753_v10 = vld [vmem:[%s4261_s23 + $0xf4] ss:$8 sps:$4 sm:$0xff]   ;;  %v3757_v12 = vld [vmem:[%s4261_s23 + $0xf0] ss:$8 sps:$4 sm:$0xff]   ;;  %v3761_v14 = vld [vmem:[%s4261_s23 + $0x104] ss:$8 sps:$4 sm:$0xff]  }
  0x71   : > { %v3755_v11 = vld [vmem:[%s4261_s23 + $0x2f4] ss:$8 sps:$4 sm:$0xff]   ;;  %v3758_v13 = vld [vmem:[%s4261_s23 + $0x2f0] ss:$8 sps:$4 sm:$0xff]   ;;  %v3764_v15 = vld [vmem:[%s4261_s23 + $0x304] ss:$8 sps:$4 sm:$0xff]  }
  0x72   : > { %v925_v16 = vld [vmem:[%s4681_s0 + $0x40] sm:$0xff]  ;;  %v927_v18 = vld [vmem:[%s4681_s0 + $0x50] sm:$0xff]  ;;  %s4694_s5 = smov (!%p833_p11, %s3292_s5), 3  ;;  %s3291_s9 = sshll.u32 %s771_s7, 7 }
  0x73   : > { %2080 = vmatpush1.bf16.msra.mxu1 %v3697_v30  ;;  %2306 = vmatpush1.bf16.msra.mxu0 %v3698_v31  ;;  %v929_v17 = vld [vmem:[%s4681_s0 + $0x60] sm:$0xff]  ;;  %v931_v20 = vld [vmem:[%s4681_s0 + $0x70] sm:$0xff]  ;;  %s4594_s15 = scalar_lea.vmem [#allocation4], %s3291_s9  ;;  %s3294_s7 = sshll.u32 %s4694_s5, 1 }
  0x74   : > { %2081 = vmatprep.subr.bf16.mxu1 %v3699_v32  ;;  %2307 = vmatprep.subr.bf16.mxu0 %v3701_v33  ;;  %v3759_v19 = vld [vmem:[%s4261_s23 + $0x100] ss:$8 sps:$4 sm:$0xff]   ;;  %v3767_v22 = vld [vmem:[%s4261_s23 + $0x114] ss:$8 sps:$4 sm:$0xff]   ;;  %v3304_v24 = vcombine.high %v925_v16, %v929_v17  ;;  %v3308_v25 = vcombine.high %v927_v18, %v931_v20  ;;  %v3765_v26 = vld [vmem:[%s4261_s23 + $0x110] ss:$8 sps:$4 sm:$0xff]   ;;  %v3303_v2 = vcombine.low %v925_v16, %v929_v17  ;;  %s847_s12 = scalar_lea.vmem %s4685_s4, %s3294_s7 }
  0x75   : > { %v3762_v21 = vld [vmem:[%s4261_s23 + $0x300] ss:$8 sps:$4 sm:$0xff]   ;;  %v3770_v23 = vld [vmem:[%s4261_s23 + $0x314] ss:$8 sps:$4 sm:$0xff]   ;;  %v3768_v27 = vld [vmem:[%s4261_s23 + $0x310] ss:$8 sps:$4 sm:$0xff]  }
  0x76   : > { %v3773_v28 = vld [vmem:[%s4261_s23 + $0x124] ss:$8 sps:$4 sm:$0xff]   ;;  %v3771_v30 = vld [vmem:[%s4261_s23 + $0x120] ss:$8 sps:$4 sm:$0xff]   ;;  %v3779_v32 = vld [vmem:[%s4261_s23 + $0x134] ss:$8 sps:$4 sm:$0xff]  }
  0x77   : > { %2082 = vmatpush1.bf16.msra.mxu1 %v3703_v34  ;;  %2308 = vmatpush1.bf16.msra.mxu0 %v3704_v35  ;;  %v3776_v29 = vld [vmem:[%s4261_s23 + $0x324] ss:$8 sps:$4 sm:$0xff]   ;;  %v3774_v31 = vld [vmem:[%s4261_s23 + $0x320] ss:$8 sps:$4 sm:$0xff]   ;;  %v3782_v33 = vld [vmem:[%s4261_s23 + $0x334] ss:$8 sps:$4 sm:$0xff]  }
  0x78   : > { %2083 = vmatprep.subr.bf16.mxu1 %v3705_v36  ;;  %2309 = vmatprep.subr.bf16.mxu0 %v3707_v37  ;;  %v937_v1 = vld [vmem:[%s4681_s0 + $0xa0] sm:$0xff]  ;;  %v3777_v36 = vld [vmem:[%s4261_s23 + $0x130] ss:$8 sps:$4 sm:$0xff]   ;;  %s3526_s13 = sshll.u32 (%p3955_p6), %s3885_s17, 3 }
  0x79   : > { %v3312_v34 = vcombine.high %v933_v0, %v937_v1  ;;  %v3780_v37 = vld [vmem:[%s4261_s23 + $0x330] ss:$8 sps:$4 sm:$0xff]   ;;  %v961_v17 = vld [vmem:[%s4681_s0 + $0x160] sm:$0xff]  ;;  %s3043_s22 = scalar_lea.vmem (%p3955_p6), %s4684_s3, %s3526_s13 }
  0x7b   : > { %2084 = vmatpush1.bf16.msra.mxu1 %v3709_v38  ;;  %2310 = vmatpush1.bf16.msra.mxu0 %v3710_v39  ;;  %v3785_v38 = vld [vmem:[%s4261_s23 + $0x144] ss:$8 sps:$4 sm:$0xff]  }
  0x7c   : > { %2085 = vmatprep.subr.bf16.mxu1 %v3711_v40  ;;  %2311 = vmatprep.subr.bf16.mxu0 %v3713_v41  ;;  %v3788_v39 = vld [vmem:[%s4261_s23 + $0x344] ss:$8 sps:$4 sm:$0xff]   ;;  %v3311_v41 = vcombine.low %v933_v0, %v937_v1 }
  0x7d   : > { %v941_v40 = vld [vmem:[%s4681_s0 + $0xc0] sm:$0xff] }
  0x7e   : > { %v965_v0 = vld [vmem:[%s4681_s0 + $0x180] sm:$0xff] }
  0x7f   : > { %2086 = vmatpush1.bf16.msra.mxu1 %v3715_v42  ;;  %2312 = vmatpush1.bf16.msra.mxu0 %v3716_v43  ;;  %v945_v43 = vld [vmem:[%s4681_s0 + $0xe0] sm:$0xff] }
  0x80   : > { %2087 = vmatprep.subr.bf16.mxu1 %v3717_v44  ;;  %2313 = vmatprep.subr.bf16.mxu0 %v3719_v45  ;;  %v943_v44 = vld [vmem:[%s4681_s0 + $0xd0] sm:$0xff] }
  0x81   : > { %v947_v45 = vld [vmem:[%s4681_s0 + $0xf0] sm:$0xff] }
  0x83   : > { %2088 = vmatpush1.bf16.msra.mxu1 %v3721_v46  ;;  %2314 = vmatpush1.bf16.msra.mxu0 %v3722_v47  ;;  %v3783_v46 = vld [vmem:[%s4261_s23 + $0x140] ss:$8 sps:$4 sm:$0xff]  }
  0x84   : > { %2089 = vmatprep.subr.bf16.mxu1 %v3723_v48  ;;  %2315 = vmatprep.subr.bf16.mxu0 %v3725_v49  ;;  %v3786_v47 = vld [vmem:[%s4261_s23 + $0x340] ss:$8 sps:$4 sm:$0xff]   ;;  %v3791_v48 = vld [vmem:[%s4261_s23 + $0x154] ss:$8 sps:$4 sm:$0xff]  }
  0x85   : > { %v3794_v49 = vld [vmem:[%s4261_s23 + $0x354] ss:$8 sps:$4 sm:$0xff]  }
  0x87   : > { %2090 = vmatpush1.bf16.msra.mxu1 %v3727_v50  ;;  %2316 = vmatpush1.bf16.msra.mxu0 %v3728_v51  ;;  %v3320_v50 = vcombine.high %v941_v40, %v945_v43  ;;  %v3324_v51 = vcombine.high %v943_v44, %v947_v45 }
  0x88   : > { %2091 = vmatprep.subr.bf16.mxu1 %v3729_v52  ;;  %2317 = vmatprep.subr.bf16.mxu0 %v3731_v53  ;;  %v3789_v52 = vld [vmem:[%s4261_s23 + $0x150] ss:$8 sps:$4 sm:$0xff]  }
  0x89   : > { %v3792_v53 = vld [vmem:[%s4261_s23 + $0x350] ss:$8 sps:$4 sm:$0xff]  }
  0x8b   : > { %2092 = vmatpush1.bf16.msra.mxu1 %v3733_v54  ;;  %2318 = vmatpush1.bf16.msra.mxu0 %v3734_v55  ;;  %v3797_v54 = vld [vmem:[%s4261_s23 + $0x164] ss:$8 sps:$4 sm:$0xff]  }
  0x8c   : > { %2093 = vmatprep.subr.bf16.mxu1 %v3735_v56  ;;  %2319 = vmatprep.subr.bf16.mxu0 %v3737_v57  ;;  %v3800_v55 = vld [vmem:[%s4261_s23 + $0x364] ss:$8 sps:$4 sm:$0xff]   ;;  %v3795_v56 = vld [vmem:[%s4261_s23 + $0x160] ss:$8 sps:$4 sm:$0xff]  }
  0x8d   : > { %v949_v57 = vld [vmem:[%s4681_s0 + $0x100] sm:$0xff] }
  0x8f   : > { %2094 = vmatpush1.bf16.msra.mxu1 %v3739_v58  ;;  %2320 = vmatpush1.bf16.msra.mxu0 %v3740_v59  ;;  %v953_v58 = vld [vmem:[%s4681_s0 + $0x120] sm:$0xff]  ;;  %v3319_v59 = vcombine.low %v941_v40, %v945_v43 }
  0x90   : > { %2095 = vmatprep.subr.bf16.mxu1 %v3741_v60  ;;  %2321 = vmatprep.subr.bf16.mxu0 %v3743_v61  ;;  %v3323_v60 = vcombine.low %v943_v44, %v947_v45  ;;  %v951_v61 = vld [vmem:[%s4681_s0 + $0x110] sm:$0xff]  ;;  %v973_v40 = vld [vmem:[%s4681_s0 + $0x1c0] sm:$0xff] }
  0x91   : > { %v977_v43 = vld [vmem:[%s4681_s0 + $0x1e0] sm:$0xff]  ;;  %v975_v44 = vld [vmem:[%s4681_s0 + $0x1d0] sm:$0xff] }
  0x92   : > { %v979_v45 = vld [vmem:[%s4681_s0 + $0x1f0] sm:$0xff] }
  0x93   : > { %2096 = vmatpush1.bf16.msra.mxu1 %v3745_v62  ;;  %2322 = vmatpush1.bf16.msra.mxu0 %v3746_v63  ;;  %v955_v62 = vld [vmem:[%s4681_s0 + $0x130] sm:$0xff]  ;;  %v3798_v63 = vld [vmem:[%s4261_s23 + $0x360] ss:$8 sps:$4 sm:$0xff]  }
  0x94   : > { %2097 = vmatprep.subr.bf16.mxu1 %v3747_v4  ;;  %2323 = vmatprep.subr.bf16.mxu0 %v3749_v7  ;;  %v3803_v4 = vld [vmem:[%s4261_s23 + $0x174] ss:$8 sps:$4 sm:$0xff]   ;;  %v3331_v16 = vcombine.low %v951_v61, %v955_v62 }
  0x95   : > { %v3806_v7 = vld [vmem:[%s4261_s23 + $0x374] ss:$8 sps:$4 sm:$0xff]  }
  0x97   : > { %2098 = vmatpush1.bf16.msra.mxu1 %v3751_v8  ;;  %2324 = vmatpush1.bf16.msra.mxu0 %v3752_v9  ;;  %v3328_v8 = vcombine.high %v949_v57, %v953_v58  ;;  %v3332_v9 = vcombine.high %v951_v61, %v955_v62  ;;  %v924_v61 = vld [vmem:[%s4681_s0 + $0x38] sm:$0xff]  ;;  %v3843_v62 = vld [vmem:[%s4261_s23 + $0x1e0] ss:$8 sps:$4 sm:$0xff]  }
  0x98   : > { %2099 = vmatprep.subr.bf16.mxu1 %v3753_v10  ;;  %2325 = vmatprep.subr.bf16.mxu0 %v3755_v11  ;;  %v3801_v10 = vld [vmem:[%s4261_s23 + $0x170] ss:$8 sps:$4 sm:$0xff]  }
  0x99   : > { %v3804_v11 = vld [vmem:[%s4261_s23 + $0x370] ss:$8 sps:$4 sm:$0xff]  }
  0x9b   : > { %2100 = vmatpush1.bf16.msra.mxu1 %v3757_v12  ;;  %2326 = vmatpush1.bf16.msra.mxu0 %v3758_v13  ;;  %v3809_v12 = vld [vmem:[%s4261_s23 + $0x184] ss:$8 sps:$4 sm:$0xff]  }
  0x9c   : > { %2182 = vmatprep.subr.bf16.mxu1 %v3761_v14  ;;  %2408 = vmatprep.subr.bf16.mxu0 %v3764_v15  ;;  %v3812_v13 = vld [vmem:[%s4261_s23 + $0x384] ss:$8 sps:$4 sm:$0xff]   ;;  %v3327_v15 = vcombine.low %v949_v57, %v953_v58  ;;  %v3351_v57 = vcombine.low %v973_v40, %v977_v43  ;;  %v3355_v58 = vcombine.low %v975_v44, %v979_v45 }
  0x9d   : > { %v957_v14 = vld [vmem:[%s4681_s0 + $0x140] sm:$0xff] }
  0x9e   : > { %2102 = vmatmul.mubr.bf16.vlgmr.msra.gmra.mrb[0].mxu1 %v3295_v3  ;;  %2328 = vmatmul.mubr.bf16.vlgmr.msra.gmra.mrb[0].mxu0 %v3299_v6  ;;  %v3307_v3 = vcombine.low %v927_v18, %v931_v20  ;;  %v939_v6 = vld [vmem:[%s4681_s0 + $0xb0] sm:$0xff]  ;;  %v3807_v20 = vld [vmem:[%s4261_s23 + $0x180] ss:$8 sps:$4 sm:$0xff]   ;;  %v3335_v1 = vcombine.low %v957_v14, %v961_v17 }
  0x9f   : > { %2183 = vmatpush1.bf16.msra.mxu1 %v3759_v19  ;;  %2409 = vmatpush1.bf16.msra.mxu0 %v3762_v21  ;;  %v3316_v35 = vcombine.high %v935_v5, %v939_v6  ;;  %v3315_v42 = vcombine.low %v935_v5, %v939_v6  ;;  %v959_v18 = vld [vmem:[%s4681_s0 + $0x150] sm:$0xff]  ;;  %v3810_v21 = vld [vmem:[%s4261_s23 + $0x380] ss:$8 sps:$4 sm:$0xff]  }
  0xa0   : > { %2184 = vmatprep.subr.bf16.mxu1 %v3767_v22  ;;  %2410 = vmatprep.subr.bf16.mxu0 %v3770_v23  ;;  %v963_v19 = vld [vmem:[%s4681_s0 + $0x170] sm:$0xff] }
  0xa1   : > { %2111 = vmatprep.mubr.bf16.mxu1 %v3304_v24  ;;  %2337 = vmatprep.mubr.bf16.mxu0 %v3308_v25  ;;  %v3815_v22 = vld [vmem:[%s4261_s23 + $0x194] ss:$8 sps:$4 sm:$0xff]   ;;  %v3336_v24 = vcombine.high %v957_v14, %v961_v17  ;;  %v3340_v25 = vcombine.high %v959_v18, %v963_v19 }
  0xa2   : > { %v3818_v23 = vld [vmem:[%s4261_s23 + $0x394] ss:$8 sps:$4 sm:$0xff]  }
  0xa3   : > { %2185 = vmatpush1.bf16.msra.mxu1 %v3765_v26  ;;  %2411 = vmatpush1.bf16.msra.mxu0 %v3768_v27  ;;  %v3813_v26 = vld [vmem:[%s4261_s23 + $0x190] ss:$8 sps:$4 sm:$0xff]  }
  0xa4   : > { %2186 = vmatprep.subr.bf16.mxu1 %v3773_v28  ;;  %2412 = vmatprep.subr.bf16.mxu0 %v3776_v29  ;;  %v3816_v27 = vld [vmem:[%s4261_s23 + $0x390] ss:$8 sps:$4 sm:$0xff]   ;;  %v3821_v28 = vld [vmem:[%s4261_s23 + $0x1a4] ss:$8 sps:$4 sm:$0xff]  }
  0xa5   : > { %v3824_v29 = vld [vmem:[%s4261_s23 + $0x3a4] ss:$8 sps:$4 sm:$0xff]   ;;  %v967_v5 = vld [vmem:[%s4681_s0 + $0x190] sm:$0xff]  ;;  %v928_v14 = vld [vmem:[%s4681_s0 + $0x58] sm:$0xff] }
  0xa6   : > { %2112 = vmatmul.mubr.bf16.gmra.mrb[4].mxu1 %v3303_v2  ;;  %2338 = vmatmul.mubr.bf16.gmra.mrb[4].mxu0 %v3307_v3  ;;  %v3339_v2 = vcombine.low %v959_v18, %v963_v19  ;;  %v969_v3 = vld [vmem:[%s4681_s0 + $0x1a0] sm:$0xff]  ;;  %v971_v6 = vld [vmem:[%s4681_s0 + $0x1b0] sm:$0xff] }
  0xa7   : > { %2187 = vmatpush1.bf16.msra.mxu1 %v3771_v30  ;;  %2413 = vmatpush1.bf16.msra.mxu0 %v3774_v31  ;;  %v3819_v30 = vld [vmem:[%s4261_s23 + $0x1a0] ss:$8 sps:$4 sm:$0xff]  }
  0xa8   : > { %2188 = vmatprep.subr.bf16.mxu1 %v3779_v32  ;;  %2414 = vmatprep.subr.bf16.mxu0 %v3782_v33  ;;  %v3822_v31 = vld [vmem:[%s4261_s23 + $0x3a0] ss:$8 sps:$4 sm:$0xff]   ;;  %v3827_v32 = vld [vmem:[%s4261_s23 + $0x1b4] ss:$8 sps:$4 sm:$0xff]  }
  0xa9   : > { %2121 = vmatprep.mubr.bf16.mxu1 %v3312_v34  ;;  %2347 = vmatprep.mubr.bf16.mxu0 %v3316_v35  ;;  %v3830_v33 = vld [vmem:[%s4261_s23 + $0x3b4] ss:$8 sps:$4 sm:$0xff]   ;;  %v3344_v34 = vcombine.high %v965_v0, %v969_v3  ;;  %v3348_v35 = vcombine.high %v967_v5, %v971_v6 }
  0xab   : > { %2189 = vmatpush1.bf16.msra.mxu1 %v3777_v36  ;;  %2415 = vmatpush1.bf16.msra.mxu0 %v3780_v37  ;;  %v3825_v36 = vld [vmem:[%s4261_s23 + $0x1b0] ss:$8 sps:$4 sm:$0xff]  }
  0xac   : > { %2190 = vmatprep.subr.bf16.mxu1 %v3785_v38  ;;  %2416 = vmatprep.subr.bf16.mxu0 %v3788_v39  ;;  %v3828_v37 = vld [vmem:[%s4261_s23 + $0x3b0] ss:$8 sps:$4 sm:$0xff]   ;;  %v3833_v38 = vld [vmem:[%s4261_s23 + $0x1c4] ss:$8 sps:$4 sm:$0xff]  }
  0xad   : > { %v3836_v39 = vld [vmem:[%s4261_s23 + $0x3c4] ss:$8 sps:$4 sm:$0xff]  }
  0xae   : > { %2122 = vmatmul.mubr.bf16.gmra.mrb[8].mxu1 %v3311_v41  ;;  %2348 = vmatmul.mubr.bf16.gmra.mrb[8].mxu0 %v3315_v42  ;;  %v3343_v41 = vcombine.low %v965_v0, %v969_v3  ;;  %v3347_v42 = vcombine.low %v967_v5, %v971_v6  ;;  %v944_v0 = vld [vmem:[%s4681_s0 + $0xd8] sm:$0xff] }
  0xaf   : > { %2191 = vmatpush1.bf16.msra.mxu1 %v3783_v46  ;;  %2417 = vmatpush1.bf16.msra.mxu0 %v3786_v47  ;;  %v3831_v46 = vld [vmem:[%s4261_s23 + $0x1c0] ss:$8 sps:$4 sm:$0xff]  }
  0xb0   : > { %2192 = vmatprep.subr.bf16.mxu1 %v3791_v48  ;;  %2418 = vmatprep.subr.bf16.mxu0 %v3794_v49  ;;  %v3834_v47 = vld [vmem:[%s4261_s23 + $0x3c0] ss:$8 sps:$4 sm:$0xff]   ;;  %v3839_v48 = vld [vmem:[%s4261_s23 + $0x1d4] ss:$8 sps:$4 sm:$0xff]  }
  0xb1   : > { %2131 = vmatprep.mubr.bf16.mxu1 %v3320_v50  ;;  %2357 = vmatprep.mubr.bf16.mxu0 %v3324_v51  ;;  %v3842_v49 = vld [vmem:[%s4261_s23 + $0x3d4] ss:$8 sps:$4 sm:$0xff]   ;;  %v3352_v50 = vcombine.high %v973_v40, %v977_v43  ;;  %v3356_v51 = vcombine.high %v975_v44, %v979_v45 }
  0xb2   : > { %v960_v40 = vld [vmem:[%s4681_s0 + $0x158] sm:$0xff] }
  0xb3   : > { %2193 = vmatpush1.bf16.msra.mxu1 %v3789_v52  ;;  %2419 = vmatpush1.bf16.msra.mxu0 %v3792_v53  ;;  %v3837_v52 = vld [vmem:[%s4261_s23 + $0x1d0] ss:$8 sps:$4 sm:$0xff]  }
  0xb4   : > { %2194 = vmatprep.subr.bf16.mxu1 %v3797_v54  ;;  %2420 = vmatprep.subr.bf16.mxu0 %v3800_v55  ;;  %v3840_v53 = vld [vmem:[%s4261_s23 + $0x3d0] ss:$8 sps:$4 sm:$0xff]   ;;  %v3845_v54 = vld [vmem:[%s4261_s23 + $0x1e4] ss:$8 sps:$4 sm:$0xff]  }
  0xb5   : > { %v3848_v55 = vld [vmem:[%s4261_s23 + $0x3e4] ss:$8 sps:$4 sm:$0xff]  }
  0xb6   : > { %2132 = vmatmul.mubr.bf16.gmra.mrb[12].mxu1 %v3319_v59  ;;  %2358 = vmatmul.mubr.bf16.gmra.mrb[12].mxu0 %v3323_v60  ;;  %v922_v59 = vld [vmem:[%s4681_s0 + $0x28] sm:$0xff]  ;;  %v920_v60 = vld [vmem:[%s4681_s0 + $0x18] sm:$0xff] }
  0xb7   : > { %2195 = vmatpush1.bf16.msra.mxu1 %v3795_v56  ;;  %2421 = vmatpush1.bf16.msra.mxu0 %v3798_v63  ;;  %v918_v56 = vld [vmem:[%s4681_s0 + $0x8] sm:$0xff]  ;;  %v3301_v17 = vcombine.low %v920_v60, %v924_v61 }
  0xb8   : > { %2196 = vmatprep.subr.bf16.mxu1 %v3803_v4  ;;  %2422 = vmatprep.subr.bf16.mxu0 %v3806_v7  ;;  %v3846_v63 = vld [vmem:[%s4261_s23 + $0x3e0] ss:$8 sps:$4 sm:$0xff]   ;;  %v3851_v4 = vld [vmem:[%s4261_s23 + $0x1f4] ss:$8 sps:$4 sm:$0xff]  }
  0xb9   : > { %2141 = vmatprep.mubr.bf16.mxu1 %v3328_v8  ;;  %2367 = vmatprep.mubr.bf16.mxu0 %v3332_v9  ;;  %v3854_v7 = vld [vmem:[%s4261_s23 + $0x3f4] ss:$8 sps:$4 sm:$0xff]   ;;  %v3298_v8 = vcombine.high %v918_v56, %v922_v59  ;;  %v3302_v9 = vcombine.high %v920_v60, %v924_v61 }
  0xbb   : > { %2197 = vmatpush1.bf16.msra.mxu1 %v3801_v10  ;;  %2423 = vmatpush1.bf16.msra.mxu0 %v3804_v11  ;;  %v3849_v10 = vld [vmem:[%s4261_s23 + $0x1f0] ss:$8 sps:$4 sm:$0xff]  }
  0xbc   : > { %2198 = vmatprep.subr.bf16.mxu1 %v3809_v12  ;;  %2424 = vmatprep.subr.bf16.mxu0 %v3812_v13  ;;  %v3852_v11 = vld [vmem:[%s4261_s23 + $0x3f0] ss:$8 sps:$4 sm:$0xff]   ;;  %v926_v12 = vld [vmem:[%s4681_s0 + $0x48] sm:$0xff]  ;;  %s835_s23 = scalar_lea.vmem %s4683_s2, %s4694_s5 }
  0xbd   : > { %v930_v13 = vld [vmem:[%s4681_s0 + $0x68] sm:$0xff] }
  0xbe   : > { %2142 = vmatmul.mubr.bf16.gmra.mrb[16].mxu1 %v3327_v15  ;;  %2368 = vmatmul.mubr.bf16.gmra.mrb[16].mxu0 %v3331_v16  ;;  %v932_v15 = vld [vmem:[%s4681_s0 + $0x78] sm:$0xff]  ;;  %v3297_v16 = vcombine.low %v918_v56, %v922_v59  ;;  %v3306_v18 = vcombine.high %v926_v12, %v930_v13 }
  0xbf   : > { %2199 = vmatpush1.bf16.msra.mxu1 %v3807_v20  ;;  %2425 = vmatpush1.bf16.msra.mxu0 %v3810_v21  ;;  %v3310_v19 = vcombine.high %v928_v14, %v932_v15  ;;  %v934_v20 = vld [vmem:[%s4681_s0 + $0x88] sm:$0xff]  ;;  %v976_v56 = vld [vmem:[%s4681_s0 + $0x1d8] sm:$0xff] }
  0xc0   : > { %2200 = vmatprep.subr.bf16.mxu1 %v3815_v22  ;;  %2426 = vmatprep.subr.bf16.mxu0 %v3818_v23  ;;  %v938_v21 = vld [vmem:[%s4681_s0 + $0xa8] sm:$0xff]  ;;  %v936_v22 = vld [vmem:[%s4681_s0 + $0x98] sm:$0xff] }
  0xc1   : > { %2151 = vmatprep.mubr.bf16.mxu1 %v3336_v24  ;;  %2377 = vmatprep.mubr.bf16.mxu0 %v3340_v25  ;;  %v940_v23 = vld [vmem:[%s4681_s0 + $0xb8] sm:$0xff]  ;;  %v3305_v24 = vcombine.low %v926_v12, %v930_v13  ;;  %v3309_v25 = vcombine.low %v928_v14, %v932_v15 }
  0xc2   : > { %v3317_v3 = vcombine.low %v936_v22, %v940_v23 }
  0xc3   : > { %2201 = vmatpush1.bf16.msra.mxu1 %v3813_v26  ;;  %2427 = vmatpush1.bf16.msra.mxu0 %v3816_v27  ;;  %v3314_v26 = vcombine.high %v934_v20, %v938_v21  ;;  %v3318_v27 = vcombine.high %v936_v22, %v940_v23 }
  0xc4   : > { %2202 = vmatprep.subr.bf16.mxu1 %v3821_v28  ;;  %2428 = vmatprep.subr.bf16.mxu0 %v3824_v29  ;;  %v942_v28 = vld [vmem:[%s4681_s0 + $0xc8] sm:$0xff] }
  0xc5   : > { %v946_v29 = vld [vmem:[%s4681_s0 + $0xe8] sm:$0xff] }
  0xc6   : > { %2152 = vmatmul.mubr.bf16.gmra.mrb[20].mxu1 %v3335_v1  ;;  %2378 = vmatmul.mubr.bf16.gmra.mrb[20].mxu0 %v3339_v2  ;;  %v948_v1 = vld [vmem:[%s4681_s0 + $0xf8] sm:$0xff]  ;;  %v3313_v2 = vcombine.low %v934_v20, %v938_v21  ;;  %v3322_v5 = vcombine.high %v942_v28, %v946_v29 }
  0xc7   : > { %2203 = vmatpush1.bf16.msra.mxu1 %v3819_v30  ;;  %2429 = vmatpush1.bf16.msra.mxu0 %v3822_v31  ;;  %v3326_v6 = vcombine.high %v944_v0, %v948_v1  ;;  %v950_v30 = vld [vmem:[%s4681_s0 + $0x108] sm:$0xff] }
  0xc8   : > { %2204 = vmatprep.subr.bf16.mxu1 %v3827_v32  ;;  %2430 = vmatprep.subr.bf16.mxu0 %v3830_v33  ;;  %v954_v31 = vld [vmem:[%s4681_s0 + $0x128] sm:$0xff]  ;;  %v952_v32 = vld [vmem:[%s4681_s0 + $0x118] sm:$0xff] }
  0xc9   : > { %2161 = vmatprep.mubr.bf16.mxu1 %v3344_v34  ;;  %2387 = vmatprep.mubr.bf16.mxu0 %v3348_v35  ;;  %v956_v33 = vld [vmem:[%s4681_s0 + $0x138] sm:$0xff]  ;;  %v3321_v34 = vcombine.low %v942_v28, %v946_v29  ;;  %v3325_v35 = vcombine.low %v944_v0, %v948_v1 }
  0xca   : > { %v3333_v43 = vcombine.low %v952_v32, %v956_v33 }
  0xcb   : > { %2205 = vmatpush1.bf16.msra.mxu1 %v3825_v36  ;;  %2431 = vmatpush1.bf16.msra.mxu0 %v3828_v37  ;;  %v3330_v36 = vcombine.high %v950_v30, %v954_v31  ;;  %v3334_v37 = vcombine.high %v952_v32, %v956_v33 }
  0xcc   : > { %2206 = vmatprep.subr.bf16.mxu1 %v3833_v38  ;;  %2432 = vmatprep.subr.bf16.mxu0 %v3836_v39  ;;  %v958_v38 = vld [vmem:[%s4681_s0 + $0x148] sm:$0xff] }
  0xcd   : > { %v962_v39 = vld [vmem:[%s4681_s0 + $0x168] sm:$0xff] }
  0xce   : > { %2162 = vmatmul.mubr.bf16.gmra.mrb[24].mxu1 %v3343_v41  ;;  %2388 = vmatmul.mubr.bf16.gmra.mrb[24].mxu0 %v3347_v42  ;;  %v964_v41 = vld [vmem:[%s4681_s0 + $0x178] sm:$0xff]  ;;  %v3329_v42 = vcombine.low %v950_v30, %v954_v31  ;;  %v3338_v44 = vcombine.high %v958_v38, %v962_v39 }
  0xcf   : > { %2207 = vmatpush1.bf16.msra.mxu1 %v3831_v46  ;;  %2433 = vmatpush1.bf16.msra.mxu0 %v3834_v47  ;;  %v3342_v45 = vcombine.high %v960_v40, %v964_v41  ;;  %v966_v46 = vld [vmem:[%s4681_s0 + $0x188] sm:$0xff] }
  0xd0   : > { %2208 = vmatprep.subr.bf16.mxu1 %v3839_v48  ;;  %2434 = vmatprep.subr.bf16.mxu0 %v3842_v49  ;;  %v970_v47 = vld [vmem:[%s4681_s0 + $0x1a8] sm:$0xff]  ;;  %v968_v48 = vld [vmem:[%s4681_s0 + $0x198] sm:$0xff] }
  0xd1   : > { %2171 = vmatprep.mubr.bf16.mxu1 %v3352_v50  ;;  %2397 = vmatprep.mubr.bf16.mxu0 %v3356_v51  ;;  %v972_v49 = vld [vmem:[%s4681_s0 + $0x1b8] sm:$0xff]  ;;  %v3337_v50 = vcombine.low %v958_v38, %v962_v39  ;;  %v3341_v51 = vcombine.low %v960_v40, %v964_v41 }
  0xd2   : > { %v3349_v59 = vcombine.low %v968_v48, %v972_v49 }
  0xd3   : > { %2209 = vmatpush1.bf16.msra.mxu1 %v3837_v52  ;;  %2435 = vmatpush1.bf16.msra.mxu0 %v3840_v53  ;;  %v3346_v52 = vcombine.high %v966_v46, %v970_v47  ;;  %v3350_v53 = vcombine.high %v968_v48, %v972_v49 }
  0xd4   : > { %2210 = vmatprep.subr.bf16.mxu1 %v3845_v54  ;;  %2436 = vmatprep.subr.bf16.mxu0 %v3848_v55  ;;  %v974_v54 = vld [vmem:[%s4681_s0 + $0x1c8] sm:$0xff] }
  0xd5   : > { %v978_v55 = vld [vmem:[%s4681_s0 + $0x1e8] sm:$0xff] }
  0xd6   : > { %2172 = vmatmul.mubr.bf16.gmra.mrb[28].mxu1 %v3351_v57  ;;  %2398 = vmatmul.mubr.bf16.gmra.mrb[28].mxu0 %v3355_v58  ;;  %v980_v57 = vld [vmem:[%s4681_s0 + $0x1f8] sm:$0xff]  ;;  %v3345_v58 = vcombine.low %v966_v46, %v970_v47  ;;  %v3354_v60 = vcombine.high %v974_v54, %v978_v55 }
  0xd7   : > { %2211 = vmatpush1.bf16.msra.mxu1 %v3843_v62  ;;  %2437 = vmatpush1.bf16.msra.mxu0 %v3846_v63  ;;  %v3358_v61 = vcombine.high %v976_v56, %v980_v57  ;;  %v3353_v62 = vcombine.low %v974_v54, %v978_v55  ;;  %v3357_v63 = vcombine.low %v976_v56, %v980_v57 }
  0xd8   : > { %2212 = vmatprep.subr.bf16.mxu1 %v3851_v4  ;;  %2438 = vmatprep.subr.bf16.mxu0 %v3854_v7  ;;  %v2622_v4 = vlaneseq }
  0xd9   : > { %2214 = vmatprep.mubr.bf16.mxu1 %v3298_v8  ;;  %2440 = vmatprep.mubr.bf16.mxu0 %v3302_v9  ;;  %v2620_v9 = vld [vmem:[%s835_s23] sm:$0x3] }
  0xda   : > { %v2623_v7 = vshrl.u32 %v2622_v4, 7 }
  0xdb   : > { %2213 = vmatpush1.bf16.msra.mxu1 %v3849_v10  ;;  %2439 = vmatpush1.bf16.msra.mxu0 %v3852_v11 }
  0xdc   : > { %v2624_v8 = vsub.s32 0, %v2623_v7  ;;  %v2628_v10 = vsub.s32 1, %v2623_v7 }
  0xde   : > { %2215 = vmatmul.mubr.bf16.vlgmr.msra.gmra.mrb[0].mxu1 %v3297_v16  ;;  %2441 = vmatmul.mubr.bf16.vlgmr.msra.gmra.mrb[0].mxu0 %v3301_v17  ;;  %v4584_v11 = vrot.slane %v2620_v9, %v2624_v8  ;;  %v4586_v14 = vrot.slane %v2620_v9, %v2628_v10 }
  0xdf   : > { %2224 = vmatprep.mubr.bf16.mxu1 %v3306_v18  ;;  %2450 = vmatprep.mubr.bf16.mxu0 %v3310_v19 }
  0xe6   : > { %2225 = vmatmul.mubr.bf16.gmra.mrb[4].mxu1 %v3305_v24  ;;  %2451 = vmatmul.mubr.bf16.gmra.mrb[4].mxu0 %v3309_v25 }
  0xe7   : > { %2234 = vmatprep.mubr.bf16.mxu1 %v3314_v26  ;;  %2460 = vmatprep.mubr.bf16.mxu0 %v3318_v27 }
  0xee   : > { %2235 = vmatmul.mubr.bf16.gmra.mrb[8].mxu1 %v3313_v2  ;;  %2461 = vmatmul.mubr.bf16.gmra.mrb[8].mxu0 %v3317_v3 }
  0xef   : > { %2244 = vmatprep.mubr.bf16.mxu1 %v3322_v5  ;;  %2470 = vmatprep.mubr.bf16.mxu0 %v3326_v6 }
  0xf6   : > { %2245 = vmatmul.mubr.bf16.gmra.mrb[12].mxu1 %v3321_v34  ;;  %2471 = vmatmul.mubr.bf16.gmra.mrb[12].mxu0 %v3325_v35 }
  0xf7   : > { %2254 = vmatprep.mubr.bf16.mxu1 %v3330_v36  ;;  %2480 = vmatprep.mubr.bf16.mxu0 %v3334_v37 }
  0xfe   : > { %2255 = vmatmul.mubr.bf16.gmra.mrb[16].mxu1 %v3329_v42  ;;  %2481 = vmatmul.mubr.bf16.gmra.mrb[16].mxu0 %v3333_v43 }
  0xff   : > { %2264 = vmatprep.mubr.bf16.mxu1 %v3338_v44  ;;  %2490 = vmatprep.mubr.bf16.mxu0 %v3342_v45 }
 0x106   : > { %2265 = vmatmul.mubr.bf16.gmra.mrb[20].mxu1 %v3337_v50  ;;  %2491 = vmatmul.mubr.bf16.gmra.mrb[20].mxu0 %v3341_v51 }
 0x107   : > { %2274 = vmatprep.mubr.bf16.mxu1 %v3346_v52  ;;  %2500 = vmatprep.mubr.bf16.mxu0 %v3350_v53 }
 0x10e   : > { %2275 = vmatmul.mubr.bf16.gmra.mrb[24].mxu1 %v3345_v58  ;;  %2501 = vmatmul.mubr.bf16.gmra.mrb[24].mxu0 %v3349_v59 }
 0x10f   : > { %2284 = vmatprep.mubr.bf16.mxu1 %v3354_v60  ;;  %2510 = vmatprep.mubr.bf16.mxu0 %v3358_v61 }
 0x116   : > { %2285 = vmatmul.mubr.bf16.gmra.mrb[28].mxu1 %v3353_v62  ;;  %2511 = vmatmul.mubr.bf16.gmra.mrb[28].mxu0 %v3357_v63 }
 0x1b1   : > { %v2216_v12 = vpop.f32.mrb[0].mxu1  ;;  %v2442_v13 = vpop.f32.mrb[0].mxu0 }
 0x1b2   : > { %v3527_v15 = vadd.f32 %v2442_v13, %v2216_v12  ;;  %v2218_v16 = vpop.f32.mrb[1].mxu1  ;;  %v2444_v17 = vpop.f32.mrb[1].mxu0 }
 0x1b3   : > { %v3528_v18 = vadd.f32 %v2444_v17, %v2218_v16  ;;  %v2220_v19 = vpop.f32.mrb[2].mxu1  ;;  %v2446_v20 = vpop.f32.mrb[2].mxu0 }
 0x1b4   : > { %v2632_v21 = vadd.f32 %v3527_v15, %v4584_v11  ;;  %v3529_v22 = vadd.f32 %v2446_v20, %v2220_v19  ;;  %v2222_v23 = vpop.f32.mrb[3].mxu1  ;;  %v2448_v24 = vpop.f32.mrb[3].mxu0 }
 0x1b5   : > { %v2633_v25 = vadd.f32 %v3528_v18, %v4586_v14  ;;  %v3530_v26 = vadd.f32 %v2448_v24, %v2222_v23 }
 0x1b6   : > { %v2664_v27 = vmax.f32 %v2632_v21, 0.0  ;;  %v2634_v28 = vadd.f32 %v3529_v22, %v4584_v11 }
 0x1b7   : > { %v2665_v29 = vmax.f32 %v2633_v25, 0.0  ;;  %v2635_v0 = vadd.f32 %v3530_v26, %v4586_v14 }
 0x1b8   : > { %v2666_v1 = vmax.f32 %v2634_v28, 0.0  ;;  %v2933_v2 = vmul.f32 %v2664_v27, %v2664_v27 }
 0x1b9   : > { %v3510_v3 = vpack.c.bf16 %v2665_v29, %v2664_v27  ;;  %v2667_v5 = vmax.f32 %v2635_v0, 0.0  ;;  %v2226_v6 = vpop.f32.mrb[4].mxu1  ;;  %v2452_v30 = vpop.f32.mrb[4].mxu0  ;;  %v2934_v31 = vmul.f32 %v2665_v29, %v2665_v29 }
 0x1ba   : > { %v2891_v32 = vadd.f32 %v2666_v1, %v2664_v27  ;;  %v2935_v33 = vmul.f32 %v2666_v1, %v2666_v1  ;;  %v3531_v34 = vadd.f32 %v2452_v30, %v2226_v6  ;;  %v2228_v35 = vpop.f32.mrb[5].mxu1  ;;  %v2454_v36 = vpop.f32.mrb[5].mxu0 }
 0x1bb   : > { %2792 = vst [vmem:[%s4594_s15] sm:$0xff] %v3510_v3  ;;  %v3511_v37 = vpack.c.bf16 %v2667_v5, %v2666_v1  ;;  %v2912_v38 = vadd.f32 %v2667_v5, %v2665_v29  ;;  %v2936_v39 = vmul.f32 %v2667_v5, %v2667_v5  ;;  %v3532_v40 = vadd.f32 %v2454_v36, %v2228_v35  ;;  %v2230_v41 = vpop.f32.mrb[6].mxu1  ;;  %v2456_v42 = vpop.f32.mrb[6].mxu0 }
 0x1bc   : > { %v2965_v43 = vadd.f32 %v2935_v33, %v2933_v2  ;;  %v2636_v44 = vadd.f32 %v3531_v34, %v4584_v11  ;;  %v3533_v45 = vadd.f32 %v2456_v42, %v2230_v41  ;;  %v2232_v46 = vpop.f32.mrb[7].mxu1  ;;  %v2458_v47 = vpop.f32.mrb[7].mxu0 }
 0x1bd   : > { %2793 = vst [vmem:[%s4594_s15 + $0x8] sm:$0xff] %v3511_v37  ;;  %v2986_v48 = vadd.f32 %v2936_v39, %v2934_v31  ;;  %v2637_v49 = vadd.f32 %v3532_v40, %v4586_v14  ;;  %v3534_v50 = vadd.f32 %v2458_v47, %v2232_v46 }
 0x1be   : > { %v2668_v51 = vmax.f32 %v2636_v44, 0.0  ;;  %v2638_v52 = vadd.f32 %v3533_v45, %v4584_v11 }
 0x1bf   : > { %v2669_v53 = vmax.f32 %v2637_v49, 0.0  ;;  %v2639_v54 = vadd.f32 %v3534_v50, %v4586_v14 }
 0x1c0   : > { %v2892_v55 = vadd.f32 %v2891_v32, %v2668_v51  ;;  %v2937_v56 = vmul.f32 %v2668_v51, %v2668_v51  ;;  %v2670_v57 = vmax.f32 %v2638_v52, 0.0 }
 0x1c1   : > { %v3512_v58 = vpack.c.bf16 %v2669_v53, %v2668_v51  ;;  %v2913_v59 = vadd.f32 %v2912_v38, %v2669_v53  ;;  %v2938_v60 = vmul.f32 %v2669_v53, %v2669_v53  ;;  %v2671_v61 = vmax.f32 %v2639_v54, 0.0  ;;  %v2236_v62 = vpop.f32.mrb[8].mxu1  ;;  %v2462_v63 = vpop.f32.mrb[8].mxu0 }
 0x1c2   : > { %v2966_v4 = vadd.f32 %v2965_v43, %v2937_v56  ;;  %v2893_v7 = vadd.f32 %v2892_v55, %v2670_v57  ;;  %v2939_v8 = vmul.f32 %v2670_v57, %v2670_v57  ;;  %v3535_v9 = vadd.f32 %v2462_v63, %v2236_v62  ;;  %v2238_v10 = vpop.f32.mrb[9].mxu1  ;;  %v2464_v12 = vpop.f32.mrb[9].mxu0 }
 0x1c3   : > { %2794 = vst [vmem:[%s4594_s15 + $0x10] sm:$0xff] %v3512_v58  ;;  %v2987_v13 = vadd.f32 %v2986_v48, %v2938_v60  ;;  %v3513_v15 = vpack.c.bf16 %v2671_v61, %v2670_v57  ;;  %v2914_v16 = vadd.f32 %v2913_v59, %v2671_v61  ;;  %v2940_v17 = vmul.f32 %v2671_v61, %v2671_v61  ;;  %v2240_v18 = vpop.f32.mrb[10].mxu1  ;;  %v2466_v19 = vpop.f32.mrb[10].mxu0 }
 0x1c4   : > { %v2967_v20 = vadd.f32 %v2966_v4, %v2939_v8  ;;  %v2640_v21 = vadd.f32 %v3535_v9, %v4584_v11  ;;  %v3536_v22 = vadd.f32 %v2464_v12, %v2238_v10  ;;  %v3537_v23 = vadd.f32 %v2466_v19, %v2240_v18  ;;  %v2242_v24 = vpop.f32.mrb[11].mxu1  ;;  %v2468_v25 = vpop.f32.mrb[11].mxu0 }
 0x1c5   : > { %2795 = vst [vmem:[%s4594_s15 + $0x18] sm:$0xff] %v3513_v15  ;;  %v2988_v26 = vadd.f32 %v2987_v13, %v2940_v17  ;;  %v3538_v27 = vadd.f32 %v2468_v25, %v2242_v24 }
 0x1c6   : > { %v2672_v28 = vmax.f32 %v2640_v21, 0.0  ;;  %v2641_v29 = vadd.f32 %v3536_v22, %v4586_v14  ;;  %v2642_v0 = vadd.f32 %v3537_v23, %v4584_v11 }
 0x1c7   : > { %v2643_v1 = vadd.f32 %v3538_v27, %v4586_v14 }
 0x1c8   : > { %v2894_v2 = vadd.f32 %v2893_v7, %v2672_v28  ;;  %v2941_v3 = vmul.f32 %v2672_v28, %v2672_v28  ;;  %v2673_v5 = vmax.f32 %v2641_v29, 0.0  ;;  %v2674_v6 = vmax.f32 %v2642_v0, 0.0 }
 0x1c9   : > { %v2675_v30 = vmax.f32 %v2643_v1, 0.0  ;;  %v2246_v31 = vpop.f32.mrb[12].mxu1  ;;  %v2472_v32 = vpop.f32.mrb[12].mxu0 }
 0x1ca   : > { %v2968_v33 = vadd.f32 %v2967_v20, %v2941_v3  ;;  %v3514_v34 = vpack.c.bf16 %v2673_v5, %v2672_v28  ;;  %v2915_v35 = vadd.f32 %v2914_v16, %v2673_v5  ;;  %v2942_v36 = vmul.f32 %v2673_v5, %v2673_v5  ;;  %v2248_v37 = vpop.f32.mrb[13].mxu1  ;;  %v2474_v38 = vpop.f32.mrb[13].mxu0 }
 0x1cb   : > { %v2895_v39 = vadd.f32 %v2894_v2, %v2674_v6  ;;  %v2943_v40 = vmul.f32 %v2674_v6, %v2674_v6  ;;  %v3515_v41 = vpack.c.bf16 %v2675_v30, %v2674_v6  ;;  %v2944_v42 = vmul.f32 %v2675_v30, %v2675_v30  ;;  %v2250_v43 = vpop.f32.mrb[14].mxu1  ;;  %v2476_v44 = vpop.f32.mrb[14].mxu0 }
 0x1cc   : > { %2796 = vst [vmem:[%s4594_s15 + $0x20] sm:$0xff] %v3514_v34  ;;  %v2989_v45 = vadd.f32 %v2988_v26, %v2942_v36  ;;  %v2916_v46 = vadd.f32 %v2915_v35, %v2675_v30  ;;  %v3539_v47 = vadd.f32 %v2472_v32, %v2246_v31  ;;  %v3540_v48 = vadd.f32 %v2474_v38, %v2248_v37  ;;  %v2252_v49 = vpop.f32.mrb[15].mxu1  ;;  %v2478_v50 = vpop.f32.mrb[15].mxu0 }
 0x1cd   : > { %v2969_v51 = vadd.f32 %v2968_v33, %v2943_v40  ;;  %2797 = vst [vmem:[%s4594_s15 + $0x28] sm:$0xff] %v3515_v41  ;;  %v3541_v52 = vadd.f32 %v2476_v44, %v2250_v43  ;;  %v3542_v53 = vadd.f32 %v2478_v50, %v2252_v49 }
 0x1ce   : > { %v2990_v54 = vadd.f32 %v2989_v45, %v2944_v42  ;;  %v2644_v55 = vadd.f32 %v3539_v47, %v4584_v11  ;;  %v2645_v56 = vadd.f32 %v3540_v48, %v4586_v14 }
 0x1cf   : > { %v2646_v57 = vadd.f32 %v3541_v52, %v4584_v11  ;;  %v2647_v58 = vadd.f32 %v3542_v53, %v4586_v14 }
 0x1d0   : > { %v2676_v59 = vmax.f32 %v2644_v55, 0.0  ;;  %v2677_v60 = vmax.f32 %v2645_v56, 0.0 }
 0x1d1   : > { %v2678_v61 = vmax.f32 %v2646_v57, 0.0  ;;  %v2679_v62 = vmax.f32 %v2647_v58, 0.0  ;;  %v2256_v63 = vpop.f32.mrb[16].mxu1  ;;  %v2482_v4 = vpop.f32.mrb[16].mxu0 }
 0x1d2   : > { %v2896_v7 = vadd.f32 %v2895_v39, %v2676_v59  ;;  %v2945_v8 = vmul.f32 %v2676_v59, %v2676_v59  ;;  %v3516_v9 = vpack.c.bf16 %v2677_v60, %v2676_v59  ;;  %v2917_v10 = vadd.f32 %v2916_v46, %v2677_v60  ;;  %v2258_v12 = vpop.f32.mrb[17].mxu1  ;;  %v2484_v13 = vpop.f32.mrb[17].mxu0 }
 0x1d3   : > { %v2946_v15 = vmul.f32 %v2677_v60, %v2677_v60  ;;  %v2947_v16 = vmul.f32 %v2678_v61, %v2678_v61  ;;  %v3517_v17 = vpack.c.bf16 %v2679_v62, %v2678_v61  ;;  %v2948_v18 = vmul.f32 %v2679_v62, %v2679_v62  ;;  %v2260_v19 = vpop.f32.mrb[18].mxu1  ;;  %v2486_v20 = vpop.f32.mrb[18].mxu0 }
 0x1d4   : > { %v2970_v21 = vadd.f32 %v2969_v51, %v2945_v8  ;;  %2798 = vst [vmem:[%s4594_s15 + $0x30] sm:$0xff] %v3516_v9  ;;  %v2897_v22 = vadd.f32 %v2896_v7, %v2678_v61  ;;  %v2918_v23 = vadd.f32 %v2917_v10, %v2679_v62  ;;  %v3543_v24 = vadd.f32 %v2482_v4, %v2256_v63  ;;  %v2262_v25 = vpop.f32.mrb[19].mxu1  ;;  %v2488_v26 = vpop.f32.mrb[19].mxu0 }
 0x1d5   : > { %v2991_v27 = vadd.f32 %v2990_v54, %v2946_v15  ;;  %2799 = vst [vmem:[%s4594_s15 + $0x38] sm:$0xff] %v3517_v17  ;;  %v3544_v28 = vadd.f32 %v2484_v13, %v2258_v12  ;;  %v3545_v29 = vadd.f32 %v2486_v20, %v2260_v19  ;;  %v3546_v0 = vadd.f32 %v2488_v26, %v2262_v25 }
 0x1d6   : > { %v2971_v1 = vadd.f32 %v2970_v21, %v2947_v16  ;;  %v2648_v2 = vadd.f32 %v3543_v24, %v4584_v11 }
 0x1d7   : > { %v2992_v3 = vadd.f32 %v2991_v27, %v2948_v18  ;;  %v2649_v5 = vadd.f32 %v3544_v28, %v4586_v14  ;;  %v2650_v6 = vadd.f32 %v3545_v29, %v4584_v11  ;;  %v2651_v30 = vadd.f32 %v3546_v0, %v4586_v14 }
 0x1d8   : > { %v2680_v31 = vmax.f32 %v2648_v2, 0.0 }
 0x1d9   : > { %v2681_v32 = vmax.f32 %v2649_v5, 0.0  ;;  %v2682_v33 = vmax.f32 %v2650_v6, 0.0  ;;  %v2683_v34 = vmax.f32 %v2651_v30, 0.0  ;;  %v2266_v35 = vpop.f32.mrb[20].mxu1  ;;  %v2492_v36 = vpop.f32.mrb[20].mxu0 }
 0x1da   : > { %v2898_v37 = vadd.f32 %v2897_v22, %v2680_v31  ;;  %v2949_v38 = vmul.f32 %v2680_v31, %v2680_v31  ;;  %v3547_v39 = vadd.f32 %v2492_v36, %v2266_v35  ;;  %v2268_v40 = vpop.f32.mrb[21].mxu1  ;;  %v2494_v41 = vpop.f32.mrb[21].mxu0 }
 0x1db   : > { %v3518_v42 = vpack.c.bf16 %v2681_v32, %v2680_v31  ;;  %v2919_v43 = vadd.f32 %v2918_v23, %v2681_v32  ;;  %v2950_v44 = vmul.f32 %v2681_v32, %v2681_v32  ;;  %v2951_v45 = vmul.f32 %v2682_v33, %v2682_v33  ;;  %v2270_v46 = vpop.f32.mrb[22].mxu1  ;;  %v2496_v47 = vpop.f32.mrb[22].mxu0 }
 0x1dc   : > { %v2972_v48 = vadd.f32 %v2971_v1, %v2949_v38  ;;  %v2899_v49 = vadd.f32 %v2898_v37, %v2682_v33  ;;  %v3519_v50 = vpack.c.bf16 %v2683_v34, %v2682_v33  ;;  %v2952_v51 = vmul.f32 %v2683_v34, %v2683_v34  ;;  %v2272_v52 = vpop.f32.mrb[23].mxu1  ;;  %v2498_v53 = vpop.f32.mrb[23].mxu0 }
 0x1dd   : > { %2800 = vst [vmem:[%s4594_s15 + $0x40] sm:$0xff] %v3518_v42  ;;  %v2993_v54 = vadd.f32 %v2992_v3, %v2950_v44  ;;  %v2920_v55 = vadd.f32 %v2919_v43, %v2683_v34  ;;  %v2652_v56 = vadd.f32 %v3547_v39, %v4584_v11  ;;  %v3548_v57 = vadd.f32 %v2494_v41, %v2268_v40 }
 0x1de   : > { %v2973_v58 = vadd.f32 %v2972_v48, %v2951_v45  ;;  %2801 = vst [vmem:[%s4594_s15 + $0x48] sm:$0xff] %v3519_v50  ;;  %v3549_v59 = vadd.f32 %v2496_v47, %v2270_v46  ;;  %v3550_v60 = vadd.f32 %v2498_v53, %v2272_v52 }
 0x1df   : > { %v2994_v61 = vadd.f32 %v2993_v54, %v2952_v51  ;;  %v2684_v62 = vmax.f32 %v2652_v56, 0.0  ;;  %v2653_v63 = vadd.f32 %v3548_v57, %v4586_v14 }
 0x1e0   : > { %v2654_v4 = vadd.f32 %v3549_v59, %v4584_v11  ;;  %v2655_v7 = vadd.f32 %v3550_v60, %v4586_v14 }
 0x1e1   : > { %v2900_v8 = vadd.f32 %v2899_v49, %v2684_v62  ;;  %v2953_v9 = vmul.f32 %v2684_v62, %v2684_v62  ;;  %v2685_v10 = vmax.f32 %v2653_v63, 0.0  ;;  %v2276_v12 = vpop.f32.mrb[24].mxu1  ;;  %v2502_v13 = vpop.f32.mrb[24].mxu0 }
 0x1e2   : > { %v2686_v15 = vmax.f32 %v2654_v4, 0.0  ;;  %v2687_v16 = vmax.f32 %v2655_v7, 0.0  ;;  %v3551_v17 = vadd.f32 %v2502_v13, %v2276_v12  ;;  %v2278_v18 = vpop.f32.mrb[25].mxu1  ;;  %v2504_v19 = vpop.f32.mrb[25].mxu0 }
 0x1e3   : > { %v2974_v20 = vadd.f32 %v2973_v58, %v2953_v9  ;;  %v3520_v21 = vpack.c.bf16 %v2685_v10, %v2684_v62  ;;  %v2921_v22 = vadd.f32 %v2920_v55, %v2685_v10  ;;  %v2954_v23 = vmul.f32 %v2685_v10, %v2685_v10  ;;  %v2280_v24 = vpop.f32.mrb[26].mxu1  ;;  %v2506_v25 = vpop.f32.mrb[26].mxu0 }
 0x1e4   : > { %v2901_v26 = vadd.f32 %v2900_v8, %v2686_v15  ;;  %v2955_v27 = vmul.f32 %v2686_v15, %v2686_v15  ;;  %v3521_v28 = vpack.c.bf16 %v2687_v16, %v2686_v15  ;;  %v2956_v29 = vmul.f32 %v2687_v16, %v2687_v16  ;;  %v2282_v0 = vpop.f32.mrb[27].mxu1  ;;  %v2508_v1 = vpop.f32.mrb[27].mxu0 }
 0x1e5   : > { %2802 = vst [vmem:[%s4594_s15 + $0x50] sm:$0xff] %v3520_v21  ;;  %v2995_v2 = vadd.f32 %v2994_v61, %v2954_v23  ;;  %v2922_v3 = vadd.f32 %v2921_v22, %v2687_v16  ;;  %v2656_v5 = vadd.f32 %v3551_v17, %v4584_v11  ;;  %v3552_v6 = vadd.f32 %v2504_v19, %v2278_v18 }
 0x1e6   : > { %v2975_v30 = vadd.f32 %v2974_v20, %v2955_v27  ;;  %2803 = vst [vmem:[%s4594_s15 + $0x58] sm:$0xff] %v3521_v28  ;;  %v3553_v31 = vadd.f32 %v2506_v25, %v2280_v24  ;;  %v3554_v32 = vadd.f32 %v2508_v1, %v2282_v0 }
 0x1e7   : > { %v2996_v33 = vadd.f32 %v2995_v2, %v2956_v29  ;;  %v2688_v34 = vmax.f32 %v2656_v5, 0.0  ;;  %v2657_v35 = vadd.f32 %v3552_v6, %v4586_v14 }
 0x1e8   : > { %v2658_v36 = vadd.f32 %v3553_v31, %v4584_v11  ;;  %v2659_v37 = vadd.f32 %v3554_v32, %v4586_v14 }
 0x1e9   : > { %v2902_v38 = vadd.f32 %v2901_v26, %v2688_v34  ;;  %v2957_v39 = vmul.f32 %v2688_v34, %v2688_v34  ;;  %v2689_v40 = vmax.f32 %v2657_v35, 0.0  ;;  %v2286_v41 = vpop.f32.mrb[28].mxu1  ;;  %v2512_v42 = vpop.f32.mrb[28].mxu0 }
 0x1ea   : > { %v2690_v43 = vmax.f32 %v2658_v36, 0.0  ;;  %v2691_v44 = vmax.f32 %v2659_v37, 0.0  ;;  %v3555_v45 = vadd.f32 %v2512_v42, %v2286_v41  ;;  %v2288_v46 = vpop.f32.mrb[29].mxu1  ;;  %v2514_v47 = vpop.f32.mrb[29].mxu0 }
 0x1eb   : > { %v2976_v48 = vadd.f32 %v2975_v30, %v2957_v39  ;;  %v3522_v49 = vpack.c.bf16 %v2689_v40, %v2688_v34  ;;  %v2923_v50 = vadd.f32 %v2922_v3, %v2689_v40  ;;  %v2958_v51 = vmul.f32 %v2689_v40, %v2689_v40  ;;  %v2290_v52 = vpop.f32.mrb[30].mxu1  ;;  %v2516_v53 = vpop.f32.mrb[30].mxu0 }
 0x1ec   : > { %v2903_v54 = vadd.f32 %v2902_v38, %v2690_v43  ;;  %v2959_v55 = vmul.f32 %v2690_v43, %v2690_v43  ;;  %v3523_v56 = vpack.c.bf16 %v2691_v44, %v2690_v43  ;;  %v2960_v57 = vmul.f32 %v2691_v44, %v2691_v44  ;;  %v2292_v58 = vpop.f32.mrb[31].mxu1  ;;  %v2518_v59 = vpop.f32.mrb[31].mxu0 }
 0x1ed   : > { %2804 = vst [vmem:[%s4594_s15 + $0x60] sm:$0xff] %v3522_v49  ;;  %v2997_v60 = vadd.f32 %v2996_v33, %v2958_v51  ;;  %v2924_v61 = vadd.f32 %v2923_v50, %v2691_v44  ;;  %v2660_v62 = vadd.f32 %v3555_v45, %v4584_v11  ;;  %v3556_v63 = vadd.f32 %v2514_v47, %v2288_v46 }
 0x1ee   : > { %v2977_v4 = vadd.f32 %v2976_v48, %v2959_v55  ;;  %2805 = vst [vmem:[%s4594_s15 + $0x68] sm:$0xff] %v3523_v56  ;;  %v3557_v7 = vadd.f32 %v2516_v53, %v2290_v52  ;;  %v3558_v8 = vadd.f32 %v2518_v59, %v2292_v58  ;;  %v3101_v52 = vld [vmem:[%s4594_s15] sm:$0xff] (%p3955_p6)  ;;  %v3103_v53 = vld [vmem:[%s4594_s15 + $0x8] sm:$0xff] (%p3955_p6)  ;;  %v3107_v55 = vld [vmem:[%s4594_s15 + $0x18] sm:$0xff] (%p3955_p6) }
 0x1ef   : > { %v2998_v9 = vadd.f32 %v2997_v60, %v2960_v57  ;;  %v2692_v10 = vmax.f32 %v2660_v62, 0.0  ;;  %v2661_v12 = vadd.f32 %v3556_v63, %v4586_v14  ;;  %v3109_v56 = vld [vmem:[%s4594_s15 + $0x20] sm:$0xff] (%p3955_p6)  ;;  %v3111_v57 = vld [vmem:[%s4594_s15 + $0x28] sm:$0xff] (%p3955_p6)  ;;  %3102 = vst [vmem:[%s3043_s22] sm:$0xff] (%p3955_p6), %v3101_v52  ;;  %3104 = vst [vmem:[%s3043_s22 + $0x10] sm:$0xff] (%p3955_p6), %v3103_v53 }
 0x1f0   : > { %v2662_v13 = vadd.f32 %v3557_v7, %v4584_v11  ;;  %v2663_v15 = vadd.f32 %v3558_v8, %v4586_v14  ;;  %3108 = vst [vmem:[%s3043_s22 + $0x30] sm:$0xff] (%p3955_p6), %v3107_v55  ;;  %3110 = vst [vmem:[%s3043_s22 + $0x40] sm:$0xff] (%p3955_p6), %v3109_v56  ;;  %v3113_v58 = vld [vmem:[%s4594_s15 + $0x30] sm:$0xff] (%p3955_p6)  ;;  %v3115_v59 = vld [vmem:[%s4594_s15 + $0x38] sm:$0xff] (%p3955_p6) }
 0x1f1   : > { %v2904_v16 = vadd.f32 %v2903_v54, %v2692_v10  ;;  %v2961_v17 = vmul.f32 %v2692_v10, %v2692_v10  ;;  %v2693_v18 = vmax.f32 %v2661_v12, 0.0  ;;  %v3105_v54 = vld [vmem:[%s4594_s15 + $0x10] sm:$0xff] (%p3955_p6)  ;;  %3112 = vst [vmem:[%s3043_s22 + $0x50] sm:$0xff] (%p3955_p6), %v3111_v57  ;;  %v3117_v60 = vld [vmem:[%s4594_s15 + $0x40] sm:$0xff] (%p3955_p6)  ;;  %3114 = vst [vmem:[%s3043_s22 + $0x60] sm:$0xff] (%p3955_p6), %v3113_v58 }
 0x1f2   : > { %v2694_v19 = vmax.f32 %v2662_v13, 0.0  ;;  %v2695_v20 = vmax.f32 %v2663_v15, 0.0  ;;  %3106 = vst [vmem:[%s3043_s22 + $0x20] sm:$0xff] (%p3955_p6), %v3105_v54  ;;  %3116 = vst [vmem:[%s3043_s22 + $0x70] sm:$0xff] (%p3955_p6), %v3115_v59  ;;  %v3121_v62 = vld [vmem:[%s4594_s15 + $0x50] sm:$0xff] (%p3955_p6)  ;;  %v3123_v63 = vld [vmem:[%s4594_s15 + $0x58] sm:$0xff] (%p3955_p6) }
 0x1f3   : > { %v2978_v21 = vadd.f32 %v2977_v4, %v2961_v17  ;;  %v3524_v22 = vpack.c.bf16 %v2693_v18, %v2692_v10  ;;  %v2925_v23 = vadd.f32 %v2924_v61, %v2693_v18  ;;  %v2962_v24 = vmul.f32 %v2693_v18, %v2693_v18  ;;  %3118 = vst [vmem:[%s3043_s22 + $0x80] sm:$0xff] (%p3955_p6), %v3117_v60  ;;  %v3119_v61 = vld [vmem:[%s4594_s15 + $0x48] sm:$0xff] (%p3955_p6) }
 0x1f4   : > { %v2905_v25 = vadd.f32 %v2904_v16, %v2694_v19  ;;  %v2963_v26 = vmul.f32 %v2694_v19, %v2694_v19  ;;  %v3525_v27 = vpack.c.bf16 %v2695_v20, %v2694_v19  ;;  %v2964_v28 = vmul.f32 %v2695_v20, %v2695_v20  ;;  %3120 = vst [vmem:[%s3043_s22 + $0x90] sm:$0xff] (%p3955_p6), %v3119_v61  ;;  %v3125_v4 = vld [vmem:[%s4594_s15 + $0x60] sm:$0xff] (%p3955_p6) }
 0x1f5   : > { %2806 = vst [vmem:[%s4594_s15 + $0x70] sm:$0xff] %v3524_v22  ;;  %v2999_v29 = vadd.f32 %v2998_v9, %v2962_v24  ;;  %v2926_v0 = vadd.f32 %v2925_v23, %v2695_v20  ;;  %3122 = vst [vmem:[%s3043_s22 + $0xa0] sm:$0xff] (%p3955_p6), %v3121_v62  ;;  %v3127_v7 = vld [vmem:[%s4594_s15 + $0x68] sm:$0xff] (%p3955_p6) }
 0x1f6   : > { %v2906_v11 = vrot.slane %v2905_v25, 4  ;;  %v2979_v1 = vadd.f32 %v2978_v21, %v2963_v26  ;;  %2807 = vst [vmem:[%s4594_s15 + $0x78] sm:$0xff] %v3525_v27  ;;  %3124 = vst [vmem:[%s3043_s22 + $0xb0] sm:$0xff] (%p3955_p6), %v3123_v63 }
 0x1f7   : > { %v2927_v14 = vrot.slane %v2926_v0, 4  ;;  %v3000_v2 = vadd.f32 %v2999_v29, %v2964_v28  ;;  %3126 = vst [vmem:[%s3043_s22 + $0xc0] sm:$0xff] (%p3955_p6), %v3125_v4  ;;  %3128 = vst [vmem:[%s3043_s22 + $0xd0] sm:$0xff] (%p3955_p6), %v3127_v7 }
 0x1f8   : > { %v2907_v3 = vadd.f32 %v2906_v11, %v2905_v25  ;;  %v2980_v5 = vrot.slane %v2979_v1, 4 }
 0x1f9   : > { %v2928_v6 = vadd.f32 %v2927_v14, %v2926_v0  ;;  %v3001_v30 = vrot.slane %v3000_v2, 4 }
 0x1fa   : > { %v2908_v31 = vrot.slane %v2907_v3, 2  ;;  %v2981_v32 = vadd.f32 %v2980_v5, %v2979_v1 }
 0x1fb   : > { %v2929_v33 = vrot.slane %v2928_v6, 2  ;;  %v3002_v34 = vadd.f32 %v3001_v30, %v3000_v2 }
 0x1fc   : > { %v2909_v35 = vadd.f32 %v2908_v31, %v2907_v3  ;;  %v2982_v36 = vrot.slane %v2981_v32, 2  ;;  %v3129_v8 = vld [vmem:[%s4594_s15 + $0x70] sm:$0xff] (%p3955_p6) }
 0x1fd   : > { %v2930_v37 = vadd.f32 %v2929_v33, %v2928_v6  ;;  %v3003_v38 = vrot.slane %v3002_v34, 2  ;;  %3130 = vst [vmem:[%s3043_s22 + $0xe0] sm:$0xff] (%p3955_p6), %v3129_v8  ;;  %v3131_v9 = vld [vmem:[%s4594_s15 + $0x78] sm:$0xff] (%p3955_p6) }
 0x1fe   : > { %v2910_v39 = vrot.slane %v2909_v35, 1  ;;  %v2983_v40 = vadd.f32 %v2982_v36, %v2981_v32  ;;  %3132 = vst [vmem:[%s3043_s22 + $0xf0] sm:$0xff] (%p3955_p6), %v3131_v9 }
 0x1ff   : > { %v2931_v41 = vrot.slane %v2930_v37, 1  ;;  %v3004_v42 = vadd.f32 %v3003_v38, %v3002_v34 }
 0x200   : > { %v2984_v43 = vrot.slane %v2983_v40, 1  ;;  %v2911_v45 = vadd.f32 %v2910_v39, %v2909_v35 }
 0x201   : > { %v3005_v44 = vrot.slane %v3004_v42, 1  ;;  %v2932_v47 = vadd.f32 %v2931_v41, %v2930_v37 }
 0x202   : > { %v2985_v46 = vadd.f32 %v2984_v43, %v2983_v40  ;;  %3037 = sbr.rel (!%p3955_p6) target bundleno = 521 (0x209), region = 82 }
 0x203   : > { %v3006_v48 = vadd.f32 %v3005_v44, %v3004_v42 }
 0x204   : > { %v3008_v49 = vsel %vm3007_vm0, %v2911_v45, %v2985_v46 }
 0x205   : > { %v3009_v50 = vsel %vm3007_vm0, %v2932_v47, %v3006_v48 }
 0x206   : > { %v3012_v51 = vcombine.low %v3008_v49, %v3009_v50 }
 0x208   : > { %3503 = vst.sshfl [vmem:[%s847_s12] sm:$0x33 pattern:$0x76325410] %v3012_v51 }
 0x209 PF: > { %s15_s19 = sadd.s32 1, %s3893_s19   ;;  %s4687_s15 = smov %s3881_s16 }
 0x20a   : > { %p12_p12 = scmp.ge.s32.totalorder %s15_s19, 4   ;;  %s4688_s16 = smov %s3960_s25 }
 0x20b   : > { %s4689_s17 = smov %s3889_s18  ;;  %s4690_s18 = smov %s4692_s20 }
 0x20c   :  { %14 = sbr.rel (!%p12_p12) target bundleno = 3 (0x3), region = 169 }

// kernel: squeeze.179
= control target key start
LH: loop header
LB: loop body
LE: loop exit
PB: predicated region body
PF: predicated region fallthrough
CT: control target
= control target key end

     0   :  { %vm7_vm0 = vcmask 523264   ;;  %s39_s0 = inlined_call_operand.vmem [shape: f32[256], index: 0, kind: input, shape index: {}]   ;;  %s40_s1 = inlined_call_operand.vmem [shape: f32[4,64], index: 1, kind: output, shape index: {}]  }
   0x1   :  { %v4_v0 = vld [vmem:[%s39_s0] sm:$0x3]  ;;  %s22_s0 = smov 64  }
   0x2   :  { %5 = vst [vmem:[#allocation1] sm:$0x3] %v4_v0 }
   0x9   :  { %v9_v1 = vld [vmem:[#allocation1] sm:$0x3]  }
   0xa   :  { %v6_v2 = vld [vmem:[#allocation1] sm:$0x3]   ;;  %10 = vrot.lane.b32.xlu0 %v9_v1, %s22_s0 }
   0xb   :  { %8 = vst.msk [vmem:[#allocation0] ss:$2 sm:$0x3] %vm7_vm0, %v6_v2  }
  0x7c   :  { %v11_v3 = vpop.permute.xlu0 %10  }
  0x7d   :  { %14 = vst.msk [vmem:[#allocation0 + $0x1] ss:$2 sm:$0x3] %vm7_vm0, %v11_v3  }
  0x84   :  { %v18_v4 = vld [vmem:[#allocation0] sm:$0xf] }
  0x85   :  { %20 = vst [vmem:[%s40_s1] sm:$0xf] %v18_v4 }

// kernel: fcn16s_forward.9
= control target key start
LH: loop header
LB: loop body
LE: loop exit
PB: predicated region body
PF: predicated region fallthrough
CT: control target
= control target key end

     0   :  { %s3290_s15 = smov 0   ;;  %s3292_s16 = smov 0   ;;  %s4009_s0 = inlined_call_operand.vmem [shape: bf16[512,512], index: 0, kind: input, shape index: {}]   ;;  %s4010_s1 = inlined_call_operand.vmem [shape: bf16[512,256], index: 1, kind: input, shape index: {}]   ;;  %s4011_s2 = inlined_call_operand.vmem [shape: f32[1,256], index: 2, kind: input, shape index: {}]   ;;  %s4012_s3 = inlined_call_operand.vmem [shape: bf16[512,256], index: 3, kind: output, shape index: {0}]   ;;  %s4013_s4 = inlined_call_operand.vmem [shape: f32[2,2,256], index: 4, kind: output, shape index: {1}]  }
   0x1   :  { %s3294_s17 = smov 0  }
   0x2 LB: > { %s34_s18 = sadd.s32 1, %s3259_s16  ;;  %p2753_p0 = scmp.ge.s32.totalorder %s3263_s17, 1  ;;  %s3263_s17 = sphi %s3294_s17, %s15_s17   ;;  %s3259_s16 = sphi %s3292_s16, %s4015_s16   ;;  %s3255_s15 = sphi %s3290_s15, %s4014_s15  }
   0x3   : > { %p36_p1 = scmp.ge.s32.totalorder %s34_s18, 2  ;;  %p226_p2 = scmp.lt.s32.totalorder %s3263_s17, 3 }
   0x5   : > { %s4017_s18 = smov (%p36_p1, %s34_s18), 0  ;;  %p227_p3 = pnand %p2753_p0, %p226_p2 }
   0x6   : > { %v3049_v0 = vld [vmem:[%s4010_s1 + $0x4] ss:$8 sps:$4 sm:$0xff] (!%p227_p3)   ;;  %v3053_v2 = vld [vmem:[%s4010_s1] ss:$8 sps:$4 sm:$0xff] (!%p227_p3)   ;;  %v3055_v4 = vld [vmem:[%s4010_s1 + $0x14] ss:$8 sps:$4 sm:$0xff] (!%p227_p3)  }
   0x7   : > { %230 = sbr.rel (%p227_p3) target bundleno = 439 (0x1b7), region = 32  ;;  %v3051_v1 = vld [vmem:[%s4010_s1 + $0x104] ss:$8 sps:$4 sm:$0xff] (!%p227_p3)   ;;  %1236 = vmatprep.subr.bf16.mxu1 (!%p227_p3), %v3049_v0  ;;  %v3054_v3 = vld [vmem:[%s4010_s1 + $0x100] ss:$8 sps:$4 sm:$0xff] (!%p227_p3)   ;;  %s2754_s9 = sshll.u32 (!%p227_p3), %s3255_s15, 5 }
   0x8   : > { %1429 = vmatprep.subr.bf16.mxu0 (!%p227_p3), %v3051_v1  ;;  %1237 = vmatpush1.bf16.msra.mxu1 (!%p227_p3), %v3053_v2  ;;  %v3057_v5 = vld [vmem:[%s4010_s1 + $0x114] ss:$8 sps:$4 sm:$0xff] (!%p227_p3)   ;;  %v3059_v6 = vld [vmem:[%s4010_s1 + $0x10] ss:$8 sps:$4 sm:$0xff] (!%p227_p3)   ;;  %v3061_v8 = vld [vmem:[%s4010_s1 + $0x24] ss:$8 sps:$4 sm:$0xff] (!%p227_p3)  }
   0x9   : > { %1430 = vmatpush1.bf16.msra.mxu0 (!%p227_p3), %v3054_v3  ;;  %1238 = vmatprep.subr.bf16.mxu1 (!%p227_p3), %v3055_v4  ;;  %v3060_v7 = vld [vmem:[%s4010_s1 + $0x110] ss:$8 sps:$4 sm:$0xff] (!%p227_p3)   ;;  %v3063_v9 = vld [vmem:[%s4010_s1 + $0x124] ss:$8 sps:$4 sm:$0xff] (!%p227_p3)   ;;  %v3065_v10 = vld [vmem:[%s4010_s1 + $0x20] ss:$8 sps:$4 sm:$0xff] (!%p227_p3)  }
   0xa   : > { %1431 = vmatprep.subr.bf16.mxu0 (!%p227_p3), %v3057_v5  ;;  %v3066_v11 = vld [vmem:[%s4010_s1 + $0x120] ss:$8 sps:$4 sm:$0xff] (!%p227_p3)   ;;  %v3067_v12 = vld [vmem:[%s4010_s1 + $0x34] ss:$8 sps:$4 sm:$0xff] (!%p227_p3)   ;;  %v3071_v14 = vld [vmem:[%s4010_s1 + $0x30] ss:$8 sps:$4 sm:$0xff] (!%p227_p3)  }
   0xb   : > { %v3069_v13 = vld [vmem:[%s4010_s1 + $0x134] ss:$8 sps:$4 sm:$0xff] (!%p227_p3)   ;;  %v3072_v15 = vld [vmem:[%s4010_s1 + $0x130] ss:$8 sps:$4 sm:$0xff] (!%p227_p3)   ;;  %v3073_v16 = vld [vmem:[%s4010_s1 + $0x44] ss:$8 sps:$4 sm:$0xff] (!%p227_p3)  }
   0xc   : > { %1239 = vmatpush1.bf16.msra.mxu1 (!%p227_p3), %v3059_v6  ;;  %v3075_v17 = vld [vmem:[%s4010_s1 + $0x144] ss:$8 sps:$4 sm:$0xff] (!%p227_p3)   ;;  %v3077_v18 = vld [vmem:[%s4010_s1 + $0x40] ss:$8 sps:$4 sm:$0xff] (!%p227_p3)   ;;  %v3079_v20 = vld [vmem:[%s4010_s1 + $0x54] ss:$8 sps:$4 sm:$0xff] (!%p227_p3)  }
   0xd   : > { %1432 = vmatpush1.bf16.msra.mxu0 (!%p227_p3), %v3060_v7  ;;  %1240 = vmatprep.subr.bf16.mxu1 (!%p227_p3), %v3061_v8  ;;  %v3078_v19 = vld [vmem:[%s4010_s1 + $0x140] ss:$8 sps:$4 sm:$0xff] (!%p227_p3)   ;;  %v3081_v21 = vld [vmem:[%s4010_s1 + $0x154] ss:$8 sps:$4 sm:$0xff] (!%p227_p3)   ;;  %v3083_v22 = vld [vmem:[%s4010_s1 + $0x50] ss:$8 sps:$4 sm:$0xff] (!%p227_p3)  }
   0xe   : > { %1433 = vmatprep.subr.bf16.mxu0 %v3063_v9  ;;  %v3084_v23 = vld [vmem:[%s4010_s1 + $0x150] ss:$8 sps:$4 sm:$0xff]   ;;  %v3085_v24 = vld [vmem:[%s4010_s1 + $0x64] ss:$8 sps:$4 sm:$0xff]   ;;  %v3089_v26 = vld [vmem:[%s4010_s1 + $0x60] ss:$8 sps:$4 sm:$0xff]  }
   0xf   : > { %v3087_v25 = vld [vmem:[%s4010_s1 + $0x164] ss:$8 sps:$4 sm:$0xff]   ;;  %v3090_v27 = vld [vmem:[%s4010_s1 + $0x160] ss:$8 sps:$4 sm:$0xff]   ;;  %v3091_v28 = vld [vmem:[%s4010_s1 + $0x74] ss:$8 sps:$4 sm:$0xff]  }
  0x10   : > { %1241 = vmatpush1.bf16.msra.mxu1 %v3065_v10  ;;  %v3093_v29 = vld [vmem:[%s4010_s1 + $0x174] ss:$8 sps:$4 sm:$0xff]   ;;  %v3095_v30 = vld [vmem:[%s4010_s1 + $0x70] ss:$8 sps:$4 sm:$0xff]   ;;  %v3097_v32 = vld [vmem:[%s4010_s1 + $0x84] ss:$8 sps:$4 sm:$0xff]  }
  0x11   : > { %1434 = vmatpush1.bf16.msra.mxu0 %v3066_v11  ;;  %1242 = vmatprep.subr.bf16.mxu1 %v3067_v12  ;;  %v3096_v31 = vld [vmem:[%s4010_s1 + $0x170] ss:$8 sps:$4 sm:$0xff]   ;;  %v3099_v33 = vld [vmem:[%s4010_s1 + $0x184] ss:$8 sps:$4 sm:$0xff]   ;;  %p287_p4 = scmp.lt.s32.totalorder %s2754_s9, 63  ;;  %s2922_s24 = sshll.u32 %s3255_s15, 8 }
  0x12   : > { %1435 = vmatprep.subr.bf16.mxu0 %v3069_v13  ;;  %v3101_v34 = vld [vmem:[%s4010_s1 + $0x80] ss:$8 sps:$4 sm:$0xff]   ;;  %v3103_v36 = vld [vmem:[%s4010_s1 + $0x94] ss:$8 sps:$4 sm:$0xff]   ;;  %v3107_v38 = vld [vmem:[%s4010_s1 + $0x90] ss:$8 sps:$4 sm:$0xff]  }
  0x13   : > { %v3102_v35 = vld [vmem:[%s4010_s1 + $0x180] ss:$8 sps:$4 sm:$0xff]   ;;  %v3105_v37 = vld [vmem:[%s4010_s1 + $0x194] ss:$8 sps:$4 sm:$0xff]   ;;  %s4019_s9 = smov (!%p287_p4, %s2754_s9), 63  ;;  %p327_p5 = scmp.lt.s32.totalorder %s3255_s15, 1 }
  0x14   : > { %1243 = vmatpush1.bf16.msra.mxu1 %v3071_v14  ;;  %v3108_v39 = vld [vmem:[%s4010_s1 + $0x190] ss:$8 sps:$4 sm:$0xff]   ;;  %v3109_v40 = vld [vmem:[%s4010_s1 + $0xa4] ss:$8 sps:$4 sm:$0xff]   ;;  %s2926_s13 = sshll.u32 %s4019_s9, 4 }
  0x15   : > { %1436 = vmatpush1.bf16.msra.mxu0 %v3072_v15  ;;  %1244 = vmatprep.subr.bf16.mxu1 %v3073_v16  ;;  %v3111_v41 = vld [vmem:[%s4010_s1 + $0x1a4] ss:$8 sps:$4 sm:$0xff]   ;;  %v3113_v42 = vld [vmem:[%s4010_s1 + $0xa0] ss:$8 sps:$4 sm:$0xff]   ;;  %v3115_v44 = vld [vmem:[%s4010_s1 + $0xb4] ss:$8 sps:$4 sm:$0xff]   ;;  %s3452_s26 = scalar_lea.vmem %s4009_s0, %s2926_s13 }
  0x16   : > { %1437 = vmatprep.subr.bf16.mxu0 %v3075_v17  ;;  %v3114_v43 = vld [vmem:[%s4010_s1 + $0x1a0] ss:$8 sps:$4 sm:$0xff]   ;;  %v3117_v45 = vld [vmem:[%s4010_s1 + $0x1b4] ss:$8 sps:$4 sm:$0xff]   ;;  %v3119_v46 = vld [vmem:[%s4010_s1 + $0xb0] ss:$8 sps:$4 sm:$0xff]  }
  0x17   : > { %v3120_v47 = vld [vmem:[%s4010_s1 + $0x1b0] ss:$8 sps:$4 sm:$0xff]   ;;  %v3121_v48 = vld [vmem:[%s4010_s1 + $0xc4] ss:$8 sps:$4 sm:$0xff]   ;;  %v3125_v52 = vld [vmem:[%s4010_s1 + $0xc0] ss:$8 sps:$4 sm:$0xff]  }
  0x18   : > { %1245 = vmatpush1.bf16.msra.mxu1 %v3077_v18  ;;  %v3147_v49 = vld [vmem:[%s3452_s26 + $0x4] ss:$16 sps:$4 sm:$0xff]   ;;  %v3150_v51 = vld [vmem:[%s3452_s26 + $0xc] ss:$16 sps:$4 sm:$0xff]   ;;  %v3126_v53 = vld [vmem:[%s4010_s1 + $0x1c0] ss:$8 sps:$4 sm:$0xff]  }
  0x19   : > { %1438 = vmatpush1.bf16.msra.mxu0 %v3078_v19  ;;  %1246 = vmatprep.subr.bf16.mxu1 %v3079_v20  ;;  %v3123_v50 = vld [vmem:[%s4010_s1 + $0x1c4] ss:$8 sps:$4 sm:$0xff]   ;;  %v3127_v54 = vld [vmem:[%s4010_s1 + $0xd4] ss:$8 sps:$4 sm:$0xff]   ;;  %v3131_v56 = vld [vmem:[%s4010_s1 + $0xd0] ss:$8 sps:$4 sm:$0xff]  }
  0x1a   : > { %1439 = vmatprep.subr.bf16.mxu0 %v3081_v21  ;;  %1268 = vmatprep.mubr.bf16.mxu1 %v3147_v49  ;;  %v3129_v55 = vld [vmem:[%s4010_s1 + $0x1d4] ss:$8 sps:$4 sm:$0xff]   ;;  %v3132_v57 = vld [vmem:[%s4010_s1 + $0x1d0] ss:$8 sps:$4 sm:$0xff]   ;;  %v3133_v58 = vld [vmem:[%s4010_s1 + $0xe4] ss:$8 sps:$4 sm:$0xff]  }
  0x1b   : > { %1461 = vmatprep.mubr.bf16.mxu0 %v3150_v51  ;;  %v3135_v59 = vld [vmem:[%s4010_s1 + $0x1e4] ss:$8 sps:$4 sm:$0xff]   ;;  %v3137_v60 = vld [vmem:[%s4010_s1 + $0xe0] ss:$8 sps:$4 sm:$0xff]   ;;  %v3139_v62 = vld [vmem:[%s4010_s1 + $0xf4] ss:$8 sps:$4 sm:$0xff]  }
  0x1c   : > { %1247 = vmatpush1.bf16.msra.mxu1 %v3083_v22  ;;  %v3138_v61 = vld [vmem:[%s4010_s1 + $0x1e0] ss:$8 sps:$4 sm:$0xff]   ;;  %v3141_v63 = vld [vmem:[%s4010_s1 + $0x1f4] ss:$8 sps:$4 sm:$0xff]   ;;  %v3143_v0 = vld [vmem:[%s4010_s1 + $0xf0] ss:$8 sps:$4 sm:$0xff]  }
  0x1d   : > { %1440 = vmatpush1.bf16.msra.mxu0 %v3084_v23  ;;  %1248 = vmatprep.subr.bf16.mxu1 %v3085_v24  ;;  %v3144_v1 = vld [vmem:[%s4010_s1 + $0x1f0] ss:$8 sps:$4 sm:$0xff]   ;;  %v3151_v4 = vld [vmem:[%s3452_s26 + $0x24] ss:$16 sps:$4 sm:$0xff]   ;;  %v3153_v5 = vld [vmem:[%s3452_s26 + $0x2c] ss:$16 sps:$4 sm:$0xff]  }
  0x1e   : > { %1441 = vmatprep.subr.bf16.mxu0 %v3087_v25  ;;  %v3145_v2 = vld [vmem:[%s3452_s26] ss:$16 sps:$4 sm:$0xff]   ;;  %v3148_v3 = vld [vmem:[%s3452_s26 + $0x8] ss:$16 sps:$4 sm:$0xff]   ;;  %v3157_v8 = vld [vmem:[%s3452_s26 + $0x44] ss:$16 sps:$4 sm:$0xff]  }
  0x1f   : > { %v3155_v6 = vld [vmem:[%s3452_s26 + $0x20] ss:$16 sps:$4 sm:$0xff]   ;;  %v3156_v7 = vld [vmem:[%s3452_s26 + $0x28] ss:$16 sps:$4 sm:$0xff]   ;;  %v3159_v9 = vld [vmem:[%s3452_s26 + $0x4c] ss:$16 sps:$4 sm:$0xff]  }
  0x20   : > { %1249 = vmatpush1.bf16.msra.mxu1 %v3089_v26  ;;  %v3161_v10 = vld [vmem:[%s3452_s26 + $0x40] ss:$16 sps:$4 sm:$0xff]   ;;  %v3162_v11 = vld [vmem:[%s3452_s26 + $0x48] ss:$16 sps:$4 sm:$0xff]   ;;  %v3163_v12 = vld [vmem:[%s3452_s26 + $0x64] ss:$16 sps:$4 sm:$0xff]  }
  0x21   : > { %1442 = vmatpush1.bf16.msra.mxu0 %v3090_v27  ;;  %1250 = vmatprep.subr.bf16.mxu1 %v3091_v28  ;;  %v3165_v13 = vld [vmem:[%s3452_s26 + $0x6c] ss:$16 sps:$4 sm:$0xff]   ;;  %v3167_v14 = vld [vmem:[%s3452_s26 + $0x60] ss:$16 sps:$4 sm:$0xff]   ;;  %v3168_v15 = vld [vmem:[%s3452_s26 + $0x68] ss:$16 sps:$4 sm:$0xff]  }
  0x22   : > { %1443 = vmatprep.subr.bf16.mxu0 %v3093_v29  ;;  %v3169_v16 = vld [vmem:[%s3452_s26 + $0x84] ss:$16 sps:$4 sm:$0xff]   ;;  %v3171_v17 = vld [vmem:[%s3452_s26 + $0x8c] ss:$16 sps:$4 sm:$0xff]   ;;  %v3173_v18 = vld [vmem:[%s3452_s26 + $0x80] ss:$16 sps:$4 sm:$0xff]  }
  0x23   : > { %v3174_v19 = vld [vmem:[%s3452_s26 + $0x88] ss:$16 sps:$4 sm:$0xff]   ;;  %v3175_v20 = vld [vmem:[%s3452_s26 + $0xa4] ss:$16 sps:$4 sm:$0xff]   ;;  %v3177_v21 = vld [vmem:[%s3452_s26 + $0xac] ss:$16 sps:$4 sm:$0xff]  }
  0x24   : > { %1251 = vmatpush1.bf16.msra.mxu1 %v3095_v30  ;;  %v3179_v22 = vld [vmem:[%s3452_s26 + $0xa0] ss:$16 sps:$4 sm:$0xff]   ;;  %v3180_v23 = vld [vmem:[%s3452_s26 + $0xa8] ss:$16 sps:$4 sm:$0xff]   ;;  %v3181_v24 = vld [vmem:[%s3452_s26 + $0xc4] ss:$16 sps:$4 sm:$0xff]  }
  0x25   : > { %1444 = vmatpush1.bf16.msra.mxu0 %v3096_v31  ;;  %1252 = vmatprep.subr.bf16.mxu1 %v3097_v32  ;;  %v3183_v25 = vld [vmem:[%s3452_s26 + $0xcc] ss:$16 sps:$4 sm:$0xff]   ;;  %v3185_v26 = vld [vmem:[%s3452_s26 + $0xc0] ss:$16 sps:$4 sm:$0xff]   ;;  %v3186_v27 = vld [vmem:[%s3452_s26 + $0xc8] ss:$16 sps:$4 sm:$0xff]  }
  0x26   : > { %1445 = vmatprep.subr.bf16.mxu0 %v3099_v33  ;;  %v3187_v28 = vld [vmem:[%s3452_s26 + $0xe4] ss:$16 sps:$4 sm:$0xff]   ;;  %v3189_v29 = vld [vmem:[%s3452_s26 + $0xec] ss:$16 sps:$4 sm:$0xff]   ;;  %v3191_v30 = vld [vmem:[%s3452_s26 + $0xe0] ss:$16 sps:$4 sm:$0xff]  }
  0x27   : > { %v3192_v31 = vld [vmem:[%s3452_s26 + $0xe8] ss:$16 sps:$4 sm:$0xff]   ;;  %v3193_v32 = vld [vmem:[%s3452_s26 + $0x104] ss:$16 sps:$4 sm:$0xff]   ;;  %v3195_v33 = vld [vmem:[%s3452_s26 + $0x10c] ss:$16 sps:$4 sm:$0xff]  }
  0x28   : > { %1253 = vmatpush1.bf16.msra.mxu1 %v3101_v34  ;;  %v3197_v34 = vld [vmem:[%s3452_s26 + $0x100] ss:$16 sps:$4 sm:$0xff]   ;;  %v3219_v49 = vld [vmem:[%s3452_s26 + $0x18c] ss:$16 sps:$4 sm:$0xff]   ;;  %v3222_v51 = vld [vmem:[%s3452_s26 + $0x188] ss:$16 sps:$4 sm:$0xff]  }
  0x29   : > { %1446 = vmatpush1.bf16.msra.mxu0 %v3102_v35  ;;  %1254 = vmatprep.subr.bf16.mxu1 %v3103_v36  ;;  %v3198_v35 = vld [vmem:[%s3452_s26 + $0x108] ss:$16 sps:$4 sm:$0xff]   ;;  %v3199_v36 = vld [vmem:[%s3452_s26 + $0x124] ss:$16 sps:$4 sm:$0xff]   ;;  %s4021_s15 = smov (!%p327_p5, %s3255_s15), 1 }
  0x2a   : > { %1447 = vmatprep.subr.bf16.mxu0 %v3105_v37  ;;  %v3201_v37 = vld [vmem:[%s3452_s26 + $0x12c] ss:$16 sps:$4 sm:$0xff]   ;;  %s2928_s30 = sshll.u32 %s4021_s15, 2 }
  0x2b   : > { %s334_s7 = scalar_lea.vmem %s4013_s4, %s2928_s30 }
  0x2c   : > { %1255 = vmatpush1.bf16.msra.mxu1 %v3107_v38  ;;  %v3203_v38 = vld [vmem:[%s3452_s26 + $0x120] ss:$16 sps:$4 sm:$0xff]  }
  0x2d   : > { %1448 = vmatpush1.bf16.msra.mxu0 %v3108_v39  ;;  %1256 = vmatprep.subr.bf16.mxu1 %v3109_v40  ;;  %v3204_v39 = vld [vmem:[%s3452_s26 + $0x128] ss:$16 sps:$4 sm:$0xff]   ;;  %v3205_v40 = vld [vmem:[%s3452_s26 + $0x144] ss:$16 sps:$4 sm:$0xff]  }
  0x2e   : > { %1449 = vmatprep.subr.bf16.mxu0 %v3111_v41  ;;  %v3207_v41 = vld [vmem:[%s3452_s26 + $0x14c] ss:$16 sps:$4 sm:$0xff]  }
  0x30   : > { %1257 = vmatpush1.bf16.msra.mxu1 %v3113_v42  ;;  %v3209_v42 = vld [vmem:[%s3452_s26 + $0x140] ss:$16 sps:$4 sm:$0xff]  }
  0x31   : > { %1450 = vmatpush1.bf16.msra.mxu0 %v3114_v43  ;;  %1258 = vmatprep.subr.bf16.mxu1 %v3115_v44  ;;  %v3210_v43 = vld [vmem:[%s3452_s26 + $0x148] ss:$16 sps:$4 sm:$0xff]   ;;  %v3211_v44 = vld [vmem:[%s3452_s26 + $0x164] ss:$16 sps:$4 sm:$0xff]  }
  0x32   : > { %1451 = vmatprep.subr.bf16.mxu0 %v3117_v45  ;;  %v3213_v45 = vld [vmem:[%s3452_s26 + $0x16c] ss:$16 sps:$4 sm:$0xff]  }
  0x34   : > { %1259 = vmatpush1.bf16.msra.mxu1 %v3119_v46  ;;  %v3215_v46 = vld [vmem:[%s3452_s26 + $0x160] ss:$16 sps:$4 sm:$0xff]  }
  0x35   : > { %1452 = vmatpush1.bf16.msra.mxu0 %v3120_v47  ;;  %1260 = vmatprep.subr.bf16.mxu1 %v3121_v48  ;;  %v3216_v47 = vld [vmem:[%s3452_s26 + $0x168] ss:$16 sps:$4 sm:$0xff]   ;;  %v3217_v48 = vld [vmem:[%s3452_s26 + $0x184] ss:$16 sps:$4 sm:$0xff]  }
  0x36   : > { %1453 = vmatprep.subr.bf16.mxu0 %v3123_v50  ;;  %v3221_v50 = vld [vmem:[%s3452_s26 + $0x180] ss:$16 sps:$4 sm:$0xff]  }
  0x38   : > { %1261 = vmatpush1.bf16.msra.mxu1 %v3125_v52  ;;  %v3223_v52 = vld [vmem:[%s3452_s26 + $0x1a4] ss:$16 sps:$4 sm:$0xff]  }
  0x39   : > { %1454 = vmatpush1.bf16.msra.mxu0 %v3126_v53  ;;  %1262 = vmatprep.subr.bf16.mxu1 %v3127_v54  ;;  %v3225_v53 = vld [vmem:[%s3452_s26 + $0x1ac] ss:$16 sps:$4 sm:$0xff]   ;;  %v3227_v54 = vld [vmem:[%s3452_s26 + $0x1a0] ss:$16 sps:$4 sm:$0xff]  }
  0x3a   : > { %1455 = vmatprep.subr.bf16.mxu0 %v3129_v55  ;;  %v3228_v55 = vld [vmem:[%s3452_s26 + $0x1a8] ss:$16 sps:$4 sm:$0xff]  }
  0x3c   : > { %1263 = vmatpush1.bf16.msra.mxu1 %v3131_v56  ;;  %v3229_v56 = vld [vmem:[%s3452_s26 + $0x1c4] ss:$16 sps:$4 sm:$0xff]  }
  0x3d   : > { %1456 = vmatpush1.bf16.msra.mxu0 %v3132_v57  ;;  %1264 = vmatprep.subr.bf16.mxu1 %v3133_v58  ;;  %v3231_v57 = vld [vmem:[%s3452_s26 + $0x1cc] ss:$16 sps:$4 sm:$0xff]   ;;  %v3233_v58 = vld [vmem:[%s3452_s26 + $0x1c0] ss:$16 sps:$4 sm:$0xff]  }
  0x3e   : > { %1457 = vmatprep.subr.bf16.mxu0 %v3135_v59  ;;  %v3234_v59 = vld [vmem:[%s3452_s26 + $0x1c8] ss:$16 sps:$4 sm:$0xff]  }
  0x40   : > { %1265 = vmatpush1.bf16.msra.mxu1 %v3137_v60  ;;  %v3235_v60 = vld [vmem:[%s3452_s26 + $0x1e4] ss:$16 sps:$4 sm:$0xff]  }
  0x41   : > { %1458 = vmatpush1.bf16.msra.mxu0 %v3138_v61  ;;  %1266 = vmatprep.subr.bf16.mxu1 %v3139_v62  ;;  %v3237_v61 = vld [vmem:[%s3452_s26 + $0x1ec] ss:$16 sps:$4 sm:$0xff]   ;;  %v3239_v62 = vld [vmem:[%s3452_s26 + $0x1e0] ss:$16 sps:$4 sm:$0xff]  }
  0x42   : > { %1459 = vmatprep.subr.bf16.mxu0 %v3141_v63  ;;  %v3240_v63 = vld [vmem:[%s3452_s26 + $0x1e8] ss:$16 sps:$4 sm:$0xff]   ;;  %s2927_s26 = sshll.u32 %s4019_s9, 3 }
  0x43   : > { %s3647_s29 = scalar_lea.vmem %s4012_s3, %s2927_s26 }
  0x44   : > { %1267 = vmatpush1.bf16.msra.mxu1 %v3143_v0  ;;  %v1819_v0 = vlaneseq }
  0x45   : > { %1460 = vmatpush1.bf16.msra.mxu0 %v3144_v1 }
  0x46   : > { %v3576_v1 = vshrl.u32 %v1819_v0, 7 }
  0x47   : > { %1269 = vmatmul.mubr.bf16.vlgmr.msra.gmra.mrb[0].mxu1 %v3145_v2  ;;  %v3578_v2 = vstv %s2922_s24 }
  0x48   : > { %1462 = vmatmul.mubr.bf16.vlgmr.msra.gmra.mrb[0].mxu0 %v3148_v3  ;;  %1278 = vmatprep.mubr.bf16.mxu1 %v3151_v4  ;;  %v2183_v3 = vadd.s32 8, %v3576_v1  ;;  %v1821_v4 = vsub.s32 0, %v3576_v1 }
  0x49   : > { %1471 = vmatprep.mubr.bf16.mxu0 %v3153_v5  ;;  %v2216_v5 = vadd.s32 %v3578_v2, %v3576_v1 }
  0x4b   : > { %vm2248_vm0 = vcmp.lt.s32.totalorder %v2216_v5, 512 }
  0x4f   : > { %1279 = vmatmul.mubr.bf16.gmra.mrb[4].mxu1 %v3155_v6  ;;  %v1825_v6 = vsub.s32 1, %v3576_v1 }
  0x50   : > { %1472 = vmatmul.mubr.bf16.gmra.mrb[4].mxu0 %v3156_v7  ;;  %1288 = vmatprep.mubr.bf16.mxu1 %v3157_v8  ;;  %v1817_v7 = vld [vmem:[%s4011_s2] sm:$0x3]  ;;  %v3589_v8 = vadd.s32 %v3578_v2, %v2183_v3 }
  0x51   : > { %1481 = vmatprep.mubr.bf16.mxu0 %v3159_v9  ;;  %v2184_v9 = vadd.s32 16, %v3576_v1 }
  0x52   : > { %vm2249_vm1 = vcmp.lt.s32.totalorder %v3589_v8, 512 }
  0x57   : > { %1289 = vmatmul.mubr.bf16.gmra.mrb[8].mxu1 %v3161_v10  ;;  %v2185_v10 = vadd.s32 24, %v3576_v1 }
  0x58   : > { %1482 = vmatmul.mubr.bf16.gmra.mrb[8].mxu0 %v3162_v11  ;;  %1298 = vmatprep.mubr.bf16.mxu1 %v3163_v12  ;;  %v2186_v11 = vadd.s32 32, %v3576_v1  ;;  %v3594_v12 = vrot.slane %v1817_v7, %v1821_v4 }
  0x59   : > { %1491 = vmatprep.mubr.bf16.mxu0 %v3165_v13  ;;  %v3596_v13 = vrot.slane %v1817_v7, %v1825_v6 }
  0x5f   : > { %1299 = vmatmul.mubr.bf16.gmra.mrb[12].mxu1 %v3167_v14  ;;  %v2187_v14 = vadd.s32 40, %v3576_v1 }
  0x60   : > { %1492 = vmatmul.mubr.bf16.gmra.mrb[12].mxu0 %v3168_v15  ;;  %1308 = vmatprep.mubr.bf16.mxu1 %v3169_v16 }
  0x61   : > { %1501 = vmatprep.mubr.bf16.mxu0 %v3171_v17  ;;  %v3601_v17 = vadd.s32 %v3578_v2, %v2184_v9 }
  0x63   : > { %vm2250_vm2 = vcmp.lt.s32.totalorder %v3601_v17, 512 }
  0x67   : > { %1309 = vmatmul.mubr.bf16.gmra.mrb[16].mxu1 %v3173_v18  ;;  %v2188_v18 = vadd.s32 48, %v3576_v1 }
  0x68   : > { %1502 = vmatmul.mubr.bf16.gmra.mrb[16].mxu0 %v3174_v19  ;;  %1318 = vmatprep.mubr.bf16.mxu1 %v3175_v20  ;;  %v2189_v19 = vadd.s32 56, %v3576_v1 }
  0x69   : > { %1511 = vmatprep.mubr.bf16.mxu0 %v3177_v21 }
  0x6f   : > { %1319 = vmatmul.mubr.bf16.gmra.mrb[20].mxu1 %v3179_v22 }
  0x70   : > { %1512 = vmatmul.mubr.bf16.gmra.mrb[20].mxu0 %v3180_v23  ;;  %1328 = vmatprep.mubr.bf16.mxu1 %v3181_v24  ;;  %v3606_v23 = vadd.s32 %v3578_v2, %v2185_v10  ;;  %v2190_v24 = vadd.s32 64, %v3576_v1 }
  0x71   : > { %1521 = vmatprep.mubr.bf16.mxu0 %v3183_v25  ;;  %v2191_v25 = vadd.s32 72, %v3576_v1 }
  0x72   : > { %vm2251_vm3 = vcmp.lt.s32.totalorder %v3606_v23, 512 }
  0x77   : > { %1329 = vmatmul.mubr.bf16.gmra.mrb[24].mxu1 %v3185_v26 }
  0x78   : > { %1522 = vmatmul.mubr.bf16.gmra.mrb[24].mxu0 %v3186_v27  ;;  %1338 = vmatprep.mubr.bf16.mxu1 %v3187_v28 }
  0x79   : > { %1531 = vmatprep.mubr.bf16.mxu0 %v3189_v29  ;;  %v3611_v29 = vadd.s32 %v3578_v2, %v2186_v11 }
  0x7b   : > { %vm2252_vm4 = vcmp.lt.s32.totalorder %v3611_v29, 512 }
  0x7f   : > { %1339 = vmatmul.mubr.bf16.gmra.mrb[28].mxu1 %v3191_v30  ;;  %v2192_v30 = vadd.s32 80, %v3576_v1 }
  0x80   : > { %1532 = vmatmul.mubr.bf16.gmra.mrb[28].mxu0 %v3192_v31  ;;  %1348 = vmatprep.mubr.bf16.mxu1 %v3193_v32  ;;  %v2193_v31 = vadd.s32 88, %v3576_v1 }
  0x81   : > { %1541 = vmatprep.mubr.bf16.mxu0 %v3195_v33 }
  0x87   : > { %1349 = vmatmul.mubr.bf16.gmra.mrb[32].mxu1 %v3197_v34 }
  0x88   : > { %1542 = vmatmul.mubr.bf16.gmra.mrb[32].mxu0 %v3198_v35  ;;  %1358 = vmatprep.mubr.bf16.mxu1 %v3199_v36  ;;  %v3617_v36 = vadd.s32 %v3578_v2, %v2187_v14 }
  0x89   : > { %1551 = vmatprep.mubr.bf16.mxu0 %v3201_v37  ;;  %v2194_v37 = vadd.s32 96, %v3576_v1 }
  0x8a   : > { %vm2253_vm5 = vcmp.lt.s32.totalorder %v3617_v36, 512  ;;  %v3731_v36 = vadd.s32 176, %v3576_v1 }
  0x8f   : > { %1359 = vmatmul.mubr.bf16.gmra.mrb[36].mxu1 %v3203_v38 }
  0x90   : > { %1552 = vmatmul.mubr.bf16.gmra.mrb[36].mxu0 %v3204_v39  ;;  %1368 = vmatprep.mubr.bf16.mxu1 %v3205_v40  ;;  %v3624_v40 = vadd.s32 %v3578_v2, %v2188_v18 }
  0x91   : > { %1561 = vmatprep.mubr.bf16.mxu0 %v3207_v41  ;;  %v3627_v41 = vadd.s32 %v3578_v2, %v2189_v19 }
  0x92   : > { %vm2254_vm6 = vcmp.lt.s32.totalorder %v3624_v40, 512 }
  0x93   : > { %vm2255_vm7 = vcmp.lt.s32.totalorder %v3627_v41, 512 }
  0x97   : > { %1369 = vmatmul.mubr.bf16.gmra.mrb[40].mxu1 %v3209_v42 }
  0x98   : > { %1562 = vmatmul.mubr.bf16.gmra.mrb[40].mxu0 %v3210_v43  ;;  %1378 = vmatprep.mubr.bf16.mxu1 %v3211_v44  ;;  %v3631_v44 = vadd.s32 %v3578_v2, %v2190_v24 }
  0x99   : > { %1571 = vmatprep.mubr.bf16.mxu0 %v3213_v45  ;;  %v3634_v45 = vadd.s32 %v3578_v2, %v2191_v25 }
  0x9a   : > { %vm2256_vm8 = vcmp.lt.s32.totalorder %v3631_v44, 512 }
  0x9b   : > { %vm2257_vm9 = vcmp.lt.s32.totalorder %v3634_v45, 512 }
  0x9f   : > { %1379 = vmatmul.mubr.bf16.gmra.mrb[44].mxu1 %v3215_v46 }
  0xa0   : > { %1572 = vmatmul.mubr.bf16.gmra.mrb[44].mxu0 %v3216_v47  ;;  %1388 = vmatprep.mubr.bf16.mxu1 %v3217_v48  ;;  %v3638_v48 = vadd.s32 %v3578_v2, %v2192_v30 }
  0xa1   : > { %1581 = vmatprep.mubr.bf16.mxu0 %v3219_v49  ;;  %v3641_v49 = vadd.s32 %v3578_v2, %v2193_v31  ;;  %v2197_v31 = vadd.s32 120, %v3576_v1 }
  0xa2   : > { %vm2258_vm10 = vcmp.lt.s32.totalorder %v3638_v48, 512 }
  0xa3   : > { %vm2259_vm11 = vcmp.lt.s32.totalorder %v3641_v49, 512 }
  0xa7   : > { %1389 = vmatmul.mubr.bf16.gmra.mrb[48].mxu1 %v3221_v50 }
  0xa8   : > { %1582 = vmatmul.mubr.bf16.gmra.mrb[48].mxu0 %v3222_v51  ;;  %1398 = vmatprep.mubr.bf16.mxu1 %v3223_v52  ;;  %v3651_v52 = vadd.s32 %v3578_v2, %v2194_v37  ;;  %v2200_v37 = vadd.s32 144, %v3576_v1 }
  0xa9   : > { %1591 = vmatprep.mubr.bf16.mxu0 %v3225_v53  ;;  %v2195_v53 = vadd.s32 104, %v3576_v1 }
  0xaa   : > { %vm2260_vm12 = vcmp.lt.s32.totalorder %v3651_v52, 512 }
  0xab   : > { %v3664_v24 = vadd.s32 %v3578_v2, %v2195_v53 }
  0xad   : > { %vm2261_vm13 = vcmp.lt.s32.totalorder %v3664_v24, 512 }
  0xaf   : > { %1399 = vmatmul.mubr.bf16.gmra.mrb[52].mxu1 %v3227_v54 }
  0xb0   : > { %1592 = vmatmul.mubr.bf16.gmra.mrb[52].mxu0 %v3228_v55  ;;  %1408 = vmatprep.mubr.bf16.mxu1 %v3229_v56 }
  0xb1   : > { %1601 = vmatprep.mubr.bf16.mxu0 %v3231_v57 }
  0xb7   : > { %1409 = vmatmul.mubr.bf16.gmra.mrb[56].mxu1 %v3233_v58 }
  0xb8   : > { %1602 = vmatmul.mubr.bf16.gmra.mrb[56].mxu0 %v3234_v59  ;;  %1418 = vmatprep.mubr.bf16.mxu1 %v3235_v60  ;;  %v2196_v59 = vadd.s32 112, %v3576_v1 }
  0xb9   : > { %1611 = vmatprep.mubr.bf16.mxu0 %v3237_v61 }
  0xbf   : > { %1419 = vmatmul.mubr.bf16.gmra.mrb[60].mxu1 %v3239_v62 }
  0xc0   : > { %1612 = vmatmul.mubr.bf16.gmra.mrb[60].mxu0 %v3240_v63 }
 0x11a   : > { %v1270_v15 = vpop.f32.mrb[0].mxu1 }
 0x11b   : > { %v1463_v16 = vpop.f32.mrb[0].mxu0  ;;  %v1272_v21 = vpop.f32.mrb[1].mxu1 }
 0x11c   : > { %v1464_v20 = vadd.f32 %v1463_v16, %v1270_v15  ;;  %v1465_v22 = vpop.f32.mrb[1].mxu0  ;;  %v1274_v27 = vpop.f32.mrb[2].mxu1 }
 0x11d   : > { %v1466_v26 = vadd.f32 %v1465_v22, %v1272_v21  ;;  %v1467_v28 = vpop.f32.mrb[2].mxu0  ;;  %v1276_v34 = vpop.f32.mrb[3].mxu1 }
 0x11e   : > { %v1829_v32 = vadd.f32 %v3594_v12, %v1464_v20  ;;  %v1468_v33 = vadd.f32 %v1467_v28, %v1274_v27  ;;  %v1469_v35 = vpop.f32.mrb[3].mxu0  ;;  %v3669_v27 = vadd.s32 %v3578_v2, %v2196_v59 }
 0x11f   : > { %v1830_v38 = vadd.f32 %v3596_v13, %v1466_v26  ;;  %v1470_v39 = vadd.f32 %v1469_v35, %v1276_v34  ;;  %v2199_v35 = vadd.s32 136, %v3576_v1 }
 0x120   : > { %v1893_v42 = vmax.f32 %v1829_v32, 0.0  ;;  %v1831_v43 = vadd.f32 %v3594_v12, %v1468_v33  ;;  %v2198_v32 = vadd.s32 128, %v3576_v1  ;;  %vm2262_vm14 = vcmp.lt.s32.totalorder %v3669_v27, 512 }
 0x121   : > { %v1894_v46 = vmax.f32 %v1830_v38, 0.0  ;;  %v1832_v47 = vadd.f32 %v3596_v13, %v1470_v39 }
 0x122   : > { %v2280_v50 = vsel %vm2248_vm0, %v1893_v42, 0.0  ;;  %v1895_v51 = vmax.f32 %v1831_v43, 0.0  ;;  %v1280_v57 = vpop.f32.mrb[4].mxu1  ;;  %v3695_v23 = vadd.s32 %v3578_v2, %v2198_v32 }
 0x123   : > { %v2929_v54 = vpack.c.bf16 %v1894_v46, %v1893_v42  ;;  %v2281_v55 = vsel %vm2248_vm0, %v1894_v46, 0.0  ;;  %v1896_v56 = vmax.f32 %v1832_v47, 0.0  ;;  %v1473_v58 = vpop.f32.mrb[4].mxu0  ;;  %v2418_v60 = vmul.f32 %v2280_v50, %v2280_v50  ;;  %v1282_v0 = vpop.f32.mrb[5].mxu1 }
 0x124   : > { %v2419_v61 = vmul.f32 %v2281_v55, %v2281_v55  ;;  %v2282_v62 = vsel %vm2249_vm1, %v1895_v51, 0.0  ;;  %v1474_v63 = vadd.f32 %v1473_v58, %v1280_v57  ;;  %v1475_v3 = vpop.f32.mrb[5].mxu0  ;;  %v1284_v9 = vpop.f32.mrb[6].mxu1  ;;  %vm2264_vm0 = vcmp.lt.s32.totalorder %v3695_v23, 512 }
 0x125   : > { %2149 = vst [vmem:[%s3647_s29] sm:$0xff] %v2929_v54  ;;  %v2344_v4 = vadd.f32 %v2282_v62, %v2280_v50  ;;  %v2420_v6 = vmul.f32 %v2282_v62, %v2282_v62  ;;  %v2930_v7 = vpack.c.bf16 %v1896_v56, %v1895_v51  ;;  %v2283_v5 = vsel %vm2249_vm1, %v1896_v56, 0.0  ;;  %v1477_v10 = vpop.f32.mrb[6].mxu0  ;;  %v1286_v18 = vpop.f32.mrb[7].mxu1 }
 0x126   : > { %v2381_v11 = vadd.f32 %v2283_v5, %v2281_v55  ;;  %v2421_v14 = vmul.f32 %v2283_v5, %v2283_v5  ;;  %v1833_v15 = vadd.f32 %v3594_v12, %v1474_v63  ;;  %v1476_v16 = vadd.f32 %v1475_v3, %v1282_v0  ;;  %v1479_v19 = vpop.f32.mrb[7].mxu0 }
 0x127   : > { %v2482_v20 = vadd.f32 %v2420_v6, %v2418_v60  ;;  %2150 = vst [vmem:[%s3647_s29 + $0x8] sm:$0xff] %v2930_v7  ;;  %v1478_v21 = vadd.f32 %v1477_v10, %v1284_v9  ;;  %v1480_v22 = vadd.f32 %v1479_v19, %v1286_v18  ;;  %v2201_v56 = vadd.s32 152, %v3576_v1 }
 0x128   : > { %v2519_v25 = vadd.f32 %v2421_v14, %v2419_v61  ;;  %v1897_v26 = vmax.f32 %v1833_v15, 0.0  ;;  %v1834_v8 = vadd.f32 %v3596_v13, %v1476_v16 }
 0x129   : > { %v1835_v28 = vadd.f32 %v3594_v12, %v1478_v21  ;;  %v1836_v30 = vadd.f32 %v3596_v13, %v1480_v22  ;;  %v3709_v32 = vadd.s32 %v3578_v2, %v2201_v56 }
 0x12a   : > { %v2284_v33 = vsel %vm2250_vm2, %v1897_v26, 0.0  ;;  %v1898_v34 = vmax.f32 %v1834_v8, 0.0  ;;  %v1290_v46 = vpop.f32.mrb[8].mxu1 }
 0x12b   : > { %v2345_v38 = vadd.f32 %v2344_v4, %v2284_v33  ;;  %v2422_v39 = vmul.f32 %v2284_v33, %v2284_v33  ;;  %v1899_v42 = vmax.f32 %v1835_v28, 0.0  ;;  %v1900_v43 = vmax.f32 %v1836_v30, 0.0  ;;  %v1483_v47 = vpop.f32.mrb[8].mxu0  ;;  %v1292_v54 = vpop.f32.mrb[9].mxu1 }
 0x12c   : > { %v2931_v50 = vpack.c.bf16 %v1898_v34, %v1897_v26  ;;  %v2285_v51 = vsel %vm2250_vm2, %v1898_v34, 0.0  ;;  %v1484_v53 = vadd.f32 %v1483_v47, %v1290_v46  ;;  %v1485_v55 = vpop.f32.mrb[9].mxu0  ;;  %v1294_v61 = vpop.f32.mrb[10].mxu1  ;;  %v3701_v26 = vadd.s32 %v3578_v2, %v2199_v35 }
 0x12d   : > { %v2483_v57 = vadd.f32 %v2482_v20, %v2422_v39  ;;  %v2382_v58 = vadd.f32 %v2381_v11, %v2285_v51  ;;  %v2423_v59 = vmul.f32 %v2285_v51, %v2285_v51  ;;  %v2286_v60 = vsel %vm2251_vm3, %v1899_v42, 0.0  ;;  %v1487_v62 = vpop.f32.mrb[10].mxu0  ;;  %v1296_v4 = vpop.f32.mrb[11].mxu1 }
 0x12e   : > { %2151 = vst [vmem:[%s3647_s29 + $0x10] sm:$0xff] %v2931_v50  ;;  %v2346_v63 = vadd.f32 %v2345_v38, %v2286_v60  ;;  %v2424_v0 = vmul.f32 %v2286_v60, %v2286_v60  ;;  %v2932_v3 = vpack.c.bf16 %v1900_v43, %v1899_v42  ;;  %v2287_v17 = vsel %vm2251_vm3, %v1900_v43, 0.0  ;;  %v1489_v6 = vpop.f32.mrb[11].mxu0 }
 0x12f   : > { %v2520_v7 = vadd.f32 %v2519_v25, %v2423_v59  ;;  %v2383_v5 = vadd.f32 %v2382_v58, %v2287_v17  ;;  %v2425_v9 = vmul.f32 %v2287_v17, %v2287_v17  ;;  %v1837_v10 = vadd.f32 %v3594_v12, %v1484_v53 }
 0x130   : > { %v2484_v11 = vadd.f32 %v2483_v57, %v2424_v0  ;;  %2152 = vst [vmem:[%s3647_s29 + $0x18] sm:$0xff] %v2932_v3  ;;  %v1486_v14 = vadd.f32 %v1485_v55, %v1292_v54  ;;  %v1488_v15 = vadd.f32 %v1487_v62, %v1294_v61  ;;  %v1490_v16 = vadd.f32 %v1489_v6, %v1296_v4 }
 0x131   : > { %v2521_v18 = vadd.f32 %v2520_v7, %v2425_v9  ;;  %v1901_v19 = vmax.f32 %v1837_v10, 0.0  ;;  %v3692_v20 = vadd.s32 %v3578_v2, %v2197_v31  ;;  %v3706_v31 = vadd.s32 %v3578_v2, %v2200_v37 }
 0x132   : > { %v1838_v21 = vadd.f32 %v3596_v13, %v1486_v14  ;;  %v1839_v22 = vadd.f32 %v3594_v12, %v1488_v15  ;;  %v1840_v25 = vadd.f32 %v3596_v13, %v1490_v16  ;;  %v1300_v28 = vpop.f32.mrb[12].mxu1  ;;  %v3712_v33 = vadd.s32 160, %v3576_v1 }
 0x133   : > { %v2288_v8 = vsel %vm2252_vm4, %v1901_v19, 0.0  ;;  %v1493_v30 = vpop.f32.mrb[12].mxu0  ;;  %v1302_v35 = vpop.f32.mrb[13].mxu1  ;;  %v3716_v37 = vadd.s32 168, %v3576_v1  ;;  %vm2263_vm15 = vcmp.lt.s32.totalorder %v3692_v20, 512  ;;  %vm2265_vm1 = vcmp.lt.s32.totalorder %v3701_v26, 512 }
 0x134   : > { %v2347_v34 = vadd.f32 %v2346_v63, %v2288_v8  ;;  %v2426_v38 = vmul.f32 %v2288_v8, %v2288_v8  ;;  %v1902_v39 = vmax.f32 %v1838_v21, 0.0  ;;  %v1903_v42 = vmax.f32 %v1839_v22, 0.0  ;;  %v1495_v43 = vpop.f32.mrb[13].mxu0  ;;  %v1304_v51 = vpop.f32.mrb[14].mxu1 }
 0x135   : > { %v1904_v46 = vmax.f32 %v1840_v25, 0.0  ;;  %v1494_v47 = vadd.f32 %v1493_v30, %v1300_v28  ;;  %v1496_v50 = vadd.f32 %v1495_v43, %v1302_v35  ;;  %v1497_v53 = vpop.f32.mrb[14].mxu0  ;;  %v1306_v58 = vpop.f32.mrb[15].mxu1  ;;  %v3737_v21 = vadd.s32 192, %v3576_v1 }
 0x136   : > { %v2485_v54 = vadd.f32 %v2484_v11, %v2426_v38  ;;  %v2933_v55 = vpack.c.bf16 %v1902_v39, %v1901_v19  ;;  %v2289_v56 = vsel %vm2252_vm4, %v1902_v39, 0.0  ;;  %v2290_v57 = vsel %vm2253_vm5, %v1903_v42, 0.0  ;;  %v1499_v59 = vpop.f32.mrb[15].mxu0 }
 0x137   : > { %v2384_v60 = vadd.f32 %v2383_v5, %v2289_v56  ;;  %v2427_v61 = vmul.f32 %v2289_v56, %v2289_v56  ;;  %v2348_v62 = vadd.f32 %v2347_v34, %v2290_v57  ;;  %v2428_v63 = vmul.f32 %v2290_v57, %v2290_v57 }
 0x138   : > { %2153 = vst [vmem:[%s3647_s29 + $0x20] sm:$0xff] %v2933_v55  ;;  %v2934_v0 = vpack.c.bf16 %v1904_v46, %v1903_v42  ;;  %v2291_v3 = vsel %vm2253_vm5, %v1904_v46, 0.0  ;;  %v1841_v17 = vadd.f32 %v3594_v12, %v1494_v47  ;;  %v1842_v29 = vadd.f32 %v3596_v13, %v1496_v50 }
 0x139   : > { %v2522_v4 = vadd.f32 %v2521_v18, %v2427_v61  ;;  %v2486_v6 = vadd.f32 %v2485_v54, %v2428_v63  ;;  %v2385_v7 = vadd.f32 %v2384_v60, %v2291_v3  ;;  %v2429_v9 = vmul.f32 %v2291_v3, %v2291_v3 }
 0x13a   : > { %2154 = vst [vmem:[%s3647_s29 + $0x28] sm:$0xff] %v2934_v0  ;;  %v1905_v5 = vmax.f32 %v1841_v17, 0.0  ;;  %v1906_v10 = vmax.f32 %v1842_v29, 0.0  ;;  %v1498_v11 = vadd.f32 %v1497_v53, %v1304_v51  ;;  %v1500_v14 = vadd.f32 %v1499_v59, %v1306_v58  ;;  %v1310_v16 = vpop.f32.mrb[16].mxu1 }
 0x13b   : > { %v2523_v15 = vadd.f32 %v2522_v4, %v2429_v9  ;;  %v1503_v19 = vpop.f32.mrb[16].mxu0  ;;  %v3734_v18 = vadd.s32 184, %v3576_v1  ;;  %v1312_v30 = vpop.f32.mrb[17].mxu1  ;;  %v3770_v45 = vadd.s32 %v3578_v2, %v3712_v33  ;;  %vm2266_vm2 = vcmp.lt.s32.totalorder %v3706_v31, 512 }
 0x13c   : > { %v2292_v22 = vsel %vm2254_vm6, %v1905_v5, 0.0  ;;  %v2935_v25 = vpack.c.bf16 %v1906_v10, %v1905_v5  ;;  %v2293_v8 = vsel %vm2254_vm6, %v1906_v10, 0.0  ;;  %v1843_v28 = vadd.f32 %v3594_v12, %v1498_v11  ;;  %v1505_v34 = vpop.f32.mrb[17].mxu0  ;;  %v1314_v43 = vpop.f32.mrb[18].mxu1 }
 0x13d   : > { %v2349_v38 = vadd.f32 %v2348_v62, %v2292_v22  ;;  %v2430_v39 = vmul.f32 %v2292_v22, %v2292_v22  ;;  %v2386_v42 = vadd.f32 %v2385_v7, %v2293_v8  ;;  %v2431_v35 = vmul.f32 %v2293_v8, %v2293_v8  ;;  %v1507_v46 = vpop.f32.mrb[18].mxu0  ;;  %v1316_v54 = vpop.f32.mrb[19].mxu1 }
 0x13e   : > { %2155 = vst [vmem:[%s3647_s29 + $0x30] sm:$0xff] %v2935_v25  ;;  %v1907_v47 = vmax.f32 %v1843_v28, 0.0  ;;  %v1844_v50 = vadd.f32 %v3596_v13, %v1500_v14  ;;  %v1504_v51 = vadd.f32 %v1503_v19, %v1310_v16  ;;  %v1506_v53 = vadd.f32 %v1505_v34, %v1312_v30  ;;  %v1509_v55 = vpop.f32.mrb[19].mxu0 }
 0x13f   : > { %v2487_v40 = vadd.f32 %v2486_v6, %v2430_v39  ;;  %v2524_v56 = vadd.f32 %v2523_v15, %v2431_v35  ;;  %v1508_v57 = vadd.f32 %v1507_v46, %v1314_v43  ;;  %v1510_v58 = vadd.f32 %v1509_v55, %v1316_v54 }
 0x140   : > { %v2294_v59 = vsel %vm2255_vm7, %v1907_v47, 0.0  ;;  %v1908_v60 = vmax.f32 %v1844_v50, 0.0  ;;  %v1845_v61 = vadd.f32 %v3594_v12, %v1504_v51  ;;  %v1846_v62 = vadd.f32 %v3596_v13, %v1506_v53 }
 0x141   : > { %v2350_v63 = vadd.f32 %v2349_v38, %v2294_v59  ;;  %v2432_v0 = vmul.f32 %v2294_v59, %v2294_v59  ;;  %v1847_v3 = vadd.f32 %v3594_v12, %v1508_v57  ;;  %v1848_v17 = vadd.f32 %v3596_v13, %v1510_v58 }
 0x142   : > { %v2936_v29 = vpack.c.bf16 %v1908_v60, %v1907_v47  ;;  %v2295_v4 = vsel %vm2255_vm7, %v1908_v60, 0.0  ;;  %v1909_v6 = vmax.f32 %v1845_v61, 0.0  ;;  %v1910_v7 = vmax.f32 %v1846_v62, 0.0  ;;  %v1320_v14 = vpop.f32.mrb[20].mxu1 }
 0x143   : > { %v2488_v9 = vadd.f32 %v2487_v40, %v2432_v0  ;;  %v2387_v5 = vadd.f32 %v2386_v42, %v2295_v4  ;;  %v2433_v10 = vmul.f32 %v2295_v4, %v2295_v4  ;;  %v1911_v11 = vmax.f32 %v1847_v3, 0.0  ;;  %v1513_v15 = vpop.f32.mrb[20].mxu0  ;;  %v1322_v25 = vpop.f32.mrb[21].mxu1 }
 0x144   : > { %2156 = vst [vmem:[%s3647_s29 + $0x38] sm:$0xff] %v2936_v29  ;;  %v2296_v16 = vsel %vm2256_vm8, %v1909_v6, 0.0  ;;  %v2937_v19 = vpack.c.bf16 %v1910_v7, %v1909_v6  ;;  %v2297_v41 = vsel %vm2256_vm8, %v1910_v7, 0.0  ;;  %v1912_v22 = vmax.f32 %v1848_v17, 0.0  ;;  %v1515_v8 = vpop.f32.mrb[21].mxu0  ;;  %v1324_v39 = vpop.f32.mrb[22].mxu1 }
 0x145   : > { %v2525_v28 = vadd.f32 %v2524_v56, %v2433_v10  ;;  %v2351_v30 = vadd.f32 %v2350_v63, %v2296_v16  ;;  %v2434_v34 = vmul.f32 %v2296_v16, %v2296_v16  ;;  %v2388_v38 = vadd.f32 %v2387_v5, %v2297_v41  ;;  %v1517_v42 = vpop.f32.mrb[22].mxu0  ;;  %v1326_v47 = vpop.f32.mrb[23].mxu1 }
 0x146   : > { %2157 = vst [vmem:[%s3647_s29 + $0x40] sm:$0xff] %v2937_v19  ;;  %v2435_v35 = vmul.f32 %v2297_v41, %v2297_v41  ;;  %v2298_v43 = vsel %vm2257_vm9, %v1911_v11, 0.0  ;;  %v2938_v46 = vpack.c.bf16 %v1912_v22, %v1911_v11  ;;  %v2299_v44 = vsel %vm2257_vm9, %v1912_v22, 0.0  ;;  %v1519_v50 = vpop.f32.mrb[23].mxu0 }
 0x147   : > { %v2489_v51 = vadd.f32 %v2488_v9, %v2434_v34  ;;  %v2352_v53 = vadd.f32 %v2351_v30, %v2298_v43  ;;  %v2436_v54 = vmul.f32 %v2298_v43, %v2298_v43  ;;  %v2389_v55 = vadd.f32 %v2388_v38, %v2299_v44 }
 0x148   : > { %v2526_v40 = vadd.f32 %v2525_v28, %v2435_v35  ;;  %2158 = vst [vmem:[%s3647_s29 + $0x48] sm:$0xff] %v2938_v46  ;;  %v2437_v56 = vmul.f32 %v2299_v44, %v2299_v44  ;;  %v1514_v57 = vadd.f32 %v1513_v15, %v1320_v14  ;;  %v1516_v58 = vadd.f32 %v1515_v8, %v1322_v25 }
 0x149   : > { %v2490_v59 = vadd.f32 %v2489_v51, %v2436_v54  ;;  %v1518_v60 = vadd.f32 %v1517_v42, %v1324_v39  ;;  %v1520_v61 = vadd.f32 %v1519_v50, %v1326_v47  ;;  %v3776_v3 = vadd.s32 %v3578_v2, %v3716_v37 }
 0x14a   : > { %v2527_v62 = vadd.f32 %v2526_v40, %v2437_v56  ;;  %v1849_v63 = vadd.f32 %v3594_v12, %v1514_v57  ;;  %v1850_v0 = vadd.f32 %v3596_v13, %v1516_v58  ;;  %v1330_v4 = vpop.f32.mrb[24].mxu1  ;;  %v3782_v7 = vadd.s32 %v3578_v2, %v3731_v36 }
 0x14b   : > { %v1851_v17 = vadd.f32 %v3594_v12, %v1518_v60  ;;  %v1852_v29 = vadd.f32 %v3596_v13, %v1520_v61  ;;  %v1523_v6 = vpop.f32.mrb[24].mxu0  ;;  %v3786_v33 = vadd.s32 %v3578_v2, %v3734_v18  ;;  %v1332_v11 = vpop.f32.mrb[25].mxu1  ;;  %v3790_v14 = vadd.s32 %v3578_v2, %v3737_v21 }
 0x14c   : > { %v1913_v9 = vmax.f32 %v1849_v63, 0.0  ;;  %v1914_v5 = vmax.f32 %v1850_v0, 0.0  ;;  %v1524_v10 = vadd.f32 %v1523_v6, %v1330_v4  ;;  %v1525_v37 = vpop.f32.mrb[25].mxu0  ;;  %v1334_v41 = vpop.f32.mrb[26].mxu1  ;;  %v2207_v22 = vadd.s32 200, %v3576_v1 }
 0x14d   : > { %v1915_v15 = vmax.f32 %v1851_v17, 0.0  ;;  %v1916_v16 = vmax.f32 %v1852_v29, 0.0  ;;  %v1526_v19 = vadd.f32 %v1525_v37, %v1332_v11  ;;  %v1527_v36 = vpop.f32.mrb[26].mxu0  ;;  %v1336_v21 = vpop.f32.mrb[27].mxu1  ;;  %vm2267_vm3 = vcmp.lt.s32.totalorder %v3709_v32, 512 }
 0x14e   : > { %v2300_v18 = vsel %vm2258_vm10, %v1913_v9, 0.0  ;;  %v2939_v25 = vpack.c.bf16 %v1914_v5, %v1913_v9  ;;  %v2301_v8 = vsel %vm2258_vm10, %v1914_v5, 0.0  ;;  %v1853_v28 = vadd.f32 %v3594_v12, %v1524_v10  ;;  %v1529_v30 = vpop.f32.mrb[27].mxu0 }
 0x14f   : > { %v2353_v34 = vadd.f32 %v2352_v53, %v2300_v18  ;;  %v2438_v38 = vmul.f32 %v2300_v18, %v2300_v18  ;;  %v2390_v39 = vadd.f32 %v2389_v55, %v2301_v8  ;;  %v2439_v42 = vmul.f32 %v2301_v8, %v2301_v8 }
 0x150   : > { %2159 = vst [vmem:[%s3647_s29 + $0x50] sm:$0xff] %v2939_v25  ;;  %v2302_v35 = vsel %vm2259_vm11, %v1915_v15, 0.0  ;;  %v2940_v43 = vpack.c.bf16 %v1916_v16, %v1915_v15  ;;  %v2303_v48 = vsel %vm2259_vm11, %v1916_v16, 0.0  ;;  %v1917_v46 = vmax.f32 %v1853_v28, 0.0 }
 0x151   : > { %v2491_v44 = vadd.f32 %v2490_v59, %v2438_v38  ;;  %v2528_v47 = vadd.f32 %v2527_v62, %v2439_v42  ;;  %v2354_v50 = vadd.f32 %v2353_v34, %v2302_v35  ;;  %v2440_v51 = vmul.f32 %v2302_v35, %v2302_v35 }
 0x152   : > { %2160 = vst [vmem:[%s3647_s29 + $0x58] sm:$0xff] %v2940_v43  ;;  %v2391_v53 = vadd.f32 %v2390_v39, %v2303_v48  ;;  %v2441_v54 = vmul.f32 %v2303_v48, %v2303_v48  ;;  %v2304_v55 = vsel %vm2260_vm12, %v1917_v46, 0.0  ;;  %v1854_v40 = vadd.f32 %v3596_v13, %v1526_v19  ;;  %v1340_v60 = vpop.f32.mrb[28].mxu1 }
 0x153   : > { %v2492_v56 = vadd.f32 %v2491_v44, %v2440_v51  ;;  %v2355_v57 = vadd.f32 %v2354_v50, %v2304_v55  ;;  %v2442_v58 = vmul.f32 %v2304_v55, %v2304_v55  ;;  %v1528_v49 = vadd.f32 %v1527_v36, %v1334_v41  ;;  %v1533_v61 = vpop.f32.mrb[28].mxu0  ;;  %v1342_v17 = vpop.f32.mrb[29].mxu1 }
 0x154   : > { %v2529_v63 = vadd.f32 %v2528_v47, %v2441_v54  ;;  %v1918_v0 = vmax.f32 %v1854_v40, 0.0  ;;  %v1530_v59 = vadd.f32 %v1529_v30, %v1336_v21  ;;  %v1534_v62 = vadd.f32 %v1533_v61, %v1340_v60  ;;  %v1535_v29 = vpop.f32.mrb[29].mxu0  ;;  %v1344_v5 = vpop.f32.mrb[30].mxu1 }
 0x155   : > { %v2493_v4 = vadd.f32 %v2492_v56, %v2442_v58  ;;  %v1855_v6 = vadd.f32 %v3594_v12, %v1528_v49  ;;  %v1536_v9 = vadd.f32 %v1535_v29, %v1342_v17  ;;  %v1537_v10 = vpop.f32.mrb[30].mxu0  ;;  %v3811_v11 = vadd.s32 %v3578_v2, %v2207_v22  ;;  %v1346_v41 = vpop.f32.mrb[31].mxu1 }
 0x156   : > { %v2941_v37 = vpack.c.bf16 %v1918_v0, %v1917_v46  ;;  %v2305_v15 = vsel %vm2260_vm12, %v1918_v0, 0.0  ;;  %v1856_v16 = vadd.f32 %v3596_v13, %v1530_v59  ;;  %v1857_v19 = vadd.f32 %v3594_v12, %v1534_v62  ;;  %v1539_v36 = vpop.f32.mrb[31].mxu0 }
 0x157   : > { %v2392_v18 = vadd.f32 %v2391_v53, %v2305_v15  ;;  %v2443_v25 = vmul.f32 %v2305_v15, %v2305_v15  ;;  %v1919_v8 = vmax.f32 %v1855_v6, 0.0  ;;  %v1858_v28 = vadd.f32 %v3596_v13, %v1536_v9 }
 0x158   : > { %2161 = vst [vmem:[%s3647_s29 + $0x60] sm:$0xff] %v2941_v37  ;;  %v1920_v22 = vmax.f32 %v1856_v16, 0.0  ;;  %v1921_v21 = vmax.f32 %v1857_v19, 0.0  ;;  %v1538_v30 = vadd.f32 %v1537_v10, %v1344_v5  ;;  %v1540_v34 = vadd.f32 %v1539_v36, %v1346_v41 }
 0x159   : > { %v2530_v52 = vadd.f32 %v2529_v63, %v2443_v25  ;;  %v2306_v38 = vsel %vm2261_vm13, %v1919_v8, 0.0  ;;  %v1922_v39 = vmax.f32 %v1858_v28, 0.0  ;;  %v3823_v42 = vadd.s32 208, %v3576_v1 }
 0x15a   : > { %v2356_v35 = vadd.f32 %v2355_v57, %v2306_v38  ;;  %v2444_v43 = vmul.f32 %v2306_v38, %v2306_v38  ;;  %v2942_v48 = vpack.c.bf16 %v1920_v22, %v1919_v8  ;;  %v2307_v46 = vsel %vm2261_vm13, %v1920_v22, 0.0  ;;  %v1350_v53 = vpop.f32.mrb[32].mxu1 }
 0x15b   : > { %v2393_v44 = vadd.f32 %v2392_v18, %v2307_v46  ;;  %v2445_v47 = vmul.f32 %v2307_v46, %v2307_v46  ;;  %v2308_v50 = vsel %vm2262_vm14, %v1921_v21, 0.0  ;;  %v2943_v51 = vpack.c.bf16 %v1922_v39, %v1921_v21  ;;  %v1543_v54 = vpop.f32.mrb[32].mxu0  ;;  %v1352_v24 = vpop.f32.mrb[33].mxu1 }
 0x15c   : > { %v2494_v55 = vadd.f32 %v2493_v4, %v2444_v43  ;;  %2162 = vst [vmem:[%s3647_s29 + $0x68] sm:$0xff] %v2942_v48  ;;  %v2357_v40 = vadd.f32 %v2356_v35, %v2308_v50  ;;  %v2446_v56 = vmul.f32 %v2308_v50, %v2308_v50  ;;  %v2309_v57 = vsel %vm2262_vm14, %v1922_v39, 0.0  ;;  %v1545_v58 = vpop.f32.mrb[33].mxu0  ;;  %v1354_v0 = vpop.f32.mrb[34].mxu1 }
 0x15d   : > { %v2531_v49 = vadd.f32 %v2530_v52, %v2445_v47  ;;  %2163 = vst [vmem:[%s3647_s29 + $0x70] sm:$0xff] %v2943_v51  ;;  %v2394_v60 = vadd.f32 %v2393_v44, %v2309_v57  ;;  %v2447_v61 = vmul.f32 %v2309_v57, %v2309_v57  ;;  %v1859_v63 = vadd.f32 %v3594_v12, %v1538_v30  ;;  %v1547_v59 = vpop.f32.mrb[34].mxu0  ;;  %v1356_v6 = vpop.f32.mrb[35].mxu1 }
 0x15e   : > { %v2495_v62 = vadd.f32 %v2494_v55, %v2446_v56  ;;  %v1860_v17 = vadd.f32 %v3596_v13, %v1540_v34  ;;  %v1544_v29 = vadd.f32 %v1543_v54, %v1350_v53  ;;  %v1546_v4 = vadd.f32 %v1545_v58, %v1352_v24  ;;  %v1549_v27 = vpop.f32.mrb[35].mxu0 }
 0x15f   : > { %v2532_v9 = vadd.f32 %v2531_v49, %v2447_v61  ;;  %v1923_v5 = vmax.f32 %v1859_v63, 0.0  ;;  %v1548_v10 = vadd.f32 %v1547_v59, %v1354_v0  ;;  %v1550_v37 = vadd.f32 %v1549_v27, %v1356_v6 }
 0x160   : > { %v1924_v15 = vmax.f32 %v1860_v17, 0.0  ;;  %v1861_v16 = vadd.f32 %v3594_v12, %v1544_v29  ;;  %v1862_v19 = vadd.f32 %v3596_v13, %v1546_v4  ;;  %v2209_v41 = vadd.s32 216, %v3576_v1 }
 0x161   : > { %v2310_v36 = vsel %vm2263_vm15, %v1923_v5, 0.0  ;;  %v1863_v18 = vadd.f32 %v3594_v12, %v1548_v10  ;;  %v1864_v25 = vadd.f32 %v3596_v13, %v1550_v37  ;;  %v3846_v8 = vadd.s32 224, %v3576_v1 }
 0x162   : > { %v2358_v28 = vadd.f32 %v2357_v40, %v2310_v36  ;;  %v2448_v22 = vmul.f32 %v2310_v36, %v2310_v36  ;;  %v2944_v21 = vpack.c.bf16 %v1924_v15, %v1923_v5  ;;  %v2311_v30 = vsel %vm2263_vm15, %v1924_v15, 0.0  ;;  %v1360_v35 = vpop.f32.mrb[36].mxu1 }
 0x163   : > { %v2395_v34 = vadd.f32 %v2394_v60, %v2311_v30  ;;  %v2449_v52 = vmul.f32 %v2311_v30, %v2311_v30  ;;  %v1925_v38 = vmax.f32 %v1861_v16, 0.0  ;;  %v1926_v39 = vmax.f32 %v1862_v19, 0.0  ;;  %v1553_v43 = vpop.f32.mrb[36].mxu0  ;;  %v1362_v50 = vpop.f32.mrb[37].mxu1 }
 0x164   : > { %v2496_v48 = vadd.f32 %v2495_v62, %v2448_v22  ;;  %2164 = vst [vmem:[%s3647_s29 + $0x78] sm:$0xff] %v2944_v21  ;;  %v1927_v46 = vmax.f32 %v1863_v18, 0.0  ;;  %v1928_v44 = vmax.f32 %v1864_v25, 0.0  ;;  %v1554_v47 = vadd.f32 %v1553_v43, %v1360_v35  ;;  %v1555_v51 = vpop.f32.mrb[37].mxu0  ;;  %v1364_v40 = vpop.f32.mrb[38].mxu1 }
 0x165   : > { %v2533_v53 = vadd.f32 %v2532_v9, %v2449_v52  ;;  %v2312_v54 = vsel %vm2264_vm0, %v1925_v38, 0.0  ;;  %v2945_v20 = vpack.c.bf16 %v1926_v39, %v1925_v38  ;;  %v2313_v55 = vsel %vm2264_vm0, %v1926_v39, 0.0  ;;  %v1557_v56 = vpop.f32.mrb[38].mxu0  ;;  %v1366_v60 = vpop.f32.mrb[39].mxu1 }
 0x166   : > { %v2359_v57 = vadd.f32 %v2358_v28, %v2312_v54  ;;  %v2450_v24 = vmul.f32 %v2312_v54, %v2312_v54  ;;  %v2396_v58 = vadd.f32 %v2395_v34, %v2313_v55  ;;  %v2451_v49 = vmul.f32 %v2313_v55, %v2313_v55  ;;  %v1559_v61 = vpop.f32.mrb[39].mxu0 }
 0x167   : > { %2165 = vst [vmem:[%s3647_s29 + $0x80] sm:$0xff] %v2945_v20  ;;  %v2314_v63 = vsel %vm2265_vm1, %v1927_v46, 0.0  ;;  %v2946_v0 = vpack.c.bf16 %v1928_v44, %v1927_v46  ;;  %v2315_v23 = vsel %vm2265_vm1, %v1928_v44, 0.0  ;;  %v1865_v59 = vadd.f32 %v3594_v12, %v1554_v47 }
 0x168   : > { %v2497_v62 = vadd.f32 %v2496_v48, %v2450_v24  ;;  %v2534_v17 = vadd.f32 %v2533_v53, %v2451_v49  ;;  %v2360_v29 = vadd.f32 %v2359_v57, %v2314_v63  ;;  %v2452_v4 = vmul.f32 %v2314_v63, %v2314_v63 }
 0x169   : > { %vm2268_vm4 = vcmp.lt.s32.totalorder %v3770_v45, 512  ;;  %2166 = vst [vmem:[%s3647_s29 + $0x88] sm:$0xff] %v2946_v0  ;;  %v2397_v6 = vadd.f32 %v2396_v58, %v2315_v23  ;;  %v2453_v27 = vmul.f32 %v2315_v23, %v2315_v23  ;;  %v1929_v9 = vmax.f32 %v1865_v59, 0.0 }
 0x16a   : > { %v1556_v5 = vadd.f32 %v1555_v51, %v1362_v50  ;;  %v2498_v10 = vadd.f32 %v2497_v62, %v2452_v4  ;;  %v1558_v37 = vadd.f32 %v1557_v56, %v1364_v40  ;;  %v1560_v15 = vadd.f32 %v1559_v61, %v1366_v60  ;;  %v1370_v18 = vpop.f32.mrb[40].mxu1 }
 0x16b   : > { %v3866_v26 = vadd.s32 %v3578_v2, %v3823_v42  ;;  %v2535_v16 = vadd.f32 %v2534_v17, %v2453_v27  ;;  %v2316_v19 = vsel %vm2266_vm2, %v1929_v9, 0.0  ;;  %v1563_v25 = vpop.f32.mrb[40].mxu0  ;;  %v3872_v28 = vadd.s32 %v3578_v2, %v2209_v41  ;;  %v1372_v52 = vpop.f32.mrb[41].mxu1 }
 0x16c   : > { %v1866_v36 = vadd.f32 %v3596_v13, %v1556_v5  ;;  %v2361_v22 = vadd.f32 %v2360_v29, %v2316_v19  ;;  %v2454_v21 = vmul.f32 %v2316_v19, %v2316_v19  ;;  %v1867_v30 = vadd.f32 %v3594_v12, %v1558_v37  ;;  %v1565_v42 = vpop.f32.mrb[41].mxu0  ;;  %v1374_v43 = vpop.f32.mrb[42].mxu1 }
 0x16d   : > { %v1868_v34 = vadd.f32 %v3596_v13, %v1560_v15  ;;  %vm2269_vm5 = vcmp.lt.s32.totalorder %v3776_v3, 512  ;;  %v1564_v39 = vadd.f32 %v1563_v25, %v1370_v18  ;;  %v1566_v35 = vadd.f32 %v1565_v42, %v1372_v52  ;;  %v1567_v48 = vpop.f32.mrb[42].mxu0  ;;  %v1376_v51 = vpop.f32.mrb[43].mxu1 }
 0x16e   : > { %v1930_v38 = vmax.f32 %v1866_v36, 0.0  ;;  %v3879_v46 = vadd.s32 %v3578_v2, %v3846_v8  ;;  %v2499_v41 = vadd.f32 %v2498_v10, %v2454_v21  ;;  %v1931_v44 = vmax.f32 %v1867_v30, 0.0  ;;  %v1569_v53 = vpop.f32.mrb[43].mxu0 }
 0x16f   : > { %v1932_v47 = vmax.f32 %v1868_v34, 0.0  ;;  %v1568_v50 = vadd.f32 %v1567_v48, %v1374_v43  ;;  %v1869_v55 = vadd.f32 %v3594_v12, %v1564_v39  ;;  %v1870_v40 = vadd.f32 %v3596_v13, %v1566_v35 }
 0x170   : > { %v2947_v54 = vpack.c.bf16 %v1930_v38, %v1929_v9  ;;  %v2317_v20 = vsel %vm2266_vm2, %v1930_v38, 0.0  ;;  %v2318_v8 = vsel %vm2267_vm3, %v1931_v44, 0.0  ;;  %vm2270_vm6 = vcmp.lt.s32.totalorder %v3782_v7, 512 }
 0x171   : > { %v2398_v56 = vadd.f32 %v2397_v6, %v2317_v20  ;;  %v2455_v57 = vmul.f32 %v2317_v20, %v2317_v20  ;;  %v2948_v24 = vpack.c.bf16 %v1932_v47, %v1931_v44  ;;  %v2362_v58 = vadd.f32 %v2361_v22, %v2318_v8 }
 0x172   : > { %2167 = vst [vmem:[%s3647_s29 + $0x90] sm:$0xff] %v2947_v54  ;;  %v2456_v49 = vmul.f32 %v2318_v8, %v2318_v8  ;;  %v2319_v60 = vsel %vm2267_vm3, %v1932_v47, 0.0  ;;  %v1933_v31 = vmax.f32 %v1869_v55, 0.0  ;;  %v1934_v23 = vmax.f32 %v1870_v40, 0.0  ;;  %v1380_v4 = vpop.f32.mrb[44].mxu1 }
 0x173   : > { %v2536_v61 = vadd.f32 %v2535_v16, %v2455_v57  ;;  %2168 = vst [vmem:[%s3647_s29 + $0x98] sm:$0xff] %v2948_v24  ;;  %v2399_v63 = vadd.f32 %v2398_v56, %v2319_v60  ;;  %v2457_v0 = vmul.f32 %v2319_v60, %v2319_v60  ;;  %vm2271_vm7 = vcmp.lt.s32.totalorder %v3786_v33, 512  ;;  %v1573_v6 = vpop.f32.mrb[44].mxu0  ;;  %v1382_v10 = vpop.f32.mrb[45].mxu1 }
 0x174   : > { %v2500_v59 = vadd.f32 %v2499_v41, %v2456_v49  ;;  %v2320_v62 = vsel %vm2268_vm4, %v1933_v31, 0.0  ;;  %v1871_v17 = vadd.f32 %v3594_v12, %v1568_v50  ;;  %v1570_v29 = vadd.f32 %v1569_v53, %v1376_v51  ;;  %v1575_v37 = vpop.f32.mrb[45].mxu0  ;;  %v1384_v18 = vpop.f32.mrb[46].mxu1 }
 0x175   : > { %v2537_v32 = vadd.f32 %v2536_v61, %v2457_v0  ;;  %v2363_v27 = vadd.f32 %v2362_v58, %v2320_v62  ;;  %v2458_v9 = vmul.f32 %v2320_v62, %v2320_v62  ;;  %v2949_v5 = vpack.c.bf16 %v1934_v23, %v1933_v31  ;;  %v1577_v25 = vpop.f32.mrb[46].mxu0  ;;  %v1386_v52 = vpop.f32.mrb[47].mxu1 }
 0x176   : > { %v2321_v15 = vsel %vm2268_vm4, %v1934_v23, 0.0  ;;  %v1935_v16 = vmax.f32 %v1871_v17, 0.0  ;;  %v1872_v19 = vadd.f32 %v3596_v13, %v1570_v29  ;;  %v1574_v36 = vadd.f32 %v1573_v6, %v1380_v4  ;;  %v1579_v42 = vpop.f32.mrb[47].mxu0 }
 0x177   : > { %v2501_v22 = vadd.f32 %v2500_v59, %v2458_v9  ;;  %2169 = vst [vmem:[%s3647_s29 + $0xa0] sm:$0xff] %v2949_v5  ;;  %v2400_v21 = vadd.f32 %v2399_v63, %v2321_v15  ;;  %v2459_v30 = vmul.f32 %v2321_v15, %v2321_v15  ;;  %v1576_v34 = vadd.f32 %v1575_v37, %v1382_v10 }
 0x178   : > { %v2322_v38 = vsel %vm2269_vm5, %v1935_v16, 0.0  ;;  %v1936_v39 = vmax.f32 %v1872_v19, 0.0  ;;  %v1873_v45 = vadd.f32 %v3594_v12, %v1574_v36  ;;  %v1578_v35 = vadd.f32 %v1577_v25, %v1384_v18 }
 0x179   : > { %v2538_v43 = vadd.f32 %v2537_v32, %v2459_v30  ;;  %v2364_v48 = vadd.f32 %v2363_v27, %v2322_v38  ;;  %v2460_v41 = vmul.f32 %v2322_v38, %v2322_v38  ;;  %v1874_v44 = vadd.f32 %v3596_v13, %v1576_v34 }
 0x17a   : > { %vm2272_vm8 = vcmp.lt.s32.totalorder %v3790_v14, 512  ;;  %v2950_v47 = vpack.c.bf16 %v1936_v39, %v1935_v16  ;;  %v2323_v50 = vsel %vm2269_vm5, %v1936_v39, 0.0  ;;  %v1937_v51 = vmax.f32 %v1873_v45, 0.0  ;;  %v1390_v24 = vpop.f32.mrb[48].mxu1 }
 0x17b   : > { %v1875_v53 = vadd.f32 %v3594_v12, %v1578_v35  ;;  %v2502_v54 = vadd.f32 %v2501_v22, %v2460_v41  ;;  %v2401_v20 = vadd.f32 %v2400_v21, %v2323_v50  ;;  %v2461_v55 = vmul.f32 %v2323_v50, %v2323_v50  ;;  %v1583_v58 = vpop.f32.mrb[48].mxu0  ;;  %v1392_v63 = vpop.f32.mrb[49].mxu1 }
 0x17c   : > { %v1938_v40 = vmax.f32 %v1874_v44, 0.0  ;;  %2170 = vst [vmem:[%s3647_s29 + $0xa8] sm:$0xff] %v2950_v47  ;;  %v2324_v56 = vsel %vm2270_vm6, %v1937_v51, 0.0  ;;  %v1580_v8 = vadd.f32 %v1579_v42, %v1386_v52  ;;  %v2211_v49 = vadd.s32 232, %v3576_v1  ;;  %v1585_v0 = vpop.f32.mrb[49].mxu0  ;;  %v1394_v29 = vpop.f32.mrb[50].mxu1 }
 0x17d   : > { %v1939_v57 = vmax.f32 %v1875_v53, 0.0  ;;  %v2539_v3 = vadd.f32 %v2538_v43, %v2461_v55  ;;  %v2365_v60 = vadd.f32 %v2364_v48, %v2324_v56  ;;  %v2462_v31 = vmul.f32 %v2324_v56, %v2324_v56  ;;  %v1587_v4 = vpop.f32.mrb[50].mxu0  ;;  %v1396_v5 = vpop.f32.mrb[51].mxu1 }
 0x17e   : > { %v2951_v61 = vpack.c.bf16 %v1938_v40, %v1937_v51  ;;  %vm2273_vm9 = vcmp.lt.s32.totalorder %v3811_v11, 512  ;;  %v2325_v23 = vsel %vm2270_vm6, %v1938_v40, 0.0  ;;  %v1876_v62 = vadd.f32 %v3596_v13, %v1580_v8  ;;  %v1589_v10 = vpop.f32.mrb[51].mxu0 }
 0x17f   : > { %v2326_v59 = vsel %vm2271_vm7, %v1939_v57, 0.0  ;;  %v1584_v17 = vadd.f32 %v1583_v58, %v1390_v24  ;;  %v2503_v6 = vadd.f32 %v2502_v54, %v2462_v31  ;;  %v2402_v32 = vadd.f32 %v2401_v20, %v2325_v23 }
 0x180   : > { %2171 = vst [vmem:[%s3647_s29 + $0xb0] sm:$0xff] %v2951_v61  ;;  %v2463_v27 = vmul.f32 %v2325_v23, %v2325_v23  ;;  %v2366_v9 = vadd.f32 %v2365_v60, %v2326_v59  ;;  %v2464_v37 = vmul.f32 %v2326_v59, %v2326_v59  ;;  %v1940_v15 = vmax.f32 %v1876_v62, 0.0 }
 0x181   : > { %v1877_v7 = vadd.f32 %v3594_v12, %v1584_v17  ;;  %v1586_v16 = vadd.f32 %v1585_v0, %v1392_v63  ;;  %v1588_v36 = vadd.f32 %v1587_v4, %v1394_v29  ;;  %v1590_v18 = vadd.f32 %v1589_v10, %v1396_v5 }
 0x182   : > { %v2540_v19 = vadd.f32 %v2539_v3, %v2463_v27  ;;  %v3921_v25 = vadd.s32 %v3578_v2, %v2211_v49  ;;  %v2504_v22 = vadd.f32 %v2503_v6, %v2464_v37  ;;  %v2952_v21 = vpack.c.bf16 %v1940_v15, %v1939_v57  ;;  %v1400_v43 = vpop.f32.mrb[52].mxu1 }
 0x183   : > { %v2327_v30 = vsel %vm2271_vm7, %v1940_v15, 0.0  ;;  %v1941_v34 = vmax.f32 %v1877_v7, 0.0  ;;  %vm2274_vm10 = vcmp.lt.s32.totalorder %v3866_v26, 512  ;;  %v1878_v38 = vadd.f32 %v3596_v13, %v1586_v16  ;;  %v1593_v48 = vpop.f32.mrb[52].mxu0  ;;  %v1402_v53 = vpop.f32.mrb[53].mxu1 }
 0x184   : > { %v2403_v52 = vadd.f32 %v2402_v32, %v2327_v30  ;;  %v2465_v42 = vmul.f32 %v2327_v30, %v2327_v30  ;;  %v1879_v39 = vadd.f32 %v3594_v12, %v1588_v36  ;;  %2172 = vst [vmem:[%s3647_s29 + $0xb8] sm:$0xff] %v2952_v21  ;;  %v1880_v35 = vadd.f32 %v3596_v13, %v1590_v18  ;;  %v1595_v54 = vpop.f32.mrb[53].mxu0  ;;  %v1404_v57 = vpop.f32.mrb[54].mxu1 }
 0x185   : > { %v2328_v45 = vsel %vm2272_vm8, %v1941_v34, 0.0  ;;  %vm2275_vm11 = vcmp.lt.s32.totalorder %v3872_v28, 512  ;;  %v2212_v33 = vadd.s32 240, %v3576_v1  ;;  %v2213_v41 = vadd.s32 248, %v3576_v1  ;;  %v1597_v8 = vpop.f32.mrb[54].mxu0  ;;  %v1406_v3 = vpop.f32.mrb[55].mxu1 }
 0x186   : > { %v2541_v44 = vadd.f32 %v2540_v19, %v2465_v42  ;;  %v2367_v47 = vadd.f32 %v2366_v9, %v2328_v45  ;;  %v2466_v50 = vmul.f32 %v2328_v45, %v2328_v45  ;;  %v1942_v51 = vmax.f32 %v1878_v38, 0.0  ;;  %v1599_v60 = vpop.f32.mrb[55].mxu0 }
 0x187   : > { %v1943_v20 = vmax.f32 %v1879_v39, 0.0  ;;  %v1944_v55 = vmax.f32 %v1880_v35, 0.0  ;;  %v1594_v40 = vadd.f32 %v1593_v48, %v1400_v43  ;;  %v1596_v56 = vadd.f32 %v1595_v54, %v1402_v53 }
 0x188   : > { %v2505_v24 = vadd.f32 %v2504_v22, %v2466_v50  ;;  %v2953_v58 = vpack.c.bf16 %v1942_v51, %v1941_v34  ;;  %v2329_v49 = vsel %vm2272_vm8, %v1942_v51, 0.0  ;;  %v1598_v1 = vadd.f32 %v1597_v8, %v1404_v57 }
 0x189   : > { %v2404_v31 = vadd.f32 %v2403_v52, %v2329_v49  ;;  %v2467_v61 = vmul.f32 %v2329_v49, %v2329_v49  ;;  %v2330_v63 = vsel %vm2273_vm9, %v1943_v20, 0.0  ;;  %v2954_v0 = vpack.c.bf16 %v1944_v55, %v1943_v20 }
 0x18a   : > { %2173 = vst [vmem:[%s3647_s29 + $0xc0] sm:$0xff] %v2953_v58  ;;  %v2368_v23 = vadd.f32 %v2367_v47, %v2330_v63  ;;  %v2468_v59 = vmul.f32 %v2330_v63, %v2330_v63  ;;  %v2331_v62 = vsel %vm2273_vm9, %v1944_v55, 0.0  ;;  %v1881_v17 = vadd.f32 %v3594_v12, %v1594_v40  ;;  %v1410_v15 = vpop.f32.mrb[56].mxu1 }
 0x18b   : > { %vm2276_vm12 = vcmp.lt.s32.totalorder %v3879_v46, 512  ;;  %v2542_v14 = vadd.f32 %v2541_v44, %v2467_v61  ;;  %2174 = vst [vmem:[%s3647_s29 + $0xc8] sm:$0xff] %v2954_v0  ;;  %v2405_v29 = vadd.f32 %v2404_v31, %v2331_v62  ;;  %v2469_v4 = vmul.f32 %v2331_v62, %v2331_v62  ;;  %v1603_v11 = vpop.f32.mrb[56].mxu0  ;;  %v1412_v21 = vpop.f32.mrb[57].mxu1 }
 0x18c   : > { %v1882_v6 = vadd.f32 %v3596_v13, %v1596_v56  ;;  %v2506_v32 = vadd.f32 %v2505_v24, %v2468_v59  ;;  %v1945_v27 = vmax.f32 %v1881_v17, 0.0  ;;  %v1883_v9 = vadd.f32 %v3594_v12, %v1598_v1  ;;  %v1605_v30 = vpop.f32.mrb[57].mxu0  ;;  %v1414_v39 = vpop.f32.mrb[58].mxu1 }
 0x18d   : > { %v1600_v5 = vadd.f32 %v1599_v60, %v1406_v3  ;;  %v2543_v10 = vadd.f32 %v2542_v14, %v2469_v4  ;;  %v3948_v7 = vadd.s32 %v3578_v2, %v2212_v33  ;;  %v3951_v16 = vadd.s32 %v3578_v2, %v2213_v41  ;;  %v1607_v45 = vpop.f32.mrb[58].mxu0  ;;  %v1416_v33 = vpop.f32.mrb[59].mxu1 }
 0x18e   : > { %v1946_v37 = vmax.f32 %v1882_v6, 0.0  ;;  %v2332_v19 = vsel %vm2274_vm10, %v1945_v27, 0.0  ;;  %v1947_v36 = vmax.f32 %v1883_v9, 0.0  ;;  %v1604_v22 = vadd.f32 %v1603_v11, %v1410_v15  ;;  %v1609_v41 = vpop.f32.mrb[59].mxu0 }
 0x18f   : > { %v1884_v18 = vadd.f32 %v3596_v13, %v1600_v5  ;;  %v2369_v34 = vadd.f32 %v2368_v23, %v2332_v19  ;;  %v2470_v52 = vmul.f32 %v2332_v19, %v2332_v19  ;;  %v1606_v20 = vadd.f32 %v1605_v30, %v1412_v21 }
 0x190   : > { %v2955_v42 = vpack.c.bf16 %v1946_v37, %v1945_v27  ;;  %v2333_v38 = vsel %vm2274_vm10, %v1946_v37, 0.0  ;;  %v2334_v43 = vsel %vm2275_vm11, %v1947_v36, 0.0  ;;  %v1885_v51 = vadd.f32 %v3594_v12, %v1604_v22 }
 0x191   : > { %v2406_v2 = vadd.f32 %v2405_v29, %v2333_v38  ;;  %v2471_v35 = vmul.f32 %v2333_v38, %v2333_v38  ;;  %v1948_v48 = vmax.f32 %v1884_v18, 0.0  ;;  %v2507_v44 = vadd.f32 %v2506_v32, %v2470_v52 }
 0x192   : > { %2175 = vst [vmem:[%s3647_s29 + $0xd0] sm:$0xff] %v2955_v42  ;;  %v2370_v47 = vadd.f32 %v2369_v34, %v2334_v43  ;;  %v2472_v50 = vmul.f32 %v2334_v43, %v2334_v43  ;;  %v1949_v57 = vmax.f32 %v1885_v51, 0.0  ;;  %v1886_v8 = vadd.f32 %v3596_v13, %v1606_v20  ;;  %v1420_v3 = vpop.f32.mrb[60].mxu1 }
 0x193   : > { %v2544_v53 = vadd.f32 %v2543_v10, %v2471_v35  ;;  %v2956_v26 = vpack.c.bf16 %v1948_v48, %v1947_v36  ;;  %v2335_v54 = vsel %vm2275_vm11, %v1948_v48, 0.0  ;;  %v1608_v24 = vadd.f32 %v1607_v45, %v1414_v39  ;;  %v1613_v60 = vpop.f32.mrb[60].mxu0  ;;  %v1422_v0 = vpop.f32.mrb[61].mxu1 }
 0x194   : > { %v2508_v55 = vadd.f32 %v2507_v44, %v2472_v50  ;;  %v2407_v40 = vadd.f32 %v2406_v2, %v2335_v54  ;;  %v2473_v56 = vmul.f32 %v2335_v54, %v2335_v54  ;;  %v1610_v58 = vadd.f32 %v1609_v41, %v1416_v33  ;;  %v1615_v23 = vpop.f32.mrb[61].mxu0  ;;  %v1424_v14 = vpop.f32.mrb[62].mxu1 }
 0x195   : > { %2176 = vst [vmem:[%s3647_s29 + $0xd8] sm:$0xff] %v2956_v26  ;;  %v2336_v1 = vsel %vm2276_vm12, %v1949_v57, 0.0  ;;  %vm2277_vm13 = vcmp.lt.s32.totalorder %v3921_v25, 512  ;;  %vm2278_vm14 = vcmp.lt.s32.totalorder %v3948_v7, 512  ;;  %v1950_v61 = vmax.f32 %v1886_v8, 0.0  ;;  %v1617_v29 = vpop.f32.mrb[62].mxu0 }
 0x196   : > { %v2545_v49 = vadd.f32 %v2544_v53, %v2473_v56  ;;  %v2371_v28 = vadd.f32 %v2370_v47, %v2336_v1  ;;  %v2474_v31 = vmul.f32 %v2336_v1, %v2336_v1  ;;  %v1887_v63 = vadd.f32 %v3594_v12, %v1608_v24  ;;  %v1426_v9 = vpop.f32.mrb[63].mxu1  ;;  %v1619_v5 = vpop.f32.mrb[63].mxu0 }
 0x197   : > { %v1888_v59 = vadd.f32 %v3596_v13, %v1610_v58  ;;  %v1614_v62 = vadd.f32 %v1613_v60, %v1420_v3  ;;  %v1616_v17 = vadd.f32 %v1615_v23, %v1422_v0  ;;  %vm2279_vm15 = vcmp.lt.s32.totalorder %v3951_v16, 512 }
 0x198   : > { %v2509_v4 = vadd.f32 %v2508_v55, %v2474_v31  ;;  %v2957_v6 = vpack.c.bf16 %v1950_v61, %v1949_v57  ;;  %v2337_v32 = vsel %vm2276_vm12, %v1950_v61, 0.0  ;;  %v1951_v27 = vmax.f32 %v1887_v63, 0.0 }
 0x199   : > { %v2408_v10 = vadd.f32 %v2407_v40, %v2337_v32  ;;  %v2475_v37 = vmul.f32 %v2337_v32, %v2337_v32  ;;  %v1952_v15 = vmax.f32 %v1888_v59, 0.0  ;;  %v1889_v11 = vadd.f32 %v3594_v12, %v1614_v62 }
 0x19a   : > { %2177 = vst [vmem:[%s3647_s29 + $0xe0] sm:$0xff] %v2957_v6  ;;  %v2338_v19 = vsel %vm2277_vm13, %v1951_v27, 0.0  ;;  %v1890_v36 = vadd.f32 %v3596_v13, %v1616_v17  ;;  %v1618_v18 = vadd.f32 %v1617_v29, %v1424_v14  ;;  %v1620_v22 = vadd.f32 %v1619_v5, %v1426_v9 }
 0x19b   : > { %v2546_v21 = vadd.f32 %v2545_v49, %v2475_v37  ;;  %v2372_v46 = vadd.f32 %v2371_v28, %v2338_v19  ;;  %v2476_v30 = vmul.f32 %v2338_v19, %v2338_v19  ;;  %v2958_v34 = vpack.c.bf16 %v1952_v15, %v1951_v27 }
 0x19c   : > { %v2339_v52 = vsel %vm2277_vm13, %v1952_v15, 0.0  ;;  %v1953_v42 = vmax.f32 %v1889_v11, 0.0  ;;  %v1954_v38 = vmax.f32 %v1890_v36, 0.0  ;;  %v1891_v39 = vadd.f32 %v3594_v12, %v1618_v18 }
 0x19d   : > { %v2510_v45 = vadd.f32 %v2509_v4, %v2476_v30  ;;  %2178 = vst [vmem:[%s3647_s29 + $0xe8] sm:$0xff] %v2958_v34  ;;  %v2409_v2 = vadd.f32 %v2408_v10, %v2339_v52  ;;  %v2477_v35 = vmul.f32 %v2339_v52, %v2339_v52  ;;  %v1892_v43 = vadd.f32 %v3596_v13, %v1620_v22 }
 0x19e   : > { %v2340_v48 = vsel %vm2278_vm14, %v1953_v42, 0.0  ;;  %v2959_v33 = vpack.c.bf16 %v1954_v38, %v1953_v42  ;;  %v2341_v41 = vsel %vm2278_vm14, %v1954_v38, 0.0  ;;  %v1955_v25 = vmax.f32 %v1891_v39, 0.0 }
 0x19f   : > { %v2547_v44 = vadd.f32 %v2546_v21, %v2477_v35  ;;  %v2373_v47 = vadd.f32 %v2372_v46, %v2340_v48  ;;  %v2478_v50 = vmul.f32 %v2340_v48, %v2340_v48  ;;  %v2410_v51 = vadd.f32 %v2409_v2, %v2341_v41 }
 0x1a0   : > { %2179 = vst [vmem:[%s3647_s29 + $0xf0] sm:$0xff] %v2959_v33  ;;  %v2479_v12 = vmul.f32 %v2341_v41, %v2341_v41  ;;  %v2342_v53 = vsel %vm2279_vm15, %v1955_v25, 0.0  ;;  %v1956_v26 = vmax.f32 %v1892_v43, 0.0  ;;  %vm2556_vm0 = vcmask 1040384  }
 0x1a1   : > { %v2511_v13 = vadd.f32 %v2510_v45, %v2478_v50  ;;  %v2374_v54 = vadd.f32 %v2373_v47, %v2342_v53  ;;  %v2480_v20 = vmul.f32 %v2342_v53, %v2342_v53 }
 0x1a2   : > { %v2548_v55 = vadd.f32 %v2547_v44, %v2479_v12  ;;  %v2960_v40 = vpack.c.bf16 %v1956_v26, %v1955_v25  ;;  %v2343_v7 = vsel %vm2279_vm15, %v1956_v26, 0.0 }
 0x1a3   : > { %v2375_v56 = vrot.slane %v2374_v54, 4  ;;  %v2512_v57 = vadd.f32 %v2511_v13, %v2480_v20  ;;  %v2411_v8 = vadd.f32 %v2410_v51, %v2343_v7  ;;  %v2481_v24 = vmul.f32 %v2343_v7, %v2343_v7 }
 0x1a4   : > { %2180 = vst [vmem:[%s3647_s29 + $0xf8] sm:$0xff] %v2960_v40 }
 0x1a5   : > { %v2376_v58 = vadd.f32 %v2375_v56, %v2374_v54  ;;  %v2513_v49 = vrot.slane %v2512_v57, 4  ;;  %v2412_v1 = vrot.slane %v2411_v8, 4  ;;  %v2549_v3 = vadd.f32 %v2548_v55, %v2481_v24 }
 0x1a7   : > { %v2377_v60 = vrot.slane %v2376_v58, 2  ;;  %v2514_v28 = vadd.f32 %v2513_v49, %v2512_v57  ;;  %v2413_v31 = vadd.f32 %v2412_v1, %v2411_v8  ;;  %v2550_v61 = vrot.slane %v2549_v3, 4 }
 0x1a9   : > { %v2378_v63 = vadd.f32 %v2377_v60, %v2376_v58  ;;  %v2515_v0 = vrot.slane %v2514_v28, 2  ;;  %v2414_v23 = vrot.slane %v2413_v31, 2  ;;  %v2551_v16 = vadd.f32 %v2550_v61, %v2549_v3 }
 0x1ab   : > { %v2379_v59 = vrot.slane %v2378_v63, 1  ;;  %v2516_v62 = vadd.f32 %v2515_v0, %v2514_v28  ;;  %v2415_v17 = vadd.f32 %v2414_v23, %v2413_v31  ;;  %v2552_v14 = vrot.slane %v2551_v16, 2 }
 0x1ad   : > { %v2517_v29 = vrot.slane %v2516_v62, 1  ;;  %v2416_v4 = vrot.slane %v2415_v17, 1  ;;  %v2553_v6 = vadd.f32 %v2552_v14, %v2551_v16  ;;  %v2380_v32 = vadd.f32 %v2379_v59, %v2378_v63 }
 0x1af   : > { %v2518_v27 = vadd.f32 %v2517_v29, %v2516_v62  ;;  %v2554_v9 = vrot.slane %v2553_v6, 1  ;;  %v2417_v10 = vadd.f32 %v2416_v4, %v2415_v17 }
 0x1b1   : > { %v2557_v5 = vsel %vm2556_vm0, %v2380_v32, %v2518_v27  ;;  %v2555_v37 = vadd.f32 %v2554_v9, %v2553_v6 }
 0x1b3   : > { %v2558_v15 = vsel %vm2556_vm0, %v2417_v10, %v2555_v37 }
 0x1b4   : > { %v2561_v11 = vcombine.low %v2557_v5, %v2558_v15 }
 0x1b6   : > { %2923 = vst.sshfl [vmem:[%s334_s7] sm:$0x33 pattern:$0x76325410] %v2561_v11 }
 0x1b7 PF: > { %s15_s17 = sadd.s32 1, %s3263_s17   ;;  %s4014_s15 = smov %s3259_s16 }
 0x1b8   : > { %p12_p6 = scmp.ge.s32.totalorder %s15_s17, 4   ;;  %s4015_s16 = smov %s4017_s18 }
 0x1ba   :  { %14 = sbr.rel (!%p12_p6) target bundleno = 2 (0x2), region = 88 }

// kernel: squeeze.199
= control target key start
LH: loop header
LB: loop body
LE: loop exit
PB: predicated region body
PF: predicated region fallthrough
CT: control target
= control target key end

     0   :  { %s37_s8 = smov 32   ;;  %vm7_vm0 = vcmask 261120   ;;  %s38_s9 = smov 64   ;;  %s55_s0 = inlined_call_operand.vmem [shape: f32[128], index: 0, kind: input, shape index: {}]   ;;  %s56_s1 = inlined_call_operand.vmem [shape: f32[4,32], index: 1, kind: output, shape index: {}]  }
   0x1   :  { %v4_v0 = vld [vmem:[%s55_s0] sm:$0x1]  ;;  %s36_s0 = smov 96  }
   0x2   :  { %5 = vst [vmem:[#allocation1] sm:$0x1] %v4_v0 }
   0x9   :  { %v9_v1 = vld [vmem:[#allocation1] sm:$0x1]  }
   0xa   :  { %v21_v2 = vld [vmem:[#allocation1] sm:$0x1]   ;;  %10 = vrot.lane.b32.xlu0 %v9_v1, %s36_s0 }
   0xb   :  { %22 = vrot.lane.b32.xlu1 %v21_v2, %s37_s8  ;;  %v6_v3 = vld [vmem:[#allocation1] sm:$0x1]  }
   0xc   :  { %v15_v4 = vld [vmem:[#allocation1] sm:$0x1]   ;;  %8 = vst.msk [vmem:[#allocation0] sm:$0x1] %vm7_vm0, %v6_v3  }
   0xe   :  { %16 = vrot.lane.b32.xlu0 %v15_v4, %s38_s9 }
  0x7c   :  { %v11_v5 = vpop.permute.xlu0 %10  }
  0x7d   :  { %v23_v6 = vpop.permute.xlu1 %22   ;;  %14 = vst.msk [vmem:[#allocation0 + $0x1] sm:$0x1] %vm7_vm0, %v11_v5  }
  0x7e   :  { %26 = vst.msk [vmem:[#allocation0 + $0x3] sm:$0x1] %vm7_vm0, %v23_v6  }
  0x80   :  { %v17_v7 = vpop.permute.xlu0 %16  }
  0x81   :  { %20 = vst.msk [vmem:[#allocation0 + $0x2] sm:$0x1] %vm7_vm0, %v17_v7  }
  0x88   :  { %v30_v8 = vld [vmem:[#allocation0] sm:$0xf] }
  0x89   :  { %32 = vst [vmem:[%s56_s1] sm:$0xf] %v30_v8 }

// kernel: fcn16s_forward.10
= control target key start
LH: loop header
LB: loop body
LE: loop exit
PB: predicated region body
PF: predicated region fallthrough
CT: control target
= control target key end

     0   :  { %s3153_s15 = smov 0   ;;  %s3155_s16 = smov 0   ;;  %s3806_s0 = inlined_call_operand.vmem [shape: bf16[2048,256], index: 0, kind: input, shape index: {}]   ;;  %s3807_s1 = inlined_call_operand.vmem [shape: bf16[256,128], index: 1, kind: input, shape index: {}]   ;;  %s3808_s2 = inlined_call_operand.vmem [shape: f32[1,128], index: 2, kind: input, shape index: {}]   ;;  %s3809_s3 = inlined_call_operand.vmem [shape: bf16[2048,128], index: 3, kind: output, shape index: {0}]   ;;  %s3810_s4 = inlined_call_operand.vmem [shape: f32[4,2,128], index: 4, kind: output, shape index: {1}]  }
   0x1   :  { %s3157_s17 = smov 0  }
   0x2 LB: > { %s34_s18 = sadd.s32 1, %s3121_s16  ;;  %p2522_p0 = scmp.ge.s32.totalorder %s3125_s17, 1  ;;  %s3125_s17 = sphi %s3157_s17, %s15_s17   ;;  %s3121_s16 = sphi %s3155_s16, %s3860_s16   ;;  %s3117_s15 = sphi %s3153_s15, %s3859_s15  }
   0x3   : > { %p36_p1 = scmp.ge.s32.totalorder %s34_s18, 4  ;;  %p221_p2 = scmp.lt.s32.totalorder %s3125_s17, 5 }
   0x5   : > { %s3862_s18 = smov (%p36_p1, %s34_s18), 0  ;;  %p222_p3 = pnand %p2522_p0, %p221_p2 }
   0x6   : > { %v2990_v0 = vld [vmem:[%s3807_s1] sm:$0xff] (!%p222_p3)   ;;  %v3127_v1 = vmov (!%p222_p3), 0   ;;  %s2523_s21 = sshll.u32 (!%p222_p3), %s3117_s15, 6  ;;  %v2991_v2 = vld [vmem:[%s3807_s1 + $0x8] sm:$0xff] (!%p222_p3)   ;;  %v2992_v3 = vld [vmem:[%s3807_s1 + $0x10] sm:$0xff] (!%p222_p3)   ;;  %s2674_s10 = sshll.u32 (!%p222_p3), %s3117_s15, 9 }
   0x7   : > { %225 = sbr.rel (%p222_p3) target bundleno = 492 (0x1ec), region = 32  ;;  %958 = vmatprep.subr.bf16.mxu0 (!%p222_p3), %v3127_v1  ;;  %2933 = vmatprep.subr.bf16.mxu1 (!%p222_p3), %v3127_v1  ;;  %p275_p4 = scmp.lt.s32.totalorder (!%p222_p3), %s2523_s21, 255  ;;  %v2993_v4 = vld [vmem:[%s3807_s1 + $0x18] sm:$0xff] (!%p222_p3)   ;;  %v2994_v5 = vld [vmem:[%s3807_s1 + $0x20] sm:$0xff] (!%p222_p3)   ;;  %v2995_v7 = vld [vmem:[%s3807_s1 + $0x28] sm:$0xff] (!%p222_p3)  }
   0x8   : > { %959 = vmatpush1.bf16.msra.mxu0 (!%p222_p3), %v2990_v0  ;;  %2949 = vmatpush1.bf16.msra.mxu1 (!%p222_p3), %v2990_v0  ;;  %v2996_v8 = vld [vmem:[%s3807_s1 + $0x30] sm:$0xff] (!%p222_p3)   ;;  %v2997_v9 = vld [vmem:[%s3807_s1 + $0x38] sm:$0xff] (!%p222_p3)   ;;  %v2998_v11 = vld [vmem:[%s3807_s1 + $0x40] sm:$0xff] (!%p222_p3)   ;;  %p306_p5 = scmp.lt.s32.totalorder (!%p222_p3), %s3117_s15, 3 }
   0x9   : > { %960 = vmatprep.subr.bf16.mxu0 (!%p222_p3), %v3127_v1  ;;  %2934 = vmatprep.subr.bf16.mxu1 (!%p222_p3), %v3127_v1  ;;  %v2999_v12 = vld [vmem:[%s3807_s1 + $0x48] sm:$0xff] (!%p222_p3)   ;;  %v3000_v13 = vld [vmem:[%s3807_s1 + $0x50] sm:$0xff] (!%p222_p3)   ;;  %v3001_v14 = vld [vmem:[%s3807_s1 + $0x58] sm:$0xff] (!%p222_p3)  }
   0xa   : > { %v3002_v15 = vld [vmem:[%s3807_s1 + $0x60] sm:$0xff] (!%p222_p3)   ;;  %v3003_v16 = vld [vmem:[%s3807_s1 + $0x68] sm:$0xff] (!%p222_p3)   ;;  %v3004_v17 = vld [vmem:[%s3807_s1 + $0x70] sm:$0xff] (!%p222_p3)  }
   0xb   : > { %v3005_v18 = vld [vmem:[%s3807_s1 + $0x78] sm:$0xff] (!%p222_p3)  }
   0xc   : > { %961 = vmatpush1.bf16.msra.mxu0 (!%p222_p3), %v2991_v2  ;;  %2950 = vmatpush1.bf16.msra.mxu1 (!%p222_p3), %v2991_v2 }
   0xd   : > { %962 = vmatprep.subr.bf16.mxu0 (!%p222_p3), %v3127_v1  ;;  %2935 = vmatprep.subr.bf16.mxu1 (!%p222_p3), %v3127_v1 }
   0xe   : > { %s3864_s21 = smov (!%p275_p4, %s2523_s21), 255  ;;  %s3866_s15 = smov (!%p306_p5, %s3117_s15), 3 }
   0xf   : > { %s2677_s28 = sshll.u32 %s3864_s21, 3  ;;  %s2528_s22 = sshll.u32 %s3866_s15, 1 }
  0x10   : > { %963 = vmatpush1.bf16.msra.mxu0 %v2992_v3  ;;  %2951 = vmatpush1.bf16.msra.mxu1 %v2992_v3  ;;  %s3203_s7 = scalar_lea.vmem %s3806_s0, %s2677_s28  ;;  %s312_s25 = scalar_lea.vmem %s3810_s4, %s2528_s22 }
  0x11   : > { %964 = vmatprep.subr.bf16.mxu0 %v3127_v1  ;;  %2936 = vmatprep.subr.bf16.mxu1 %v3127_v1  ;;  %v3008_v6 = vld [vmem:[%s3203_s7 + $0x4] ss:$8 sps:$4 sm:$0xff]   ;;  %v3006_v19 = vld [vmem:[%s3203_s7] ss:$8 sps:$4 sm:$0xff]   ;;  %v3009_v21 = vld [vmem:[%s3203_s7 + $0x14] ss:$8 sps:$4 sm:$0xff]  }
  0x12   : > { %990 = vmatprep.mubr.bf16.mxu0 %v3008_v6  ;;  %v3032_v10 = vld [vmem:[%s3203_s7 + $0x104] ss:$8 sps:$4 sm:$0xff]   ;;  %v3030_v20 = vld [vmem:[%s3203_s7 + $0x100] ss:$8 sps:$4 sm:$0xff]   ;;  %v3036_v22 = vld [vmem:[%s3203_s7 + $0x114] ss:$8 sps:$4 sm:$0xff]  }
  0x13   : > { %1118 = vmatprep.mubr.bf16.mxu1 %v3032_v10  ;;  %v3011_v23 = vld [vmem:[%s3203_s7 + $0x10] ss:$8 sps:$4 sm:$0xff]   ;;  %v3012_v25 = vld [vmem:[%s3203_s7 + $0x24] ss:$8 sps:$4 sm:$0xff]   ;;  %v3014_v27 = vld [vmem:[%s3203_s7 + $0x20] ss:$8 sps:$4 sm:$0xff]  }
  0x14   : > { %965 = vmatpush1.bf16.msra.mxu0 %v2993_v4  ;;  %2952 = vmatpush1.bf16.msra.mxu1 %v2993_v4  ;;  %v3038_v24 = vld [vmem:[%s3203_s7 + $0x110] ss:$8 sps:$4 sm:$0xff]   ;;  %v3042_v26 = vld [vmem:[%s3203_s7 + $0x124] ss:$8 sps:$4 sm:$0xff]   ;;  %v3044_v28 = vld [vmem:[%s3203_s7 + $0x120] ss:$8 sps:$4 sm:$0xff]  }
  0x15   : > { %966 = vmatprep.subr.bf16.mxu0 %v3127_v1  ;;  %2937 = vmatprep.subr.bf16.mxu1 %v3127_v1  ;;  %v3015_v29 = vld [vmem:[%s3203_s7 + $0x34] ss:$8 sps:$4 sm:$0xff]   ;;  %v3017_v31 = vld [vmem:[%s3203_s7 + $0x30] ss:$8 sps:$4 sm:$0xff]   ;;  %v3018_v33 = vld [vmem:[%s3203_s7 + $0x44] ss:$8 sps:$4 sm:$0xff]  }
  0x16   : > { %v3048_v30 = vld [vmem:[%s3203_s7 + $0x134] ss:$8 sps:$4 sm:$0xff]   ;;  %v3050_v32 = vld [vmem:[%s3203_s7 + $0x130] ss:$8 sps:$4 sm:$0xff]   ;;  %v3054_v34 = vld [vmem:[%s3203_s7 + $0x144] ss:$8 sps:$4 sm:$0xff]  }
  0x17   : > { %v3020_v35 = vld [vmem:[%s3203_s7 + $0x40] ss:$8 sps:$4 sm:$0xff]   ;;  %v3021_v37 = vld [vmem:[%s3203_s7 + $0x54] ss:$8 sps:$4 sm:$0xff]   ;;  %v3023_v39 = vld [vmem:[%s3203_s7 + $0x50] ss:$8 sps:$4 sm:$0xff]  }
  0x18   : > { %967 = vmatpush1.bf16.msra.mxu0 %v2994_v5  ;;  %2953 = vmatpush1.bf16.msra.mxu1 %v2994_v5  ;;  %v3056_v36 = vld [vmem:[%s3203_s7 + $0x140] ss:$8 sps:$4 sm:$0xff]   ;;  %v3060_v38 = vld [vmem:[%s3203_s7 + $0x154] ss:$8 sps:$4 sm:$0xff]   ;;  %v3062_v40 = vld [vmem:[%s3203_s7 + $0x150] ss:$8 sps:$4 sm:$0xff]  }
  0x19   : > { %968 = vmatprep.subr.bf16.mxu0 %v3127_v1  ;;  %2938 = vmatprep.subr.bf16.mxu1 %v3127_v1  ;;  %v3024_v41 = vld [vmem:[%s3203_s7 + $0x64] ss:$8 sps:$4 sm:$0xff]   ;;  %v3026_v43 = vld [vmem:[%s3203_s7 + $0x60] ss:$8 sps:$4 sm:$0xff]   ;;  %v3027_v45 = vld [vmem:[%s3203_s7 + $0x74] ss:$8 sps:$4 sm:$0xff]  }
  0x1a   : > { %v3066_v42 = vld [vmem:[%s3203_s7 + $0x164] ss:$8 sps:$4 sm:$0xff]   ;;  %v3068_v44 = vld [vmem:[%s3203_s7 + $0x160] ss:$8 sps:$4 sm:$0xff]   ;;  %v3072_v46 = vld [vmem:[%s3203_s7 + $0x174] ss:$8 sps:$4 sm:$0xff]  }
  0x1b   : > { %v3029_v47 = vld [vmem:[%s3203_s7 + $0x70] ss:$8 sps:$4 sm:$0xff]   ;;  %v3033_v49 = vld [vmem:[%s3203_s7 + $0x84] ss:$8 sps:$4 sm:$0xff]   ;;  %v3035_v51 = vld [vmem:[%s3203_s7 + $0x80] ss:$8 sps:$4 sm:$0xff]  }
  0x1c   : > { %969 = vmatpush1.bf16.msra.mxu0 %v2995_v7  ;;  %2954 = vmatpush1.bf16.msra.mxu1 %v2995_v7  ;;  %v3074_v48 = vld [vmem:[%s3203_s7 + $0x170] ss:$8 sps:$4 sm:$0xff]   ;;  %v3078_v50 = vld [vmem:[%s3203_s7 + $0x184] ss:$8 sps:$4 sm:$0xff]   ;;  %v3080_v52 = vld [vmem:[%s3203_s7 + $0x180] ss:$8 sps:$4 sm:$0xff]  }
  0x1d   : > { %970 = vmatprep.subr.bf16.mxu0 %v3127_v1  ;;  %2939 = vmatprep.subr.bf16.mxu1 %v3127_v1  ;;  %v3039_v53 = vld [vmem:[%s3203_s7 + $0x94] ss:$8 sps:$4 sm:$0xff]   ;;  %v3041_v55 = vld [vmem:[%s3203_s7 + $0x90] ss:$8 sps:$4 sm:$0xff]   ;;  %v3045_v57 = vld [vmem:[%s3203_s7 + $0xa4] ss:$8 sps:$4 sm:$0xff]  }
  0x1e   : > { %v3081_v54 = vld [vmem:[%s3203_s7 + $0x194] ss:$8 sps:$4 sm:$0xff]   ;;  %v3083_v56 = vld [vmem:[%s3203_s7 + $0x190] ss:$8 sps:$4 sm:$0xff]   ;;  %v3084_v58 = vld [vmem:[%s3203_s7 + $0x1a4] ss:$8 sps:$4 sm:$0xff]  }
  0x1f   : > { %v3047_v59 = vld [vmem:[%s3203_s7 + $0xa0] ss:$8 sps:$4 sm:$0xff]   ;;  %v3051_v61 = vld [vmem:[%s3203_s7 + $0xb4] ss:$8 sps:$4 sm:$0xff]   ;;  %v3053_v63 = vld [vmem:[%s3203_s7 + $0xb0] ss:$8 sps:$4 sm:$0xff]  }
  0x20   : > { %971 = vmatpush1.bf16.msra.mxu0 %v2996_v8  ;;  %2955 = vmatpush1.bf16.msra.mxu1 %v2996_v8  ;;  %v3086_v60 = vld [vmem:[%s3203_s7 + $0x1a0] ss:$8 sps:$4 sm:$0xff]   ;;  %v3087_v62 = vld [vmem:[%s3203_s7 + $0x1b4] ss:$8 sps:$4 sm:$0xff]   ;;  %v3089_v0 = vld [vmem:[%s3203_s7 + $0x1b0] ss:$8 sps:$4 sm:$0xff]  }
  0x21   : > { %972 = vmatprep.subr.bf16.mxu0 %v3127_v1  ;;  %2940 = vmatprep.subr.bf16.mxu1 %v3127_v1  ;;  %v3090_v2 = vld [vmem:[%s3203_s7 + $0x1c4] ss:$8 sps:$4 sm:$0xff]   ;;  %v3059_v3 = vld [vmem:[%s3203_s7 + $0xc0] ss:$8 sps:$4 sm:$0xff]   ;;  %v3063_v5 = vld [vmem:[%s3203_s7 + $0xd4] ss:$8 sps:$4 sm:$0xff]  }
  0x22   : > { %v3092_v4 = vld [vmem:[%s3203_s7 + $0x1c0] ss:$8 sps:$4 sm:$0xff]   ;;  %v3093_v6 = vld [vmem:[%s3203_s7 + $0x1d4] ss:$8 sps:$4 sm:$0xff]   ;;  %v3065_v7 = vld [vmem:[%s3203_s7 + $0xd0] ss:$8 sps:$4 sm:$0xff]  }
  0x23   : > { %v3095_v8 = vld [vmem:[%s3203_s7 + $0x1d0] ss:$8 sps:$4 sm:$0xff]   ;;  %v3096_v10 = vld [vmem:[%s3203_s7 + $0x1e4] ss:$8 sps:$4 sm:$0xff]  }
  0x24   : > { %973 = vmatpush1.bf16.msra.mxu0 %v2997_v9  ;;  %2956 = vmatpush1.bf16.msra.mxu1 %v2997_v9  ;;  %v3069_v9 = vld [vmem:[%s3203_s7 + $0xe4] ss:$8 sps:$4 sm:$0xff]  }
  0x25   : > { %974 = vmatprep.subr.bf16.mxu0 %v3127_v1  ;;  %2941 = vmatprep.subr.bf16.mxu1 %v3127_v1 }
  0x28   : > { %975 = vmatpush1.bf16.msra.mxu0 %v2998_v11  ;;  %2957 = vmatpush1.bf16.msra.mxu1 %v2998_v11  ;;  %v3071_v11 = vld [vmem:[%s3203_s7 + $0xe0] ss:$8 sps:$4 sm:$0xff]  }
  0x29   : > { %976 = vmatprep.subr.bf16.mxu0 %v3127_v1  ;;  %2942 = vmatprep.subr.bf16.mxu1 %v3127_v1 }
  0x2c   : > { %977 = vmatpush1.bf16.msra.mxu0 %v2999_v12  ;;  %2958 = vmatpush1.bf16.msra.mxu1 %v2999_v12  ;;  %v3098_v12 = vld [vmem:[%s3203_s7 + $0x1e0] ss:$8 sps:$4 sm:$0xff]  }
  0x2d   : > { %978 = vmatprep.subr.bf16.mxu0 %v3127_v1  ;;  %2943 = vmatprep.subr.bf16.mxu1 %v3127_v1 }
  0x30   : > { %979 = vmatpush1.bf16.msra.mxu0 %v3000_v13  ;;  %2959 = vmatpush1.bf16.msra.mxu1 %v3000_v13  ;;  %v3075_v13 = vld [vmem:[%s3203_s7 + $0xf4] ss:$8 sps:$4 sm:$0xff]  }
  0x31   : > { %980 = vmatprep.subr.bf16.mxu0 %v3127_v1  ;;  %2944 = vmatprep.subr.bf16.mxu1 %v3127_v1 }
  0x34   : > { %981 = vmatpush1.bf16.msra.mxu0 %v3001_v14  ;;  %2960 = vmatpush1.bf16.msra.mxu1 %v3001_v14  ;;  %v3099_v14 = vld [vmem:[%s3203_s7 + $0x1f4] ss:$8 sps:$4 sm:$0xff]  }
  0x35   : > { %982 = vmatprep.subr.bf16.mxu0 %v3127_v1  ;;  %2945 = vmatprep.subr.bf16.mxu1 %v3127_v1 }
  0x38   : > { %983 = vmatpush1.bf16.msra.mxu0 %v3002_v15  ;;  %2961 = vmatpush1.bf16.msra.mxu1 %v3002_v15  ;;  %v3077_v15 = vld [vmem:[%s3203_s7 + $0xf0] ss:$8 sps:$4 sm:$0xff]  }
  0x39   : > { %984 = vmatprep.subr.bf16.mxu0 %v3127_v1  ;;  %2946 = vmatprep.subr.bf16.mxu1 %v3127_v1 }
  0x3c   : > { %985 = vmatpush1.bf16.msra.mxu0 %v3003_v16  ;;  %2962 = vmatpush1.bf16.msra.mxu1 %v3003_v16  ;;  %v3101_v16 = vld [vmem:[%s3203_s7 + $0x1f0] ss:$8 sps:$4 sm:$0xff]  }
  0x3d   : > { %986 = vmatprep.subr.bf16.mxu0 %v3127_v1  ;;  %2947 = vmatprep.subr.bf16.mxu1 %v3127_v1 }
  0x40   : > { %987 = vmatpush1.bf16.msra.mxu0 %v3004_v17  ;;  %2963 = vmatpush1.bf16.msra.mxu1 %v3004_v17  ;;  %v1897_v17 = vlaneseq }
  0x41   : > { %988 = vmatprep.subr.bf16.mxu0 %v3127_v1  ;;  %2948 = vmatprep.subr.bf16.mxu1 %v3127_v1  ;;  %v3057_v1 = vld [vmem:[%s3203_s7 + $0xc4] ss:$8 sps:$4 sm:$0xff]   ;;  %s2527_s7 = sshll.u32 %s3864_s21, 2 }
  0x42   : > { %s3356_s21 = scalar_lea.vmem %s3809_s3, %s2527_s7 }
  0x44   : > { %989 = vmatpush1.bf16.msra.mxu0 %v3005_v18  ;;  %2964 = vmatpush1.bf16.msra.mxu1 %v3005_v18  ;;  %v3326_v18 = vshrl.u32 %v1897_v17, 7 }
  0x47   : > { %991 = vmatmul.mubr.bf16.vlgmr.msra.gmra.mrb[0].mxu0 %v3006_v19  ;;  %1119 = vmatmul.mubr.bf16.vlgmr.msra.gmra.mrb[0].mxu1 %v3030_v20  ;;  %v3329_v19 = vstv %s2674_s10  ;;  %v1899_v20 = vadd.s32 8, %v3326_v18 }
  0x48   : > { %998 = vmatprep.mubr.bf16.mxu0 %v3009_v21  ;;  %1126 = vmatprep.mubr.bf16.mxu1 %v3036_v22  ;;  %v3335_v21 = vld [vmem:[%s3808_s2] ss:$0 sm:$0xff]  ;;  %v1964_v22 = vadd.s32 %v3329_v19, %v3326_v18 }
  0x4a   : > { %vm2028_vm0 = vcmp.lt.s32.totalorder %v1964_v22, 2048 }
  0x4f   : > { %999 = vmatmul.mubr.bf16.gmra.mrb[4].mxu0 %v3011_v23  ;;  %1127 = vmatmul.mubr.bf16.gmra.mrb[4].mxu1 %v3038_v24  ;;  %v1965_v24 = vadd.s32 %v3329_v19, %v1899_v20 }
  0x50   : > { %1006 = vmatprep.mubr.bf16.mxu0 %v3012_v25  ;;  %1134 = vmatprep.mubr.bf16.mxu1 %v3042_v26 }
  0x51   : > { %vm2029_vm1 = vcmp.lt.s32.totalorder %v1965_v24, 2048 }
  0x57   : > { %1007 = vmatmul.mubr.bf16.gmra.mrb[8].mxu0 %v3014_v27  ;;  %1135 = vmatmul.mubr.bf16.gmra.mrb[8].mxu1 %v3044_v28 }
  0x58   : > { %1014 = vmatprep.mubr.bf16.mxu0 %v3015_v29  ;;  %1142 = vmatprep.mubr.bf16.mxu1 %v3048_v30 }
  0x5f   : > { %1015 = vmatmul.mubr.bf16.gmra.mrb[12].mxu0 %v3017_v31  ;;  %1143 = vmatmul.mubr.bf16.gmra.mrb[12].mxu1 %v3050_v32  ;;  %v1900_v31 = vadd.s32 16, %v3326_v18 }
  0x60   : > { %1022 = vmatprep.mubr.bf16.mxu0 %v3018_v33  ;;  %1150 = vmatprep.mubr.bf16.mxu1 %v3054_v34 }
  0x67   : > { %1023 = vmatmul.mubr.bf16.gmra.mrb[16].mxu0 %v3020_v35  ;;  %1151 = vmatmul.mubr.bf16.gmra.mrb[16].mxu1 %v3056_v36 }
  0x68   : > { %1030 = vmatprep.mubr.bf16.mxu0 %v3021_v37  ;;  %1158 = vmatprep.mubr.bf16.mxu1 %v3060_v38 }
  0x6f   : > { %1031 = vmatmul.mubr.bf16.gmra.mrb[20].mxu0 %v3023_v39  ;;  %1159 = vmatmul.mubr.bf16.gmra.mrb[20].mxu1 %v3062_v40  ;;  %v1901_v39 = vadd.s32 24, %v3326_v18 }
  0x70   : > { %1038 = vmatprep.mubr.bf16.mxu0 %v3024_v41  ;;  %1166 = vmatprep.mubr.bf16.mxu1 %v3066_v42 }
  0x77   : > { %1039 = vmatmul.mubr.bf16.gmra.mrb[24].mxu0 %v3026_v43  ;;  %1167 = vmatmul.mubr.bf16.gmra.mrb[24].mxu1 %v3068_v44  ;;  %v1966_v43 = vadd.s32 %v3329_v19, %v1900_v31 }
  0x78   : > { %1046 = vmatprep.mubr.bf16.mxu0 %v3027_v45  ;;  %1174 = vmatprep.mubr.bf16.mxu1 %v3072_v46 }
  0x79   : > { %vm2030_vm2 = vcmp.lt.s32.totalorder %v1966_v43, 2048 }
  0x7f   : > { %1047 = vmatmul.mubr.bf16.gmra.mrb[28].mxu0 %v3029_v47  ;;  %1175 = vmatmul.mubr.bf16.gmra.mrb[28].mxu1 %v3074_v48 }
  0x80   : > { %1054 = vmatprep.mubr.bf16.mxu0 %v3033_v49  ;;  %1182 = vmatprep.mubr.bf16.mxu1 %v3078_v50 }
  0x87   : > { %1055 = vmatmul.mubr.bf16.gmra.mrb[32].mxu0 %v3035_v51  ;;  %1183 = vmatmul.mubr.bf16.gmra.mrb[32].mxu1 %v3080_v52  ;;  %v1967_v51 = vadd.s32 %v3329_v19, %v1901_v39  ;;  %v1905_v39 = vadd.s32 56, %v3326_v18 }
  0x88   : > { %1062 = vmatprep.mubr.bf16.mxu0 %v3039_v53  ;;  %1190 = vmatprep.mubr.bf16.mxu1 %v3081_v54 }
  0x89   : > { %vm2031_vm3 = vcmp.lt.s32.totalorder %v1967_v51, 2048 }
  0x8f   : > { %1063 = vmatmul.mubr.bf16.gmra.mrb[36].mxu0 %v3041_v55  ;;  %1191 = vmatmul.mubr.bf16.gmra.mrb[36].mxu1 %v3083_v56 }
  0x90   : > { %1070 = vmatprep.mubr.bf16.mxu0 %v3045_v57  ;;  %1198 = vmatprep.mubr.bf16.mxu1 %v3084_v58 }
  0x97   : > { %1071 = vmatmul.mubr.bf16.gmra.mrb[40].mxu0 %v3047_v59  ;;  %1199 = vmatmul.mubr.bf16.gmra.mrb[40].mxu1 %v3086_v60  ;;  %v1902_v59 = vadd.s32 32, %v3326_v18 }
  0x98   : > { %1078 = vmatprep.mubr.bf16.mxu0 %v3051_v61  ;;  %1206 = vmatprep.mubr.bf16.mxu1 %v3087_v62 }
  0x9f   : > { %1079 = vmatmul.mubr.bf16.gmra.mrb[44].mxu0 %v3053_v63  ;;  %1207 = vmatmul.mubr.bf16.gmra.mrb[44].mxu1 %v3089_v0 }
  0xa0   : > { %1086 = vmatprep.mubr.bf16.mxu0 %v3057_v1  ;;  %1214 = vmatprep.mubr.bf16.mxu1 %v3090_v2 }
  0xa7   : > { %1087 = vmatmul.mubr.bf16.gmra.mrb[48].mxu0 %v3059_v3  ;;  %1215 = vmatmul.mubr.bf16.gmra.mrb[48].mxu1 %v3092_v4  ;;  %v1903_v3 = vadd.s32 40, %v3326_v18 }
  0xa8   : > { %1094 = vmatprep.mubr.bf16.mxu0 %v3063_v5  ;;  %1222 = vmatprep.mubr.bf16.mxu1 %v3093_v6 }
  0xa9   : > { %v1969_v17 = vadd.s32 %v3329_v19, %v1903_v3 }
  0xab   : > { %vm2033_vm5 = vcmp.lt.s32.totalorder %v1969_v17, 2048 }
  0xaf   : > { %1095 = vmatmul.mubr.bf16.gmra.mrb[52].mxu0 %v3065_v7  ;;  %1223 = vmatmul.mubr.bf16.gmra.mrb[52].mxu1 %v3095_v8 }
  0xb0   : > { %1102 = vmatprep.mubr.bf16.mxu0 %v3069_v9  ;;  %1230 = vmatprep.mubr.bf16.mxu1 %v3096_v10  ;;  %v1968_v9 = vadd.s32 %v3329_v19, %v1902_v59 }
  0xb2   : > { %vm2032_vm4 = vcmp.lt.s32.totalorder %v1968_v9, 2048 }
  0xb7   : > { %1103 = vmatmul.mubr.bf16.gmra.mrb[56].mxu0 %v3071_v11  ;;  %1231 = vmatmul.mubr.bf16.gmra.mrb[56].mxu1 %v3098_v12 }
  0xb8   : > { %1110 = vmatprep.mubr.bf16.mxu0 %v3075_v13  ;;  %1238 = vmatprep.mubr.bf16.mxu1 %v3099_v14 }
  0xbf   : > { %1111 = vmatmul.mubr.bf16.gmra.mrb[60].mxu0 %v3077_v15  ;;  %1239 = vmatmul.mubr.bf16.gmra.mrb[60].mxu1 %v3101_v16 }
 0x11a   : > { %v992_v23 = vpop.f32.mrb[0].mxu0  ;;  %v1120_v25 = vpop.f32.mrb[0].mxu1 }
 0x11b   : > { %v1449_v26 = vadd.f32 %v3335_v21, %v992_v23  ;;  %v994_v27 = vpop.f32.mrb[1].mxu0  ;;  %v3342_v28 = vadd.f32 %v3335_v21, %v1120_v25  ;;  %v1122_v29 = vpop.f32.mrb[1].mxu1 }
 0x11c   : > { %v995_v30 = vpop.f32.mrb[2].mxu0  ;;  %v1123_v32 = vpop.f32.mrb[2].mxu1  ;;  %v1904_v29 = vadd.s32 48, %v3326_v18 }
 0x11d   : > { %v1513_v33 = vmax.f32 %v1449_v26, 0.0  ;;  %v1450_v34 = vadd.f32 %v3335_v21, %v995_v30  ;;  %v997_v35 = vpop.f32.mrb[3].mxu0  ;;  %v1545_v36 = vmax.f32 %v3342_v28, 0.0  ;;  %v3349_v37 = vadd.f32 %v3335_v21, %v1123_v32  ;;  %v1125_v38 = vpop.f32.mrb[3].mxu1 }
 0x11e   : > { %v1937_v28 = vadd.s32 312, %v3326_v18 }
 0x11f   : > { %v2092_v40 = vsel %vm2028_vm0, %v1513_v33, 0.0  ;;  %v1514_v41 = vmax.f32 %v1450_v34, 0.0  ;;  %v1546_v42 = vmax.f32 %v3349_v37, 0.0  ;;  %v1938_v37 = vadd.s32 320, %v3326_v18 }
 0x120   : > { %v2225_v47 = vmul.f32 %v2092_v40, %v2092_v40 }
 0x121   : > { %v2745_v44 = vpack.c.bf16 %v1514_v41, %v1513_v33  ;;  %v2093_v45 = vsel %vm2029_vm1, %v1514_v41, 0.0  ;;  %v2825_v46 = vpack.c.bf16 %v1546_v42, %v1545_v36 }
 0x122   : > { %v2156_v48 = vadd.f32 %v2093_v45, %v2092_v40  ;;  %v2226_v49 = vmul.f32 %v2093_v45, %v2093_v45  ;;  %v1000_v50 = vpop.f32.mrb[4].mxu0  ;;  %v1128_v52 = vpop.f32.mrb[4].mxu1 }
 0x123   : > { %2746 = vst [vmem:[%s3356_s21] sm:$0xff] %v2745_v44   ;;  %v1451_v53 = vadd.f32 %v3335_v21, %v1000_v50  ;;  %v1002_v54 = vpop.f32.mrb[5].mxu0  ;;  %2917 = vst [vmem:[%s3356_s21 + $0x80] sm:$0xff] %v2825_v46   ;;  %v3368_v55 = vadd.f32 %v3335_v21, %v1128_v52  ;;  %v1130_v56 = vpop.f32.mrb[5].mxu1  ;;  %v1970_v46 = vadd.s32 %v3329_v19, %v1904_v29 }
 0x124   : > { %v2289_v57 = vadd.f32 %v2226_v49, %v2225_v47  ;;  %v1003_v58 = vpop.f32.mrb[6].mxu0  ;;  %v1131_v60 = vpop.f32.mrb[6].mxu1  ;;  %v1971_v54 = vadd.s32 %v3329_v19, %v1905_v39 }
 0x125   : > { %v1515_v61 = vmax.f32 %v1451_v53, 0.0  ;;  %v1452_v62 = vadd.f32 %v3335_v21, %v1003_v58  ;;  %v1005_v63 = vpop.f32.mrb[7].mxu0  ;;  %v1547_v0 = vmax.f32 %v3368_v55, 0.0  ;;  %v3374_v1 = vadd.f32 %v3335_v21, %v1131_v60  ;;  %v1133_v2 = vpop.f32.mrb[7].mxu1 }
 0x126   : > { %vm2034_vm6 = vcmp.lt.s32.totalorder %v1970_v46, 2048  ;;  %v1906_v63 = vadd.s32 64, %v3326_v18  ;;  %vm2035_vm7 = vcmp.lt.s32.totalorder %v1971_v54, 2048 }
 0x127   : > { %v2094_v4 = vsel %vm2030_vm2, %v1515_v61, 0.0  ;;  %v1516_v5 = vmax.f32 %v1452_v62, 0.0  ;;  %v1548_v6 = vmax.f32 %v3374_v1, 0.0 }
 0x128   : > { %v2157_v7 = vadd.f32 %v2156_v48, %v2094_v4  ;;  %v2227_v8 = vmul.f32 %v2094_v4, %v2094_v4 }
 0x129   : > { %v2750_v10 = vpack.c.bf16 %v1516_v5, %v1515_v61  ;;  %v2095_v11 = vsel %vm2031_vm3, %v1516_v5, 0.0  ;;  %v2830_v12 = vpack.c.bf16 %v1548_v6, %v1547_v0 }
 0x12a   : > { %v2290_v13 = vadd.f32 %v2289_v57, %v2227_v8  ;;  %v2158_v14 = vadd.f32 %v2157_v7, %v2095_v11  ;;  %v2228_v15 = vmul.f32 %v2095_v11, %v2095_v11  ;;  %v1008_v16 = vpop.f32.mrb[8].mxu0  ;;  %v1136_v20 = vpop.f32.mrb[8].mxu1 }
 0x12b   : > { %2902 = vst [vmem:[%s3356_s21 + $0x8] sm:$0xff] %v2750_v10   ;;  %v1453_v22 = vadd.f32 %v3335_v21, %v1008_v16  ;;  %v1010_v23 = vpop.f32.mrb[9].mxu0  ;;  %2918 = vst [vmem:[%s3356_s21 + $0x88] sm:$0xff] %v2830_v12   ;;  %v3388_v24 = vadd.f32 %v3335_v21, %v1136_v20  ;;  %v1138_v25 = vpop.f32.mrb[9].mxu1  ;;  %v1907_v10 = vadd.s32 72, %v3326_v18  ;;  %v1972_v16 = vadd.s32 %v3329_v19, %v1906_v63 }
 0x12c   : > { %v2291_v26 = vadd.f32 %v2290_v13, %v2228_v15  ;;  %v1011_v27 = vpop.f32.mrb[10].mxu0  ;;  %v1139_v30 = vpop.f32.mrb[10].mxu1 }
 0x12d   : > { %v1517_v31 = vmax.f32 %v1453_v22, 0.0  ;;  %v1454_v32 = vadd.f32 %v3335_v21, %v1011_v27  ;;  %v1013_v33 = vpop.f32.mrb[11].mxu0  ;;  %v1549_v34 = vmax.f32 %v3388_v24, 0.0  ;;  %v3394_v35 = vadd.f32 %v3335_v21, %v1139_v30  ;;  %v1141_v38 = vpop.f32.mrb[11].mxu1 }
 0x12e   : > { %v1973_v29 = vadd.s32 %v3329_v19, %v1907_v10  ;;  %vm2036_vm8 = vcmp.lt.s32.totalorder %v1972_v16, 2048 }
 0x12f   : > { %v2096_v40 = vsel %vm2032_vm4, %v1517_v31, 0.0  ;;  %v1518_v41 = vmax.f32 %v1454_v32, 0.0  ;;  %v1550_v43 = vmax.f32 %v3394_v35, 0.0 }
 0x130   : > { %v2159_v44 = vadd.f32 %v2158_v14, %v2096_v40  ;;  %v2229_v45 = vmul.f32 %v2096_v40, %v2096_v40  ;;  %vm2037_vm9 = vcmp.lt.s32.totalorder %v1973_v29, 2048 }
 0x131   : > { %v2755_v47 = vpack.c.bf16 %v1518_v41, %v1517_v31  ;;  %v2097_v48 = vsel %vm2033_vm5, %v1518_v41, 0.0  ;;  %v2835_v49 = vpack.c.bf16 %v1550_v43, %v1549_v34  ;;  %v1908_v41 = vadd.s32 80, %v3326_v18 }
 0x132   : > { %v2292_v50 = vadd.f32 %v2291_v26, %v2229_v45  ;;  %v2160_v51 = vadd.f32 %v2159_v44, %v2097_v48  ;;  %v2230_v52 = vmul.f32 %v2097_v48, %v2097_v48  ;;  %v1016_v53 = vpop.f32.mrb[12].mxu0  ;;  %v1144_v56 = vpop.f32.mrb[12].mxu1 }
 0x133   : > { %2903 = vst [vmem:[%s3356_s21 + $0x10] sm:$0xff] %v2755_v47   ;;  %v1455_v57 = vadd.f32 %v3335_v21, %v1016_v53  ;;  %v1018_v58 = vpop.f32.mrb[13].mxu0  ;;  %2919 = vst [vmem:[%s3356_s21 + $0x90] sm:$0xff] %v2835_v49   ;;  %v3408_v59 = vadd.f32 %v3335_v21, %v1144_v56  ;;  %v1146_v60 = vpop.f32.mrb[13].mxu1 }
 0x134   : > { %v2293_v61 = vadd.f32 %v2292_v50, %v2230_v52  ;;  %v1019_v62 = vpop.f32.mrb[14].mxu0  ;;  %v1147_v2 = vpop.f32.mrb[14].mxu1  ;;  %v1974_v58 = vadd.s32 %v3329_v19, %v1908_v41 }
 0x135   : > { %v1519_v3 = vmax.f32 %v1455_v57, 0.0  ;;  %v1456_v4 = vadd.f32 %v3335_v21, %v1019_v62  ;;  %v1021_v5 = vpop.f32.mrb[15].mxu0  ;;  %v3834_v7 = vmax.f32 %v3408_v59, 0.0  ;;  %v3414_v8 = vadd.f32 %v3335_v21, %v1147_v2  ;;  %v1149_v9 = vpop.f32.mrb[15].mxu1 }
 0x136   : > { %vm2038_vm10 = vcmp.lt.s32.totalorder %v1974_v58, 2048 }
 0x137   : > { %v2098_v11 = vsel %vm2034_vm6, %v1519_v3, 0.0  ;;  %v1520_v12 = vmax.f32 %v1456_v4, 0.0  ;;  %v3831_v13 = vmax.f32 %v3414_v8, 0.0 }
 0x138   : > { %v2161_v14 = vadd.f32 %v2160_v51, %v2098_v11  ;;  %v2231_v15 = vmul.f32 %v2098_v11, %v2098_v11  ;;  %v1909_v51 = vadd.s32 88, %v3326_v18 }
 0x139   : > { %v2760_v17 = vpack.c.bf16 %v1520_v12, %v1519_v3  ;;  %v2099_v20 = vsel %vm2035_vm7, %v1520_v12, 0.0  ;;  %v2840_v22 = vpack.c.bf16 %v3831_v13, %v3834_v7 }
 0x13a   : > { %v2294_v23 = vadd.f32 %v2293_v61, %v2231_v15  ;;  %v2162_v25 = vadd.f32 %v2161_v14, %v2099_v20  ;;  %v2232_v26 = vmul.f32 %v2099_v20, %v2099_v20  ;;  %v1024_v27 = vpop.f32.mrb[16].mxu0  ;;  %v1152_v30 = vpop.f32.mrb[16].mxu1  ;;  %v1975_v5 = vadd.s32 %v3329_v19, %v1909_v51 }
 0x13b   : > { %2904 = vst [vmem:[%s3356_s21 + $0x18] sm:$0xff] %v2760_v17   ;;  %v1457_v31 = vadd.f32 %v3335_v21, %v1024_v27  ;;  %v1026_v32 = vpop.f32.mrb[17].mxu0  ;;  %2920 = vst [vmem:[%s3356_s21 + $0x98] sm:$0xff] %v2840_v22   ;;  %v3428_v33 = vadd.f32 %v3335_v21, %v1152_v30  ;;  %v1154_v38 = vpop.f32.mrb[17].mxu1  ;;  %v1910_v17 = vadd.s32 96, %v3326_v18  ;;  %v1911_v30 = vadd.s32 104, %v3326_v18 }
 0x13c   : > { %v2295_v39 = vadd.f32 %v2294_v23, %v2232_v26  ;;  %v1027_v40 = vpop.f32.mrb[18].mxu0  ;;  %v1155_v44 = vpop.f32.mrb[18].mxu1  ;;  %vm2039_vm11 = vcmp.lt.s32.totalorder %v1975_v5, 2048 }
 0x13d   : > { %v1521_v45 = vmax.f32 %v1457_v31, 0.0  ;;  %v1458_v46 = vadd.f32 %v3335_v21, %v1027_v40  ;;  %v1029_v47 = vpop.f32.mrb[19].mxu0  ;;  %v3830_v48 = vmax.f32 %v3428_v33, 0.0  ;;  %v3434_v49 = vadd.f32 %v3335_v21, %v1155_v44  ;;  %v1157_v50 = vpop.f32.mrb[19].mxu1 }
 0x13e   : > { %v1976_v41 = vadd.s32 %v3329_v19, %v1910_v17 }
 0x13f   : > { %v2100_v52 = vsel %vm2036_vm8, %v1521_v45, 0.0  ;;  %v1522_v53 = vmax.f32 %v1458_v46, 0.0  ;;  %v3829_v54 = vmax.f32 %v3434_v49, 0.0 }
 0x140   : > { %v2163_v56 = vadd.f32 %v2162_v25, %v2100_v52  ;;  %v2233_v57 = vmul.f32 %v2100_v52, %v2100_v52  ;;  %vm2040_vm12 = vcmp.lt.s32.totalorder %v1976_v41, 2048 }
 0x141   : > { %v2765_v60 = vpack.c.bf16 %v1522_v53, %v1521_v45  ;;  %v2101_v61 = vsel %vm2037_vm9, %v1522_v53, 0.0  ;;  %v2845_v62 = vpack.c.bf16 %v3829_v54, %v3830_v48  ;;  %v1977_v53 = vadd.s32 %v3329_v19, %v1911_v30 }
 0x142   : > { %v2296_v63 = vadd.f32 %v2295_v39, %v2233_v57  ;;  %v2164_v2 = vadd.f32 %v2163_v56, %v2101_v61  ;;  %v2234_v3 = vmul.f32 %v2101_v61, %v2101_v61  ;;  %v1032_v4 = vpop.f32.mrb[20].mxu0  ;;  %v1160_v9 = vpop.f32.mrb[20].mxu1 }
 0x143   : > { %2905 = vst [vmem:[%s3356_s21 + $0x20] sm:$0xff] %v2765_v60   ;;  %v1459_v10 = vadd.f32 %v3335_v21, %v1032_v4  ;;  %v1034_v11 = vpop.f32.mrb[21].mxu0  ;;  %2921 = vst [vmem:[%s3356_s21 + $0xa0] sm:$0xff] %v2845_v62   ;;  %v3448_v12 = vadd.f32 %v3335_v21, %v1160_v9  ;;  %v1162_v14 = vpop.f32.mrb[21].mxu1  ;;  %vm2041_vm13 = vcmp.lt.s32.totalorder %v1977_v53, 2048 }
 0x144   : > { %v2297_v15 = vadd.f32 %v2296_v63, %v2234_v3  ;;  %v1035_v16 = vpop.f32.mrb[22].mxu0  ;;  %v1163_v20 = vpop.f32.mrb[22].mxu1 }
 0x145   : > { %v1523_v22 = vmax.f32 %v1459_v10, 0.0  ;;  %v1460_v23 = vadd.f32 %v3335_v21, %v1035_v16  ;;  %v1037_v25 = vpop.f32.mrb[23].mxu0  ;;  %v3826_v26 = vmax.f32 %v3448_v12, 0.0  ;;  %v3454_v27 = vadd.f32 %v3335_v21, %v1163_v20  ;;  %v1165_v29 = vpop.f32.mrb[23].mxu1 }
 0x147   : > { %v2102_v31 = vsel %vm2038_vm10, %v1523_v22, 0.0  ;;  %v1524_v32 = vmax.f32 %v1460_v23, 0.0  ;;  %v3825_v38 = vmax.f32 %v3454_v27, 0.0 }
 0x148   : > { %v2165_v39 = vadd.f32 %v2164_v2, %v2102_v31  ;;  %v2235_v40 = vmul.f32 %v2102_v31, %v2102_v31  ;;  %v1912_v2 = vadd.s32 112, %v3326_v18 }
 0x149   : > { %v2770_v44 = vpack.c.bf16 %v1524_v32, %v1523_v22  ;;  %v2103_v45 = vsel %vm2039_vm11, %v1524_v32, 0.0  ;;  %v2850_v46 = vpack.c.bf16 %v3825_v38, %v3826_v26  ;;  %v1931_v38 = vadd.s32 264, %v3326_v18 }
 0x14a   : > { %v2298_v47 = vadd.f32 %v2297_v15, %v2235_v40  ;;  %v2166_v50 = vadd.f32 %v2165_v39, %v2103_v45  ;;  %v2236_v51 = vmul.f32 %v2103_v45, %v2103_v45  ;;  %v1040_v52 = vpop.f32.mrb[24].mxu0  ;;  %v1168_v56 = vpop.f32.mrb[24].mxu1  ;;  %v1913_v15 = vadd.s32 120, %v3326_v18 }
 0x14b   : > { %2906 = vst [vmem:[%s3356_s21 + $0x28] sm:$0xff] %v2770_v44   ;;  %v1461_v57 = vadd.f32 %v3335_v21, %v1040_v52  ;;  %v1042_v58 = vpop.f32.mrb[25].mxu0  ;;  %2922 = vst [vmem:[%s3356_s21 + $0xa8] sm:$0xff] %v2850_v46   ;;  %v3468_v60 = vadd.f32 %v3335_v21, %v1168_v56  ;;  %v1170_v61 = vpop.f32.mrb[25].mxu1  ;;  %v1978_v25 = vadd.s32 %v3329_v19, %v1912_v2  ;;  %v1914_v56 = vadd.s32 128, %v3326_v18 }
 0x14c   : > { %v2299_v62 = vadd.f32 %v2298_v47, %v2236_v51  ;;  %v1043_v63 = vpop.f32.mrb[26].mxu0  ;;  %v1171_v3 = vpop.f32.mrb[26].mxu1  ;;  %v1979_v44 = vadd.s32 %v3329_v19, %v1913_v15 }
 0x14d   : > { %v1525_v4 = vmax.f32 %v1461_v57, 0.0  ;;  %v1462_v5 = vadd.f32 %v3335_v21, %v1043_v63  ;;  %v1045_v9 = vpop.f32.mrb[27].mxu0  ;;  %v3824_v10 = vmax.f32 %v3468_v60, 0.0  ;;  %v3474_v11 = vadd.f32 %v3335_v21, %v1171_v3  ;;  %v1173_v14 = vpop.f32.mrb[27].mxu1 }
 0x14e   : > { %vm2042_vm14 = vcmp.lt.s32.totalorder %v1978_v25, 2048  ;;  %vm2043_vm15 = vcmp.lt.s32.totalorder %v1979_v44, 2048 }
 0x14f   : > { %v2104_v16 = vsel %vm2040_vm12, %v1525_v4, 0.0  ;;  %v1526_v17 = vmax.f32 %v1462_v5, 0.0  ;;  %v3821_v20 = vmax.f32 %v3474_v11, 0.0 }
 0x150   : > { %v2167_v22 = vadd.f32 %v2166_v50, %v2104_v16  ;;  %v2237_v23 = vmul.f32 %v2104_v16, %v2104_v16 }
 0x151   : > { %v2775_v29 = vpack.c.bf16 %v1526_v17, %v1525_v4  ;;  %v2105_v30 = vsel %vm2041_vm13, %v1526_v17, 0.0  ;;  %v2855_v31 = vpack.c.bf16 %v3821_v20, %v3824_v10  ;;  %v1915_v4 = vadd.s32 136, %v3326_v18 }
 0x152   : > { %v2300_v32 = vadd.f32 %v2299_v62, %v2237_v23  ;;  %v2168_v39 = vadd.f32 %v2167_v22, %v2105_v30  ;;  %v2238_v40 = vmul.f32 %v2105_v30, %v2105_v30  ;;  %v1048_v41 = vpop.f32.mrb[28].mxu0  ;;  %v1176_v45 = vpop.f32.mrb[28].mxu1  ;;  %v1980_v17 = vadd.s32 %v3329_v19, %v1914_v56 }
 0x153   : > { %2907 = vst [vmem:[%s3356_s21 + $0x30] sm:$0xff] %v2775_v29   ;;  %v1463_v46 = vadd.f32 %v3335_v21, %v1048_v41  ;;  %v1050_v47 = vpop.f32.mrb[29].mxu0  ;;  %2923 = vst [vmem:[%s3356_s21 + $0xb0] sm:$0xff] %v2855_v31   ;;  %v3488_v50 = vadd.f32 %v3335_v21, %v1176_v45  ;;  %v1178_v51 = vpop.f32.mrb[29].mxu1 }
 0x154   : > { %v2301_v52 = vadd.f32 %v2300_v32, %v2238_v40  ;;  %v1051_v53 = vpop.f32.mrb[30].mxu0  ;;  %v1179_v57 = vpop.f32.mrb[30].mxu1  ;;  %v1981_v40 = vadd.s32 %v3329_v19, %v1915_v4  ;;  %vm2044_vm0 = vcmp.lt.s32.totalorder %v1980_v17, 2048  ;;  %v1917_v4 = vadd.s32 152, %v3326_v18 }
 0x155   : > { %v1527_v58 = vmax.f32 %v1463_v46, 0.0  ;;  %v1464_v61 = vadd.f32 %v3335_v21, %v1051_v53  ;;  %v1053_v62 = vpop.f32.mrb[31].mxu0  ;;  %v3820_v63 = vmax.f32 %v3488_v50, 0.0  ;;  %v3494_v2 = vadd.f32 %v3335_v21, %v1179_v57  ;;  %v1181_v3 = vpop.f32.mrb[31].mxu1 }
 0x156   : > { %vm2045_vm1 = vcmp.lt.s32.totalorder %v1981_v40, 2048 }
 0x157   : > { %v2106_v5 = vsel %vm2042_vm14, %v1527_v58, 0.0  ;;  %v1528_v9 = vmax.f32 %v1464_v61, 0.0  ;;  %v3817_v14 = vmax.f32 %v3494_v2, 0.0 }
 0x158   : > { %v2169_v15 = vadd.f32 %v2168_v39, %v2106_v5  ;;  %v2239_v16 = vmul.f32 %v2106_v5, %v2106_v5 }
 0x159   : > { %v2780_v22 = vpack.c.bf16 %v1528_v9, %v1527_v58  ;;  %v2107_v23 = vsel %vm2043_vm15, %v1528_v9, 0.0  ;;  %v2860_v25 = vpack.c.bf16 %v3817_v14, %v3820_v63 }
 0x15a   : > { %v2302_v29 = vadd.f32 %v2301_v52, %v2239_v16  ;;  %v2170_v30 = vadd.f32 %v2169_v15, %v2107_v23  ;;  %v2240_v31 = vmul.f32 %v2107_v23, %v2107_v23  ;;  %v1056_v32 = vpop.f32.mrb[32].mxu0  ;;  %v1184_v41 = vpop.f32.mrb[32].mxu1  ;;  %v1916_v52 = vadd.s32 144, %v3326_v18 }
 0x15b   : > { %2908 = vst [vmem:[%s3356_s21 + $0x38] sm:$0xff] %v2780_v22   ;;  %v1465_v39 = vadd.f32 %v3335_v21, %v1056_v32  ;;  %v1058_v44 = vpop.f32.mrb[33].mxu0  ;;  %2924 = vst [vmem:[%s3356_s21 + $0xb8] sm:$0xff] %v2860_v25   ;;  %v3508_v45 = vadd.f32 %v3335_v21, %v1184_v41  ;;  %v1186_v46 = vpop.f32.mrb[33].mxu1 }
 0x15c   : > { %v2303_v47 = vadd.f32 %v2302_v29, %v2240_v31  ;;  %v1059_v51 = vpop.f32.mrb[34].mxu0  ;;  %v1187_v53 = vpop.f32.mrb[34].mxu1  ;;  %v1982_v22 = vadd.s32 %v3329_v19, %v1916_v52 }
 0x15d   : > { %v1529_v56 = vmax.f32 %v1465_v39, 0.0  ;;  %v1466_v57 = vadd.f32 %v3335_v21, %v1059_v51  ;;  %v1061_v58 = vpop.f32.mrb[35].mxu0  ;;  %v3816_v61 = vmax.f32 %v3508_v45, 0.0  ;;  %v3514_v62 = vadd.f32 %v3335_v21, %v1187_v53  ;;  %v1189_v3 = vpop.f32.mrb[35].mxu1 }
 0x15e   : > { %v1983_v39 = vadd.s32 %v3329_v19, %v1917_v4  ;;  %vm2046_vm2 = vcmp.lt.s32.totalorder %v1982_v22, 2048 }
 0x15f   : > { %v2108_v5 = vsel %vm2044_vm0, %v1529_v56, 0.0  ;;  %v1530_v9 = vmax.f32 %v1466_v57, 0.0  ;;  %v3813_v15 = vmax.f32 %v3514_v62, 0.0 }
 0x160   : > { %v2171_v16 = vadd.f32 %v2170_v30, %v2108_v5  ;;  %v2241_v17 = vmul.f32 %v2108_v5, %v2108_v5  ;;  %vm2047_vm3 = vcmp.lt.s32.totalorder %v1983_v39, 2048 }
 0x161   : > { %v2785_v23 = vpack.c.bf16 %v1530_v9, %v1529_v56  ;;  %v2109_v25 = vsel %vm2045_vm1, %v1530_v9, 0.0  ;;  %v2865_v29 = vpack.c.bf16 %v3813_v15, %v3816_v61 }
 0x162   : > { %v2304_v31 = vadd.f32 %v2303_v47, %v2241_v17  ;;  %v2172_v32 = vadd.f32 %v2171_v16, %v2109_v25  ;;  %v2242_v40 = vmul.f32 %v2109_v25, %v2109_v25  ;;  %v1064_v41 = vpop.f32.mrb[36].mxu0  ;;  %v1192_v44 = vpop.f32.mrb[36].mxu1  ;;  %v1918_v47 = vadd.s32 160, %v3326_v18 }
 0x163   : > { %2909 = vst [vmem:[%s3356_s21 + $0x40] sm:$0xff] %v2785_v23   ;;  %v1467_v30 = vadd.f32 %v3335_v21, %v1064_v41  ;;  %v1066_v46 = vpop.f32.mrb[37].mxu0  ;;  %2925 = vst [vmem:[%s3356_s21 + $0xc0] sm:$0xff] %v2865_v29   ;;  %v3528_v51 = vadd.f32 %v3335_v21, %v1192_v44  ;;  %v1194_v52 = vpop.f32.mrb[37].mxu1  ;;  %v1919_v17 = vadd.s32 168, %v3326_v18 }
 0x164   : > { %v2305_v53 = vadd.f32 %v2304_v31, %v2242_v40  ;;  %v1067_v56 = vpop.f32.mrb[38].mxu0  ;;  %v1195_v57 = vpop.f32.mrb[38].mxu1  ;;  %v1984_v40 = vadd.s32 %v3329_v19, %v1918_v47 }
 0x165   : > { %v1531_v58 = vmax.f32 %v1467_v30, 0.0  ;;  %v1468_v3 = vadd.f32 %v3335_v21, %v1067_v56  ;;  %v1069_v4 = vpop.f32.mrb[39].mxu0  ;;  %v3812_v5 = vmax.f32 %v3528_v51, 0.0  ;;  %v3534_v9 = vadd.f32 %v3335_v21, %v1195_v57  ;;  %v1197_v16 = vpop.f32.mrb[39].mxu1 }
 0x166   : > { %v1985_v57 = vadd.s32 %v3329_v19, %v1919_v17  ;;  %vm2048_vm4 = vcmp.lt.s32.totalorder %v1984_v40, 2048 }
 0x167   : > { %v2110_v23 = vsel %vm2046_vm2, %v1531_v58, 0.0  ;;  %v1532_v22 = vmax.f32 %v1468_v3, 0.0  ;;  %v3811_v25 = vmax.f32 %v3534_v9, 0.0 }
 0x168   : > { %v2173_v29 = vadd.f32 %v2172_v32, %v2110_v23  ;;  %v2243_v31 = vmul.f32 %v2110_v23, %v2110_v23  ;;  %vm2049_vm5 = vcmp.lt.s32.totalorder %v1985_v57, 2048 }
 0x169   : > { %v2790_v41 = vpack.c.bf16 %v1532_v22, %v1531_v58  ;;  %v2111_v44 = vsel %vm2047_vm3, %v1532_v22, 0.0  ;;  %v2870_v30 = vpack.c.bf16 %v3811_v25, %v3812_v5 }
 0x16a   : > { %v2306_v39 = vadd.f32 %v2305_v53, %v2243_v31  ;;  %v2174_v46 = vadd.f32 %v2173_v29, %v2111_v44  ;;  %v2244_v52 = vmul.f32 %v2111_v44, %v2111_v44  ;;  %v1072_v56 = vpop.f32.mrb[40].mxu0  ;;  %v1200_v3 = vpop.f32.mrb[40].mxu1  ;;  %v1920_v53 = vadd.s32 176, %v3326_v18 }
 0x16b   : > { %2910 = vst [vmem:[%s3356_s21 + $0x48] sm:$0xff] %v2790_v41   ;;  %v1469_v32 = vadd.f32 %v3335_v21, %v1072_v56  ;;  %v1074_v4 = vpop.f32.mrb[41].mxu0  ;;  %2926 = vst [vmem:[%s3356_s21 + $0xc8] sm:$0xff] %v2870_v30   ;;  %v3548_v47 = vadd.f32 %v3335_v21, %v1200_v3  ;;  %v1202_v58 = vpop.f32.mrb[41].mxu1  ;;  %v1921_v56 = vadd.s32 184, %v3326_v18 }
 0x16c   : > { %v2307_v16 = vadd.f32 %v2306_v39, %v2244_v52  ;;  %v1075_v23 = vpop.f32.mrb[42].mxu0  ;;  %v1203_v22 = vpop.f32.mrb[42].mxu1  ;;  %v1986_v4 = vadd.s32 %v3329_v19, %v1920_v53 }
 0x16d   : > { %v1533_v29 = vmax.f32 %v1469_v32, 0.0  ;;  %v1470_v31 = vadd.f32 %v3335_v21, %v1075_v23  ;;  %v1077_v17 = vpop.f32.mrb[43].mxu0  ;;  %v3815_v41 = vmax.f32 %v3548_v47, 0.0  ;;  %v3554_v44 = vadd.f32 %v3335_v21, %v1203_v22  ;;  %v1205_v30 = vpop.f32.mrb[43].mxu1 }
 0x16e   : > { %vm2050_vm6 = vcmp.lt.s32.totalorder %v1986_v4, 2048 }
 0x16f   : > { %v2112_v39 = vsel %vm2048_vm4, %v1533_v29, 0.0  ;;  %v1534_v40 = vmax.f32 %v1470_v31, 0.0  ;;  %v3814_v52 = vmax.f32 %v3554_v44, 0.0  ;;  %v1987_v31 = vadd.s32 %v3329_v19, %v1921_v56 }
 0x170   : > { %v2175_v3 = vadd.f32 %v2174_v46, %v2112_v39  ;;  %v2245_v32 = vmul.f32 %v2112_v39, %v2112_v39 }
 0x171   : > { %v2795_v58 = vpack.c.bf16 %v1534_v40, %v1533_v29  ;;  %v2113_v23 = vsel %vm2049_vm5, %v1534_v40, 0.0  ;;  %v2875_v22 = vpack.c.bf16 %v3814_v52, %v3815_v41  ;;  %vm2051_vm7 = vcmp.lt.s32.totalorder %v1987_v31, 2048 }
 0x172   : > { %v2308_v57 = vadd.f32 %v2307_v16, %v2245_v32  ;;  %v2176_v17 = vadd.f32 %v2175_v3, %v2113_v23  ;;  %v2246_v30 = vmul.f32 %v2113_v23, %v2113_v23  ;;  %v1080_v25 = vpop.f32.mrb[44].mxu0  ;;  %v1208_v5 = vpop.f32.mrb[44].mxu1  ;;  %v1922_v16 = vadd.s32 192, %v3326_v18 }
 0x173   : > { %2911 = vst [vmem:[%s3356_s21 + $0x50] sm:$0xff] %v2795_v58   ;;  %v1471_v46 = vadd.f32 %v3335_v21, %v1080_v25  ;;  %v1082_v39 = vpop.f32.mrb[45].mxu0  ;;  %2927 = vst [vmem:[%s3356_s21 + $0xd0] sm:$0xff] %v2875_v22   ;;  %v3568_v53 = vadd.f32 %v3335_v21, %v1208_v5  ;;  %v1210_v29 = vpop.f32.mrb[45].mxu1  ;;  %v1923_v5 = vadd.s32 200, %v3326_v18 }
 0x174   : > { %v2309_v40 = vadd.f32 %v2308_v57, %v2246_v30  ;;  %v1083_v15 = vpop.f32.mrb[46].mxu0  ;;  %v1211_v3 = vpop.f32.mrb[46].mxu1 }
 0x175   : > { %v1535_v32 = vmax.f32 %v1471_v46, 0.0  ;;  %v1472_v23 = vadd.f32 %v3335_v21, %v1083_v15  ;;  %v1085_v56 = vpop.f32.mrb[47].mxu0  ;;  %v3819_v58 = vmax.f32 %v3568_v53, 0.0  ;;  %v3574_v25 = vadd.f32 %v3335_v21, %v1211_v3  ;;  %v1213_v22 = vpop.f32.mrb[47].mxu1 }
 0x176   : > { %v1988_v15 = vadd.s32 %v3329_v19, %v1922_v16 }
 0x177   : > { %v2114_v57 = vsel %vm2050_vm6, %v1535_v32, 0.0  ;;  %v1536_v4 = vmax.f32 %v1472_v23, 0.0  ;;  %v3818_v30 = vmax.f32 %v3574_v25, 0.0  ;;  %v1989_v23 = vadd.s32 %v3329_v19, %v1923_v5 }
 0x178   : > { %v2177_v39 = vadd.f32 %v2176_v17, %v2114_v57  ;;  %v2247_v46 = vmul.f32 %v2114_v57, %v2114_v57  ;;  %vm2052_vm8 = vcmp.lt.s32.totalorder %v1988_v15, 2048 }
 0x179   : > { %v2800_v29 = vpack.c.bf16 %v1536_v4, %v1535_v32  ;;  %v2115_v56 = vsel %vm2051_vm7, %v1536_v4, 0.0  ;;  %v2880_v3 = vpack.c.bf16 %v3818_v30, %v3819_v58  ;;  %vm2053_vm9 = vcmp.lt.s32.totalorder %v1989_v23, 2048 }
 0x17a   : > { %v2310_v31 = vadd.f32 %v2309_v40, %v2247_v46  ;;  %v2178_v22 = vadd.f32 %v2177_v39, %v2115_v56  ;;  %v2248_v52 = vmul.f32 %v2115_v56, %v2115_v56  ;;  %v1088_v41 = vpop.f32.mrb[48].mxu0  ;;  %v1216_v61 = vpop.f32.mrb[48].mxu1  ;;  %v1924_v40 = vadd.s32 208, %v3326_v18 }
 0x17b   : > { %2912 = vst [vmem:[%s3356_s21 + $0x58] sm:$0xff] %v2800_v29   ;;  %v1473_v17 = vadd.f32 %v3335_v21, %v1088_v41  ;;  %v1090_v57 = vpop.f32.mrb[49].mxu0  ;;  %2928 = vst [vmem:[%s3356_s21 + $0xd8] sm:$0xff] %v2880_v3   ;;  %v3588_v16 = vadd.f32 %v3335_v21, %v1216_v61  ;;  %v1218_v32 = vpop.f32.mrb[49].mxu1  ;;  %v1925_v61 = vadd.s32 216, %v3326_v18 }
 0x17c   : > { %v2311_v4 = vadd.f32 %v2310_v31, %v2248_v52  ;;  %v1091_v14 = vpop.f32.mrb[50].mxu0  ;;  %v1219_v39 = vpop.f32.mrb[50].mxu1 }
 0x17d   : > { %v1537_v46 = vmax.f32 %v1473_v17, 0.0  ;;  %v1474_v56 = vadd.f32 %v3335_v21, %v1091_v14  ;;  %v1093_v5 = vpop.f32.mrb[51].mxu0  ;;  %v3823_v29 = vmax.f32 %v3588_v16, 0.0  ;;  %v3594_v41 = vadd.f32 %v3335_v21, %v1219_v39  ;;  %v1221_v3 = vpop.f32.mrb[51].mxu1 }
 0x17e   : > { %v1990_v14 = vadd.s32 %v3329_v19, %v1924_v40 }
 0x17f   : > { %v2116_v52 = vsel %vm2052_vm8, %v1537_v46, 0.0  ;;  %v1538_v15 = vmax.f32 %v1474_v56, 0.0  ;;  %v3822_v31 = vmax.f32 %v3594_v41, 0.0  ;;  %v1991_v56 = vadd.s32 %v3329_v19, %v1925_v61 }
 0x180   : > { %v2179_v57 = vadd.f32 %v2178_v22, %v2116_v52  ;;  %v2249_v17 = vmul.f32 %v2116_v52, %v2116_v52  ;;  %vm2054_vm10 = vcmp.lt.s32.totalorder %v1990_v14, 2048 }
 0x181   : > { %v2805_v32 = vpack.c.bf16 %v1538_v15, %v1537_v46  ;;  %v2117_v5 = vsel %vm2053_vm9, %v1538_v15, 0.0  ;;  %v2885_v39 = vpack.c.bf16 %v3822_v31, %v3823_v29  ;;  %vm2055_vm11 = vcmp.lt.s32.totalorder %v1991_v56, 2048 }
 0x182   : > { %v2312_v23 = vadd.f32 %v2311_v4, %v2249_v17  ;;  %v2180_v3 = vadd.f32 %v2179_v57, %v2117_v5  ;;  %v2250_v30 = vmul.f32 %v2117_v5, %v2117_v5  ;;  %v1096_v58 = vpop.f32.mrb[52].mxu0  ;;  %v1224_v63 = vpop.f32.mrb[52].mxu1  ;;  %v1926_v4 = vadd.s32 224, %v3326_v18 }
 0x183   : > { %2913 = vst [vmem:[%s3356_s21 + $0x60] sm:$0xff] %v2805_v32   ;;  %v1475_v22 = vadd.f32 %v3335_v21, %v1096_v58  ;;  %v1098_v52 = vpop.f32.mrb[53].mxu0  ;;  %2929 = vst [vmem:[%s3356_s21 + $0xe0] sm:$0xff] %v2885_v39   ;;  %v3608_v40 = vadd.f32 %v3335_v21, %v1224_v63  ;;  %v1226_v46 = vpop.f32.mrb[53].mxu1  ;;  %v1927_v63 = vadd.s32 232, %v3326_v18 }
 0x184   : > { %v2313_v15 = vadd.f32 %v2312_v23, %v2250_v30  ;;  %v1099_v20 = vpop.f32.mrb[54].mxu0  ;;  %v1227_v57 = vpop.f32.mrb[54].mxu1  ;;  %v1930_v46 = vadd.s32 256, %v3326_v18 }
 0x185   : > { %v1539_v17 = vmax.f32 %v1475_v22, 0.0  ;;  %v1476_v5 = vadd.f32 %v3335_v21, %v1099_v20  ;;  %v1101_v61 = vpop.f32.mrb[55].mxu0  ;;  %v3828_v32 = vmax.f32 %v3608_v40, 0.0  ;;  %v3614_v58 = vadd.f32 %v3335_v21, %v1227_v57  ;;  %v1229_v39 = vpop.f32.mrb[55].mxu1 }
 0x186   : > { %v1992_v20 = vadd.s32 %v3329_v19, %v1926_v4  ;;  %v1993_v10 = vadd.s32 %v3329_v19, %v1927_v63 }
 0x187   : > { %v2118_v52 = vsel %vm2054_vm10, %v1539_v17, 0.0  ;;  %v1540_v30 = vmax.f32 %v1476_v5, 0.0  ;;  %v3827_v14 = vmax.f32 %v3614_v58, 0.0 }
 0x188   : > { %v2181_v23 = vadd.f32 %v2180_v3, %v2118_v52  ;;  %v2251_v22 = vmul.f32 %v2118_v52, %v2118_v52  ;;  %vm2056_vm12 = vcmp.lt.s32.totalorder %v1992_v20, 2048  ;;  %vm2057_vm13 = vcmp.lt.s32.totalorder %v1993_v10, 2048 }
 0x189   : > { %v2810_v61 = vpack.c.bf16 %v1540_v30, %v1539_v17  ;;  %v2119_v31 = vsel %vm2055_vm11, %v1540_v30, 0.0  ;;  %v2890_v56 = vpack.c.bf16 %v3827_v14, %v3828_v32  ;;  %v1932_v20 = vadd.s32 272, %v3326_v18 }
 0x18a   : > { %v2314_v57 = vadd.f32 %v2313_v15, %v2251_v22  ;;  %v2182_v39 = vadd.f32 %v2181_v23, %v2119_v31  ;;  %v2252_v29 = vmul.f32 %v2119_v31, %v2119_v31  ;;  %v1104_v5 = vpop.f32.mrb[56].mxu0  ;;  %v1232_v3 = vpop.f32.mrb[56].mxu1  ;;  %v1928_v31 = vadd.s32 240, %v3326_v18 }
 0x18b   : > { %2914 = vst [vmem:[%s3356_s21 + $0x68] sm:$0xff] %v2810_v61   ;;  %v1477_v52 = vadd.f32 %v3335_v21, %v1104_v5  ;;  %v1106_v4 = vpop.f32.mrb[57].mxu0  ;;  %2930 = vst [vmem:[%s3356_s21 + $0xe8] sm:$0xff] %v2890_v56   ;;  %v3629_v17 = vadd.f32 %v3335_v21, %v1232_v3  ;;  %v1234_v30 = vpop.f32.mrb[57].mxu1 }
 0x18c   : > { %v2315_v26 = vadd.f32 %v2314_v57, %v2252_v29  ;;  %v1107_v15 = vpop.f32.mrb[58].mxu0  ;;  %v1235_v23 = vpop.f32.mrb[58].mxu1  ;;  %v1996_v4 = vadd.s32 %v3329_v19, %v1930_v46  ;;  %v1929_v29 = vadd.s32 248, %v3326_v18 }
 0x18d   : > { %v1541_v22 = vmax.f32 %v1477_v52, 0.0  ;;  %v1478_v63 = vadd.f32 %v3335_v21, %v1107_v15  ;;  %v1109_v61 = vpop.f32.mrb[59].mxu0  ;;  %v3833_v5 = vmax.f32 %v3629_v17, 0.0  ;;  %v3636_v56 = vadd.f32 %v3335_v21, %v1235_v23  ;;  %v1237_v3 = vpop.f32.mrb[59].mxu1 }
 0x18e   : > { %v1997_v15 = vadd.s32 %v3329_v19, %v1931_v38  ;;  %v1994_v21 = vadd.s32 %v3329_v19, %v1928_v31  ;;  %v1933_v23 = vadd.s32 280, %v3326_v18  ;;  %v1995_v38 = vadd.s32 %v3329_v19, %v1929_v29  ;;  %v3102_v31 = vld [vmem:[%s3808_s2] ss:$0 sm:$0xff] }
 0x18f   : > { %v2120_v57 = vsel %vm2056_vm12, %v1541_v22, 0.0  ;;  %v1542_v30 = vmax.f32 %v1478_v63, 0.0  ;;  %v3832_v52 = vmax.f32 %v3636_v56, 0.0  ;;  %vm2060_vm14 = vcmp.lt.s32.totalorder %v1996_v4, 2048 }
 0x190   : > { %v2183_v61 = vadd.f32 %v2182_v39, %v2120_v57  ;;  %v2253_v14 = vmul.f32 %v2120_v57, %v2120_v57  ;;  %v1998_v57 = vadd.s32 %v3329_v19, %v1932_v20  ;;  %vm2058_vm15 = vcmp.lt.s32.totalorder %v1994_v21, 2048 }
 0x191   : > { %v2815_v46 = vpack.c.bf16 %v1542_v30, %v1541_v22  ;;  %v2121_v10 = vsel %vm2057_vm13, %v1542_v30, 0.0  ;;  %v2895_v3 = vpack.c.bf16 %v3832_v52, %v3833_v5  ;;  %vm2061_vm0 = vcmp.lt.s32.totalorder %v1997_v15, 2048 }
 0x192   : > { %v2316_v63 = vadd.f32 %v2315_v26, %v2253_v14  ;;  %v2184_v32 = vadd.f32 %v2183_v61, %v2121_v10  ;;  %v2254_v54 = vmul.f32 %v2121_v10, %v2121_v10  ;;  %v1112_v48 = vpop.f32.mrb[60].mxu0  ;;  %v1240_v39 = vpop.f32.mrb[60].mxu1  ;;  %vm2059_vm1 = vcmp.lt.s32.totalorder %v1995_v38, 2048 }
 0x193   : > { %2915 = vst [vmem:[%s3356_s21 + $0x70] sm:$0xff] %v2815_v46   ;;  %v1479_v22 = vadd.f32 %v3102_v31, %v1112_v48  ;;  %v1114_v30 = vpop.f32.mrb[61].mxu0  ;;  %2931 = vst [vmem:[%s3356_s21 + $0xf0] sm:$0xff] %v2895_v3   ;;  %v3656_v13 = vadd.f32 %v3102_v31, %v1240_v39  ;;  %v1242_v52 = vpop.f32.mrb[61].mxu1  ;;  %v1999_v48 = vadd.s32 %v3329_v19, %v1933_v23  ;;  %v1934_v3 = vadd.s32 288, %v3326_v18 }
 0x194   : > { %v2317_v26 = vadd.f32 %v2316_v63, %v2254_v54  ;;  %v1115_v14 = vpop.f32.mrb[62].mxu0  ;;  %v1243_v61 = vpop.f32.mrb[62].mxu1  ;;  %vm2062_vm2 = vcmp.lt.s32.totalorder %v1998_v57, 2048  ;;  %v1935_v63 = vadd.s32 296, %v3326_v18 }
 0x195   : > { %v1543_v29 = vmax.f32 %v1479_v22, 0.0  ;;  %v1480_v10 = vadd.f32 %v3102_v31, %v1115_v14  ;;  %v1117_v5 = vpop.f32.mrb[63].mxu0  ;;  %v1575_v20 = vmax.f32 %v3656_v13, 0.0  ;;  %v3659_v46 = vadd.f32 %v3102_v31, %v1243_v61  ;;  %v1245_v7 = vpop.f32.mrb[63].mxu1 }
 0x196   : > { %v1936_v5 = vadd.s32 304, %v3326_v18  ;;  %v2124_v7 = vsel %vm2060_vm14, %v1545_v36, 0.0  ;;  %v2000_v30 = vadd.s32 %v3329_v19, %v1934_v3  ;;  %vm2063_vm3 = vcmp.lt.s32.totalorder %v1999_v48, 2048 }
 0x197   : > { %v2122_v52 = vsel %vm2058_vm15, %v1543_v29, 0.0  ;;  %v1544_v54 = vmax.f32 %v1480_v10, 0.0  ;;  %v1576_v21 = vmax.f32 %v3659_v46, 0.0  ;;  %v2257_v36 = vmul.f32 %v2124_v7, %v2124_v7 }
 0x198   : > { %v2185_v39 = vadd.f32 %v2184_v32, %v2122_v52  ;;  %v2255_v31 = vmul.f32 %v2122_v52, %v2122_v52  ;;  %v2125_v32 = vsel %vm2061_vm0, %v1546_v42, 0.0  ;;  %v2001_v4 = vadd.s32 %v3329_v19, %v1935_v63 }
 0x199   : > { %v2820_v23 = vpack.c.bf16 %v1544_v54, %v1543_v29  ;;  %v2123_v22 = vsel %vm2059_vm1, %v1544_v54, 0.0  ;;  %v2900_v38 = vpack.c.bf16 %v1576_v21, %v1575_v20  ;;  %v2002_v3 = vadd.s32 %v3329_v19, %v1936_v5 }
 0x19a   : > { %v2318_v14 = vadd.f32 %v2317_v26, %v2255_v31  ;;  %v2186_v61 = vadd.f32 %v2185_v39, %v2123_v22  ;;  %v2256_v10 = vmul.f32 %v2123_v22, %v2123_v22  ;;  %v2126_v26 = vsel %vm2062_vm2, %v1547_v0, 0.0 }
 0x19b   : > { %2916 = vst [vmem:[%s3356_s21 + $0x78] sm:$0xff] %v2820_v23   ;;  %2932 = vst [vmem:[%s3356_s21 + $0xf8] sm:$0xff] %v2900_v38   ;;  %v2258_v15 = vmul.f32 %v2125_v32, %v2125_v32  ;;  %vm2064_vm4 = vcmp.lt.s32.totalorder %v2000_v30, 2048  ;;  %v2127_v54 = vsel %vm2063_vm3, %v1548_v6, 0.0  ;;  %v2003_v39 = vadd.s32 %v3329_v19, %v1937_v28 }
 0x19c   : > { %v2187_v29 = vadd.f32 %v2186_v61, %v2124_v7  ;;  %v2319_v52 = vadd.f32 %v2318_v14, %v2256_v10  ;;  %v1939_v63 = vadd.s32 328, %v3326_v18  ;;  %v2259_v31 = vmul.f32 %v2126_v26, %v2126_v26 }
 0x19d   : > { %vm2065_vm5 = vcmp.lt.s32.totalorder %v2001_v4, 2048  ;;  %v2128_v0 = vsel %vm2064_vm4, %v1549_v34, 0.0  ;;  %vm2066_vm6 = vcmp.lt.s32.totalorder %v2002_v3, 2048  ;;  %v2004_v5 = vadd.s32 %v3329_v19, %v1938_v37 }
 0x19e   : > { %v2188_v42 = vadd.f32 %v2187_v29, %v2125_v32  ;;  %v2320_v48 = vadd.f32 %v2319_v52, %v2257_v36  ;;  %v2260_v7 = vmul.f32 %v2127_v54, %v2127_v54  ;;  %v1940_v23 = vadd.s32 336, %v3326_v18 }
 0x19f   : > { %v2129_v6 = vsel %vm2065_vm5, %v1550_v43, 0.0  ;;  %vm2067_vm7 = vcmp.lt.s32.totalorder %v2003_v39, 2048  ;;  %v2005_v38 = vadd.s32 %v3329_v19, %v1939_v63  ;;  %v2261_v30 = vmul.f32 %v2128_v0, %v2128_v0 }
 0x1a0   : > { %v2189_v55 = vadd.f32 %v2188_v42, %v2126_v26  ;;  %v2321_v57 = vadd.f32 %v2320_v48, %v2258_v15  ;;  %v1941_v14 = vadd.s32 344, %v3326_v18  ;;  %v3835_v34 = vmax.f32 %v3408_v59, 0.0 }
 0x1a1   : > { %vm2068_vm8 = vcmp.lt.s32.totalorder %v2004_v5, 2048  ;;  %v1942_v32 = vadd.s32 352, %v3326_v18  ;;  %v2262_v28 = vmul.f32 %v2129_v6, %v2129_v6  ;;  %v2006_v36 = vadd.s32 %v3329_v19, %v1940_v23 }
 0x1a2   : > { %v2190_v22 = vadd.f32 %v2189_v55, %v2127_v54  ;;  %v2322_v1 = vadd.f32 %v2321_v57, %v2259_v31  ;;  %v2130_v10 = vsel %vm2066_vm6, %v3835_v34, 0.0  ;;  %v3836_v43 = vmax.f32 %v3414_v8, 0.0 }
 0x1a3   : > { %vm2069_vm9 = vcmp.lt.s32.totalorder %v2005_v38, 2048  ;;  %v1943_v52 = vadd.s32 360, %v3326_v18  ;;  %v2263_v26 = vmul.f32 %v2130_v10, %v2130_v10  ;;  %v2007_v3 = vadd.s32 %v3329_v19, %v1941_v14 }
 0x1a4   : > { %v2191_v61 = vadd.f32 %v2190_v22, %v2128_v0  ;;  %v2323_v24 = vadd.f32 %v2322_v1, %v2260_v7  ;;  %v2131_v29 = vsel %vm2067_vm7, %v3836_v43, 0.0  ;;  %v3837_v15 = vmax.f32 %v3428_v33, 0.0 }
 0x1a5   : > { %v2008_v48 = vadd.s32 %v3329_v19, %v1942_v32  ;;  %v1944_v54 = vadd.s32 368, %v3326_v18  ;;  %v2264_v39 = vmul.f32 %v2131_v29, %v2131_v29  ;;  %vm2070_vm10 = vcmp.lt.s32.totalorder %v2006_v36, 2048 }
 0x1a6   : > { %v2192_v4 = vadd.f32 %v2191_v61, %v2129_v6  ;;  %v2324_v35 = vadd.f32 %v2323_v24, %v2261_v30  ;;  %v2132_v42 = vsel %vm2068_vm8, %v3837_v15, 0.0  ;;  %v3838_v31 = vmax.f32 %v3434_v49, 0.0 }
 0x1a7   : > { %v2009_v57 = vadd.s32 %v3329_v19, %v1943_v52  ;;  %v1945_v0 = vadd.s32 376, %v3326_v18  ;;  %v2265_v5 = vmul.f32 %v2132_v42, %v2132_v42  ;;  %vm2071_vm11 = vcmp.lt.s32.totalorder %v2007_v3, 2048 }
 0x1a8   : > { %v2193_v37 = vadd.f32 %v2192_v4, %v2130_v10  ;;  %v2325_v59 = vadd.f32 %v2324_v35, %v2262_v28  ;;  %v2133_v55 = vsel %vm2069_vm9, %v3838_v31, 0.0  ;;  %v3839_v23 = vmax.f32 %v3448_v12, 0.0 }
 0x1a9   : > { %vm2072_vm12 = vcmp.lt.s32.totalorder %v2008_v48, 2048  ;;  %v2010_v1 = vadd.s32 %v3329_v19, %v1944_v54  ;;  %v2266_v6 = vmul.f32 %v2133_v55, %v2133_v55  ;;  %v1946_v38 = vadd.s32 384, %v3326_v18 }
 0x1aa   : > { %v2194_v63 = vadd.f32 %v2193_v37, %v2131_v29  ;;  %v2326_v8 = vadd.f32 %v2325_v59, %v2263_v26  ;;  %v2134_v22 = vsel %vm2070_vm10, %v3839_v23, 0.0  ;;  %v3840_v14 = vmax.f32 %v3454_v27, 0.0 }
 0x1ab   : > { %vm2073_vm13 = vcmp.lt.s32.totalorder %v2009_v57, 2048  ;;  %v2011_v24 = vadd.s32 %v3329_v19, %v1945_v0  ;;  %v2267_v34 = vmul.f32 %v2134_v22, %v2134_v22  ;;  %v1947_v12 = vadd.s32 392, %v3326_v18 }
 0x1ac   : > { %v2327_v7 = vadd.f32 %v2326_v8, %v2264_v39  ;;  %v2195_v33 = vadd.f32 %v2194_v63, %v2132_v42  ;;  %v2135_v61 = vsel %vm2071_vm11, %v3840_v14, 0.0  ;;  %v3841_v28 = vmax.f32 %v3468_v60, 0.0 }
 0x1ad   : > { %vm2074_vm14 = vcmp.lt.s32.totalorder %v2010_v1, 2048  ;;  %v1948_v4 = vadd.s32 400, %v3326_v18  ;;  %v2268_v35 = vmul.f32 %v2135_v61, %v2135_v61  ;;  %v2012_v43 = vadd.s32 %v3329_v19, %v1946_v38 }
 0x1ae   : > { %v2196_v30 = vadd.f32 %v2195_v33, %v2133_v55  ;;  %v2328_v49 = vadd.f32 %v2327_v7, %v2265_v5  ;;  %v2136_v36 = vsel %vm2072_vm12, %v3841_v28, 0.0  ;;  %v3842_v52 = vmax.f32 %v3474_v11, 0.0 }
 0x1af   : > { %vm2075_vm15 = vcmp.lt.s32.totalorder %v2011_v24, 2048  ;;  %v1949_v3 = vadd.s32 408, %v3326_v18  ;;  %v2269_v37 = vmul.f32 %v2136_v36, %v2136_v36  ;;  %v2013_v60 = vadd.s32 %v3329_v19, %v1947_v12 }
 0x1b0   : > { %v2197_v10 = vadd.f32 %v2196_v30, %v2134_v22  ;;  %v2329_v32 = vadd.f32 %v2328_v49, %v2266_v6  ;;  %v2137_v26 = vsel %vm2073_vm13, %v3842_v52, 0.0  ;;  %v3843_v42 = vmax.f32 %v3488_v50, 0.0 }
 0x1b1   : > { %v2014_v54 = vadd.s32 %v3329_v19, %v1948_v4  ;;  %v1950_v39 = vadd.s32 416, %v3326_v18  ;;  %v2270_v63 = vmul.f32 %v2137_v26, %v2137_v26  ;;  %vm2076_vm0 = vcmp.lt.s32.totalorder %v2012_v43, 2048 }
 0x1b2   : > { %v2198_v29 = vadd.f32 %v2197_v10, %v2135_v61  ;;  %v2330_v27 = vadd.f32 %v2329_v32, %v2267_v34  ;;  %v2138_v48 = vsel %vm2074_vm14, %v3843_v42, 0.0  ;;  %v3844_v31 = vmax.f32 %v3494_v2, 0.0 }
 0x1b3   : > { %v2015_v57 = vadd.s32 %v3329_v19, %v1949_v3  ;;  %v1951_v0 = vadd.s32 424, %v3326_v18  ;;  %v2271_v5 = vmul.f32 %v2138_v48, %v2138_v48  ;;  %vm2077_vm1 = vcmp.lt.s32.totalorder %v2013_v60, 2048 }
 0x1b4   : > { %v2199_v59 = vadd.f32 %v2198_v29, %v2136_v36  ;;  %v2331_v15 = vadd.f32 %v2330_v27, %v2268_v35  ;;  %v2139_v55 = vsel %vm2075_vm15, %v3844_v31, 0.0  ;;  %v3845_v50 = vmax.f32 %v3508_v45, 0.0 }
 0x1b5   : > { %vm2078_vm2 = vcmp.lt.s32.totalorder %v2014_v54, 2048  ;;  %v2016_v22 = vadd.s32 %v3329_v19, %v1950_v39  ;;  %v2272_v1 = vmul.f32 %v2139_v55, %v2139_v55  ;;  %v1952_v2 = vadd.s32 432, %v3326_v18 }
 0x1b6   : > { %v2200_v8 = vadd.f32 %v2199_v59, %v2137_v26  ;;  %v2332_v11 = vadd.f32 %v2331_v15, %v2269_v37  ;;  %v2140_v23 = vsel %vm2076_vm0, %v3845_v50, 0.0  ;;  %v3846_v30 = vmax.f32 %v3514_v62, 0.0 }
 0x1b7   : > { %vm2079_vm3 = vcmp.lt.s32.totalorder %v2015_v57, 2048  ;;  %v2017_v14 = vadd.s32 %v3329_v19, %v1951_v0  ;;  %v2273_v24 = vmul.f32 %v2140_v23, %v2140_v23  ;;  %v1953_v45 = vadd.s32 440, %v3326_v18 }
 0x1b8   : > { %v2201_v7 = vadd.f32 %v2200_v8, %v2138_v48  ;;  %v2333_v33 = vadd.f32 %v2332_v11, %v2270_v63  ;;  %v2141_v49 = vsel %vm2077_vm1, %v3846_v30, 0.0  ;;  %v3847_v10 = vmax.f32 %v3528_v51, 0.0 }
 0x1b9   : > { %vm2080_vm4 = vcmp.lt.s32.totalorder %v2016_v22, 2048  ;;  %v1954_v12 = vadd.s32 448, %v3326_v18  ;;  %v2274_v4 = vmul.f32 %v2141_v49, %v2141_v49  ;;  %v2018_v62 = vadd.s32 %v3329_v19, %v1952_v2 }
 0x1ba   : > { %v2202_v6 = vadd.f32 %v2201_v7, %v2139_v55  ;;  %v2334_v38 = vadd.f32 %v2333_v33, %v2271_v5  ;;  %v2142_v32 = vsel %vm2078_vm2, %v3847_v10, 0.0  ;;  %v3848_v35 = vmax.f32 %v3534_v9, 0.0 }
 0x1bb   : > { %vm2081_vm5 = vcmp.lt.s32.totalorder %v2017_v14, 2048  ;;  %v1955_v29 = vadd.s32 456, %v3326_v18  ;;  %v2275_v26 = vmul.f32 %v2142_v32, %v2142_v32  ;;  %v2019_v51 = vadd.s32 %v3329_v19, %v1953_v45 }
 0x1bc   : > { %v2203_v61 = vadd.f32 %v2202_v6, %v2140_v23  ;;  %v2335_v34 = vadd.f32 %v2334_v38, %v2272_v1  ;;  %v2143_v43 = vsel %vm2079_vm3, %v3848_v35, 0.0  ;;  %v3849_v3 = vmax.f32 %v3548_v47, 0.0 }
 0x1bd   : > { %v2020_v59 = vadd.s32 %v3329_v19, %v1954_v12  ;;  %v1956_v15 = vadd.s32 464, %v3326_v18  ;;  %v2276_v48 = vmul.f32 %v2143_v43, %v2143_v43  ;;  %vm2082_vm6 = vcmp.lt.s32.totalorder %v2018_v62, 2048 }
 0x1be   : > { %v2336_v28 = vadd.f32 %v2335_v34, %v2273_v24  ;;  %v2204_v36 = vadd.f32 %v2203_v61, %v2141_v49  ;;  %v2144_v37 = vsel %vm2080_vm4, %v3849_v3, 0.0  ;;  %v3850_v9 = vmax.f32 %v3554_v44, 0.0 }
 0x1bf   : > { %v2021_v39 = vadd.s32 %v3329_v19, %v1955_v29  ;;  %v1957_v63 = vadd.s32 472, %v3326_v18  ;;  %v2277_v31 = vmul.f32 %v2144_v37, %v2144_v37  ;;  %vm2083_vm7 = vcmp.lt.s32.totalorder %v2019_v51, 2048 }
 0x1c0   : > { %v2337_v27 = vadd.f32 %v2336_v28, %v2274_v4  ;;  %v2205_v52 = vadd.f32 %v2204_v36, %v2142_v32  ;;  %v2145_v54 = vsel %vm2081_vm5, %v3850_v9, 0.0  ;;  %v3851_v47 = vmax.f32 %v3568_v53, 0.0 }
 0x1c1   : > { %vm2084_vm8 = vcmp.lt.s32.totalorder %v2020_v59, 2048  ;;  %v2022_v57 = vadd.s32 %v3329_v19, %v1956_v15  ;;  %v2278_v7 = vmul.f32 %v2145_v54, %v2145_v54  ;;  %v1958_v44 = vadd.s32 480, %v3326_v18 }
 0x1c2   : > { %v2338_v60 = vadd.f32 %v2337_v27, %v2275_v26  ;;  %v2206_v42 = vadd.f32 %v2205_v52, %v2143_v43  ;;  %v2146_v55 = vsel %vm2082_vm6, %v3851_v47, 0.0  ;;  %v3852_v33 = vmax.f32 %v3574_v25, 0.0 }
 0x1c3   : > { %vm2085_vm9 = vcmp.lt.s32.totalorder %v2021_v39, 2048  ;;  %v2023_v23 = vadd.s32 %v3329_v19, %v1957_v63  ;;  %v1959_v22 = vadd.s32 488, %v3326_v18  ;;  %v2279_v53 = vmul.f32 %v2146_v55, %v2146_v55 }
 0x1c4   : > { %v2339_v8 = vadd.f32 %v2338_v60, %v2276_v48  ;;  %v2207_v11 = vadd.f32 %v2206_v42, %v2144_v37  ;;  %v2147_v50 = vsel %vm2083_vm7, %v3852_v33, 0.0  ;;  %v1960_v38 = vadd.s32 496, %v3326_v18 }
 0x1c5   : > { %v3853_v2 = vmax.f32 %v3588_v16, 0.0  ;;  %vm2086_vm10 = vcmp.lt.s32.totalorder %v2022_v57, 2048  ;;  %v2280_v61 = vmul.f32 %v2147_v50, %v2147_v50  ;;  %v2024_v25 = vadd.s32 %v3329_v19, %v1958_v44 }
 0x1c6   : > { %v2340_v0 = vadd.f32 %v2339_v8, %v2277_v31  ;;  %v2208_v5 = vadd.f32 %v2207_v11, %v2145_v54  ;;  %v3854_v24 = vmax.f32 %v3594_v41, 0.0  ;;  %vm2087_vm11 = vcmp.lt.s32.totalorder %v2023_v23, 2048 }
 0x1c7   : > { %v2148_v30 = vsel %vm2084_vm8, %v3853_v2, 0.0  ;;  %v2025_v45 = vadd.s32 %v3329_v19, %v1959_v22  ;;  %v1961_v10 = vadd.s32 504, %v3326_v18  ;;  %v2026_v16 = vadd.s32 %v3329_v19, %v1960_v38 }
 0x1c8   : > { %v2341_v1 = vadd.f32 %v2340_v0, %v2278_v7  ;;  %v2209_v6 = vadd.f32 %v2208_v5, %v2146_v55  ;;  %v2149_v34 = vsel %vm2085_vm9, %v3854_v24, 0.0  ;;  %v2281_v28 = vmul.f32 %v2148_v30, %v2148_v30 }
 0x1c9   : > { %v3855_v36 = vmax.f32 %v3608_v40, 0.0  ;;  %v2282_v43 = vmul.f32 %v2149_v34, %v2149_v34  ;;  %vm2088_vm12 = vcmp.lt.s32.totalorder %v2024_v25, 2048  ;;  %v3856_v41 = vmax.f32 %v3614_v58, 0.0 }
 0x1ca   : > { %v2342_v49 = vadd.f32 %v2341_v1, %v2279_v53  ;;  %v2210_v14 = vadd.f32 %v2209_v6, %v2147_v50  ;;  %vm2089_vm13 = vcmp.lt.s32.totalorder %v2025_v45, 2048  ;;  %v2027_v27 = vadd.s32 %v3329_v19, %v1961_v10 }
 0x1cb   : > { %v2150_v4 = vsel %vm2086_vm10, %v3855_v36, 0.0  ;;  %v2151_v29 = vsel %vm2087_vm11, %v3856_v41, 0.0  ;;  %vm2090_vm14 = vcmp.lt.s32.totalorder %v2026_v16, 2048  ;;  %v3857_v51 = vmax.f32 %v3629_v17, 0.0 }
 0x1cc   : > { %v2343_v32 = vadd.f32 %v2342_v49, %v2280_v61  ;;  %v2211_v12 = vadd.f32 %v2210_v14, %v2148_v30  ;;  %v2283_v26 = vmul.f32 %v2150_v4, %v2150_v4  ;;  %v2284_v59 = vmul.f32 %v2151_v29, %v2151_v29 }
 0x1cd   : > { %v2152_v3 = vsel %vm2088_vm12, %v3857_v51, 0.0  ;;  %v3858_v15 = vmax.f32 %v3636_v56, 0.0  ;;  %v2154_v58 = vsel %vm2090_vm14, %v1575_v20, 0.0  ;;  %vm2091_vm15 = vcmp.lt.s32.totalorder %v2027_v27, 2048 }
 0x1ce   : > { %v2344_v62 = vadd.f32 %v2343_v32, %v2281_v28  ;;  %v2212_v35 = vadd.f32 %v2211_v12, %v2149_v34  ;;  %v2285_v19 = vmul.f32 %v2152_v3, %v2152_v3  ;;  %v2287_v17 = vmul.f32 %v2154_v58, %v2154_v58 }
 0x1cf   : > { %v2153_v60 = vsel %vm2089_vm13, %v3858_v15, 0.0  ;;  %v2155_v63 = vsel %vm2091_vm15, %v1576_v21, 0.0  ;;  %vm2358_vm0 = vcmask 1040384  }
 0x1d0   : > { %v2345_v52 = vadd.f32 %v2344_v62, %v2282_v43  ;;  %v2213_v18 = vadd.f32 %v2212_v35, %v2150_v4  ;;  %v2286_v39 = vmul.f32 %v2153_v60, %v2153_v60  ;;  %v2288_v47 = vmul.f32 %v2155_v63, %v2155_v63 }
 0x1d2   : > { %v2346_v37 = vadd.f32 %v2345_v52, %v2283_v26  ;;  %v2214_v40 = vadd.f32 %v2213_v18, %v2151_v29 }
 0x1d4   : > { %v2347_v42 = vadd.f32 %v2346_v37, %v2284_v59  ;;  %v2215_v48 = vadd.f32 %v2214_v40, %v2152_v3 }
 0x1d6   : > { %v2348_v9 = vadd.f32 %v2347_v42, %v2285_v19  ;;  %v2216_v54 = vadd.f32 %v2215_v48, %v2153_v60 }
 0x1d8   : > { %v2349_v8 = vadd.f32 %v2348_v9, %v2286_v39  ;;  %v2217_v11 = vadd.f32 %v2216_v54, %v2154_v58 }
 0x1da   : > { %v2350_v56 = vadd.f32 %v2349_v8, %v2287_v17  ;;  %v2218_v31 = vadd.f32 %v2217_v11, %v2155_v63 }
 0x1dc   : > { %v2219_v13 = vrot.slane %v2218_v31, 4  ;;  %v2351_v20 = vadd.f32 %v2350_v56, %v2288_v47 }
 0x1de   : > { %v2220_v55 = vadd.f32 %v2219_v13, %v2218_v31  ;;  %v2352_v57 = vrot.slane %v2351_v20, 4 }
 0x1e0   : > { %v2221_v0 = vrot.slane %v2220_v55, 2  ;;  %v2353_v5 = vadd.f32 %v2352_v57, %v2351_v20 }
 0x1e2   : > { %v2222_v7 = vadd.f32 %v2221_v0, %v2220_v55  ;;  %v2354_v44 = vrot.slane %v2353_v5, 2 }
 0x1e4   : > { %v2223_v33 = vrot.slane %v2222_v7, 1  ;;  %v2355_v50 = vadd.f32 %v2354_v44, %v2353_v5 }
 0x1e6   : > { %v2356_v46 = vrot.slane %v2355_v50, 1  ;;  %v2224_v21 = vadd.f32 %v2223_v33, %v2222_v7 }
 0x1e8   : > { %v2357_v23 = vadd.f32 %v2356_v46, %v2355_v50 }
 0x1ea   : > { %v2359_v22 = vsel %vm2358_vm0, %v2224_v21, %v2357_v23 }
 0x1eb   : > { %2360 = vst [vmem:[%s312_s25] sm:$0x3] %v2359_v22 }
 0x1ec PF: > { %s15_s17 = sadd.s32 1, %s3125_s17   ;;  %s3859_s15 = smov %s3121_s16 }
 0x1ed   : > { %p12_p6 = scmp.ge.s32.totalorder %s15_s17, 6   ;;  %s3860_s16 = smov %s3862_s18 }
 0x1ef   :  { %14 = sbr.rel (!%p12_p6) target bundleno = 2 (0x2), region = 88 }

// kernel: fcn16s_forward.11
= control target key start
LH: loop header
LB: loop body
LE: loop exit
PB: predicated region body
PF: predicated region fallthrough
CT: control target
= control target key end

     0   :  { %s1747_s12 = smov 0   ;;  %s1749_s13 = smov 0   ;;  %s1991_s0 = inlined_call_operand.vmem [shape: bf16[8192,32], index: 0, kind: input, shape index: {}]   ;;  %s1992_s1 = inlined_call_operand.vmem [shape: bf16[32,128], index: 1, kind: input, shape index: {}]   ;;  %s1993_s2 = inlined_call_operand.vmem [shape: f32[1,128], index: 2, kind: input, shape index: {}]   ;;  %s1994_s3 = inlined_call_operand.vmem [shape: f32[8192,128], index: 3, kind: output, shape index: {}]  }
   0x1   :  { %s1751_s14 = smov 0  }
   0x2 LB: > { %s32_s15 = sadd.s32 1, %s1721_s13  ;;  %p1465_p0 = scmp.ge.s32.totalorder %s1725_s14, 1  ;;  %s1725_s14 = sphi %s1751_s14, %s13_s14   ;;  %s1721_s13 = sphi %s1749_s13, %s1996_s13   ;;  %s1717_s12 = sphi %s1747_s12, %s1995_s12  }
   0x3   : > { %p34_p1 = scmp.ge.s32.totalorder %s32_s15, 16  ;;  %p188_p2 = scmp.lt.s32.totalorder %s1725_s14, 17 }
   0x5   : > { %s1998_s15 = smov (%p34_p1, %s32_s15), 0  ;;  %p189_p3 = pnand %p1465_p0, %p188_p2 }
   0x6   : > { %v1669_v0 = vld [vmem:[%s1992_s1] sm:$0xff] (!%p189_p3)   ;;  %s1466_s18 = sshll.u32 (!%p189_p3), %s1717_s12, 6  ;;  %v1670_v1 = vld [vmem:[%s1992_s1 + $0x8] sm:$0xff] (!%p189_p3)   ;;  %vm632_vm0 = vcmask (!%p189_p3), 261120  }
   0x7   : > { %192 = sbr.rel (%p189_p3) target bundleno = 294 (0x126), region = 32  ;;  %p230_p4 = scmp.lt.s32.totalorder (!%p189_p3), %s1466_s18, 1023  ;;  %1573 = vmatprep.subr.bf16.mxu0 (!%p189_p3), %v1669_v0  ;;  %1641 = vmatprep.subr.bf16.mxu1 (!%p189_p3), %v1669_v0  ;;  %v1847_v34 = vld [vmem:[%s1993_s2] ss:$0 sm:$0xff] (!%p189_p3) }
   0x8   : > { %1574 = vmatpush3.bf16.msra.mxu0 (!%p189_p3), %v1669_v0  ;;  %1643 = vmatpush3.bf16.msra.mxu1 (!%p189_p3), %v1669_v0 }
   0x9   : > { %1575 = vmatprep.subr.bf16.mxu0 (!%p189_p3), %v1670_v1  ;;  %1642 = vmatprep.subr.bf16.mxu1 (!%p189_p3), %v1670_v1 }
   0xc   : > { %1576 = vmatpush3.bf16.msra.mxu0 (!%p189_p3), %v1670_v1  ;;  %1644 = vmatpush3.bf16.msra.mxu1 (!%p189_p3), %v1670_v1 }
   0xe   : > { %s2000_s18 = smov (!%p230_p4, %s1466_s18), 1023 }
   0xf   : > { %s1467_s21 = sshll.u32 %s2000_s18, 2  ;;  %s1469_s25 = sshll.u32 %s2000_s18, 3 }
  0x10   : > { %s1777_s24 = scalar_lea.vmem %s1991_s0, %s1467_s21  ;;  %s1852_s30 = scalar_lea.vmem %s1994_s3, %s1469_s25 }
  0x11   : > { %v1671_v2 = vld [vmem:[%s1777_s24] sm:$0xff]   ;;  %v1673_v4 = vld [vmem:[%s1777_s24 + $0x8] sm:$0xff]   ;;  %v1675_v6 = vld [vmem:[%s1777_s24 + $0x10] sm:$0xff]  }
  0x12   : > { %v1672_v3 = vld [vmem:[%s1777_s24 + $0x80] sm:$0xff]   ;;  %1577 = vmatprep.mubr.msk.bf16.mxu0 %vm632_vm0, %v1671_v2  ;;  %v1674_v5 = vld [vmem:[%s1777_s24 + $0x88] sm:$0xff]   ;;  %v1676_v7 = vld [vmem:[%s1777_s24 + $0x90] sm:$0xff]  }
  0x13   : > { %1609 = vmatprep.mubr.msk.bf16.mxu1 %vm632_vm0, %v1672_v3  ;;  %1578 = vmatmul.mubr.msk.bf16.vlgmr.msra.gmra.mrb[0].mxu0 %vm632_vm0, %v1673_v4  ;;  %v1677_v8 = vld [vmem:[%s1777_s24 + $0x18] sm:$0xff]   ;;  %v1679_v10 = vld [vmem:[%s1777_s24 + $0x20] sm:$0xff]   ;;  %v1681_v12 = vld [vmem:[%s1777_s24 + $0x28] sm:$0xff]  }
  0x14   : > { %1610 = vmatmul.mubr.msk.bf16.vlgmr.msra.gmra.mrb[0].mxu1 %vm632_vm0, %v1674_v5  ;;  %1581 = vmatprep.mubr.msk.bf16.mxu0 %vm632_vm0, %v1675_v6  ;;  %v1678_v9 = vld [vmem:[%s1777_s24 + $0x98] sm:$0xff]   ;;  %v1680_v11 = vld [vmem:[%s1777_s24 + $0xa0] sm:$0xff]   ;;  %v1682_v13 = vld [vmem:[%s1777_s24 + $0xa8] sm:$0xff]  }
  0x15   : > { %1613 = vmatprep.mubr.msk.bf16.mxu1 %vm632_vm0, %v1676_v7  ;;  %v1683_v14 = vld [vmem:[%s1777_s24 + $0x30] sm:$0xff]   ;;  %v1685_v16 = vld [vmem:[%s1777_s24 + $0x38] sm:$0xff]   ;;  %v1687_v18 = vld [vmem:[%s1777_s24 + $0x40] sm:$0xff]  }
  0x16   : > { %v1684_v15 = vld [vmem:[%s1777_s24 + $0xb0] sm:$0xff]   ;;  %v1686_v17 = vld [vmem:[%s1777_s24 + $0xb8] sm:$0xff]   ;;  %v1688_v19 = vld [vmem:[%s1777_s24 + $0xc0] sm:$0xff]  }
  0x17   : > { %v1689_v20 = vld [vmem:[%s1777_s24 + $0x48] sm:$0xff]   ;;  %v1691_v22 = vld [vmem:[%s1777_s24 + $0x50] sm:$0xff]   ;;  %v1693_v24 = vld [vmem:[%s1777_s24 + $0x58] sm:$0xff]  }
  0x18   : > { %v1690_v21 = vld [vmem:[%s1777_s24 + $0xc8] sm:$0xff]   ;;  %v1692_v23 = vld [vmem:[%s1777_s24 + $0xd0] sm:$0xff]   ;;  %v1694_v25 = vld [vmem:[%s1777_s24 + $0xd8] sm:$0xff]  }
  0x19   : > { %v1695_v26 = vld [vmem:[%s1777_s24 + $0x60] sm:$0xff]   ;;  %v1697_v28 = vld [vmem:[%s1777_s24 + $0x68] sm:$0xff]   ;;  %v1699_v30 = vld [vmem:[%s1777_s24 + $0x70] sm:$0xff]  }
  0x1a   : > { %v1696_v27 = vld [vmem:[%s1777_s24 + $0xe0] sm:$0xff]   ;;  %v1698_v29 = vld [vmem:[%s1777_s24 + $0xe8] sm:$0xff]   ;;  %v1700_v31 = vld [vmem:[%s1777_s24 + $0xf0] sm:$0xff]  }
  0x1b   : > { %1582 = vmatmul.mubr.msk.bf16.gmra.mrb[4].mxu0 %vm632_vm0, %v1677_v8  ;;  %v1701_v32 = vld [vmem:[%s1777_s24 + $0x78] sm:$0xff]  }
  0x1c   : > { %1614 = vmatmul.mubr.msk.bf16.gmra.mrb[4].mxu1 %vm632_vm0, %v1678_v9  ;;  %1585 = vmatprep.mubr.msk.bf16.mxu0 %vm632_vm0, %v1679_v10  ;;  %v1702_v33 = vld [vmem:[%s1777_s24 + $0xf8] sm:$0xff]  }
  0x1d   : > { %1617 = vmatprep.mubr.msk.bf16.mxu1 %vm632_vm0, %v1680_v11 }
  0x23   : > { %1586 = vmatmul.mubr.msk.bf16.gmra.mrb[8].mxu0 %vm632_vm0, %v1681_v12 }
  0x24   : > { %1618 = vmatmul.mubr.msk.bf16.gmra.mrb[8].mxu1 %vm632_vm0, %v1682_v13  ;;  %1589 = vmatprep.mubr.msk.bf16.mxu0 %vm632_vm0, %v1683_v14 }
  0x25   : > { %1621 = vmatprep.mubr.msk.bf16.mxu1 %vm632_vm0, %v1684_v15 }
  0x2b   : > { %1590 = vmatmul.mubr.msk.bf16.gmra.mrb[12].mxu0 %vm632_vm0, %v1685_v16 }
  0x2c   : > { %1622 = vmatmul.mubr.msk.bf16.gmra.mrb[12].mxu1 %vm632_vm0, %v1686_v17  ;;  %1593 = vmatprep.mubr.msk.bf16.mxu0 %vm632_vm0, %v1687_v18 }
  0x2d   : > { %1625 = vmatprep.mubr.msk.bf16.mxu1 %vm632_vm0, %v1688_v19 }
  0x33   : > { %1594 = vmatmul.mubr.msk.bf16.gmra.mrb[16].mxu0 %vm632_vm0, %v1689_v20 }
  0x34   : > { %1626 = vmatmul.mubr.msk.bf16.gmra.mrb[16].mxu1 %vm632_vm0, %v1690_v21  ;;  %1597 = vmatprep.mubr.msk.bf16.mxu0 %vm632_vm0, %v1691_v22 }
  0x35   : > { %1629 = vmatprep.mubr.msk.bf16.mxu1 %vm632_vm0, %v1692_v23 }
  0x3b   : > { %1598 = vmatmul.mubr.msk.bf16.gmra.mrb[20].mxu0 %vm632_vm0, %v1693_v24 }
  0x3c   : > { %1630 = vmatmul.mubr.msk.bf16.gmra.mrb[20].mxu1 %vm632_vm0, %v1694_v25  ;;  %1601 = vmatprep.mubr.msk.bf16.mxu0 %vm632_vm0, %v1695_v26 }
  0x3d   : > { %1633 = vmatprep.mubr.msk.bf16.mxu1 %vm632_vm0, %v1696_v27 }
  0x43   : > { %1602 = vmatmul.mubr.msk.bf16.gmra.mrb[24].mxu0 %vm632_vm0, %v1697_v28 }
  0x44   : > { %1634 = vmatmul.mubr.msk.bf16.gmra.mrb[24].mxu1 %vm632_vm0, %v1698_v29  ;;  %1605 = vmatprep.mubr.msk.bf16.mxu0 %vm632_vm0, %v1699_v30 }
  0x45   : > { %1637 = vmatprep.mubr.msk.bf16.mxu1 %vm632_vm0, %v1700_v31 }
  0x4b   : > { %1606 = vmatmul.mubr.msk.bf16.gmra.mrb[28].mxu0 %vm632_vm0, %v1701_v32 }
  0x4c   : > { %1638 = vmatmul.mubr.msk.bf16.gmra.mrb[28].mxu1 %vm632_vm0, %v1702_v33 }
  0xe6   : > { %v1579_v35 = vpop.f32.mrb[0].mxu0 }
  0xe7   : > { %v1222_v36 = vadd.f32 %v1579_v35, %v1847_v34  ;;  %v1611_v37 = vpop.f32.mrb[0].mxu1  ;;  %v763_v38 = vpop.f32.mrb[1].mxu0 }
  0xe8   : > { %v1254_v39 = vadd.f32 %v1611_v37, %v1847_v34  ;;  %v1220_v40 = vadd.f32 %v1847_v34, %v763_v38  ;;  %v891_v41 = vpop.f32.mrb[1].mxu1  ;;  %v1580_v42 = vpop.f32.mrb[2].mxu0 }
  0xe9   : > { %1286 = vst [vmem:[%s1852_s30 + $0x10] sm:$0xff] %v1222_v36  ;;  %v1252_v43 = vadd.f32 %v1847_v34, %v891_v41  ;;  %v1223_v44 = vadd.f32 %v1580_v42, %v1847_v34  ;;  %v1612_v45 = vpop.f32.mrb[2].mxu1  ;;  %v766_v46 = vpop.f32.mrb[3].mxu0 }
  0xea   : > { %1318 = vst [vmem:[%s1852_s30 + $0x110] sm:$0xff] %v1254_v39  ;;  %1284 = vst [vmem:[%s1852_s30] sm:$0xff] %v1220_v40  ;;  %v1255_v47 = vadd.f32 %v1612_v45, %v1847_v34  ;;  %v1221_v48 = vadd.f32 %v1847_v34, %v766_v46  ;;  %v894_v49 = vpop.f32.mrb[3].mxu1 }
  0xeb   : > { %1316 = vst [vmem:[%s1852_s30 + $0x100] sm:$0xff] %v1252_v43  ;;  %1287 = vst [vmem:[%s1852_s30 + $0x18] sm:$0xff] %v1223_v44  ;;  %v1253_v50 = vadd.f32 %v1847_v34, %v894_v49 }
  0xec   : > { %1319 = vst [vmem:[%s1852_s30 + $0x118] sm:$0xff] %v1255_v47  ;;  %1285 = vst [vmem:[%s1852_s30 + $0x8] sm:$0xff] %v1221_v48 }
  0xed   : > { %1317 = vst [vmem:[%s1852_s30 + $0x108] sm:$0xff] %v1253_v50 }
  0xee   : > { %v1583_v51 = vpop.f32.mrb[4].mxu0 }
  0xef   : > { %v1226_v52 = vadd.f32 %v1583_v51, %v1847_v34  ;;  %v1615_v53 = vpop.f32.mrb[4].mxu1  ;;  %v779_v54 = vpop.f32.mrb[5].mxu0 }
  0xf0   : > { %v1258_v55 = vadd.f32 %v1615_v53, %v1847_v34  ;;  %v1224_v56 = vadd.f32 %v1847_v34, %v779_v54  ;;  %v907_v57 = vpop.f32.mrb[5].mxu1  ;;  %v1584_v58 = vpop.f32.mrb[6].mxu0 }
  0xf1   : > { %1290 = vst [vmem:[%s1852_s30 + $0x30] sm:$0xff] %v1226_v52  ;;  %v1256_v59 = vadd.f32 %v1847_v34, %v907_v57  ;;  %v1227_v60 = vadd.f32 %v1584_v58, %v1847_v34  ;;  %v1616_v61 = vpop.f32.mrb[6].mxu1  ;;  %v782_v62 = vpop.f32.mrb[7].mxu0 }
  0xf2   : > { %1322 = vst [vmem:[%s1852_s30 + $0x130] sm:$0xff] %v1258_v55  ;;  %1288 = vst [vmem:[%s1852_s30 + $0x20] sm:$0xff] %v1224_v56  ;;  %v1259_v63 = vadd.f32 %v1616_v61, %v1847_v34  ;;  %v1225_v0 = vadd.f32 %v1847_v34, %v782_v62  ;;  %v910_v1 = vpop.f32.mrb[7].mxu1 }
  0xf3   : > { %1320 = vst [vmem:[%s1852_s30 + $0x120] sm:$0xff] %v1256_v59  ;;  %1291 = vst [vmem:[%s1852_s30 + $0x38] sm:$0xff] %v1227_v60  ;;  %v1257_v2 = vadd.f32 %v1847_v34, %v910_v1 }
  0xf4   : > { %1323 = vst [vmem:[%s1852_s30 + $0x138] sm:$0xff] %v1259_v63  ;;  %1289 = vst [vmem:[%s1852_s30 + $0x28] sm:$0xff] %v1225_v0 }
  0xf5   : > { %1321 = vst [vmem:[%s1852_s30 + $0x128] sm:$0xff] %v1257_v2 }
  0xf6   : > { %v1587_v3 = vpop.f32.mrb[8].mxu0 }
  0xf7   : > { %v1230_v4 = vadd.f32 %v1587_v3, %v1847_v34  ;;  %v1619_v5 = vpop.f32.mrb[8].mxu1  ;;  %v795_v6 = vpop.f32.mrb[9].mxu0 }
  0xf8   : > { %v1262_v7 = vadd.f32 %v1619_v5, %v1847_v34  ;;  %v1228_v8 = vadd.f32 %v1847_v34, %v795_v6  ;;  %v923_v9 = vpop.f32.mrb[9].mxu1  ;;  %v1588_v10 = vpop.f32.mrb[10].mxu0 }
  0xf9   : > { %1294 = vst [vmem:[%s1852_s30 + $0x50] sm:$0xff] %v1230_v4  ;;  %v1260_v11 = vadd.f32 %v1847_v34, %v923_v9  ;;  %v1231_v12 = vadd.f32 %v1588_v10, %v1847_v34  ;;  %v1620_v13 = vpop.f32.mrb[10].mxu1  ;;  %v798_v14 = vpop.f32.mrb[11].mxu0 }
  0xfa   : > { %1326 = vst [vmem:[%s1852_s30 + $0x150] sm:$0xff] %v1262_v7  ;;  %1292 = vst [vmem:[%s1852_s30 + $0x40] sm:$0xff] %v1228_v8  ;;  %v1263_v15 = vadd.f32 %v1620_v13, %v1847_v34  ;;  %v1229_v16 = vadd.f32 %v1847_v34, %v798_v14  ;;  %v926_v17 = vpop.f32.mrb[11].mxu1 }
  0xfb   : > { %1324 = vst [vmem:[%s1852_s30 + $0x140] sm:$0xff] %v1260_v11  ;;  %1295 = vst [vmem:[%s1852_s30 + $0x58] sm:$0xff] %v1231_v12  ;;  %v1261_v18 = vadd.f32 %v1847_v34, %v926_v17 }
  0xfc   : > { %1327 = vst [vmem:[%s1852_s30 + $0x158] sm:$0xff] %v1263_v15  ;;  %1293 = vst [vmem:[%s1852_s30 + $0x48] sm:$0xff] %v1229_v16 }
  0xfd   : > { %1325 = vst [vmem:[%s1852_s30 + $0x148] sm:$0xff] %v1261_v18 }
  0xfe   : > { %v1591_v19 = vpop.f32.mrb[12].mxu0 }
  0xff   : > { %v1234_v20 = vadd.f32 %v1591_v19, %v1847_v34  ;;  %v1623_v21 = vpop.f32.mrb[12].mxu1  ;;  %v811_v22 = vpop.f32.mrb[13].mxu0 }
 0x100   : > { %v1266_v23 = vadd.f32 %v1623_v21, %v1847_v34  ;;  %v1232_v24 = vadd.f32 %v1847_v34, %v811_v22  ;;  %v939_v25 = vpop.f32.mrb[13].mxu1  ;;  %v1592_v26 = vpop.f32.mrb[14].mxu0 }
 0x101   : > { %1298 = vst [vmem:[%s1852_s30 + $0x70] sm:$0xff] %v1234_v20  ;;  %v1264_v27 = vadd.f32 %v1847_v34, %v939_v25  ;;  %v1235_v28 = vadd.f32 %v1592_v26, %v1847_v34  ;;  %v1624_v29 = vpop.f32.mrb[14].mxu1  ;;  %v814_v30 = vpop.f32.mrb[15].mxu0 }
 0x102   : > { %1330 = vst [vmem:[%s1852_s30 + $0x170] sm:$0xff] %v1266_v23  ;;  %1296 = vst [vmem:[%s1852_s30 + $0x60] sm:$0xff] %v1232_v24  ;;  %v1267_v31 = vadd.f32 %v1624_v29, %v1847_v34  ;;  %v1233_v32 = vadd.f32 %v1847_v34, %v814_v30  ;;  %v942_v33 = vpop.f32.mrb[15].mxu1 }
 0x103   : > { %1328 = vst [vmem:[%s1852_s30 + $0x160] sm:$0xff] %v1264_v27  ;;  %1299 = vst [vmem:[%s1852_s30 + $0x78] sm:$0xff] %v1235_v28  ;;  %v1265_v35 = vadd.f32 %v1847_v34, %v942_v33 }
 0x104   : > { %1331 = vst [vmem:[%s1852_s30 + $0x178] sm:$0xff] %v1267_v31  ;;  %1297 = vst [vmem:[%s1852_s30 + $0x68] sm:$0xff] %v1233_v32 }
 0x105   : > { %1329 = vst [vmem:[%s1852_s30 + $0x168] sm:$0xff] %v1265_v35 }
 0x106   : > { %v1595_v36 = vpop.f32.mrb[16].mxu0 }
 0x107   : > { %v1238_v37 = vadd.f32 %v1595_v36, %v1847_v34  ;;  %v1627_v38 = vpop.f32.mrb[16].mxu1  ;;  %v827_v39 = vpop.f32.mrb[17].mxu0 }
 0x108   : > { %v1270_v40 = vadd.f32 %v1627_v38, %v1847_v34  ;;  %v1236_v41 = vadd.f32 %v1847_v34, %v827_v39  ;;  %v955_v42 = vpop.f32.mrb[17].mxu1  ;;  %v1596_v43 = vpop.f32.mrb[18].mxu0 }
 0x109   : > { %1302 = vst [vmem:[%s1852_s30 + $0x90] sm:$0xff] %v1238_v37  ;;  %v1268_v44 = vadd.f32 %v1847_v34, %v955_v42  ;;  %v1239_v45 = vadd.f32 %v1596_v43, %v1847_v34  ;;  %v1628_v46 = vpop.f32.mrb[18].mxu1  ;;  %v830_v47 = vpop.f32.mrb[19].mxu0 }
 0x10a   : > { %1334 = vst [vmem:[%s1852_s30 + $0x190] sm:$0xff] %v1270_v40  ;;  %1300 = vst [vmem:[%s1852_s30 + $0x80] sm:$0xff] %v1236_v41  ;;  %v1271_v48 = vadd.f32 %v1628_v46, %v1847_v34  ;;  %v1237_v49 = vadd.f32 %v1847_v34, %v830_v47  ;;  %v958_v50 = vpop.f32.mrb[19].mxu1 }
 0x10b   : > { %1332 = vst [vmem:[%s1852_s30 + $0x180] sm:$0xff] %v1268_v44  ;;  %1303 = vst [vmem:[%s1852_s30 + $0x98] sm:$0xff] %v1239_v45  ;;  %v1269_v51 = vadd.f32 %v1847_v34, %v958_v50 }
 0x10c   : > { %1335 = vst [vmem:[%s1852_s30 + $0x198] sm:$0xff] %v1271_v48  ;;  %1301 = vst [vmem:[%s1852_s30 + $0x88] sm:$0xff] %v1237_v49 }
 0x10d   : > { %1333 = vst [vmem:[%s1852_s30 + $0x188] sm:$0xff] %v1269_v51 }
 0x10e   : > { %v1599_v52 = vpop.f32.mrb[20].mxu0 }
 0x10f   : > { %v1242_v53 = vadd.f32 %v1599_v52, %v1847_v34  ;;  %v1631_v54 = vpop.f32.mrb[20].mxu1  ;;  %v843_v55 = vpop.f32.mrb[21].mxu0 }
 0x110   : > { %v1274_v56 = vadd.f32 %v1631_v54, %v1847_v34  ;;  %v1240_v57 = vadd.f32 %v1847_v34, %v843_v55  ;;  %v971_v58 = vpop.f32.mrb[21].mxu1  ;;  %v1600_v59 = vpop.f32.mrb[22].mxu0 }
 0x111   : > { %1306 = vst [vmem:[%s1852_s30 + $0xb0] sm:$0xff] %v1242_v53  ;;  %v1272_v60 = vadd.f32 %v1847_v34, %v971_v58  ;;  %v1243_v61 = vadd.f32 %v1600_v59, %v1847_v34  ;;  %v1632_v62 = vpop.f32.mrb[22].mxu1  ;;  %v846_v63 = vpop.f32.mrb[23].mxu0 }
 0x112   : > { %1338 = vst [vmem:[%s1852_s30 + $0x1b0] sm:$0xff] %v1274_v56  ;;  %1304 = vst [vmem:[%s1852_s30 + $0xa0] sm:$0xff] %v1240_v57  ;;  %v1275_v0 = vadd.f32 %v1632_v62, %v1847_v34  ;;  %v1241_v1 = vadd.f32 %v1847_v34, %v846_v63  ;;  %v974_v2 = vpop.f32.mrb[23].mxu1 }
 0x113   : > { %1336 = vst [vmem:[%s1852_s30 + $0x1a0] sm:$0xff] %v1272_v60  ;;  %1307 = vst [vmem:[%s1852_s30 + $0xb8] sm:$0xff] %v1243_v61  ;;  %v1273_v3 = vadd.f32 %v1847_v34, %v974_v2 }
 0x114   : > { %1339 = vst [vmem:[%s1852_s30 + $0x1b8] sm:$0xff] %v1275_v0  ;;  %1305 = vst [vmem:[%s1852_s30 + $0xa8] sm:$0xff] %v1241_v1 }
 0x115   : > { %1337 = vst [vmem:[%s1852_s30 + $0x1a8] sm:$0xff] %v1273_v3 }
 0x116   : > { %v1603_v4 = vpop.f32.mrb[24].mxu0 }
 0x117   : > { %v1246_v5 = vadd.f32 %v1603_v4, %v1847_v34  ;;  %v1635_v6 = vpop.f32.mrb[24].mxu1  ;;  %v859_v7 = vpop.f32.mrb[25].mxu0 }
 0x118   : > { %v1278_v8 = vadd.f32 %v1635_v6, %v1847_v34  ;;  %v1244_v9 = vadd.f32 %v1847_v34, %v859_v7  ;;  %v987_v10 = vpop.f32.mrb[25].mxu1  ;;  %v1604_v11 = vpop.f32.mrb[26].mxu0 }
 0x119   : > { %1310 = vst [vmem:[%s1852_s30 + $0xd0] sm:$0xff] %v1246_v5  ;;  %v1276_v12 = vadd.f32 %v1847_v34, %v987_v10  ;;  %v1247_v13 = vadd.f32 %v1604_v11, %v1847_v34  ;;  %v1636_v14 = vpop.f32.mrb[26].mxu1  ;;  %v862_v15 = vpop.f32.mrb[27].mxu0 }
 0x11a   : > { %1342 = vst [vmem:[%s1852_s30 + $0x1d0] sm:$0xff] %v1278_v8  ;;  %1308 = vst [vmem:[%s1852_s30 + $0xc0] sm:$0xff] %v1244_v9  ;;  %v1279_v16 = vadd.f32 %v1636_v14, %v1847_v34  ;;  %v1245_v17 = vadd.f32 %v1847_v34, %v862_v15  ;;  %v990_v18 = vpop.f32.mrb[27].mxu1 }
 0x11b   : > { %1340 = vst [vmem:[%s1852_s30 + $0x1c0] sm:$0xff] %v1276_v12  ;;  %1311 = vst [vmem:[%s1852_s30 + $0xd8] sm:$0xff] %v1247_v13  ;;  %v1277_v19 = vadd.f32 %v1847_v34, %v990_v18 }
 0x11c   : > { %1343 = vst [vmem:[%s1852_s30 + $0x1d8] sm:$0xff] %v1279_v16  ;;  %1309 = vst [vmem:[%s1852_s30 + $0xc8] sm:$0xff] %v1245_v17 }
 0x11d   : > { %1341 = vst [vmem:[%s1852_s30 + $0x1c8] sm:$0xff] %v1277_v19 }
 0x11e   : > { %v1607_v20 = vpop.f32.mrb[28].mxu0 }
 0x11f   : > { %v1250_v21 = vadd.f32 %v1607_v20, %v1847_v34  ;;  %v1639_v22 = vpop.f32.mrb[28].mxu1  ;;  %v875_v23 = vpop.f32.mrb[29].mxu0 }
 0x120   : > { %v1282_v24 = vadd.f32 %v1639_v22, %v1847_v34  ;;  %v1248_v25 = vadd.f32 %v1847_v34, %v875_v23  ;;  %v1003_v26 = vpop.f32.mrb[29].mxu1  ;;  %v1608_v27 = vpop.f32.mrb[30].mxu0 }
 0x121   : > { %1314 = vst [vmem:[%s1852_s30 + $0xf0] sm:$0xff] %v1250_v21  ;;  %v1280_v28 = vadd.f32 %v1847_v34, %v1003_v26  ;;  %v1251_v29 = vadd.f32 %v1608_v27, %v1847_v34  ;;  %v1640_v30 = vpop.f32.mrb[30].mxu1  ;;  %v878_v31 = vpop.f32.mrb[31].mxu0 }
 0x122   : > { %1346 = vst [vmem:[%s1852_s30 + $0x1f0] sm:$0xff] %v1282_v24  ;;  %1312 = vst [vmem:[%s1852_s30 + $0xe0] sm:$0xff] %v1248_v25  ;;  %v1283_v32 = vadd.f32 %v1640_v30, %v1847_v34  ;;  %v1249_v33 = vadd.f32 %v1847_v34, %v878_v31  ;;  %v1006_v35 = vpop.f32.mrb[31].mxu1 }
 0x123   : > { %1344 = vst [vmem:[%s1852_s30 + $0x1e0] sm:$0xff] %v1280_v28  ;;  %1315 = vst [vmem:[%s1852_s30 + $0xf8] sm:$0xff] %v1251_v29  ;;  %v1281_v36 = vadd.f32 %v1847_v34, %v1006_v35 }
 0x124   : > { %1347 = vst [vmem:[%s1852_s30 + $0x1f8] sm:$0xff] %v1283_v32  ;;  %1313 = vst [vmem:[%s1852_s30 + $0xe8] sm:$0xff] %v1249_v33 }
 0x125   : > { %1345 = vst [vmem:[%s1852_s30 + $0x1e8] sm:$0xff] %v1281_v36 }
 0x126 PF: > { %s13_s14 = sadd.s32 1, %s1725_s14   ;;  %s1995_s12 = smov %s1721_s13 }
 0x127   : > { %p10_p5 = scmp.ge.s32.totalorder %s13_s14, 18   ;;  %s1996_s13 = smov %s1998_s15 }
 0x129   :  { %12 = sbr.rel (!%p10_p5) target bundleno = 2 (0x2), region = 76 }

</bundles_post_ra>
